<compile_context>
chip_gen: v6e
topology: v6e:2x2x1
jax: 0.10.0
libtpu: 0.0.40
codegen_flags: <defaults>
</compile_context>

<pallas_src>
import functools

import jax
import jax.numpy as jnp
from jax.experimental import pallas as pl
from jax.experimental.pallas import tpu as pltpu


# --------------------------------------------------------------- small helpers

def _bf16(x):
    return x.astype(jnp.bfloat16)


def _mm(a, w_bf16):
    """bf16 MXU matmul with f32 accumulation (weight already bf16)."""
    return jnp.dot(_bf16(a), w_bf16, preferred_element_type=jnp.float32)


def _ln(x, g, b):
    """LayerNorm in f32 (eps = 1e-5, matches nn.LayerNorm)."""
    mean = jnp.mean(x, axis=-1, keepdims=True)
    var = jnp.mean((x - mean) ** 2, axis=-1, keepdims=True)
    return (x - mean) * jax.lax.rsqrt(var + 1e-5) * g + b


def _erf(x):
    """erf via Abramowitz & Stegun 7.1.26 (|err| <= 1.5e-7); only exp/mul/add/
    select ops, all of which have guaranteed Mosaic lowerings."""
    a1, a2, a3, a4, a5 = 0.254829592, -0.284496736, 1.421413741, -1.453152027, 1.061405429
    p = 0.3275911
    sgn = jnp.where(x >= 0.0, 1.0, -1.0)
    ax = jnp.where(x >= 0.0, x, -x)
    t = 1.0 / (1.0 + p * ax)
    poly = ((((a5 * t + a4) * t + a3) * t + a2) * t + a1) * t
    y = 1.0 - poly * jnp.exp(-ax * ax)
    return sgn * y


def _gelu(x):
    """Exact (erf-based) GELU, matches torch.nn.functional.gelu default."""
    return 0.5 * x * (1.0 + _erf(x * 0.7071067811865475))


def _attention(q3, k3, v3, mask3, wo_ref, bo, n_head):
    """Multi-head attention + fused single output projection.

    q3: (Bb, Lq, H) f32, k3/v3: (Bb, Lk, H) f32, mask3 int32 broadcastable to
    (Bb, Lq, Lk) (0 => masked with -10000.0, torch masked_fill semantics),
    wo_ref: (H, H) bf16 ref, bo: (1, H) f32.  Returns (Bb, Lq, H) f32.
    """
    bb, lq, hidden = q3.shape
    dh = hidden // n_head
    scale = float(dh) ** -0.5
    # hoist bf16 casts once (no per-head recasting)
    qh, kh, vh = _bf16(q3), _bf16(k3), _bf16(v3)
    masked = (mask3 == 0)
    ctx_heads = []
    for h in range(n_head):
        sl = slice(h * dh, (h + 1) * dh)
        s = jnp.einsum('bqd,bkd->bqk', qh[..., sl], kh[..., sl],
                       preferred_element_type=jnp.float32) * scale
        s = jnp.where(masked, -10000.0, s)
        s = s - jnp.max(s, axis=-1, keepdims=True)
        p = jnp.exp(s)
        p = p * pl.reciprocal(jnp.sum(p, axis=-1, keepdims=True), approx=True)
        ctx_heads.append(jnp.einsum('bqk,bkd->bqd', _bf16(p), vh[..., sl],
                                    preferred_element_type=jnp.float32))
    ctx = jnp.concatenate(ctx_heads, axis=-1)                 # (Bb, Lq, H) f32
    out = jnp.dot(_bf16(ctx).reshape(bb * lq, hidden), wo_ref[...],
                  preferred_element_type=jnp.float32) + bo     # ONE full out-proj
    return out.reshape(bb, lq, hidden)


# ---------------------------------------------------------------- layer kernels

def _encoder_layer_kernel(x_ref, kvalid_ref, pk_ref,
                          wqkv_ref, bqkv_ref, wo_ref,
                          w1_ref, b1_ref, w2_ref,
                          o_ref, *, n_head):
    bb, seq, hidden = x_ref.shape
    x = x_ref[...].astype(jnp.float32)                        # (Bb, L, H)
    kv = kvalid_ref[...]                                      # (Bb, 1, L) int32
    pk = pk_ref[...]                                          # (6, H): g1,be1,bo,g2,be2,b2
    g1, be1, bo = pk[0:1], pk[1:2], pk[2:3]
    g2, be2, b2 = pk[3:4], pk[4:5], pk[5:6]

    # --- pre-LN self-attention sublayer (residual fused) ---
    x2 = x.reshape(bb * seq, hidden)
    h2 = _ln(x2, g1, be1)
    qkv = (_mm(h2, wqkv_ref[...]) + bqkv_ref[...]).reshape(bb, seq, 3 * hidden)
    q = qkv[..., :hidden]
    k = qkv[..., hidden:2 * hidden]
    v = qkv[..., 2 * hidden:]
    x = x + _attention(q, k, v, kv, wo_ref, bo, n_head)

    # --- pre-LN FFN sublayer (residual fused) ---
    # TODO(synk): for long sequences, row-tile this FFN (and use flash-style KV
    # blocking in attention) so the (rows, F) intermediate fits v7x's 64 MiB VMEM.
    x2 = x.reshape(bb * seq, hidden)
    h2 = _ln(x2, g2, be2)
    f = _gelu(_mm(h2, w1_ref[...]) + b1_ref[...])
    y2 = x2 + _mm(f, w2_ref[...]) + b2
    o_ref[...] = y2.reshape(bb, seq, hidden).astype(o_ref.dtype)


def _decoder_layer_kernel(dec_ref, enc_ref, tvalid_ref, svalid_ref, pk_ref,
                          wqkv_ref, bqkv_ref, wos_ref,
                          wqc_ref, wkvc_ref, bkvc_ref, woc_ref,
                          w1_ref, b1_ref, w2_ref,
                          o_ref, *, n_head):
    bb, lt, hidden = dec_ref.shape
    ls = enc_ref.shape[1]
    x = dec_ref[...].astype(jnp.float32)                      # (Bb, Lt, H)
    enc = enc_ref[...]                                        # (Bb, Ls, H) bf16
    tv = tvalid_ref[...]                                      # (Bb, Lt, 1) int32
    sv = svalid_ref[...]                                      # (Bb, 1, Ls) int32
    pk = pk_ref[...]                  # (10,H): g1,be1,bos, g2,be2,bqc,boc, g3,be3,b2
    g1, be1, bos = pk[0:1], pk[1:2], pk[2:3]
    g2, be2, bqc, boc = pk[3:4], pk[4:5], pk[5:6], pk[6:7]
    g3, be3, b2 = pk[7:8], pk[8:9], pk[9:10]

    # trg_mask[b,i,j] = (trg[b,i] != pad) & (j <= i)  -- built in-kernel
    ri = jax.lax.broadcasted_iota(jnp.int32, (lt, lt), 0)
    ci = jax.lax.broadcasted_iota(jnp.int32, (lt, lt), 1)
    causal = (ci <= ri).astype(jnp.int32)
    self_mask = tv * causal[None, :, :]                       # (Bb, Lt, Lt)

    # --- masked self-attention sublayer ---
    x2 = x.reshape(bb * lt, hidden)
    h2 = _ln(x2, g1, be1)
    qkv = (_mm(h2, wqkv_ref[...]) + bqkv_ref[...]).reshape(bb, lt, 3 * hidden)
    q = qkv[..., :hidden]
    k = qkv[..., hidden:2 * hidden]
    v = qkv[..., 2 * hidden:]
    x = x + _attention(q, k, v, self_mask, wos_ref, bos, n_head)

    # --- encoder-decoder cross-attention sublayer ---
    x2 = x.reshape(bb * lt, hidden)
    h2 = _ln(x2, g2, be2)
    q = (_mm(h2, wqc_ref[...]) + bqc).reshape(bb, lt, hidden)
    kvp = (_mm(enc.reshape(bb * ls, hidden), wkvc_ref[...]) + bkvc_ref[...]
           ).reshape(bb, ls, 2 * hidden)
    k = kvp[..., :hidden]
    v = kvp[..., hidden:]
    x = x + _attention(q, k, v, sv, woc_ref, boc, n_head)

    # --- FFN sublayer ---
    x2 = x.reshape(bb * lt, hidden)
    h2 = _ln(x2, g3, be3)
    f = _gelu(_mm(h2, w1_ref[...]) + b1_ref[...])
    y2 = x2 + _mm(f, w2_ref[...]) + b2
    o_ref[...] = y2.reshape(bb, lt, hidden).astype(o_ref.dtype)


def _logits_kernel(x_ref, w_ref, o_ref):
    # contract on last axes of both operands (no transposed weight in HBM)
    o_ref[...] = jax.lax.dot_general(
        x_ref[...], w_ref[...],
        (((1,), (1,)), ((), ())), preferred_element_type=jnp.float32)


# ------------------------------------------------------------- spec/size utils

def _vmem_limit_bytes():
    """Generation-aware VMEM budget (~100 MiB on v5e/v6e, ~51 MiB on v7x)."""
    cap = None
    try:
        info = pltpu.get_tpu_info()
        for name in ("vmem_capacity_bytes", "vmem_size_bytes", "vmem_bytes"):
            cap = getattr(info, name, None)
            if cap:
                break
    except Exception:
        cap = None
    if not cap:
        cap = 64 * 1024 * 1024          # conservative fallback (safe on all gens)
    return min(int(cap * 0.8), 100 * 1024 * 1024)


def _pick_batch_block(batch, seqlen):
    """Batch elements per grid step: enough rows to amortize per-step overhead,
    but keep >= 2 grid steps when possible so both v7x TensorCores get work."""
    if seqlen % 8 != 0:
        return 1                        # keep in-kernel reshapes layout-preserving
    bblk = max(1, min(batch, -(-256 // seqlen)))          # ceil(256 / L) rows
    if batch >= 2:
        bblk = min(bblk, batch // 2)
    while batch % bblk:
        bblk -= 1
    return max(bblk, 1)


def _act_spec(bblk, d1, d2):
    return pl.BlockSpec((bblk, d1, d2), lambda b: (b, 0, 0))


def _const_spec(shape, use_buffered):
    """Weight/bias spec: block index never changes; optionally single-buffered."""
    imap = lambda b: (0,) * len(shape)
    if use_buffered:
        try:
            return pl.BlockSpec(shape, imap, pipeline_mode=pl.Buffered(1))
        except Exception:
            pass
    return pl.BlockSpec(shape, imap)


# ------------------------------------------------------------- pallas wrappers

def encoder_layer(p, x, src_kvalid, n_head, bblk, vmem_limit, use_buffered):
    B, L, H = x.shape
    F = p["w1"].shape[1]
    cs = lambda shape: _const_spec(shape, use_buffered)
    return pl.pallas_call(
        functools.partial(_encoder_layer_kernel, n_head=n_head),
        out_shape=jax.ShapeDtypeStruct((B, L, H), jnp.bfloat16),
        grid=(B // bblk,),
        in_specs=[
            _act_spec(bblk, L, H),       # x (bf16)
            _act_spec(bblk, 1, L),       # key validity
            cs((6, H)),                  # packed: g1,be1,bo,g2,be2,b2
            cs((H, 3 * H)),              # fused QKV weight (bf16)
            cs((1, 3 * H)),              # fused QKV bias
            cs((H, H)),                  # wo (bf16)
            cs((H, F)),                  # w1 (bf16)
            cs((1, F)),                  # b1
            cs((F, H)),                  # w2 (bf16)
        ],
        out_specs=_act_spec(bblk, L, H),
        compiler_params=pltpu.CompilerParams(
            dimension_semantics=("parallel",),
            vmem_limit_bytes=vmem_limit),
    )(x, src_kvalid, p["packH"], p["wqkv"], p["bqkv"], p["wo"],
      p["w1"], p["b1"], p["w2"])


def decoder_layer(p, dec, enc, trg_qvalid, src_kvalid, n_head, bblk,
                  vmem_limit, use_buffered):
    B, Lt, H = dec.shape
    Ls = enc.shape[1]
    F = p["w1"].shape[1]
    cs = lambda shape: _const_spec(shape, use_buffered)
    return pl.pallas_call(
        functools.partial(_decoder_layer_kernel, n_head=n_head),
        out_shape=jax.ShapeDtypeStruct((B, Lt, H), jnp.bfloat16),
        grid=(B // bblk,),
        in_specs=[
            _act_spec(bblk, Lt, H),      # dec (bf16)
            _act_spec(bblk, Ls, H),      # enc (bf16)
            _act_spec(bblk, Lt, 1),      # trg (query) validity
            _act_spec(bblk, 1, Ls),      # src (key) validity
            cs((10, H)),                 # packed: g1,be1,bos,g2,be2,bqc,boc,g3,be3,b2
            cs((H, 3 * H)),              # self-attn fused QKV weight (bf16)
            cs((1, 3 * H)),              # self-attn fused QKV bias
            cs((H, H)),                  # self-attn wo (bf16)
            cs((H, H)),                  # cross-attn wq (bf16)
            cs((H, 2 * H)),              # cross-attn fused KV weight (bf16)
            cs((1, 2 * H)),              # cross-attn fused KV bias
            cs((H, H)),                  # cross-attn wo (bf16)
            cs((H, F)),                  # w1 (bf16)
            cs((1, F)),                  # b1
            cs((F, H)),                  # w2 (bf16)
        ],
        out_specs=_act_spec(bblk, Lt, H),
        compiler_params=pltpu.CompilerParams(
            dimension_semantics=("parallel",),
            vmem_limit_bytes=vmem_limit),
    )(dec, enc, trg_qvalid, src_kvalid, p["packH"],
      p["wqkv_s"], p["bqkv_s"], p["wo_s"],
      p["wq_c"], p["wkv_c"], p["bkv_c"], p["wo_c"],
      p["w1"], p["b1"], p["w2"])


def logits_projection(x2d_bf16, emb_bf16, vmem_limit):
    """x2d: (M, H) bf16 ; emb: (V, H) bf16 (tied decoder embedding, no bias)."""
    M, H = x2d_bf16.shape
    V = emb_bf16.shape[0]
    tm = M if M <= 512 else 512
    tn = V if V <= 1024 else 1024
    grid = (pl.cdiv(M, tm), pl.cdiv(V, tn))
    return pl.pallas_call(
        _logits_kernel,
        out_shape=jax.ShapeDtypeStruct((M, V), jnp.float32),
        grid=grid,
        in_specs=[pl.BlockSpec((tm, H), lambda i, j: (i, 0)),
                  pl.BlockSpec((tn, H), lambda i, j: (j, 0))],
        out_specs=pl.BlockSpec((tm, tn), lambda i, j: (i, j)),
        compiler_params=pltpu.CompilerParams(
            dimension_semantics=("parallel", "parallel"),
            vmem_limit_bytes=vmem_limit),
    )(x2d_bf16, emb_bf16)


# ------------------------------------------------------------ model components

def sinusoidal_encoding(max_len, hidden):
    pos = jnp.arange(max_len, dtype=jnp.float32)[:, None]
    _2i = jnp.arange(0, hidden, 2, dtype=jnp.float32)
    ang = pos / jnp.power(10000.0, _2i / hidden)
    enc = jnp.zeros((max_len, hidden), jnp.float32)
    enc = enc.at[:, 0::2].set(jnp.sin(ang))
    enc = enc.at[:, 1::2].set(jnp.cos(ang))
    return enc


def transformer_embedding(emb_weight, pos_enc, tokens):
    # TODO(synk): embedding gather + positional add stay in XLA (a data-dependent
    # gather gains nothing as a tiny Pallas kernel); dropout is identity (eval).
    tok = jnp.take(emb_weight, tokens, axis=0)            # (B, L, H) f32
    L = tokens.shape[1]
    return (tok + pos_enc[None, :L, :]).astype(jnp.bfloat16)


def transformer_forward(params, src, trg, *, pad_idx, n_head, vmem_limit, use_buffered):
    B, Ls = src.shape
    Lt = trg.shape[1]
    H = params["enc_emb"].shape[1]
    V = params["dec_emb"].shape[0]

    # tiny per-batch validity vectors; full (B,1,L,L) masks are built in-kernel
    src_kvalid = (src != pad_idx).astype(jnp.int32)[:, None, :]   # (B, 1, Ls)
    trg_qvalid = (trg != pad_idx).astype(jnp.int32)[:, :, None]   # (B, Lt, 1)

    bblk_e = _pick_batch_block(B, Ls)
    enc = transformer_embedding(params["enc_emb"], params["enc_pos"], src)
    for lp in params["enc_layers"]:
        enc = encoder_layer(lp, enc, src_kvalid, n_head, bblk_e,
                            vmem_limit, use_buffered)

    bblk_d = _pick_batch_block(B, Lt)
    dec = transformer_embedding(params["dec_emb"], params["dec_pos"], trg)
    for lp in params["dec_layers"]:
        dec = decoder_layer(lp, dec, enc, trg_qvalid, src_kvalid, n_head, bblk_d,
                            vmem_limit, use_buffered)

    logits = logits_projection(dec.reshape(B * Lt, H), params["dec_emb_bf16"],
                               vmem_limit)
    return logits.reshape(B, Lt, V)


# ---------------------------------------------------------------- parameter init

def init_linear(key, din, dout):
    k1, k2 = jax.random.split(key)
    bound = 1.0 / (din ** 0.5)
    w = jax.random.uniform(k1, (din, dout), jnp.float32, -bound, bound)
    b = jax.random.uniform(k2, (dout,), jnp.float32, -bound, bound)
    return w, b


def init_enc_layer(key, hidden, ffn_hidden):
    ks = jax.random.split(key, 6)
    wq, bq = init_linear(ks[0], hidden, hidden)
    wk, bk = init_linear(ks[1], hidden, hidden)
    wv, bv = init_linear(ks[2], hidden, hidden)
    wo, bo = init_linear(ks[3], hidden, hidden)
    w1, b1 = init_linear(ks[4], hidden, ffn_hidden)
    w2, b2 = init_linear(ks[5], ffn_hidden, hidden)
    ones = jnp.ones((hidden,), jnp.float32)
    zeros = jnp.zeros((hidden,), jnp.float32)
    packH = jnp.stack([ones, zeros, bo, ones, zeros, b2], axis=0)   # (6, H)
    return dict(
        packH=packH,
        wqkv=jnp.concatenate([wq, wk, wv], axis=1).astype(jnp.bfloat16),
        bqkv=jnp.concatenate([bq, bk, bv]).reshape(1, 3 * hidden),
        wo=wo.astype(jnp.bfloat16),
        w1=w1.astype(jnp.bfloat16), b1=b1.reshape(1, ffn_hidden),
        w2=w2.astype(jnp.bfloat16),
    )


def init_dec_layer(key, hidden, ffn_hidden):
    ks = jax.random.split(key, 10)
    wqs, bqs = init_linear(ks[0], hidden, hidden)
    wks, bks = init_linear(ks[1], hidden, hidden)
    wvs, bvs = init_linear(ks[2], hidden, hidden)
    wos, bos = init_linear(ks[3], hidden, hidden)
    wqc, bqc = init_linear(ks[4], hidden, hidden)
    wkc, bkc = init_linear(ks[5], hidden, hidden)
    wvc, bvc = init_linear(ks[6], hidden, hidden)
    woc, boc = init_linear(ks[7], hidden, hidden)
    w1, b1 = init_linear(ks[8], hidden, ffn_hidden)
    w2, b2 = init_linear(ks[9], ffn_hidden, hidden)
    ones = jnp.ones((hidden,), jnp.float32)
    zeros = jnp.zeros((hidden,), jnp.float32)
    # (10, H): [g1, be1, bos, g2, be2, bqc, boc, g3, be3, b2]
    packH = jnp.stack([ones, zeros, bos, ones, zeros, bqc, boc, ones, zeros, b2], axis=0)
    return dict(
        packH=packH,
        wqkv_s=jnp.concatenate([wqs, wks, wvs], axis=1).astype(jnp.bfloat16),
        bqkv_s=jnp.concatenate([bqs, bks, bvs]).reshape(1, 3 * hidden),
        wo_s=wos.astype(jnp.bfloat16),
        wq_c=wqc.astype(jnp.bfloat16),
        wkv_c=jnp.concatenate([wkc, wvc], axis=1).astype(jnp.bfloat16),
        bkv_c=jnp.concatenate([bkc, bvc]).reshape(1, 2 * hidden),
        wo_c=woc.astype(jnp.bfloat16),
        w1=w1.astype(jnp.bfloat16), b1=b1.reshape(1, ffn_hidden),
        w2=w2.astype(jnp.bfloat16),
    )


def init_params(key, *, vocab, hidden, ffn_hidden, n_layers, max_len, dec_max_len, pad_idx):
    ks = jax.random.split(key, 2 + 2 * n_layers)
    enc_emb = jax.random.normal(ks[0], (vocab, hidden), jnp.float32).at[pad_idx].set(0.0)
    dec_emb = jax.random.normal(ks[1], (vocab, hidden), jnp.float32).at[pad_idx].set(0.0)
    return dict(
        enc_emb=enc_emb,
        dec_emb=dec_emb,
        dec_emb_bf16=dec_emb.astype(jnp.bfloat16),     # tied logits weight, pre-cast once
        enc_pos=sinusoidal_encoding(max_len, hidden),
        dec_pos=sinusoidal_encoding(dec_max_len, hidden),
        enc_layers=[init_enc_layer(ks[2 + i], hidden, ffn_hidden) for i in range(n_layers)],
        dec_layers=[init_dec_layer(ks[2 + n_layers + i], hidden, ffn_hidden)
                    for i in range(n_layers)],
    )


# ----------------------------------------------------------------------- main

if __name__ == "__main__":
    PAD_IDX = 0
    VOCAB = 64
    HIDDEN = 32
    N_HEAD = 4
    MAX_LEN = 16
    DEC_MAX_LEN = 16
    FFN_HIDDEN = 64
    N_LAYERS = 2
    BATCH = 2
    SRC_LEN = 8
    TRG_LEN = 8

    key = jax.random.PRNGKey(0)
    k_param, k_src, k_trg = jax.random.split(key, 3)

    params = init_params(
        k_param, vocab=VOCAB, hidden=HIDDEN, ffn_hidden=FFN_HIDDEN,
        n_layers=N_LAYERS, max_len=MAX_LEN, dec_max_len=DEC_MAX_LEN,
        pad_idx=PAD_IDX,
    )

    src = jax.random.randint(k_src, (BATCH, SRC_LEN), 0, VOCAB, dtype=jnp.int32)
    trg = jax.random.randint(k_trg, (BATCH, TRG_LEN), 0, VOCAB, dtype=jnp.int32)
    # make sure some padding appears so the masks are exercised
    src = src.at[:, -1].set(PAD_IDX)
    trg = trg.at[:, -2:].set(PAD_IDX)

    vmem_limit = _vmem_limit_bytes()

    def run(use_buffered):
        fwd = jax.jit(functools.partial(
            transformer_forward, pad_idx=PAD_IDX, n_head=N_HEAD,
            vmem_limit=vmem_limit, use_buffered=use_buffered))
        return jax.block_until_ready(fwd(params, src, trg))

    try:
        out = run(True)        # single-buffered constant weight specs
    except Exception:
        out = run(False)       # fall back to default double buffering

    assert out.shape == (BATCH, TRG_LEN, VOCAB), out.shape
    assert bool(jnp.all(jnp.isfinite(out)))
    print("KERNEL_OK")
</pallas_src>

<mosaic_0001>
module attributes {stable_mosaic.version = 11 : i64} {
  func.func @_logits_kernel(%arg0: i32, %arg1: i32, %arg2: memref<16x32xbf16, #tpu.memory_space<vmem>>, %arg3: memref<64x32xbf16, #tpu.memory_space<vmem>>, %arg4: memref<16x64xf32, #tpu.memory_space<vmem>>) attributes {dimension_semantics = [#tpu.dimension_semantics<parallel>, #tpu.dimension_semantics<parallel>], iteration_bounds = array<i64: 1, 1>, scalar_prefetch = 0 : i64, scratch_operands = 0 : i64, tpu.core_type = #tpu.core_type<tc>, window_params = [{transform_indices = @transform_0, window_bounds = array<i64: 16, 32>}, {transform_indices = @transform_1, window_bounds = array<i64: 64, 32>}, {transform_indices = @transform_2, window_bounds = array<i64: 16, 64>}]} {
    %c0 = arith.constant 0 : index
    %c0_0 = arith.constant 0 : index
    %0 = vector.load %arg2[%c0, %c0_0] : memref<16x32xbf16, #tpu.memory_space<vmem>>, vector<16x32xbf16>
    %c0_1 = arith.constant 0 : index
    %c0_2 = arith.constant 0 : index
    %1 = vector.load %arg3[%c0_1, %c0_2] : memref<64x32xbf16, #tpu.memory_space<vmem>>, vector<64x32xbf16>
    %cst = arith.constant dense<0.000000e+00> : vector<16x64xf32>
    %2 = tpu.matmul %0, %1, %cst {dimension_numbers = #tpu.dot_dimension_numbers<[1], [1], [0], [0], [0, 0, 1, 0], [], []>} : vector<16x32xbf16>, vector<64x32xbf16>, vector<16x64xf32> -> vector<16x64xf32>
    %c0_3 = arith.constant 0 : index
    %c0_4 = arith.constant 0 : index
    %3 = vector.load %arg4[%c0_3, %c0_4] : memref<16x64xf32, #tpu.memory_space<vmem>>, vector<16x64xf32>
    tpu.vector_store %arg4[%c0_3, %c0_4], %2 {strides = array<i32>} : memref<16x64xf32, #tpu.memory_space<vmem>>, vector<16x64xf32>,
    return
  }
  func.func @transform_0(%arg0: i32, %arg1: i32) -> (i32, i32) {
    %c0_i32 = arith.constant 0 : i32
    %c0_i32_0 = arith.constant 0 : i32
    return %arg0, %c0_i32 : i32, i32
  }
  func.func @transform_1(%arg0: i32, %arg1: i32) -> (i32, i32) {
    %c0_i32 = arith.constant 0 : i32
    %c0_i32_0 = arith.constant 0 : i32
    return %arg1, %c0_i32 : i32, i32
  }
  func.func @transform_2(%arg0: i32, %arg1: i32) -> (i32, i32) {
    %c0_i32 = arith.constant 0 : i32
    return %arg0, %arg1 : i32, i32
  }
}

module attributes {stable_mosaic.version = 11 : i64} {
  func.func @_encoder_layer_kernel(%arg0: i32, %arg1: memref<1x8x32xbf16, #tpu.memory_space<vmem>>, %arg2: memref<1x1x8xi32, #tpu.memory_space<vmem>>, %arg3: memref<6x32xf32, #tpu.memory_space<vmem>>, %arg4: memref<32x96xbf16, #tpu.memory_space<vmem>>, %arg5: memref<1x96xf32, #tpu.memory_space<vmem>>, %arg6: memref<32x32xbf16, #tpu.memory_space<vmem>>, %arg7: memref<32x64xbf16, #tpu.memory_space<vmem>>, %arg8: memref<1x64xf32, #tpu.memory_space<vmem>>, %arg9: memref<64x32xbf16, #tpu.memory_space<vmem>>, %arg10: memref<1x8x32xbf16, #tpu.memory_space<vmem>>) attributes {dimension_semantics = [#tpu.dimension_semantics<parallel>], iteration_bounds = array<i64: 2>, scalar_prefetch = 0 : i64, scratch_operands = 0 : i64, tpu.core_type = #tpu.core_type<tc>, window_params = [{transform_indices = @transform_0, window_bounds = array<i64: 1, 8, 32>}, {transform_indices = @transform_1, window_bounds = array<i64: 1, 1, 8>}, {pipeline_mode = #tpu.pipeline_mode<synchronous>, transform_indices = @transform_2, window_bounds = array<i64: 6, 32>}, {pipeline_mode = #tpu.pipeline_mode<synchronous>, transform_indices = @transform_3, window_bounds = array<i64: 32, 96>}, {pipeline_mode = #tpu.pipeline_mode<synchronous>, transform_indices = @transform_4, window_bounds = array<i64: 1, 96>}, {pipeline_mode = #tpu.pipeline_mode<synchronous>, transform_indices = @transform_5, window_bounds = array<i64: 32, 32>}, {pipeline_mode = #tpu.pipeline_mode<synchronous>, transform_indices = @transform_6, window_bounds = array<i64: 32, 64>}, {pipeline_mode = #tpu.pipeline_mode<synchronous>, transform_indices = @transform_7, window_bounds = array<i64: 1, 64>}, {pipeline_mode = #tpu.pipeline_mode<synchronous>, transform_indices = @transform_8, window_bounds = array<i64: 64, 32>}, {transform_indices = @transform_9, window_bounds = array<i64: 1, 8, 32>}]} {
    %c0 = arith.constant 0 : index
    %c0_0 = arith.constant 0 : index
    %c0_1 = arith.constant 0 : index
    %0 = vector.load %arg1[%c0, %c0_0, %c0_1] : memref<1x8x32xbf16, #tpu.memory_space<vmem>>, vector<1x8x32xbf16>
    %1 = arith.extf %0 : vector<1x8x32xbf16> to vector<1x8x32xf32>
    %c0_2 = arith.constant 0 : index
    %c0_3 = arith.constant 0 : index
    %c0_4 = arith.constant 0 : index
    %2 = vector.load %arg2[%c0_2, %c0_3, %c0_4] : memref<1x1x8xi32, #tpu.memory_space<vmem>>, vector<1x1x8xi32>
    %c0_5 = arith.constant 0 : index
    %c0_6 = arith.constant 0 : index
    %3 = vector.load %arg3[%c0_5, %c0_6] : memref<6x32xf32, #tpu.memory_space<vmem>>, vector<6x32xf32>
    %4 = vector.extract_strided_slice %3 {offsets = [0, 0], sizes = [1, 32], strides = [1, 1]} : vector<6x32xf32> to vector<1x32xf32>
    %5 = vector.extract_strided_slice %3 {offsets = [1, 0], sizes = [1, 32], strides = [1, 1]} : vector<6x32xf32> to vector<1x32xf32>
    %6 = vector.extract_strided_slice %3 {offsets = [2, 0], sizes = [1, 32], strides = [1, 1]} : vector<6x32xf32> to vector<1x32xf32>
    %7 = vector.extract_strided_slice %3 {offsets = [3, 0], sizes = [1, 32], strides = [1, 1]} : vector<6x32xf32> to vector<1x32xf32>
    %8 = vector.extract_strided_slice %3 {offsets = [4, 0], sizes = [1, 32], strides = [1, 1]} : vector<6x32xf32> to vector<1x32xf32>
    %9 = vector.extract_strided_slice %3 {offsets = [5, 0], sizes = [1, 32], strides = [1, 1]} : vector<6x32xf32> to vector<1x32xf32>
    %10 = vector.shape_cast %1 : vector<1x8x32xf32> to vector<8x32xf32>
    %cst = arith.constant dense<0.000000e+00> : vector<8xf32>
    %11 = vector.multi_reduction <add>, %10, %cst [1] : vector<8x32xf32> to vector<8xf32>
    %12 = vector.shape_cast %11 : vector<8xf32> to vector<8x1xf32>
    %cst_7 = arith.constant 3.200000e+01 : f32
    %13 = vector.broadcast %cst_7 : f32 to vector<8x1xf32>
    %14 = arith.divf %12, %13 : vector<8x1xf32>
    %15 = vector.broadcast %14 : vector<8x1xf32> to vector<8x32xf32>
    %16 = arith.subf %10, %15 : vector<8x32xf32>
    %17 = arith.mulf %16, %16 : vector<8x32xf32>
    %cst_8 = arith.constant dense<0.000000e+00> : vector<8xf32>
    %18 = vector.multi_reduction <add>, %17, %cst_8 [1] : vector<8x32xf32> to vector<8xf32>
    %19 = vector.shape_cast %18 : vector<8xf32> to vector<8x1xf32>
    %cst_9 = arith.constant 3.200000e+01 : f32
    %20 = vector.broadcast %cst_9 : f32 to vector<8x1xf32>
    %21 = arith.divf %19, %20 : vector<8x1xf32>
    %22 = vector.broadcast %14 : vector<8x1xf32> to vector<8x32xf32>
    %23 = arith.subf %10, %22 : vector<8x32xf32>
    %cst_10 = arith.constant 9.99999974E-6 : f32
    %24 = vector.broadcast %cst_10 : f32 to vector<8x1xf32>
    %25 = arith.addf %21, %24 : vector<8x1xf32>
    %26 = math.rsqrt %25 : vector<8x1xf32>
    %27 = vector.broadcast %26 : vector<8x1xf32> to vector<8x32xf32>
    %28 = arith.mulf %23, %27 : vector<8x32xf32>
    %29 = vector.broadcast %4 : vector<1x32xf32> to vector<8x32xf32>
    %30 = arith.mulf %28, %29 : vector<8x32xf32>
    %31 = vector.broadcast %5 : vector<1x32xf32> to vector<8x32xf32>
    %32 = arith.addf %30, %31 : vector<8x32xf32>
    %c0_11 = arith.constant 0 : index
    %c0_12 = arith.constant 0 : index
    %33 = vector.load %arg4[%c0_11, %c0_12] : memref<32x96xbf16, #tpu.memory_space<vmem>>, vector<32x96xbf16>
    %34 = arith.truncf %32 : vector<8x32xf32> to vector<8x32xbf16>
    %cst_13 = arith.constant dense<0.000000e+00> : vector<8x96xf32>
    %35 = tpu.matmul %34, %33, %cst_13 {dimension_numbers = #tpu.dot_dimension_numbers<[1], [0], [0], [1], [0, 0, 1, 1], [], []>} : vector<8x32xbf16>, vector<32x96xbf16>, vector<8x96xf32> -> vector<8x96xf32>
    %c0_14 = arith.constant 0 : index
    %c0_15 = arith.constant 0 : index
    %36 = vector.load %arg5[%c0_14, %c0_15] : memref<1x96xf32, #tpu.memory_space<vmem>>, vector<1x96xf32>
    %37 = vector.broadcast %36 : vector<1x96xf32> to vector<8x96xf32>
    %38 = arith.addf %35, %37 : vector<8x96xf32>
    %39 = vector.shape_cast %38 : vector<8x96xf32> to vector<1x8x96xf32>
    %40 = vector.extract_strided_slice %39 {offsets = [0, 0, 0], sizes = [1, 8, 32], strides = [1, 1, 1]} : vector<1x8x96xf32> to vector<1x8x32xf32>
    %41 = vector.extract_strided_slice %39 {offsets = [0, 0, 32], sizes = [1, 8, 32], strides = [1, 1, 1]} : vector<1x8x96xf32> to vector<1x8x32xf32>
    %42 = vector.extract_strided_slice %39 {offsets = [0, 0, 64], sizes = [1, 8, 32], strides = [1, 1, 1]} : vector<1x8x96xf32> to vector<1x8x32xf32>
    %43 = arith.truncf %40 : vector<1x8x32xf32> to vector<1x8x32xbf16>
    %44 = arith.truncf %41 : vector<1x8x32xf32> to vector<1x8x32xbf16>
    %45 = arith.truncf %42 : vector<1x8x32xf32> to vector<1x8x32xbf16>
    %c0_i32 = arith.constant 0 : i32
    %46 = vector.broadcast %c0_i32 : i32 to vector<1x1x8xi32>
    %47 = arith.cmpi eq, %2, %46 : vector<1x1x8xi32>
    %48 = vector.extract_strided_slice %43 {offsets = [0, 0, 0], sizes = [1, 8, 8], strides = [1, 1, 1]} : vector<1x8x32xbf16> to vector<1x8x8xbf16>
    %49 = vector.extract_strided_slice %44 {offsets = [0, 0, 0], sizes = [1, 8, 8], strides = [1, 1, 1]} : vector<1x8x32xbf16> to vector<1x8x8xbf16>
    "tpu.trace_start"() <{level = 10 : i32, message = "bqd,bkd->bqk"}> : () -> ()
    %cst_16 = arith.constant dense<0.000000e+00> : vector<1x8x8xf32>
    %50 = tpu.matmul %48, %49, %cst_16 {dimension_numbers = #tpu.dot_dimension_numbers<[2], [2], [1], [1], [0, 0, 0, 1, 1, 1], [0], [0]>} : vector<1x8x8xbf16>, vector<1x8x8xbf16>, vector<1x8x8xf32> -> vector<1x8x8xf32>
    "tpu.trace_stop"() : () -> ()
    %cst_17 = arith.constant 0.353553385 : f32
    %51 = vector.broadcast %cst_17 : f32 to vector<1x8x8xf32>
    %52 = arith.mulf %50, %51 : vector<1x8x8xf32>
    %cst_18 = arith.constant -1.000000e+04 : f32
    %53 = vector.shape_cast %47 : vector<1x1x8xi1> to vector<1x1x8xi1>
    %54 = vector.broadcast %53 : vector<1x1x8xi1> to vector<1x8x8xi1>
    %55 = vector.broadcast %cst_18 : f32 to vector<1x8x8xf32>
    %56 = arith.select %54, %55, %52 : vector<1x8x8xi1>, vector<1x8x8xf32>
    %cst_19 = arith.constant dense<0xFF800000> : vector<1x8xf32>
    %57 = vector.multi_reduction <maximumf>, %56, %cst_19 [2] : vector<1x8x8xf32> to vector<1x8xf32>
    %58 = vector.shape_cast %57 : vector<1x8xf32> to vector<1x8x1xf32>
    %59 = vector.broadcast %58 : vector<1x8x1xf32> to vector<1x8x8xf32>
    %60 = arith.subf %56, %59 : vector<1x8x8xf32>
    %61 = math.exp %60 : vector<1x8x8xf32>
    %cst_20 = arith.constant dense<0.000000e+00> : vector<1x8xf32>
    %62 = vector.multi_reduction <add>, %61, %cst_20 [2] : vector<1x8x8xf32> to vector<1x8xf32>
    %63 = vector.shape_cast %62 : vector<1x8xf32> to vector<1x8x1xf32>
    %64 = tpu.reciprocal %63 {approx = true} : vector<1x8x1xf32> -> vector<1x8x1xf32>
    %65 = vector.broadcast %64 : vector<1x8x1xf32> to vector<1x8x8xf32>
    %66 = arith.mulf %61, %65 : vector<1x8x8xf32>
    %67 = arith.truncf %66 : vector<1x8x8xf32> to vector<1x8x8xbf16>
    %68 = vector.extract_strided_slice %45 {offsets = [0, 0, 0], sizes = [1, 8, 8], strides = [1, 1, 1]} : vector<1x8x32xbf16> to vector<1x8x8xbf16>
    "tpu.trace_start"() <{level = 10 : i32, message = "bqk,bkd->bqd"}> : () -> ()
    %cst_21 = arith.constant dense<0.000000e+00> : vector<1x8x8xf32>
    %69 = tpu.matmul %67, %68, %cst_21 {dimension_numbers = #tpu.dot_dimension_numbers<[2], [1], [1], [2], [0, 0, 0, 1, 1, 2], [0], [0]>} : vector<1x8x8xbf16>, vector<1x8x8xbf16>, vector<1x8x8xf32> -> vector<1x8x8xf32>
    "tpu.trace_stop"() : () -> ()
    %70 = vector.extract_strided_slice %43 {offsets = [0, 0, 8], sizes = [1, 8, 8], strides = [1, 1, 1]} : vector<1x8x32xbf16> to vector<1x8x8xbf16>
    %71 = vector.extract_strided_slice %44 {offsets = [0, 0, 8], sizes = [1, 8, 8], strides = [1, 1, 1]} : vector<1x8x32xbf16> to vector<1x8x8xbf16>
    "tpu.trace_start"() <{level = 10 : i32, message = "bqd,bkd->bqk"}> : () -> ()
    %cst_22 = arith.constant dense<0.000000e+00> : vector<1x8x8xf32>
    %72 = tpu.matmul %70, %71, %cst_22 {dimension_numbers = #tpu.dot_dimension_numbers<[2], [2], [1], [1], [0, 0, 0, 1, 1, 1], [0], [0]>} : vector<1x8x8xbf16>, vector<1x8x8xbf16>, vector<1x8x8xf32> -> vector<1x8x8xf32>
    "tpu.trace_stop"() : () -> ()
    %cst_23 = arith.constant 0.353553385 : f32
    %73 = vector.broadcast %cst_23 : f32 to vector<1x8x8xf32>
    %74 = arith.mulf %72, %73 : vector<1x8x8xf32>
    %cst_24 = arith.constant -1.000000e+04 : f32
    %75 = vector.shape_cast %47 : vector<1x1x8xi1> to vector<1x1x8xi1>
    %76 = vector.broadcast %75 : vector<1x1x8xi1> to vector<1x8x8xi1>
    %77 = vector.broadcast %cst_24 : f32 to vector<1x8x8xf32>
    %78 = arith.select %76, %77, %74 : vector<1x8x8xi1>, vector<1x8x8xf32>
    %cst_25 = arith.constant dense<0xFF800000> : vector<1x8xf32>
    %79 = vector.multi_reduction <maximumf>, %78, %cst_25 [2] : vector<1x8x8xf32> to vector<1x8xf32>
    %80 = vector.shape_cast %79 : vector<1x8xf32> to vector<1x8x1xf32>
    %81 = vector.broadcast %80 : vector<1x8x1xf32> to vector<1x8x8xf32>
    %82 = arith.subf %78, %81 : vector<1x8x8xf32>
    %83 = math.exp %82 : vector<1x8x8xf32>
    %cst_26 = arith.constant dense<0.000000e+00> : vector<1x8xf32>
    %84 = vector.multi_reduction <add>, %83, %cst_26 [2] : vector<1x8x8xf32> to vector<1x8xf32>
    %85 = vector.shape_cast %84 : vector<1x8xf32> to vector<1x8x1xf32>
    %86 = tpu.reciprocal %85 {approx = true} : vector<1x8x1xf32> -> vector<1x8x1xf32>
    %87 = vector.broadcast %86 : vector<1x8x1xf32> to vector<1x8x8xf32>
    %88 = arith.mulf %83, %87 : vector<1x8x8xf32>
    %89 = arith.truncf %88 : vector<1x8x8xf32> to vector<1x8x8xbf16>
    %90 = vector.extract_strided_slice %45 {offsets = [0, 0, 8], sizes = [1, 8, 8], strides = [1, 1, 1]} : vector<1x8x32xbf16> to vector<1x8x8xbf16>
    "tpu.trace_start"() <{level = 10 : i32, message = "bqk,bkd->bqd"}> : () -> ()
    %cst_27 = arith.constant dense<0.000000e+00> : vector<1x8x8xf32>
    %91 = tpu.matmul %89, %90, %cst_27 {dimension_numbers = #tpu.dot_dimension_numbers<[2], [1], [1], [2], [0, 0, 0, 1, 1, 2], [0], [0]>} : vector<1x8x8xbf16>, vector<1x8x8xbf16>, vector<1x8x8xf32> -> vector<1x8x8xf32>
    "tpu.trace_stop"() : () -> ()
    %92 = vector.extract_strided_slice %43 {offsets = [0, 0, 16], sizes = [1, 8, 8], strides = [1, 1, 1]} : vector<1x8x32xbf16> to vector<1x8x8xbf16>
    %93 = vector.extract_strided_slice %44 {offsets = [0, 0, 16], sizes = [1, 8, 8], strides = [1, 1, 1]} : vector<1x8x32xbf16> to vector<1x8x8xbf16>
    "tpu.trace_start"() <{level = 10 : i32, message = "bqd,bkd->bqk"}> : () -> ()
    %cst_28 = arith.constant dense<0.000000e+00> : vector<1x8x8xf32>
    %94 = tpu.matmul %92, %93, %cst_28 {dimension_numbers = #tpu.dot_dimension_numbers<[2], [2], [1], [1], [0, 0, 0, 1, 1, 1], [0], [0]>} : vector<1x8x8xbf16>, vector<1x8x8xbf16>, vector<1x8x8xf32> -> vector<1x8x8xf32>
    "tpu.trace_stop"() : () -> ()
    %cst_29 = arith.constant 0.353553385 : f32
    %95 = vector.broadcast %cst_29 : f32 to vector<1x8x8xf32>
    %96 = arith.mulf %94, %95 : vector<1x8x8xf32>
    %cst_30 = arith.constant -1.000000e+04 : f32
    %97 = vector.shape_cast %47 : vector<1x1x8xi1> to vector<1x1x8xi1>
    %98 = vector.broadcast %97 : vector<1x1x8xi1> to vector<1x8x8xi1>
    %99 = vector.broadcast %cst_30 : f32 to vector<1x8x8xf32>
    %100 = arith.select %98, %99, %96 : vector<1x8x8xi1>, vector<1x8x8xf32>
    %cst_31 = arith.constant dense<0xFF800000> : vector<1x8xf32>
    %101 = vector.multi_reduction <maximumf>, %100, %cst_31 [2] : vector<1x8x8xf32> to vector<1x8xf32>
    %102 = vector.shape_cast %101 : vector<1x8xf32> to vector<1x8x1xf32>
    %103 = vector.broadcast %102 : vector<1x8x1xf32> to vector<1x8x8xf32>
    %104 = arith.subf %100, %103 : vector<1x8x8xf32>
    %105 = math.exp %104 : vector<1x8x8xf32>
    %cst_32 = arith.constant dense<0.000000e+00> : vector<1x8xf32>
    %106 = vector.multi_reduction <add>, %105, %cst_32 [2] : vector<1x8x8xf32> to vector<1x8xf32>
    %107 = vector.shape_cast %106 : vector<1x8xf32> to vector<1x8x1xf32>
    %108 = tpu.reciprocal %107 {approx = true} : vector<1x8x1xf32> -> vector<1x8x1xf32>
    %109 = vector.broadcast %108 : vector<1x8x1xf32> to vector<1x8x8xf32>
    %110 = arith.mulf %105, %109 : vector<1x8x8xf32>
    %111 = arith.truncf %110 : vector<1x8x8xf32> to vector<1x8x8xbf16>
    %112 = vector.extract_strided_slice %45 {offsets = [0, 0, 16], sizes = [1, 8, 8], strides = [1, 1, 1]} : vector<1x8x32xbf16> to vector<1x8x8xbf16>
    "tpu.trace_start"() <{level = 10 : i32, message = "bqk,bkd->bqd"}> : () -> ()
    %cst_33 = arith.constant dense<0.000000e+00> : vector<1x8x8xf32>
    %113 = tpu.matmul %111, %112, %cst_33 {dimension_numbers = #tpu.dot_dimension_numbers<[2], [1], [1], [2], [0, 0, 0, 1, 1, 2], [0], [0]>} : vector<1x8x8xbf16>, vector<1x8x8xbf16>, vector<1x8x8xf32> -> vector<1x8x8xf32>
    "tpu.trace_stop"() : () -> ()
    %114 = vector.extract_strided_slice %43 {offsets = [0, 0, 24], sizes = [1, 8, 8], strides = [1, 1, 1]} : vector<1x8x32xbf16> to vector<1x8x8xbf16>
    %115 = vector.extract_strided_slice %44 {offsets = [0, 0, 24], sizes = [1, 8, 8], strides = [1, 1, 1]} : vector<1x8x32xbf16> to vector<1x8x8xbf16>
    "tpu.trace_start"() <{level = 10 : i32, message = "bqd,bkd->bqk"}> : () -> ()
    %cst_34 = arith.constant dense<0.000000e+00> : vector<1x8x8xf32>
    %116 = tpu.matmul %114, %115, %cst_34 {dimension_numbers = #tpu.dot_dimension_numbers<[2], [2], [1], [1], [0, 0, 0, 1, 1, 1], [0], [0]>} : vector<1x8x8xbf16>, vector<1x8x8xbf16>, vector<1x8x8xf32> -> vector<1x8x8xf32>
    "tpu.trace_stop"() : () -> ()
    %cst_35 = arith.constant 0.353553385 : f32
    %117 = vector.broadcast %cst_35 : f32 to vector<1x8x8xf32>
    %118 = arith.mulf %116, %117 : vector<1x8x8xf32>
    %cst_36 = arith.constant -1.000000e+04 : f32
    %119 = vector.shape_cast %47 : vector<1x1x8xi1> to vector<1x1x8xi1>
    %120 = vector.broadcast %119 : vector<1x1x8xi1> to vector<1x8x8xi1>
    %121 = vector.broadcast %cst_36 : f32 to vector<1x8x8xf32>
    %122 = arith.select %120, %121, %118 : vector<1x8x8xi1>, vector<1x8x8xf32>
    %cst_37 = arith.constant dense<0xFF800000> : vector<1x8xf32>
    %123 = vector.multi_reduction <maximumf>, %122, %cst_37 [2] : vector<1x8x8xf32> to vector<1x8xf32>
    %124 = vector.shape_cast %123 : vector<1x8xf32> to vector<1x8x1xf32>
    %125 = vector.broadcast %124 : vector<1x8x1xf32> to vector<1x8x8xf32>
    %126 = arith.subf %122, %125 : vector<1x8x8xf32>
    %127 = math.exp %126 : vector<1x8x8xf32>
    %cst_38 = arith.constant dense<0.000000e+00> : vector<1x8xf32>
    %128 = vector.multi_reduction <add>, %127, %cst_38 [2] : vector<1x8x8xf32> to vector<1x8xf32>
    %129 = vector.shape_cast %128 : vector<1x8xf32> to vector<1x8x1xf32>
    %130 = tpu.reciprocal %129 {approx = true} : vector<1x8x1xf32> -> vector<1x8x1xf32>
    %131 = vector.broadcast %130 : vector<1x8x1xf32> to vector<1x8x8xf32>
    %132 = arith.mulf %127, %131 : vector<1x8x8xf32>
    %133 = arith.truncf %132 : vector<1x8x8xf32> to vector<1x8x8xbf16>
    %134 = vector.extract_strided_slice %45 {offsets = [0, 0, 24], sizes = [1, 8, 8], strides = [1, 1, 1]} : vector<1x8x32xbf16> to vector<1x8x8xbf16>
    "tpu.trace_start"() <{level = 10 : i32, message = "bqk,bkd->bqd"}> : () -> ()
    %cst_39 = arith.constant dense<0.000000e+00> : vector<1x8x8xf32>
    %135 = tpu.matmul %133, %134, %cst_39 {dimension_numbers = #tpu.dot_dimension_numbers<[2], [1], [1], [2], [0, 0, 0, 1, 1, 2], [0], [0]>} : vector<1x8x8xbf16>, vector<1x8x8xbf16>, vector<1x8x8xf32> -> vector<1x8x8xf32>
    "tpu.trace_stop"() : () -> ()
    %136 = tpu.concatenate %69, %91, %113, %135 in 2 : vector<1x8x8xf32>, vector<1x8x8xf32>, vector<1x8x8xf32>, vector<1x8x8xf32> -> vector<1x8x32xf32>
    %137 = arith.truncf %136 : vector<1x8x32xf32> to vector<1x8x32xbf16>
    %138 = vector.shape_cast %137 : vector<1x8x32xbf16> to vector<8x32xbf16>
    %c0_40 = arith.constant 0 : index
    %c0_41 = arith.constant 0 : index
    %139 = vector.load %arg6[%c0_40, %c0_41] : memref<32x32xbf16, #tpu.memory_space<vmem>>, vector<32x32xbf16>
    %cst_42 = arith.constant dense<0.000000e+00> : vector<8x32xf32>
    %140 = tpu.matmul %138, %139, %cst_42 {dimension_numbers = #tpu.dot_dimension_numbers<[1], [0], [0], [1], [0, 0, 1, 1], [], []>} : vector<8x32xbf16>, vector<32x32xbf16>, vector<8x32xf32> -> vector<8x32xf32>
    %141 = vector.broadcast %6 : vector<1x32xf32> to vector<8x32xf32>
    %142 = arith.addf %140, %141 : vector<8x32xf32>
    %143 = vector.shape_cast %142 : vector<8x32xf32> to vector<1x8x32xf32>
    %144 = arith.addf %1, %143 : vector<1x8x32xf32>
    %145 = vector.shape_cast %144 : vector<1x8x32xf32> to vector<8x32xf32>
    %cst_43 = arith.constant dense<0.000000e+00> : vector<8xf32>
    %146 = vector.multi_reduction <add>, %145, %cst_43 [1] : vector<8x32xf32> to vector<8xf32>
    %147 = vector.shape_cast %146 : vector<8xf32> to vector<8x1xf32>
    %cst_44 = arith.constant 3.200000e+01 : f32
    %148 = vector.broadcast %cst_44 : f32 to vector<8x1xf32>
    %149 = arith.divf %147, %148 : vector<8x1xf32>
    %150 = vector.broadcast %149 : vector<8x1xf32> to vector<8x32xf32>
    %151 = arith.subf %145, %150 : vector<8x32xf32>
    %152 = arith.mulf %151, %151 : vector<8x32xf32>
    %cst_45 = arith.constant dense<0.000000e+00> : vector<8xf32>
    %153 = vector.multi_reduction <add>, %152, %cst_45 [1] : vector<8x32xf32> to vector<8xf32>
    %154 = vector.shape_cast %153 : vector<8xf32> to vector<8x1xf32>
    %cst_46 = arith.constant 3.200000e+01 : f32
    %155 = vector.broadcast %cst_46 : f32 to vector<8x1xf32>
    %156 = arith.divf %154, %155 : vector<8x1xf32>
    %157 = vector.broadcast %149 : vector<8x1xf32> to vector<8x32xf32>
    %158 = arith.subf %145, %157 : vector<8x32xf32>
    %cst_47 = arith.constant 9.99999974E-6 : f32
    %159 = vector.broadcast %cst_47 : f32 to vector<8x1xf32>
    %160 = arith.addf %156, %159 : vector<8x1xf32>
    %161 = math.rsqrt %160 : vector<8x1xf32>
    %162 = vector.broadcast %161 : vector<8x1xf32> to vector<8x32xf32>
    %163 = arith.mulf %158, %162 : vector<8x32xf32>
    %164 = vector.broadcast %7 : vector<1x32xf32> to vector<8x32xf32>
    %165 = arith.mulf %163, %164 : vector<8x32xf32>
    %166 = vector.broadcast %8 : vector<1x32xf32> to vector<8x32xf32>
    %167 = arith.addf %165, %166 : vector<8x32xf32>
    %c0_48 = arith.constant 0 : index
    %c0_49 = arith.constant 0 : index
    %168 = vector.load %arg7[%c0_48, %c0_49] : memref<32x64xbf16, #tpu.memory_space<vmem>>, vector<32x64xbf16>
    %169 = arith.truncf %167 : vector<8x32xf32> to vector<8x32xbf16>
    %cst_50 = arith.constant dense<0.000000e+00> : vector<8x64xf32>
    %170 = tpu.matmul %169, %168, %cst_50 {dimension_numbers = #tpu.dot_dimension_numbers<[1], [0], [0], [1], [0, 0, 1, 1], [], []>} : vector<8x32xbf16>, vector<32x64xbf16>, vector<8x64xf32> -> vector<8x64xf32>
    %c0_51 = arith.constant 0 : index
    %c0_52 = arith.constant 0 : index
    %171 = vector.load %arg8[%c0_51, %c0_52] : memref<1x64xf32, #tpu.memory_space<vmem>>, vector<1x64xf32>
    %172 = vector.broadcast %171 : vector<1x64xf32> to vector<8x64xf32>
    %173 = arith.addf %170, %172 : vector<8x64xf32>
    %cst_53 = arith.constant 5.000000e-01 : f32
    %174 = vector.broadcast %cst_53 : f32 to vector<8x64xf32>
    %175 = arith.mulf %174, %173 : vector<8x64xf32>
    %cst_54 = arith.constant 0.707106769 : f32
    %176 = vector.broadcast %cst_54 : f32 to vector<8x64xf32>
    %177 = arith.mulf %173, %176 : vector<8x64xf32>
    %cst_55 = arith.constant 0.000000e+00 : f32
    %178 = vector.broadcast %cst_55 : f32 to vector<8x64xf32>
    %179 = arith.cmpf oge, %177, %178 : vector<8x64xf32>
    %cst_56 = arith.constant 1.000000e+00 : f32
    %cst_57 = arith.constant -1.000000e+00 : f32
    %180 = vector.broadcast %cst_56 : f32 to vector<8x64xf32>
    %181 = vector.broadcast %cst_57 : f32 to vector<8x64xf32>
    %182 = arith.select %179, %180, %181 : vector<8x64xi1>, vector<8x64xf32>
    %cst_58 = arith.constant 0.000000e+00 : f32
    %183 = vector.broadcast %cst_58 : f32 to vector<8x64xf32>
    %184 = arith.cmpf oge, %177, %183 : vector<8x64xf32>
    %cst_59 = arith.constant 0.000000e+00 : f32
    %185 = vector.broadcast %cst_59 : f32 to vector<8x64xf32>
    %186 = arith.subf %185, %177 : vector<8x64xf32>
    %187 = arith.select %184, %177, %186 : vector<8x64xi1>, vector<8x64xf32>
    %cst_60 = arith.constant 0.327591091 : f32
    %188 = vector.broadcast %cst_60 : f32 to vector<8x64xf32>
    %189 = arith.mulf %188, %187 : vector<8x64xf32>
    %cst_61 = arith.constant 1.000000e+00 : f32
    %190 = vector.broadcast %cst_61 : f32 to vector<8x64xf32>
    %191 = arith.addf %190, %189 : vector<8x64xf32>
    %cst_62 = arith.constant 1.000000e+00 : f32
    %192 = vector.broadcast %cst_62 : f32 to vector<8x64xf32>
    %193 = arith.divf %192, %191 : vector<8x64xf32>
    %cst_63 = arith.constant 1.06140542 : f32
    %194 = vector.broadcast %cst_63 : f32 to vector<8x64xf32>
    %195 = arith.mulf %194, %193 : vector<8x64xf32>
    %cst_64 = arith.constant -1.45315206 : f32
    %196 = vector.broadcast %cst_64 : f32 to vector<8x64xf32>
    %197 = arith.addf %195, %196 : vector<8x64xf32>
    %198 = arith.mulf %197, %193 : vector<8x64xf32>
    %cst_65 = arith.constant 1.42141378 : f32
    %199 = vector.broadcast %cst_65 : f32 to vector<8x64xf32>
    %200 = arith.addf %198, %199 : vector<8x64xf32>
    %201 = arith.mulf %200, %193 : vector<8x64xf32>
    %cst_66 = arith.constant -0.284496725 : f32
    %202 = vector.broadcast %cst_66 : f32 to vector<8x64xf32>
    %203 = arith.addf %201, %202 : vector<8x64xf32>
    %204 = arith.mulf %203, %193 : vector<8x64xf32>
    %cst_67 = arith.constant 0.254829586 : f32
    %205 = vector.broadcast %cst_67 : f32 to vector<8x64xf32>
    %206 = arith.addf %204, %205 : vector<8x64xf32>
    %207 = arith.mulf %206, %193 : vector<8x64xf32>
    %cst_68 = arith.constant 0.000000e+00 : f32
    %208 = vector.broadcast %cst_68 : f32 to vector<8x64xf32>
    %209 = arith.subf %208, %187 : vector<8x64xf32>
    %210 = arith.mulf %209, %187 : vector<8x64xf32>
    %211 = math.exp %210 : vector<8x64xf32>
    %212 = arith.mulf %207, %211 : vector<8x64xf32>
    %cst_69 = arith.constant 1.000000e+00 : f32
    %213 = vector.broadcast %cst_69 : f32 to vector<8x64xf32>
    %214 = arith.subf %213, %212 : vector<8x64xf32>
    %215 = arith.mulf %182, %214 : vector<8x64xf32>
    %cst_70 = arith.constant 1.000000e+00 : f32
    %216 = vector.broadcast %cst_70 : f32 to vector<8x64xf32>
    %217 = arith.addf %216, %215 : vector<8x64xf32>
    %218 = arith.mulf %175, %217 : vector<8x64xf32>
    %c0_71 = arith.constant 0 : index
    %c0_72 = arith.constant 0 : index
    %219 = vector.load %arg9[%c0_71, %c0_72] : memref<64x32xbf16, #tpu.memory_space<vmem>>, vector<64x32xbf16>
    %220 = arith.truncf %218 : vector<8x64xf32> to vector<8x64xbf16>
    %cst_73 = arith.constant dense<0.000000e+00> : vector<8x32xf32>
    %221 = tpu.matmul %220, %219, %cst_73 {dimension_numbers = #tpu.dot_dimension_numbers<[1], [0], [0], [1], [0, 0, 1, 1], [], []>} : vector<8x64xbf16>, vector<64x32xbf16>, vector<8x32xf32> -> vector<8x32xf32>
    %222 = arith.addf %145, %221 : vector<8x32xf32>
    %223 = vector.broadcast %9 : vector<1x32xf32> to vector<8x32xf32>
    %224 = arith.addf %222, %223 : vector<8x32xf32>
    %225 = vector.shape_cast %224 : vector<8x32xf32> to vector<1x8x32xf32>
    %226 = arith.truncf %225 : vector<1x8x32xf32> to vector<1x8x32xbf16>
    %c0_74 = arith.constant 0 : index
    %c0_75 = arith.constant 0 : index
    %c0_76 = arith.constant 0 : index
    %227 = vector.load %arg10[%c0_74, %c0_75, %c0_76] : memref<1x8x32xbf16, #tpu.memory_space<vmem>>, vector<1x8x32xbf16>
    tpu.vector_store %arg10[%c0_74, %c0_75, %c0_76], %226 {strides = array<i32>} : memref<1x8x32xbf16, #tpu.memory_space<vmem>>, vector<1x8x32xbf16>,
    return
  }
  func.func @transform_0(%arg0: i32) -> (i32, i32, i32) {
    %c0_i32 = arith.constant 0 : i32
    %c0_i32_0 = arith.constant 0 : i32
    %c0_i32_1 = arith.constant 0 : i32
    return %arg0, %c0_i32, %c0_i32_0 : i32, i32, i32
  }
  func.func @transform_1(%arg0: i32) -> (i32, i32, i32) {
    %c0_i32 = arith.constant 0 : i32
    %c0_i32_0 = arith.constant 0 : i32
    %c0_i32_1 = arith.constant 0 : i32
    return %arg0, %c0_i32, %c0_i32_0 : i32, i32, i32
  }
  func.func @transform_2(%arg0: i32) -> (i32, i32) {
    %c0_i32 = arith.constant 0 : i32
    %c0_i32_0 = arith.constant 0 : i32
    %c0_i32_1 = arith.constant 0 : i32
    return %c0_i32, %c0_i32_0 : i32, i32
  }
  func.func @transform_3(%arg0: i32) -> (i32, i32) {
    %c0_i32 = arith.constant 0 : i32
    %c0_i32_0 = arith.constant 0 : i32
    %c0_i32_1 = arith.constant 0 : i32
    return %c0_i32, %c0_i32_0 : i32, i32
  }
  func.func @transform_4(%arg0: i32) -> (i32, i32) {
    %c0_i32 = arith.constant 0 : i32
    %c0_i32_0 = arith.constant 0 : i32
    %c0_i32_1 = arith.constant 0 : i32
    return %c0_i32, %c0_i32_0 : i32, i32
  }
  func.func @transform_5(%arg0: i32) -> (i32, i32) {
    %c0_i32 = arith.constant 0 : i32
    %c0_i32_0 = arith.constant 0 : i32
    %c0_i32_1 = arith.constant 0 : i32
    return %c0_i32, %c0_i32_0 : i32, i32
  }
  func.func @transform_6(%arg0: i32) -> (i32, i32) {
    %c0_i32 = arith.constant 0 : i32
    %c0_i32_0 = arith.constant 0 : i32
    %c0_i32_1 = arith.constant 0 : i32
    return %c0_i32, %c0_i32_0 : i32, i32
  }
  func.func @transform_7(%arg0: i32) -> (i32, i32) {
    %c0_i32 = arith.constant 0 : i32
    %c0_i32_0 = arith.constant 0 : i32
    %c0_i32_1 = arith.constant 0 : i32
    return %c0_i32, %c0_i32_0 : i32, i32
  }
  func.func @transform_8(%arg0: i32) -> (i32, i32) {
    %c0_i32 = arith.constant 0 : i32
    %c0_i32_0 = arith.constant 0 : i32
    %c0_i32_1 = arith.constant 0 : i32
    return %c0_i32, %c0_i32_0 : i32, i32
  }
  func.func @transform_9(%arg0: i32) -> (i32, i32, i32) {
    %c0_i32 = arith.constant 0 : i32
    %c0_i32_0 = arith.constant 0 : i32
    %c0_i32_1 = arith.constant 0 : i32
    return %arg0, %c0_i32, %c0_i32_0 : i32, i32, i32
  }
}

module attributes {stable_mosaic.version = 11 : i64} {
  func.func @_decoder_layer_kernel(%arg0: i32, %arg1: memref<1x8x32xbf16, #tpu.memory_space<vmem>>, %arg2: memref<1x8x32xbf16, #tpu.memory_space<vmem>>, %arg3: memref<1x8x1xi32, #tpu.memory_space<vmem>>, %arg4: memref<1x1x8xi32, #tpu.memory_space<vmem>>, %arg5: memref<10x32xf32, #tpu.memory_space<vmem>>, %arg6: memref<32x96xbf16, #tpu.memory_space<vmem>>, %arg7: memref<1x96xf32, #tpu.memory_space<vmem>>, %arg8: memref<32x32xbf16, #tpu.memory_space<vmem>>, %arg9: memref<32x32xbf16, #tpu.memory_space<vmem>>, %arg10: memref<32x64xbf16, #tpu.memory_space<vmem>>, %arg11: memref<1x64xf32, #tpu.memory_space<vmem>>, %arg12: memref<32x32xbf16, #tpu.memory_space<vmem>>, %arg13: memref<32x64xbf16, #tpu.memory_space<vmem>>, %arg14: memref<1x64xf32, #tpu.memory_space<vmem>>, %arg15: memref<64x32xbf16, #tpu.memory_space<vmem>>, %arg16: memref<1x8x32xbf16, #tpu.memory_space<vmem>>) attributes {dimension_semantics = [#tpu.dimension_semantics<parallel>], iteration_bounds = array<i64: 2>, scalar_prefetch = 0 : i64, scratch_operands = 0 : i64, tpu.core_type = #tpu.core_type<tc>, window_params = [{transform_indices = @transform_0, window_bounds = array<i64: 1, 8, 32>}, {transform_indices = @transform_1, window_bounds = array<i64: 1, 8, 32>}, {transform_indices = @transform_2, window_bounds = array<i64: 1, 8, 1>}, {transform_indices = @transform_3, window_bounds = array<i64: 1, 1, 8>}, {pipeline_mode = #tpu.pipeline_mode<synchronous>, transform_indices = @transform_4, window_bounds = array<i64: 10, 32>}, {pipeline_mode = #tpu.pipeline_mode<synchronous>, transform_indices = @transform_5, window_bounds = array<i64: 32, 96>}, {pipeline_mode = #tpu.pipeline_mode<synchronous>, transform_indices = @transform_6, window_bounds = array<i64: 1, 96>}, {pipeline_mode = #tpu.pipeline_mode<synchronous>, transform_indices = @transform_7, window_bounds = array<i64: 32, 32>}, {pipeline_mode = #tpu.pipeline_mode<synchronous>, transform_indices = @transform_8, window_bounds = array<i64: 32, 32>}, {pipeline_mode = #tpu.pipeline_mode<synchronous>, transform_indices = @transform_9, window_bounds = array<i64: 32, 64>}, {pipeline_mode = #tpu.pipeline_mode<synchronous>, transform_indices = @transform_10, window_bounds = array<i64: 1, 64>}, {pipeline_mode = #tpu.pipeline_mode<synchronous>, transform_indices = @transform_11, window_bounds = array<i64: 32, 32>}, {pipeline_mode = #tpu.pipeline_mode<synchronous>, transform_indices = @transform_12, window_bounds = array<i64: 32, 64>}, {pipeline_mode = #tpu.pipeline_mode<synchronous>, transform_indices = @transform_13, window_bounds = array<i64: 1, 64>}, {pipeline_mode = #tpu.pipeline_mode<synchronous>, transform_indices = @transform_14, window_bounds = array<i64: 64, 32>}, {transform_indices = @transform_15, window_bounds = array<i64: 1, 8, 32>}]} {
    %c0 = arith.constant 0 : index
    %c0_0 = arith.constant 0 : index
    %c0_1 = arith.constant 0 : index
    %0 = vector.load %arg1[%c0, %c0_0, %c0_1] : memref<1x8x32xbf16, #tpu.memory_space<vmem>>, vector<1x8x32xbf16>
    %1 = arith.extf %0 : vector<1x8x32xbf16> to vector<1x8x32xf32>
    %c0_2 = arith.constant 0 : index
    %c0_3 = arith.constant 0 : index
    %c0_4 = arith.constant 0 : index
    %2 = vector.load %arg2[%c0_2, %c0_3, %c0_4] : memref<1x8x32xbf16, #tpu.memory_space<vmem>>, vector<1x8x32xbf16>
    %c0_5 = arith.constant 0 : index
    %c0_6 = arith.constant 0 : index
    %c0_7 = arith.constant 0 : index
    %3 = vector.load %arg3[%c0_5, %c0_6, %c0_7] : memref<1x8x1xi32, #tpu.memory_space<vmem>>, vector<1x8x1xi32>
    %c0_8 = arith.constant 0 : index
    %c0_9 = arith.constant 0 : index
    %c0_10 = arith.constant 0 : index
    %4 = vector.load %arg4[%c0_8, %c0_9, %c0_10] : memref<1x1x8xi32, #tpu.memory_space<vmem>>, vector<1x1x8xi32>
    %c0_11 = arith.constant 0 : index
    %c0_12 = arith.constant 0 : index
    %5 = vector.load %arg5[%c0_11, %c0_12] : memref<10x32xf32, #tpu.memory_space<vmem>>, vector<10x32xf32>
    %6 = vector.extract_strided_slice %5 {offsets = [0, 0], sizes = [1, 32], strides = [1, 1]} : vector<10x32xf32> to vector<1x32xf32>
    %7 = vector.extract_strided_slice %5 {offsets = [1, 0], sizes = [1, 32], strides = [1, 1]} : vector<10x32xf32> to vector<1x32xf32>
    %8 = vector.extract_strided_slice %5 {offsets = [2, 0], sizes = [1, 32], strides = [1, 1]} : vector<10x32xf32> to vector<1x32xf32>
    %9 = vector.extract_strided_slice %5 {offsets = [3, 0], sizes = [1, 32], strides = [1, 1]} : vector<10x32xf32> to vector<1x32xf32>
    %10 = vector.extract_strided_slice %5 {offsets = [4, 0], sizes = [1, 32], strides = [1, 1]} : vector<10x32xf32> to vector<1x32xf32>
    %11 = vector.extract_strided_slice %5 {offsets = [5, 0], sizes = [1, 32], strides = [1, 1]} : vector<10x32xf32> to vector<1x32xf32>
    %12 = vector.extract_strided_slice %5 {offsets = [6, 0], sizes = [1, 32], strides = [1, 1]} : vector<10x32xf32> to vector<1x32xf32>
    %13 = vector.extract_strided_slice %5 {offsets = [7, 0], sizes = [1, 32], strides = [1, 1]} : vector<10x32xf32> to vector<1x32xf32>
    %14 = vector.extract_strided_slice %5 {offsets = [8, 0], sizes = [1, 32], strides = [1, 1]} : vector<10x32xf32> to vector<1x32xf32>
    %15 = vector.extract_strided_slice %5 {offsets = [9, 0], sizes = [1, 32], strides = [1, 1]} : vector<10x32xf32> to vector<1x32xf32>
    %16 = tpu.iota {dimensions = array<i32: 0>} : vector<8x8xi32>
    %17 = tpu.iota {dimensions = array<i32: 1>} : vector<8x8xi32>
    %18 = arith.cmpi sle, %17, %16 : vector<8x8xi32>
    %19 = arith.extui %18 : vector<8x8xi1> to vector<8x8xi32>
    %20 = vector.shape_cast %19 : vector<8x8xi32> to vector<1x8x8xi32>
    %21 = vector.broadcast %3 : vector<1x8x1xi32> to vector<1x8x8xi32>
    %22 = arith.muli %21, %20 : vector<1x8x8xi32>
    %23 = vector.shape_cast %1 : vector<1x8x32xf32> to vector<8x32xf32>
    %cst = arith.constant dense<0.000000e+00> : vector<8xf32>
    %24 = vector.multi_reduction <add>, %23, %cst [1] : vector<8x32xf32> to vector<8xf32>
    %25 = vector.shape_cast %24 : vector<8xf32> to vector<8x1xf32>
    %cst_13 = arith.constant 3.200000e+01 : f32
    %26 = vector.broadcast %cst_13 : f32 to vector<8x1xf32>
    %27 = arith.divf %25, %26 : vector<8x1xf32>
    %28 = vector.broadcast %27 : vector<8x1xf32> to vector<8x32xf32>
    %29 = arith.subf %23, %28 : vector<8x32xf32>
    %30 = arith.mulf %29, %29 : vector<8x32xf32>
    %cst_14 = arith.constant dense<0.000000e+00> : vector<8xf32>
    %31 = vector.multi_reduction <add>, %30, %cst_14 [1] : vector<8x32xf32> to vector<8xf32>
    %32 = vector.shape_cast %31 : vector<8xf32> to vector<8x1xf32>
    %cst_15 = arith.constant 3.200000e+01 : f32
    %33 = vector.broadcast %cst_15 : f32 to vector<8x1xf32>
    %34 = arith.divf %32, %33 : vector<8x1xf32>
    %35 = vector.broadcast %27 : vector<8x1xf32> to vector<8x32xf32>
    %36 = arith.subf %23, %35 : vector<8x32xf32>
    %cst_16 = arith.constant 9.99999974E-6 : f32
    %37 = vector.broadcast %cst_16 : f32 to vector<8x1xf32>
    %38 = arith.addf %34, %37 : vector<8x1xf32>
    %39 = math.rsqrt %38 : vector<8x1xf32>
    %40 = vector.broadcast %39 : vector<8x1xf32> to vector<8x32xf32>
    %41 = arith.mulf %36, %40 : vector<8x32xf32>
    %42 = vector.broadcast %6 : vector<1x32xf32> to vector<8x32xf32>
    %43 = arith.mulf %41, %42 : vector<8x32xf32>
    %44 = vector.broadcast %7 : vector<1x32xf32> to vector<8x32xf32>
    %45 = arith.addf %43, %44 : vector<8x32xf32>
    %c0_17 = arith.constant 0 : index
    %c0_18 = arith.constant 0 : index
    %46 = vector.load %arg6[%c0_17, %c0_18] : memref<32x96xbf16, #tpu.memory_space<vmem>>, vector<32x96xbf16>
    %47 = arith.truncf %45 : vector<8x32xf32> to vector<8x32xbf16>
    %cst_19 = arith.constant dense<0.000000e+00> : vector<8x96xf32>
    %48 = tpu.matmul %47, %46, %cst_19 {dimension_numbers = #tpu.dot_dimension_numbers<[1], [0], [0], [1], [0, 0, 1, 1], [], []>} : vector<8x32xbf16>, vector<32x96xbf16>, vector<8x96xf32> -> vector<8x96xf32>
    %c0_20 = arith.constant 0 : index
    %c0_21 = arith.constant 0 : index
    %49 = vector.load %arg7[%c0_20, %c0_21] : memref<1x96xf32, #tpu.memory_space<vmem>>, vector<1x96xf32>
    %50 = vector.broadcast %49 : vector<1x96xf32> to vector<8x96xf32>
    %51 = arith.addf %48, %50 : vector<8x96xf32>
    %52 = vector.shape_cast %51 : vector<8x96xf32> to vector<1x8x96xf32>
    %53 = vector.extract_strided_slice %52 {offsets = [0, 0, 0], sizes = [1, 8, 32], strides = [1, 1, 1]} : vector<1x8x96xf32> to vector<1x8x32xf32>
    %54 = vector.extract_strided_slice %52 {offsets = [0, 0, 32], sizes = [1, 8, 32], strides = [1, 1, 1]} : vector<1x8x96xf32> to vector<1x8x32xf32>
    %55 = vector.extract_strided_slice %52 {offsets = [0, 0, 64], sizes = [1, 8, 32], strides = [1, 1, 1]} : vector<1x8x96xf32> to vector<1x8x32xf32>
    %56 = arith.truncf %53 : vector<1x8x32xf32> to vector<1x8x32xbf16>
    %57 = arith.truncf %54 : vector<1x8x32xf32> to vector<1x8x32xbf16>
    %58 = arith.truncf %55 : vector<1x8x32xf32> to vector<1x8x32xbf16>
    %c0_i32 = arith.constant 0 : i32
    %59 = vector.broadcast %c0_i32 : i32 to vector<1x8x8xi32>
    %60 = arith.cmpi eq, %22, %59 : vector<1x8x8xi32>
    %61 = vector.extract_strided_slice %56 {offsets = [0, 0, 0], sizes = [1, 8, 8], strides = [1, 1, 1]} : vector<1x8x32xbf16> to vector<1x8x8xbf16>
    %62 = vector.extract_strided_slice %57 {offsets = [0, 0, 0], sizes = [1, 8, 8], strides = [1, 1, 1]} : vector<1x8x32xbf16> to vector<1x8x8xbf16>
    "tpu.trace_start"() <{level = 10 : i32, message = "bqd,bkd->bqk"}> : () -> ()
    %cst_22 = arith.constant dense<0.000000e+00> : vector<1x8x8xf32>
    %63 = tpu.matmul %61, %62, %cst_22 {dimension_numbers = #tpu.dot_dimension_numbers<[2], [2], [1], [1], [0, 0, 0, 1, 1, 1], [0], [0]>} : vector<1x8x8xbf16>, vector<1x8x8xbf16>, vector<1x8x8xf32> -> vector<1x8x8xf32>
    "tpu.trace_stop"() : () -> ()
    %cst_23 = arith.constant 0.353553385 : f32
    %64 = vector.broadcast %cst_23 : f32 to vector<1x8x8xf32>
    %65 = arith.mulf %63, %64 : vector<1x8x8xf32>
    %cst_24 = arith.constant -1.000000e+04 : f32
    %66 = vector.broadcast %cst_24 : f32 to vector<1x8x8xf32>
    %67 = arith.select %60, %66, %65 : vector<1x8x8xi1>, vector<1x8x8xf32>
    %cst_25 = arith.constant dense<0xFF800000> : vector<1x8xf32>
    %68 = vector.multi_reduction <maximumf>, %67, %cst_25 [2] : vector<1x8x8xf32> to vector<1x8xf32>
    %69 = vector.shape_cast %68 : vector<1x8xf32> to vector<1x8x1xf32>
    %70 = vector.broadcast %69 : vector<1x8x1xf32> to vector<1x8x8xf32>
    %71 = arith.subf %67, %70 : vector<1x8x8xf32>
    %72 = math.exp %71 : vector<1x8x8xf32>
    %cst_26 = arith.constant dense<0.000000e+00> : vector<1x8xf32>
    %73 = vector.multi_reduction <add>, %72, %cst_26 [2] : vector<1x8x8xf32> to vector<1x8xf32>
    %74 = vector.shape_cast %73 : vector<1x8xf32> to vector<1x8x1xf32>
    %75 = tpu.reciprocal %74 {approx = true} : vector<1x8x1xf32> -> vector<1x8x1xf32>
    %76 = vector.broadcast %75 : vector<1x8x1xf32> to vector<1x8x8xf32>
    %77 = arith.mulf %72, %76 : vector<1x8x8xf32>
    %78 = arith.truncf %77 : vector<1x8x8xf32> to vector<1x8x8xbf16>
    %79 = vector.extract_strided_slice %58 {offsets = [0, 0, 0], sizes = [1, 8, 8], strides = [1, 1, 1]} : vector<1x8x32xbf16> to vector<1x8x8xbf16>
    "tpu.trace_start"() <{level = 10 : i32, message = "bqk,bkd->bqd"}> : () -> ()
    %cst_27 = arith.constant dense<0.000000e+00> : vector<1x8x8xf32>
    %80 = tpu.matmul %78, %79, %cst_27 {dimension_numbers = #tpu.dot_dimension_numbers<[2], [1], [1], [2], [0, 0, 0, 1, 1, 2], [0], [0]>} : vector<1x8x8xbf16>, vector<1x8x8xbf16>, vector<1x8x8xf32> -> vector<1x8x8xf32>
    "tpu.trace_stop"() : () -> ()
    %81 = vector.extract_strided_slice %56 {offsets = [0, 0, 8], sizes = [1, 8, 8], strides = [1, 1, 1]} : vector<1x8x32xbf16> to vector<1x8x8xbf16>
    %82 = vector.extract_strided_slice %57 {offsets = [0, 0, 8], sizes = [1, 8, 8], strides = [1, 1, 1]} : vector<1x8x32xbf16> to vector<1x8x8xbf16>
    "tpu.trace_start"() <{level = 10 : i32, message = "bqd,bkd->bqk"}> : () -> ()
    %cst_28 = arith.constant dense<0.000000e+00> : vector<1x8x8xf32>
    %83 = tpu.matmul %81, %82, %cst_28 {dimension_numbers = #tpu.dot_dimension_numbers<[2], [2], [1], [1], [0, 0, 0, 1, 1, 1], [0], [0]>} : vector<1x8x8xbf16>, vector<1x8x8xbf16>, vector<1x8x8xf32> -> vector<1x8x8xf32>
    "tpu.trace_stop"() : () -> ()
    %cst_29 = arith.constant 0.353553385 : f32
    %84 = vector.broadcast %cst_29 : f32 to vector<1x8x8xf32>
    %85 = arith.mulf %83, %84 : vector<1x8x8xf32>
    %cst_30 = arith.constant -1.000000e+04 : f32
    %86 = vector.broadcast %cst_30 : f32 to vector<1x8x8xf32>
    %87 = arith.select %60, %86, %85 : vector<1x8x8xi1>, vector<1x8x8xf32>
    %cst_31 = arith.constant dense<0xFF800000> : vector<1x8xf32>
    %88 = vector.multi_reduction <maximumf>, %87, %cst_31 [2] : vector<1x8x8xf32> to vector<1x8xf32>
    %89 = vector.shape_cast %88 : vector<1x8xf32> to vector<1x8x1xf32>
    %90 = vector.broadcast %89 : vector<1x8x1xf32> to vector<1x8x8xf32>
    %91 = arith.subf %87, %90 : vector<1x8x8xf32>
    %92 = math.exp %91 : vector<1x8x8xf32>
    %cst_32 = arith.constant dense<0.000000e+00> : vector<1x8xf32>
    %93 = vector.multi_reduction <add>, %92, %cst_32 [2] : vector<1x8x8xf32> to vector<1x8xf32>
    %94 = vector.shape_cast %93 : vector<1x8xf32> to vector<1x8x1xf32>
    %95 = tpu.reciprocal %94 {approx = true} : vector<1x8x1xf32> -> vector<1x8x1xf32>
    %96 = vector.broadcast %95 : vector<1x8x1xf32> to vector<1x8x8xf32>
    %97 = arith.mulf %92, %96 : vector<1x8x8xf32>
    %98 = arith.truncf %97 : vector<1x8x8xf32> to vector<1x8x8xbf16>
    %99 = vector.extract_strided_slice %58 {offsets = [0, 0, 8], sizes = [1, 8, 8], strides = [1, 1, 1]} : vector<1x8x32xbf16> to vector<1x8x8xbf16>
    "tpu.trace_start"() <{level = 10 : i32, message = "bqk,bkd->bqd"}> : () -> ()
    %cst_33 = arith.constant dense<0.000000e+00> : vector<1x8x8xf32>
    %100 = tpu.matmul %98, %99, %cst_33 {dimension_numbers = #tpu.dot_dimension_numbers<[2], [1], [1], [2], [0, 0, 0, 1, 1, 2], [0], [0]>} : vector<1x8x8xbf16>, vector<1x8x8xbf16>, vector<1x8x8xf32> -> vector<1x8x8xf32>
    "tpu.trace_stop"() : () -> ()
    %101 = vector.extract_strided_slice %56 {offsets = [0, 0, 16], sizes = [1, 8, 8], strides = [1, 1, 1]} : vector<1x8x32xbf16> to vector<1x8x8xbf16>
    %102 = vector.extract_strided_slice %57 {offsets = [0, 0, 16], sizes = [1, 8, 8], strides = [1, 1, 1]} : vector<1x8x32xbf16> to vector<1x8x8xbf16>
    "tpu.trace_start"() <{level = 10 : i32, message = "bqd,bkd->bqk"}> : () -> ()
    %cst_34 = arith.constant dense<0.000000e+00> : vector<1x8x8xf32>
    %103 = tpu.matmul %101, %102, %cst_34 {dimension_numbers = #tpu.dot_dimension_numbers<[2], [2], [1], [1], [0, 0, 0, 1, 1, 1], [0], [0]>} : vector<1x8x8xbf16>, vector<1x8x8xbf16>, vector<1x8x8xf32> -> vector<1x8x8xf32>
    "tpu.trace_stop"() : () -> ()
    %cst_35 = arith.constant 0.353553385 : f32
    %104 = vector.broadcast %cst_35 : f32 to vector<1x8x8xf32>
    %105 = arith.mulf %103, %104 : vector<1x8x8xf32>
    %cst_36 = arith.constant -1.000000e+04 : f32
    %106 = vector.broadcast %cst_36 : f32 to vector<1x8x8xf32>
    %107 = arith.select %60, %106, %105 : vector<1x8x8xi1>, vector<1x8x8xf32>
    %cst_37 = arith.constant dense<0xFF800000> : vector<1x8xf32>
    %108 = vector.multi_reduction <maximumf>, %107, %cst_37 [2] : vector<1x8x8xf32> to vector<1x8xf32>
    %109 = vector.shape_cast %108 : vector<1x8xf32> to vector<1x8x1xf32>
    %110 = vector.broadcast %109 : vector<1x8x1xf32> to vector<1x8x8xf32>
    %111 = arith.subf %107, %110 : vector<1x8x8xf32>
    %112 = math.exp %111 : vector<1x8x8xf32>
    %cst_38 = arith.constant dense<0.000000e+00> : vector<1x8xf32>
    %113 = vector.multi_reduction <add>, %112, %cst_38 [2] : vector<1x8x8xf32> to vector<1x8xf32>
    %114 = vector.shape_cast %113 : vector<1x8xf32> to vector<1x8x1xf32>
    %115 = tpu.reciprocal %114 {approx = true} : vector<1x8x1xf32> -> vector<1x8x1xf32>
    %116 = vector.broadcast %115 : vector<1x8x1xf32> to vector<1x8x8xf32>
    %117 = arith.mulf %112, %116 : vector<1x8x8xf32>
    %118 = arith.truncf %117 : vector<1x8x8xf32> to vector<1x8x8xbf16>
    %119 = vector.extract_strided_slice %58 {offsets = [0, 0, 16], sizes = [1, 8, 8], strides = [1, 1, 1]} : vector<1x8x32xbf16> to vector<1x8x8xbf16>
    "tpu.trace_start"() <{level = 10 : i32, message = "bqk,bkd->bqd"}> : () -> ()
    %cst_39 = arith.constant dense<0.000000e+00> : vector<1x8x8xf32>
    %120 = tpu.matmul %118, %119, %cst_39 {dimension_numbers = #tpu.dot_dimension_numbers<[2], [1], [1], [2], [0, 0, 0, 1, 1, 2], [0], [0]>} : vector<1x8x8xbf16>, vector<1x8x8xbf16>, vector<1x8x8xf32> -> vector<1x8x8xf32>
    "tpu.trace_stop"() : () -> ()
    %121 = vector.extract_strided_slice %56 {offsets = [0, 0, 24], sizes = [1, 8, 8], strides = [1, 1, 1]} : vector<1x8x32xbf16> to vector<1x8x8xbf16>
    %122 = vector.extract_strided_slice %57 {offsets = [0, 0, 24], sizes = [1, 8, 8], strides = [1, 1, 1]} : vector<1x8x32xbf16> to vector<1x8x8xbf16>
    "tpu.trace_start"() <{level = 10 : i32, message = "bqd,bkd->bqk"}> : () -> ()
    %cst_40 = arith.constant dense<0.000000e+00> : vector<1x8x8xf32>
    %123 = tpu.matmul %121, %122, %cst_40 {dimension_numbers = #tpu.dot_dimension_numbers<[2], [2], [1], [1], [0, 0, 0, 1, 1, 1], [0], [0]>} : vector<1x8x8xbf16>, vector<1x8x8xbf16>, vector<1x8x8xf32> -> vector<1x8x8xf32>
    "tpu.trace_stop"() : () -> ()
    %cst_41 = arith.constant 0.353553385 : f32
    %124 = vector.broadcast %cst_41 : f32 to vector<1x8x8xf32>
    %125 = arith.mulf %123, %124 : vector<1x8x8xf32>
    %cst_42 = arith.constant -1.000000e+04 : f32
    %126 = vector.broadcast %cst_42 : f32 to vector<1x8x8xf32>
    %127 = arith.select %60, %126, %125 : vector<1x8x8xi1>, vector<1x8x8xf32>
    %cst_43 = arith.constant dense<0xFF800000> : vector<1x8xf32>
    %128 = vector.multi_reduction <maximumf>, %127, %cst_43 [2] : vector<1x8x8xf32> to vector<1x8xf32>
    %129 = vector.shape_cast %128 : vector<1x8xf32> to vector<1x8x1xf32>
    %130 = vector.broadcast %129 : vector<1x8x1xf32> to vector<1x8x8xf32>
    %131 = arith.subf %127, %130 : vector<1x8x8xf32>
    %132 = math.exp %131 : vector<1x8x8xf32>
    %cst_44 = arith.constant dense<0.000000e+00> : vector<1x8xf32>
    %133 = vector.multi_reduction <add>, %132, %cst_44 [2] : vector<1x8x8xf32> to vector<1x8xf32>
    %134 = vector.shape_cast %133 : vector<1x8xf32> to vector<1x8x1xf32>
    %135 = tpu.reciprocal %134 {approx = true} : vector<1x8x1xf32> -> vector<1x8x1xf32>
    %136 = vector.broadcast %135 : vector<1x8x1xf32> to vector<1x8x8xf32>
    %137 = arith.mulf %132, %136 : vector<1x8x8xf32>
    %138 = arith.truncf %137 : vector<1x8x8xf32> to vector<1x8x8xbf16>
    %139 = vector.extract_strided_slice %58 {offsets = [0, 0, 24], sizes = [1, 8, 8], strides = [1, 1, 1]} : vector<1x8x32xbf16> to vector<1x8x8xbf16>
    "tpu.trace_start"() <{level = 10 : i32, message = "bqk,bkd->bqd"}> : () -> ()
    %cst_45 = arith.constant dense<0.000000e+00> : vector<1x8x8xf32>
    %140 = tpu.matmul %138, %139, %cst_45 {dimension_numbers = #tpu.dot_dimension_numbers<[2], [1], [1], [2], [0, 0, 0, 1, 1, 2], [0], [0]>} : vector<1x8x8xbf16>, vector<1x8x8xbf16>, vector<1x8x8xf32> -> vector<1x8x8xf32>
    "tpu.trace_stop"() : () -> ()
    %141 = tpu.concatenate %80, %100, %120, %140 in 2 : vector<1x8x8xf32>, vector<1x8x8xf32>, vector<1x8x8xf32>, vector<1x8x8xf32> -> vector<1x8x32xf32>
    %142 = arith.truncf %141 : vector<1x8x32xf32> to vector<1x8x32xbf16>
    %143 = vector.shape_cast %142 : vector<1x8x32xbf16> to vector<8x32xbf16>
    %c0_46 = arith.constant 0 : index
    %c0_47 = arith.constant 0 : index
    %144 = vector.load %arg8[%c0_46, %c0_47] : memref<32x32xbf16, #tpu.memory_space<vmem>>, vector<32x32xbf16>
    %cst_48 = arith.constant dense<0.000000e+00> : vector<8x32xf32>
    %145 = tpu.matmul %143, %144, %cst_48 {dimension_numbers = #tpu.dot_dimension_numbers<[1], [0], [0], [1], [0, 0, 1, 1], [], []>} : vector<8x32xbf16>, vector<32x32xbf16>, vector<8x32xf32> -> vector<8x32xf32>
    %146 = vector.broadcast %8 : vector<1x32xf32> to vector<8x32xf32>
    %147 = arith.addf %145, %146 : vector<8x32xf32>
    %148 = vector.shape_cast %147 : vector<8x32xf32> to vector<1x8x32xf32>
    %149 = arith.addf %1, %148 : vector<1x8x32xf32>
    %150 = vector.shape_cast %149 : vector<1x8x32xf32> to vector<8x32xf32>
    %cst_49 = arith.constant dense<0.000000e+00> : vector<8xf32>
    %151 = vector.multi_reduction <add>, %150, %cst_49 [1] : vector<8x32xf32> to vector<8xf32>
    %152 = vector.shape_cast %151 : vector<8xf32> to vector<8x1xf32>
    %cst_50 = arith.constant 3.200000e+01 : f32
    %153 = vector.broadcast %cst_50 : f32 to vector<8x1xf32>
    %154 = arith.divf %152, %153 : vector<8x1xf32>
    %155 = vector.broadcast %154 : vector<8x1xf32> to vector<8x32xf32>
    %156 = arith.subf %150, %155 : vector<8x32xf32>
    %157 = arith.mulf %156, %156 : vector<8x32xf32>
    %cst_51 = arith.constant dense<0.000000e+00> : vector<8xf32>
    %158 = vector.multi_reduction <add>, %157, %cst_51 [1] : vector<8x32xf32> to vector<8xf32>
    %159 = vector.shape_cast %158 : vector<8xf32> to vector<8x1xf32>
    %cst_52 = arith.constant 3.200000e+01 : f32
    %160 = vector.broadcast %cst_52 : f32 to vector<8x1xf32>
    %161 = arith.divf %159, %160 : vector<8x1xf32>
    %162 = vector.broadcast %154 : vector<8x1xf32> to vector<8x32xf32>
    %163 = arith.subf %150, %162 : vector<8x32xf32>
    %cst_53 = arith.constant 9.99999974E-6 : f32
    %164 = vector.broadcast %cst_53 : f32 to vector<8x1xf32>
    %165 = arith.addf %161, %164 : vector<8x1xf32>
    %166 = math.rsqrt %165 : vector<8x1xf32>
    %167 = vector.broadcast %166 : vector<8x1xf32> to vector<8x32xf32>
    %168 = arith.mulf %163, %167 : vector<8x32xf32>
    %169 = vector.broadcast %9 : vector<1x32xf32> to vector<8x32xf32>
    %170 = arith.mulf %168, %169 : vector<8x32xf32>
    %171 = vector.broadcast %10 : vector<1x32xf32> to vector<8x32xf32>
    %172 = arith.addf %170, %171 : vector<8x32xf32>
    %c0_54 = arith.constant 0 : index
    %c0_55 = arith.constant 0 : index
    %173 = vector.load %arg9[%c0_54, %c0_55] : memref<32x32xbf16, #tpu.memory_space<vmem>>, vector<32x32xbf16>
    %174 = arith.truncf %172 : vector<8x32xf32> to vector<8x32xbf16>
    %cst_56 = arith.constant dense<0.000000e+00> : vector<8x32xf32>
    %175 = tpu.matmul %174, %173, %cst_56 {dimension_numbers = #tpu.dot_dimension_numbers<[1], [0], [0], [1], [0, 0, 1, 1], [], []>} : vector<8x32xbf16>, vector<32x32xbf16>, vector<8x32xf32> -> vector<8x32xf32>
    %176 = vector.broadcast %11 : vector<1x32xf32> to vector<8x32xf32>
    %177 = arith.addf %175, %176 : vector<8x32xf32>
    %178 = vector.shape_cast %177 : vector<8x32xf32> to vector<1x8x32xf32>
    %179 = vector.shape_cast %2 : vector<1x8x32xbf16> to vector<8x32xbf16>
    %c0_57 = arith.constant 0 : index
    %c0_58 = arith.constant 0 : index
    %180 = vector.load %arg10[%c0_57, %c0_58] : memref<32x64xbf16, #tpu.memory_space<vmem>>, vector<32x64xbf16>
    %cst_59 = arith.constant dense<0.000000e+00> : vector<8x64xf32>
    %181 = tpu.matmul %179, %180, %cst_59 {dimension_numbers = #tpu.dot_dimension_numbers<[1], [0], [0], [1], [0, 0, 1, 1], [], []>} : vector<8x32xbf16>, vector<32x64xbf16>, vector<8x64xf32> -> vector<8x64xf32>
    %c0_60 = arith.constant 0 : index
    %c0_61 = arith.constant 0 : index
    %182 = vector.load %arg11[%c0_60, %c0_61] : memref<1x64xf32, #tpu.memory_space<vmem>>, vector<1x64xf32>
    %183 = vector.broadcast %182 : vector<1x64xf32> to vector<8x64xf32>
    %184 = arith.addf %181, %183 : vector<8x64xf32>
    %185 = vector.shape_cast %184 : vector<8x64xf32> to vector<1x8x64xf32>
    %186 = vector.extract_strided_slice %185 {offsets = [0, 0, 0], sizes = [1, 8, 32], strides = [1, 1, 1]} : vector<1x8x64xf32> to vector<1x8x32xf32>
    %187 = vector.extract_strided_slice %185 {offsets = [0, 0, 32], sizes = [1, 8, 32], strides = [1, 1, 1]} : vector<1x8x64xf32> to vector<1x8x32xf32>
    %188 = arith.truncf %178 : vector<1x8x32xf32> to vector<1x8x32xbf16>
    %189 = arith.truncf %186 : vector<1x8x32xf32> to vector<1x8x32xbf16>
    %190 = arith.truncf %187 : vector<1x8x32xf32> to vector<1x8x32xbf16>
    %c0_i32_62 = arith.constant 0 : i32
    %191 = vector.broadcast %c0_i32_62 : i32 to vector<1x1x8xi32>
    %192 = arith.cmpi eq, %4, %191 : vector<1x1x8xi32>
    %193 = vector.extract_strided_slice %188 {offsets = [0, 0, 0], sizes = [1, 8, 8], strides = [1, 1, 1]} : vector<1x8x32xbf16> to vector<1x8x8xbf16>
    %194 = vector.extract_strided_slice %189 {offsets = [0, 0, 0], sizes = [1, 8, 8], strides = [1, 1, 1]} : vector<1x8x32xbf16> to vector<1x8x8xbf16>
    "tpu.trace_start"() <{level = 10 : i32, message = "bqd,bkd->bqk"}> : () -> ()
    %cst_63 = arith.constant dense<0.000000e+00> : vector<1x8x8xf32>
    %195 = tpu.matmul %193, %194, %cst_63 {dimension_numbers = #tpu.dot_dimension_numbers<[2], [2], [1], [1], [0, 0, 0, 1, 1, 1], [0], [0]>} : vector<1x8x8xbf16>, vector<1x8x8xbf16>, vector<1x8x8xf32> -> vector<1x8x8xf32>
    "tpu.trace_stop"() : () -> ()
    %cst_64 = arith.constant 0.353553385 : f32
    %196 = vector.broadcast %cst_64 : f32 to vector<1x8x8xf32>
    %197 = arith.mulf %195, %196 : vector<1x8x8xf32>
    %cst_65 = arith.constant -1.000000e+04 : f32
    %198 = vector.shape_cast %192 : vector<1x1x8xi1> to vector<1x1x8xi1>
    %199 = vector.broadcast %198 : vector<1x1x8xi1> to vector<1x8x8xi1>
    %200 = vector.broadcast %cst_65 : f32 to vector<1x8x8xf32>
    %201 = arith.select %199, %200, %197 : vector<1x8x8xi1>, vector<1x8x8xf32>
    %cst_66 = arith.constant dense<0xFF800000> : vector<1x8xf32>
    %202 = vector.multi_reduction <maximumf>, %201, %cst_66 [2] : vector<1x8x8xf32> to vector<1x8xf32>
    %203 = vector.shape_cast %202 : vector<1x8xf32> to vector<1x8x1xf32>
    %204 = vector.broadcast %203 : vector<1x8x1xf32> to vector<1x8x8xf32>
    %205 = arith.subf %201, %204 : vector<1x8x8xf32>
    %206 = math.exp %205 : vector<1x8x8xf32>
    %cst_67 = arith.constant dense<0.000000e+00> : vector<1x8xf32>
    %207 = vector.multi_reduction <add>, %206, %cst_67 [2] : vector<1x8x8xf32> to vector<1x8xf32>
    %208 = vector.shape_cast %207 : vector<1x8xf32> to vector<1x8x1xf32>
    %209 = tpu.reciprocal %208 {approx = true} : vector<1x8x1xf32> -> vector<1x8x1xf32>
    %210 = vector.broadcast %209 : vector<1x8x1xf32> to vector<1x8x8xf32>
    %211 = arith.mulf %206, %210 : vector<1x8x8xf32>
    %212 = arith.truncf %211 : vector<1x8x8xf32> to vector<1x8x8xbf16>
    %213 = vector.extract_strided_slice %190 {offsets = [0, 0, 0], sizes = [1, 8, 8], strides = [1, 1, 1]} : vector<1x8x32xbf16> to vector<1x8x8xbf16>
    "tpu.trace_start"() <{level = 10 : i32, message = "bqk,bkd->bqd"}> : () -> ()
    %cst_68 = arith.constant dense<0.000000e+00> : vector<1x8x8xf32>
    %214 = tpu.matmul %212, %213, %cst_68 {dimension_numbers = #tpu.dot_dimension_numbers<[2], [1], [1], [2], [0, 0, 0, 1, 1, 2], [0], [0]>} : vector<1x8x8xbf16>, vector<1x8x8xbf16>, vector<1x8x8xf32> -> vector<1x8x8xf32>
    "tpu.trace_stop"() : () -> ()
    %215 = vector.extract_strided_slice %188 {offsets = [0, 0, 8], sizes = [1, 8, 8], strides = [1, 1, 1]} : vector<1x8x32xbf16> to vector<1x8x8xbf16>
    %216 = vector.extract_strided_slice %189 {offsets = [0, 0, 8], sizes = [1, 8, 8], strides = [1, 1, 1]} : vector<1x8x32xbf16> to vector<1x8x8xbf16>
    "tpu.trace_start"() <{level = 10 : i32, message = "bqd,bkd->bqk"}> : () -> ()
    %cst_69 = arith.constant dense<0.000000e+00> : vector<1x8x8xf32>
    %217 = tpu.matmul %215, %216, %cst_69 {dimension_numbers = #tpu.dot_dimension_numbers<[2], [2], [1], [1], [0, 0, 0, 1, 1, 1], [0], [0]>} : vector<1x8x8xbf16>, vector<1x8x8xbf16>, vector<1x8x8xf32> -> vector<1x8x8xf32>
    "tpu.trace_stop"() : () -> ()
    %cst_70 = arith.constant 0.353553385 : f32
    %218 = vector.broadcast %cst_70 : f32 to vector<1x8x8xf32>
    %219 = arith.mulf %217, %218 : vector<1x8x8xf32>
    %cst_71 = arith.constant -1.000000e+04 : f32
    %220 = vector.shape_cast %192 : vector<1x1x8xi1> to vector<1x1x8xi1>
    %221 = vector.broadcast %220 : vector<1x1x8xi1> to vector<1x8x8xi1>
    %222 = vector.broadcast %cst_71 : f32 to vector<1x8x8xf32>
    %223 = arith.select %221, %222, %219 : vector<1x8x8xi1>, vector<1x8x8xf32>
    %cst_72 = arith.constant dense<0xFF800000> : vector<1x8xf32>
    %224 = vector.multi_reduction <maximumf>, %223, %cst_72 [2] : vector<1x8x8xf32> to vector<1x8xf32>
    %225 = vector.shape_cast %224 : vector<1x8xf32> to vector<1x8x1xf32>
    %226 = vector.broadcast %225 : vector<1x8x1xf32> to vector<1x8x8xf32>
    %227 = arith.subf %223, %226 : vector<1x8x8xf32>
    %228 = math.exp %227 : vector<1x8x8xf32>
    %cst_73 = arith.constant dense<0.000000e+00> : vector<1x8xf32>
    %229 = vector.multi_reduction <add>, %228, %cst_73 [2] : vector<1x8x8xf32> to vector<1x8xf32>
    %230 = vector.shape_cast %229 : vector<1x8xf32> to vector<1x8x1xf32>
    %231 = tpu.reciprocal %230 {approx = true} : vector<1x8x1xf32> -> vector<1x8x1xf32>
    %232 = vector.broadcast %231 : vector<1x8x1xf32> to vector<1x8x8xf32>
    %233 = arith.mulf %228, %232 : vector<1x8x8xf32>
    %234 = arith.truncf %233 : vector<1x8x8xf32> to vector<1x8x8xbf16>
    %235 = vector.extract_strided_slice %190 {offsets = [0, 0, 8], sizes = [1, 8, 8], strides = [1, 1, 1]} : vector<1x8x32xbf16> to vector<1x8x8xbf16>
    "tpu.trace_start"() <{level = 10 : i32, message = "bqk,bkd->bqd"}> : () -> ()
    %cst_74 = arith.constant dense<0.000000e+00> : vector<1x8x8xf32>
    %236 = tpu.matmul %234, %235, %cst_74 {dimension_numbers = #tpu.dot_dimension_numbers<[2], [1], [1], [2], [0, 0, 0, 1, 1, 2], [0], [0]>} : vector<1x8x8xbf16>, vector<1x8x8xbf16>, vector<1x8x8xf32> -> vector<1x8x8xf32>
    "tpu.trace_stop"() : () -> ()
    %237 = vector.extract_strided_slice %188 {offsets = [0, 0, 16], sizes = [1, 8, 8], strides = [1, 1, 1]} : vector<1x8x32xbf16> to vector<1x8x8xbf16>
    %238 = vector.extract_strided_slice %189 {offsets = [0, 0, 16], sizes = [1, 8, 8], strides = [1, 1, 1]} : vector<1x8x32xbf16> to vector<1x8x8xbf16>
    "tpu.trace_start"() <{level = 10 : i32, message = "bqd,bkd->bqk"}> : () -> ()
    %cst_75 = arith.constant dense<0.000000e+00> : vector<1x8x8xf32>
    %239 = tpu.matmul %237, %238, %cst_75 {dimension_numbers = #tpu.dot_dimension_numbers<[2], [2], [1], [1], [0, 0, 0, 1, 1, 1], [0], [0]>} : vector<1x8x8xbf16>, vector<1x8x8xbf16>, vector<1x8x8xf32> -> vector<1x8x8xf32>
    "tpu.trace_stop"() : () -> ()
    %cst_76 = arith.constant 0.353553385 : f32
    %240 = vector.broadcast %cst_76 : f32 to vector<1x8x8xf32>
    %241 = arith.mulf %239, %240 : vector<1x8x8xf32>
    %cst_77 = arith.constant -1.000000e+04 : f32
    %242 = vector.shape_cast %192 : vector<1x1x8xi1> to vector<1x1x8xi1>
    %243 = vector.broadcast %242 : vector<1x1x8xi1> to vector<1x8x8xi1>
    %244 = vector.broadcast %cst_77 : f32 to vector<1x8x8xf32>
    %245 = arith.select %243, %244, %241 : vector<1x8x8xi1>, vector<1x8x8xf32>
    %cst_78 = arith.constant dense<0xFF800000> : vector<1x8xf32>
    %246 = vector.multi_reduction <maximumf>, %245, %cst_78 [2] : vector<1x8x8xf32> to vector<1x8xf32>
    %247 = vector.shape_cast %246 : vector<1x8xf32> to vector<1x8x1xf32>
    %248 = vector.broadcast %247 : vector<1x8x1xf32> to vector<1x8x8xf32>
    %249 = arith.subf %245, %248 : vector<1x8x8xf32>
    %250 = math.exp %249 : vector<1x8x8xf32>
    %cst_79 = arith.constant dense<0.000000e+00> : vector<1x8xf32>
    %251 = vector.multi_reduction <add>, %250, %cst_79 [2] : vector<1x8x8xf32> to vector<1x8xf32>
    %252 = vector.shape_cast %251 : vector<1x8xf32> to vector<1x8x1xf32>
    %253 = tpu.reciprocal %252 {approx = true} : vector<1x8x1xf32> -> vector<1x8x1xf32>
    %254 = vector.broadcast %253 : vector<1x8x1xf32> to vector<1x8x8xf32>
    %255 = arith.mulf %250, %254 : vector<1x8x8xf32>
    %256 = arith.truncf %255 : vector<1x8x8xf32> to vector<1x8x8xbf16>
    %257 = vector.extract_strided_slice %190 {offsets = [0, 0, 16], sizes = [1, 8, 8], strides = [1, 1, 1]} : vector<1x8x32xbf16> to vector<1x8x8xbf16>
    "tpu.trace_start"() <{level = 10 : i32, message = "bqk,bkd->bqd"}> : () -> ()
    %cst_80 = arith.constant dense<0.000000e+00> : vector<1x8x8xf32>
    %258 = tpu.matmul %256, %257, %cst_80 {dimension_numbers = #tpu.dot_dimension_numbers<[2], [1], [1], [2], [0, 0, 0, 1, 1, 2], [0], [0]>} : vector<1x8x8xbf16>, vector<1x8x8xbf16>, vector<1x8x8xf32> -> vector<1x8x8xf32>
    "tpu.trace_stop"() : () -> ()
    %259 = vector.extract_strided_slice %188 {offsets = [0, 0, 24], sizes = [1, 8, 8], strides = [1, 1, 1]} : vector<1x8x32xbf16> to vector<1x8x8xbf16>
    %260 = vector.extract_strided_slice %189 {offsets = [0, 0, 24], sizes = [1, 8, 8], strides = [1, 1, 1]} : vector<1x8x32xbf16> to vector<1x8x8xbf16>
    "tpu.trace_start"() <{level = 10 : i32, message = "bqd,bkd->bqk"}> : () -> ()
    %cst_81 = arith.constant dense<0.000000e+00> : vector<1x8x8xf32>
    %261 = tpu.matmul %259, %260, %cst_81 {dimension_numbers = #tpu.dot_dimension_numbers<[2], [2], [1], [1], [0, 0, 0, 1, 1, 1], [0], [0]>} : vector<1x8x8xbf16>, vector<1x8x8xbf16>, vector<1x8x8xf32> -> vector<1x8x8xf32>
    "tpu.trace_stop"() : () -> ()
    %cst_82 = arith.constant 0.353553385 : f32
    %262 = vector.broadcast %cst_82 : f32 to vector<1x8x8xf32>
    %263 = arith.mulf %261, %262 : vector<1x8x8xf32>
    %cst_83 = arith.constant -1.000000e+04 : f32
    %264 = vector.shape_cast %192 : vector<1x1x8xi1> to vector<1x1x8xi1>
    %265 = vector.broadcast %264 : vector<1x1x8xi1> to vector<1x8x8xi1>
    %266 = vector.broadcast %cst_83 : f32 to vector<1x8x8xf32>
    %267 = arith.select %265, %266, %263 : vector<1x8x8xi1>, vector<1x8x8xf32>
    %cst_84 = arith.constant dense<0xFF800000> : vector<1x8xf32>
    %268 = vector.multi_reduction <maximumf>, %267, %cst_84 [2] : vector<1x8x8xf32> to vector<1x8xf32>
    %269 = vector.shape_cast %268 : vector<1x8xf32> to vector<1x8x1xf32>
    %270 = vector.broadcast %269 : vector<1x8x1xf32> to vector<1x8x8xf32>
    %271 = arith.subf %267, %270 : vector<1x8x8xf32>
    %272 = math.exp %271 : vector<1x8x8xf32>
    %cst_85 = arith.constant dense<0.000000e+00> : vector<1x8xf32>
    %273 = vector.multi_reduction <add>, %272, %cst_85 [2] : vector<1x8x8xf32> to vector<1x8xf32>
    %274 = vector.shape_cast %273 : vector<1x8xf32> to vector<1x8x1xf32>
    %275 = tpu.reciprocal %274 {approx = true} : vector<1x8x1xf32> -> vector<1x8x1xf32>
    %276 = vector.broadcast %275 : vector<1x8x1xf32> to vector<1x8x8xf32>
    %277 = arith.mulf %272, %276 : vector<1x8x8xf32>
    %278 = arith.truncf %277 : vector<1x8x8xf32> to vector<1x8x8xbf16>
    %279 = vector.extract_strided_slice %190 {offsets = [0, 0, 24], sizes = [1, 8, 8], strides = [1, 1, 1]} : vector<1x8x32xbf16> to vector<1x8x8xbf16>
    "tpu.trace_start"() <{level = 10 : i32, message = "bqk,bkd->bqd"}> : () -> ()
    %cst_86 = arith.constant dense<0.000000e+00> : vector<1x8x8xf32>
    %280 = tpu.matmul %278, %279, %cst_86 {dimension_numbers = #tpu.dot_dimension_numbers<[2], [1], [1], [2], [0, 0, 0, 1, 1, 2], [0], [0]>} : vector<1x8x8xbf16>, vector<1x8x8xbf16>, vector<1x8x8xf32> -> vector<1x8x8xf32>
    "tpu.trace_stop"() : () -> ()
    %281 = tpu.concatenate %214, %236, %258, %280 in 2 : vector<1x8x8xf32>, vector<1x8x8xf32>, vector<1x8x8xf32>, vector<1x8x8xf32> -> vector<1x8x32xf32>
    %282 = arith.truncf %281 : vector<1x8x32xf32> to vector<1x8x32xbf16>
    %283 = vector.shape_cast %282 : vector<1x8x32xbf16> to vector<8x32xbf16>
    %c0_87 = arith.constant 0 : index
    %c0_88 = arith.constant 0 : index
    %284 = vector.load %arg12[%c0_87, %c0_88] : memref<32x32xbf16, #tpu.memory_space<vmem>>, vector<32x32xbf16>
    %cst_89 = arith.constant dense<0.000000e+00> : vector<8x32xf32>
    %285 = tpu.matmul %283, %284, %cst_89 {dimension_numbers = #tpu.dot_dimension_numbers<[1], [0], [0], [1], [0, 0, 1, 1], [], []>} : vector<8x32xbf16>, vector<32x32xbf16>, vector<8x32xf32> -> vector<8x32xf32>
    %286 = vector.broadcast %12 : vector<1x32xf32> to vector<8x32xf32>
    %287 = arith.addf %285, %286 : vector<8x32xf32>
    %288 = vector.shape_cast %287 : vector<8x32xf32> to vector<1x8x32xf32>
    %289 = arith.addf %149, %288 : vector<1x8x32xf32>
    %290 = vector.shape_cast %289 : vector<1x8x32xf32> to vector<8x32xf32>
    %cst_90 = arith.constant dense<0.000000e+00> : vector<8xf32>
    %291 = vector.multi_reduction <add>, %290, %cst_90 [1] : vector<8x32xf32> to vector<8xf32>
    %292 = vector.shape_cast %291 : vector<8xf32> to vector<8x1xf32>
    %cst_91 = arith.constant 3.200000e+01 : f32
    %293 = vector.broadcast %cst_91 : f32 to vector<8x1xf32>
    %294 = arith.divf %292, %293 : vector<8x1xf32>
    %295 = vector.broadcast %294 : vector<8x1xf32> to vector<8x32xf32>
    %296 = arith.subf %290, %295 : vector<8x32xf32>
    %297 = arith.mulf %296, %296 : vector<8x32xf32>
    %cst_92 = arith.constant dense<0.000000e+00> : vector<8xf32>
    %298 = vector.multi_reduction <add>, %297, %cst_92 [1] : vector<8x32xf32> to vector<8xf32>
    %299 = vector.shape_cast %298 : vector<8xf32> to vector<8x1xf32>
    %cst_93 = arith.constant 3.200000e+01 : f32
    %300 = vector.broadcast %cst_93 : f32 to vector<8x1xf32>
    %301 = arith.divf %299, %300 : vector<8x1xf32>
    %302 = vector.broadcast %294 : vector<8x1xf32> to vector<8x32xf32>
    %303 = arith.subf %290, %302 : vector<8x32xf32>
    %cst_94 = arith.constant 9.99999974E-6 : f32
    %304 = vector.broadcast %cst_94 : f32 to vector<8x1xf32>
    %305 = arith.addf %301, %304 : vector<8x1xf32>
    %306 = math.rsqrt %305 : vector<8x1xf32>
    %307 = vector.broadcast %306 : vector<8x1xf32> to vector<8x32xf32>
    %308 = arith.mulf %303, %307 : vector<8x32xf32>
    %309 = vector.broadcast %13 : vector<1x32xf32> to vector<8x32xf32>
    %310 = arith.mulf %308, %309 : vector<8x32xf32>
    %311 = vector.broadcast %14 : vector<1x32xf32> to vector<8x32xf32>
    %312 = arith.addf %310, %311 : vector<8x32xf32>
    %c0_95 = arith.constant 0 : index
    %c0_96 = arith.constant 0 : index
    %313 = vector.load %arg13[%c0_95, %c0_96] : memref<32x64xbf16, #tpu.memory_space<vmem>>, vector<32x64xbf16>
    %314 = arith.truncf %312 : vector<8x32xf32> to vector<8x32xbf16>
    %cst_97 = arith.constant dense<0.000000e+00> : vector<8x64xf32>
    %315 = tpu.matmul %314, %313, %cst_97 {dimension_numbers = #tpu.dot_dimension_numbers<[1], [0], [0], [1], [0, 0, 1, 1], [], []>} : vector<8x32xbf16>, vector<32x64xbf16>, vector<8x64xf32> -> vector<8x64xf32>
    %c0_98 = arith.constant 0 : index
    %c0_99 = arith.constant 0 : index
    %316 = vector.load %arg14[%c0_98, %c0_99] : memref<1x64xf32, #tpu.memory_space<vmem>>, vector<1x64xf32>
    %317 = vector.broadcast %316 : vector<1x64xf32> to vector<8x64xf32>
    %318 = arith.addf %315, %317 : vector<8x64xf32>
    %cst_100 = arith.constant 5.000000e-01 : f32
    %319 = vector.broadcast %cst_100 : f32 to vector<8x64xf32>
    %320 = arith.mulf %319, %318 : vector<8x64xf32>
    %cst_101 = arith.constant 0.707106769 : f32
    %321 = vector.broadcast %cst_101 : f32 to vector<8x64xf32>
    %322 = arith.mulf %318, %321 : vector<8x64xf32>
    %cst_102 = arith.constant 0.000000e+00 : f32
    %323 = vector.broadcast %cst_102 : f32 to vector<8x64xf32>
    %324 = arith.cmpf oge, %322, %323 : vector<8x64xf32>
    %cst_103 = arith.constant 1.000000e+00 : f32
    %cst_104 = arith.constant -1.000000e+00 : f32
    %325 = vector.broadcast %cst_103 : f32 to vector<8x64xf32>
    %326 = vector.broadcast %cst_104 : f32 to vector<8x64xf32>
    %327 = arith.select %324, %325, %326 : vector<8x64xi1>, vector<8x64xf32>
    %cst_105 = arith.constant 0.000000e+00 : f32
    %328 = vector.broadcast %cst_105 : f32 to vector<8x64xf32>
    %329 = arith.cmpf oge, %322, %328 : vector<8x64xf32>
    %cst_106 = arith.constant 0.000000e+00 : f32
    %330 = vector.broadcast %cst_106 : f32 to vector<8x64xf32>
    %331 = arith.subf %330, %322 : vector<8x64xf32>
    %332 = arith.select %329, %322, %331 : vector<8x64xi1>, vector<8x64xf32>
    %cst_107 = arith.constant 0.327591091 : f32
    %333 = vector.broadcast %cst_107 : f32 to vector<8x64xf32>
    %334 = arith.mulf %333, %332 : vector<8x64xf32>
    %cst_108 = arith.constant 1.000000e+00 : f32
    %335 = vector.broadcast %cst_108 : f32 to vector<8x64xf32>
    %336 = arith.addf %335, %334 : vector<8x64xf32>
    %cst_109 = arith.constant 1.000000e+00 : f32
    %337 = vector.broadcast %cst_109 : f32 to vector<8x64xf32>
    %338 = arith.divf %337, %336 : vector<8x64xf32>
    %cst_110 = arith.constant 1.06140542 : f32
    %339 = vector.broadcast %cst_110 : f32 to vector<8x64xf32>
    %340 = arith.mulf %339, %338 : vector<8x64xf32>
    %cst_111 = arith.constant -1.45315206 : f32
    %341 = vector.broadcast %cst_111 : f32 to vector<8x64xf32>
    %342 = arith.addf %340, %341 : vector<8x64xf32>
    %343 = arith.mulf %342, %338 : vector<8x64xf32>
    %cst_112 = arith.constant 1.42141378 : f32
    %344 = vector.broadcast %cst_112 : f32 to vector<8x64xf32>
    %345 = arith.addf %343, %344 : vector<8x64xf32>
    %346 = arith.mulf %345, %338 : vector<8x64xf32>
    %cst_113 = arith.constant -0.284496725 : f32
    %347 = vector.broadcast %cst_113 : f32 to vector<8x64xf32>
    %348 = arith.addf %346, %347 : vector<8x64xf32>
    %349 = arith.mulf %348, %338 : vector<8x64xf32>
    %cst_114 = arith.constant 0.254829586 : f32
    %350 = vector.broadcast %cst_114 : f32 to vector<8x64xf32>
    %351 = arith.addf %349, %350 : vector<8x64xf32>
    %352 = arith.mulf %351, %338 : vector<8x64xf32>
    %cst_115 = arith.constant 0.000000e+00 : f32
    %353 = vector.broadcast %cst_115 : f32 to vector<8x64xf32>
    %354 = arith.subf %353, %332 : vector<8x64xf32>
    %355 = arith.mulf %354, %332 : vector<8x64xf32>
    %356 = math.exp %355 : vector<8x64xf32>
    %357 = arith.mulf %352, %356 : vector<8x64xf32>
    %cst_116 = arith.constant 1.000000e+00 : f32
    %358 = vector.broadcast %cst_116 : f32 to vector<8x64xf32>
    %359 = arith.subf %358, %357 : vector<8x64xf32>
    %360 = arith.mulf %327, %359 : vector<8x64xf32>
    %cst_117 = arith.constant 1.000000e+00 : f32
    %361 = vector.broadcast %cst_117 : f32 to vector<8x64xf32>
    %362 = arith.addf %361, %360 : vector<8x64xf32>
    %363 = arith.mulf %320, %362 : vector<8x64xf32>
    %c0_118 = arith.constant 0 : index
    %c0_119 = arith.constant 0 : index
    %364 = vector.load %arg15[%c0_118, %c0_119] : memref<64x32xbf16, #tpu.memory_space<vmem>>, vector<64x32xbf16>
    %365 = arith.truncf %363 : vector<8x64xf32> to vector<8x64xbf16>
    %cst_120 = arith.constant dense<0.000000e+00> : vector<8x32xf32>
    %366 = tpu.matmul %365, %364, %cst_120 {dimension_numbers = #tpu.dot_dimension_numbers<[1], [0], [0], [1], [0, 0, 1, 1], [], []>} : vector<8x64xbf16>, vector<64x32xbf16>, vector<8x32xf32> -> vector<8x32xf32>
    %367 = arith.addf %290, %366 : vector<8x32xf32>
    %368 = vector.broadcast %15 : vector<1x32xf32> to vector<8x32xf32>
    %369 = arith.addf %367, %368 : vector<8x32xf32>
    %370 = vector.shape_cast %369 : vector<8x32xf32> to vector<1x8x32xf32>
    %371 = arith.truncf %370 : vector<1x8x32xf32> to vector<1x8x32xbf16>
    %c0_121 = arith.constant 0 : index
    %c0_122 = arith.constant 0 : index
    %c0_123 = arith.constant 0 : index
    %372 = vector.load %arg16[%c0_121, %c0_122, %c0_123] : memref<1x8x32xbf16, #tpu.memory_space<vmem>>, vector<1x8x32xbf16>
    tpu.vector_store %arg16[%c0_121, %c0_122, %c0_123], %371 {strides = array<i32>} : memref<1x8x32xbf16, #tpu.memory_space<vmem>>, vector<1x8x32xbf16>,
    return
  }
  func.func @transform_0(%arg0: i32) -> (i32, i32, i32) {
    %c0_i32 = arith.constant 0 : i32
    %c0_i32_0 = arith.constant 0 : i32
    %c0_i32_1 = arith.constant 0 : i32
    return %arg0, %c0_i32, %c0_i32_0 : i32, i32, i32
  }
  func.func @transform_1(%arg0: i32) -> (i32, i32, i32) {
    %c0_i32 = arith.constant 0 : i32
    %c0_i32_0 = arith.constant 0 : i32
    %c0_i32_1 = arith.constant 0 : i32
    return %arg0, %c0_i32, %c0_i32_0 : i32, i32, i32
  }
  func.func @transform_2(%arg0: i32) -> (i32, i32, i32) {
    %c0_i32 = arith.constant 0 : i32
    %c0_i32_0 = arith.constant 0 : i32
    %c0_i32_1 = arith.constant 0 : i32
    return %arg0, %c0_i32, %c0_i32_0 : i32, i32, i32
  }
  func.func @transform_3(%arg0: i32) -> (i32, i32, i32) {
    %c0_i32 = arith.constant 0 : i32
    %c0_i32_0 = arith.constant 0 : i32
    %c0_i32_1 = arith.constant 0 : i32
    return %arg0, %c0_i32, %c0_i32_0 : i32, i32, i32
  }
  func.func @transform_4(%arg0: i32) -> (i32, i32) {
    %c0_i32 = arith.constant 0 : i32
    %c0_i32_0 = arith.constant 0 : i32
    %c0_i32_1 = arith.constant 0 : i32
    return %c0_i32, %c0_i32_0 : i32, i32
  }
  func.func @transform_5(%arg0: i32) -> (i32, i32) {
    %c0_i32 = arith.constant 0 : i32
    %c0_i32_0 = arith.constant 0 : i32
    %c0_i32_1 = arith.constant 0 : i32
    return %c0_i32, %c0_i32_0 : i32, i32
  }
  func.func @transform_6(%arg0: i32) -> (i32, i32) {
    %c0_i32 = arith.constant 0 : i32
    %c0_i32_0 = arith.constant 0 : i32
    %c0_i32_1 = arith.constant 0 : i32
    return %c0_i32, %c0_i32_0 : i32, i32
  }
  func.func @transform_7(%arg0: i32) -> (i32, i32) {
    %c0_i32 = arith.constant 0 : i32
    %c0_i32_0 = arith.constant 0 : i32
    %c0_i32_1 = arith.constant 0 : i32
    return %c0_i32, %c0_i32_0 : i32, i32
  }
  func.func @transform_8(%arg0: i32) -> (i32, i32) {
    %c0_i32 = arith.constant 0 : i32
    %c0_i32_0 = arith.constant 0 : i32
    %c0_i32_1 = arith.constant 0 : i32
    return %c0_i32, %c0_i32_0 : i32, i32
  }
  func.func @transform_9(%arg0: i32) -> (i32, i32) {
    %c0_i32 = arith.constant 0 : i32
    %c0_i32_0 = arith.constant 0 : i32
    %c0_i32_1 = arith.constant 0 : i32
    return %c0_i32, %c0_i32_0 : i32, i32
  }
  func.func @transform_10(%arg0: i32) -> (i32, i32) {
    %c0_i32 = arith.constant 0 : i32
    %c0_i32_0 = arith.constant 0 : i32
    %c0_i32_1 = arith.constant 0 : i32
    return %c0_i32, %c0_i32_0 : i32, i32
  }
  func.func @transform_11(%arg0: i32) -> (i32, i32) {
    %c0_i32 = arith.constant 0 : i32
    %c0_i32_0 = arith.constant 0 : i32
    %c0_i32_1 = arith.constant 0 : i32
    return %c0_i32, %c0_i32_0 : i32, i32
  }
  func.func @transform_12(%arg0: i32) -> (i32, i32) {
    %c0_i32 = arith.constant 0 : i32
    %c0_i32_0 = arith.constant 0 : i32
    %c0_i32_1 = arith.constant 0 : i32
    return %c0_i32, %c0_i32_0 : i32, i32
  }
  func.func @transform_13(%arg0: i32) -> (i32, i32) {
    %c0_i32 = arith.constant 0 : i32
    %c0_i32_0 = arith.constant 0 : i32
    %c0_i32_1 = arith.constant 0 : i32
    return %c0_i32, %c0_i32_0 : i32, i32
  }
  func.func @transform_14(%arg0: i32) -> (i32, i32) {
    %c0_i32 = arith.constant 0 : i32
    %c0_i32_0 = arith.constant 0 : i32
    %c0_i32_1 = arith.constant 0 : i32
    return %c0_i32, %c0_i32_0 : i32, i32
  }
  func.func @transform_15(%arg0: i32) -> (i32, i32, i32) {
    %c0_i32 = arith.constant 0 : i32
    %c0_i32_0 = arith.constant 0 : i32
    %c0_i32_1 = arith.constant 0 : i32
    return %arg0, %c0_i32, %c0_i32_0 : i32, i32, i32
  }
}

module attributes {stable_mosaic.version = 11 : i64} {
  func.func @_logits_kernel(%arg0: i32, %arg1: i32, %arg2: memref<16x32xbf16, #tpu.memory_space<vmem>>, %arg3: memref<64x32xbf16, #tpu.memory_space<vmem>>, %arg4: memref<16x64xf32, #tpu.memory_space<vmem>>) attributes {dimension_semantics = [#tpu.dimension_semantics<parallel>, #tpu.dimension_semantics<parallel>], iteration_bounds = array<i64: 1, 1>, scalar_prefetch = 0 : i64, scratch_operands = 0 : i64, tpu.core_type = #tpu.core_type<tc>, window_params = [{transform_indices = @transform_0, window_bounds = array<i64: 16, 32>}, {transform_indices = @transform_1, window_bounds = array<i64: 64, 32>}, {transform_indices = @transform_2, window_bounds = array<i64: 16, 64>}]} {
    %c0 = arith.constant 0 : index
    %c0_0 = arith.constant 0 : index
    %0 = vector.load %arg2[%c0, %c0_0] : memref<16x32xbf16, #tpu.memory_space<vmem>>, vector<16x32xbf16>
    %c0_1 = arith.constant 0 : index
    %c0_2 = arith.constant 0 : index
    %1 = vector.load %arg3[%c0_1, %c0_2] : memref<64x32xbf16, #tpu.memory_space<vmem>>, vector<64x32xbf16>
    %cst = arith.constant dense<0.000000e+00> : vector<16x64xf32>
    %2 = tpu.matmul %0, %1, %cst {dimension_numbers = #tpu.dot_dimension_numbers<[1], [1], [0], [0], [0, 0, 1, 0], [], []>} : vector<16x32xbf16>, vector<64x32xbf16>, vector<16x64xf32> -> vector<16x64xf32>
    %c0_3 = arith.constant 0 : index
    %c0_4 = arith.constant 0 : index
    %3 = vector.load %arg4[%c0_3, %c0_4] : memref<16x64xf32, #tpu.memory_space<vmem>>, vector<16x64xf32>
    tpu.vector_store %arg4[%c0_3, %c0_4], %2 {strides = array<i32>} : memref<16x64xf32, #tpu.memory_space<vmem>>, vector<16x64xf32>,
    return
  }
  func.func @transform_0(%arg0: i32, %arg1: i32) -> (i32, i32) {
    %c0_i32 = arith.constant 0 : i32
    %c0_i32_0 = arith.constant 0 : i32
    return %arg0, %c0_i32 : i32, i32
  }
  func.func @transform_1(%arg0: i32, %arg1: i32) -> (i32, i32) {
    %c0_i32 = arith.constant 0 : i32
    %c0_i32_0 = arith.constant 0 : i32
    return %arg1, %c0_i32 : i32, i32
  }
  func.func @transform_2(%arg0: i32, %arg1: i32) -> (i32, i32) {
    %c0_i32 = arith.constant 0 : i32
    return %arg0, %arg1 : i32, i32
  }
}

module attributes {stable_mosaic.version = 11 : i64} {
  func.func @_encoder_layer_kernel(%arg0: i32, %arg1: memref<1x8x32xbf16, #tpu.memory_space<vmem>>, %arg2: memref<1x1x8xi32, #tpu.memory_space<vmem>>, %arg3: memref<6x32xf32, #tpu.memory_space<vmem>>, %arg4: memref<32x96xbf16, #tpu.memory_space<vmem>>, %arg5: memref<1x96xf32, #tpu.memory_space<vmem>>, %arg6: memref<32x32xbf16, #tpu.memory_space<vmem>>, %arg7: memref<32x64xbf16, #tpu.memory_space<vmem>>, %arg8: memref<1x64xf32, #tpu.memory_space<vmem>>, %arg9: memref<64x32xbf16, #tpu.memory_space<vmem>>, %arg10: memref<1x8x32xbf16, #tpu.memory_space<vmem>>) attributes {dimension_semantics = [#tpu.dimension_semantics<parallel>], iteration_bounds = array<i64: 2>, scalar_prefetch = 0 : i64, scratch_operands = 0 : i64, tpu.core_type = #tpu.core_type<tc>, window_params = [{transform_indices = @transform_0, window_bounds = array<i64: 1, 8, 32>}, {transform_indices = @transform_1, window_bounds = array<i64: 1, 1, 8>}, {pipeline_mode = #tpu.pipeline_mode<synchronous>, transform_indices = @transform_2, window_bounds = array<i64: 6, 32>}, {pipeline_mode = #tpu.pipeline_mode<synchronous>, transform_indices = @transform_3, window_bounds = array<i64: 32, 96>}, {pipeline_mode = #tpu.pipeline_mode<synchronous>, transform_indices = @transform_4, window_bounds = array<i64: 1, 96>}, {pipeline_mode = #tpu.pipeline_mode<synchronous>, transform_indices = @transform_5, window_bounds = array<i64: 32, 32>}, {pipeline_mode = #tpu.pipeline_mode<synchronous>, transform_indices = @transform_6, window_bounds = array<i64: 32, 64>}, {pipeline_mode = #tpu.pipeline_mode<synchronous>, transform_indices = @transform_7, window_bounds = array<i64: 1, 64>}, {pipeline_mode = #tpu.pipeline_mode<synchronous>, transform_indices = @transform_8, window_bounds = array<i64: 64, 32>}, {transform_indices = @transform_9, window_bounds = array<i64: 1, 8, 32>}]} {
    %c0 = arith.constant 0 : index
    %c0_0 = arith.constant 0 : index
    %c0_1 = arith.constant 0 : index
    %0 = vector.load %arg1[%c0, %c0_0, %c0_1] : memref<1x8x32xbf16, #tpu.memory_space<vmem>>, vector<1x8x32xbf16>
    %1 = arith.extf %0 : vector<1x8x32xbf16> to vector<1x8x32xf32>
    %c0_2 = arith.constant 0 : index
    %c0_3 = arith.constant 0 : index
    %c0_4 = arith.constant 0 : index
    %2 = vector.load %arg2[%c0_2, %c0_3, %c0_4] : memref<1x1x8xi32, #tpu.memory_space<vmem>>, vector<1x1x8xi32>
    %c0_5 = arith.constant 0 : index
    %c0_6 = arith.constant 0 : index
    %3 = vector.load %arg3[%c0_5, %c0_6] : memref<6x32xf32, #tpu.memory_space<vmem>>, vector<6x32xf32>
    %4 = vector.extract_strided_slice %3 {offsets = [0, 0], sizes = [1, 32], strides = [1, 1]} : vector<6x32xf32> to vector<1x32xf32>
    %5 = vector.extract_strided_slice %3 {offsets = [1, 0], sizes = [1, 32], strides = [1, 1]} : vector<6x32xf32> to vector<1x32xf32>
    %6 = vector.extract_strided_slice %3 {offsets = [2, 0], sizes = [1, 32], strides = [1, 1]} : vector<6x32xf32> to vector<1x32xf32>
    %7 = vector.extract_strided_slice %3 {offsets = [3, 0], sizes = [1, 32], strides = [1, 1]} : vector<6x32xf32> to vector<1x32xf32>
    %8 = vector.extract_strided_slice %3 {offsets = [4, 0], sizes = [1, 32], strides = [1, 1]} : vector<6x32xf32> to vector<1x32xf32>
    %9 = vector.extract_strided_slice %3 {offsets = [5, 0], sizes = [1, 32], strides = [1, 1]} : vector<6x32xf32> to vector<1x32xf32>
    %10 = vector.shape_cast %1 : vector<1x8x32xf32> to vector<8x32xf32>
    %cst = arith.constant dense<0.000000e+00> : vector<8xf32>
    %11 = vector.multi_reduction <add>, %10, %cst [1] : vector<8x32xf32> to vector<8xf32>
    %12 = vector.shape_cast %11 : vector<8xf32> to vector<8x1xf32>
    %cst_7 = arith.constant 3.200000e+01 : f32
    %13 = vector.broadcast %cst_7 : f32 to vector<8x1xf32>
    %14 = arith.divf %12, %13 : vector<8x1xf32>
    %15 = vector.broadcast %14 : vector<8x1xf32> to vector<8x32xf32>
    %16 = arith.subf %10, %15 : vector<8x32xf32>
    %17 = arith.mulf %16, %16 : vector<8x32xf32>
    %cst_8 = arith.constant dense<0.000000e+00> : vector<8xf32>
    %18 = vector.multi_reduction <add>, %17, %cst_8 [1] : vector<8x32xf32> to vector<8xf32>
    %19 = vector.shape_cast %18 : vector<8xf32> to vector<8x1xf32>
    %cst_9 = arith.constant 3.200000e+01 : f32
    %20 = vector.broadcast %cst_9 : f32 to vector<8x1xf32>
    %21 = arith.divf %19, %20 : vector<8x1xf32>
    %22 = vector.broadcast %14 : vector<8x1xf32> to vector<8x32xf32>
    %23 = arith.subf %10, %22 : vector<8x32xf32>
    %cst_10 = arith.constant 9.99999974E-6 : f32
    %24 = vector.broadcast %cst_10 : f32 to vector<8x1xf32>
    %25 = arith.addf %21, %24 : vector<8x1xf32>
    %26 = math.rsqrt %25 : vector<8x1xf32>
    %27 = vector.broadcast %26 : vector<8x1xf32> to vector<8x32xf32>
    %28 = arith.mulf %23, %27 : vector<8x32xf32>
    %29 = vector.broadcast %4 : vector<1x32xf32> to vector<8x32xf32>
    %30 = arith.mulf %28, %29 : vector<8x32xf32>
    %31 = vector.broadcast %5 : vector<1x32xf32> to vector<8x32xf32>
    %32 = arith.addf %30, %31 : vector<8x32xf32>
    %c0_11 = arith.constant 0 : index
    %c0_12 = arith.constant 0 : index
    %33 = vector.load %arg4[%c0_11, %c0_12] : memref<32x96xbf16, #tpu.memory_space<vmem>>, vector<32x96xbf16>
    %34 = arith.truncf %32 : vector<8x32xf32> to vector<8x32xbf16>
    %cst_13 = arith.constant dense<0.000000e+00> : vector<8x96xf32>
    %35 = tpu.matmul %34, %33, %cst_13 {dimension_numbers = #tpu.dot_dimension_numbers<[1], [0], [0], [1], [0, 0, 1, 1], [], []>} : vector<8x32xbf16>, vector<32x96xbf16>, vector<8x96xf32> -> vector<8x96xf32>
    %c0_14 = arith.constant 0 : index
    %c0_15 = arith.constant 0 : index
    %36 = vector.load %arg5[%c0_14, %c0_15] : memref<1x96xf32, #tpu.memory_space<vmem>>, vector<1x96xf32>
    %37 = vector.broadcast %36 : vector<1x96xf32> to vector<8x96xf32>
    %38 = arith.addf %35, %37 : vector<8x96xf32>
    %39 = vector.shape_cast %38 : vector<8x96xf32> to vector<1x8x96xf32>
    %40 = vector.extract_strided_slice %39 {offsets = [0, 0, 0], sizes = [1, 8, 32], strides = [1, 1, 1]} : vector<1x8x96xf32> to vector<1x8x32xf32>
    %41 = vector.extract_strided_slice %39 {offsets = [0, 0, 32], sizes = [1, 8, 32], strides = [1, 1, 1]} : vector<1x8x96xf32> to vector<1x8x32xf32>
    %42 = vector.extract_strided_slice %39 {offsets = [0, 0, 64], sizes = [1, 8, 32], strides = [1, 1, 1]} : vector<1x8x96xf32> to vector<1x8x32xf32>
    %43 = arith.truncf %40 : vector<1x8x32xf32> to vector<1x8x32xbf16>
    %44 = arith.truncf %41 : vector<1x8x32xf32> to vector<1x8x32xbf16>
    %45 = arith.truncf %42 : vector<1x8x32xf32> to vector<1x8x32xbf16>
    %c0_i32 = arith.constant 0 : i32
    %46 = vector.broadcast %c0_i32 : i32 to vector<1x1x8xi32>
    %47 = arith.cmpi eq, %2, %46 : vector<1x1x8xi32>
    %48 = vector.extract_strided_slice %43 {offsets = [0, 0, 0], sizes = [1, 8, 8], strides = [1, 1, 1]} : vector<1x8x32xbf16> to vector<1x8x8xbf16>
    %49 = vector.extract_strided_slice %44 {offsets = [0, 0, 0], sizes = [1, 8, 8], strides = [1, 1, 1]} : vector<1x8x32xbf16> to vector<1x8x8xbf16>
    "tpu.trace_start"() <{level = 10 : i32, message = "bqd,bkd->bqk"}> : () -> ()
    %cst_16 = arith.constant dense<0.000000e+00> : vector<1x8x8xf32>
    %50 = tpu.matmul %48, %49, %cst_16 {dimension_numbers = #tpu.dot_dimension_numbers<[2], [2], [1], [1], [0, 0, 0, 1, 1, 1], [0], [0]>} : vector<1x8x8xbf16>, vector<1x8x8xbf16>, vector<1x8x8xf32> -> vector<1x8x8xf32>
    "tpu.trace_stop"() : () -> ()
    %cst_17 = arith.constant 0.353553385 : f32
    %51 = vector.broadcast %cst_17 : f32 to vector<1x8x8xf32>
    %52 = arith.mulf %50, %51 : vector<1x8x8xf32>
    %cst_18 = arith.constant -1.000000e+04 : f32
    %53 = vector.shape_cast %47 : vector<1x1x8xi1> to vector<1x1x8xi1>
    %54 = vector.broadcast %53 : vector<1x1x8xi1> to vector<1x8x8xi1>
    %55 = vector.broadcast %cst_18 : f32 to vector<1x8x8xf32>
    %56 = arith.select %54, %55, %52 : vector<1x8x8xi1>, vector<1x8x8xf32>
    %cst_19 = arith.constant dense<0xFF800000> : vector<1x8xf32>
    %57 = vector.multi_reduction <maximumf>, %56, %cst_19 [2] : vector<1x8x8xf32> to vector<1x8xf32>
    %58 = vector.shape_cast %57 : vector<1x8xf32> to vector<1x8x1xf32>
    %59 = vector.broadcast %58 : vector<1x8x1xf32> to vector<1x8x8xf32>
    %60 = arith.subf %56, %59 : vector<1x8x8xf32>
    %61 = math.exp %60 : vector<1x8x8xf32>
    %cst_20 = arith.constant dense<0.000000e+00> : vector<1x8xf32>
    %62 = vector.multi_reduction <add>, %61, %cst_20 [2] : vector<1x8x8xf32> to vector<1x8xf32>
    %63 = vector.shape_cast %62 : vector<1x8xf32> to vector<1x8x1xf32>
    %64 = tpu.reciprocal %63 {approx = true} : vector<1x8x1xf32> -> vector<1x8x1xf32>
    %65 = vector.broadcast %64 : vector<1x8x1xf32> to vector<1x8x8xf32>
    %66 = arith.mulf %61, %65 : vector<1x8x8xf32>
    %67 = arith.truncf %66 : vector<1x8x8xf32> to vector<1x8x8xbf16>
    %68 = vector.extract_strided_slice %45 {offsets = [0, 0, 0], sizes = [1, 8, 8], strides = [1, 1, 1]} : vector<1x8x32xbf16> to vector<1x8x8xbf16>
    "tpu.trace_start"() <{level = 10 : i32, message = "bqk,bkd->bqd"}> : () -> ()
    %cst_21 = arith.constant dense<0.000000e+00> : vector<1x8x8xf32>
    %69 = tpu.matmul %67, %68, %cst_21 {dimension_numbers = #tpu.dot_dimension_numbers<[2], [1], [1], [2], [0, 0, 0, 1, 1, 2], [0], [0]>} : vector<1x8x8xbf16>, vector<1x8x8xbf16>, vector<1x8x8xf32> -> vector<1x8x8xf32>
    "tpu.trace_stop"() : () -> ()
    %70 = vector.extract_strided_slice %43 {offsets = [0, 0, 8], sizes = [1, 8, 8], strides = [1, 1, 1]} : vector<1x8x32xbf16> to vector<1x8x8xbf16>
    %71 = vector.extract_strided_slice %44 {offsets = [0, 0, 8], sizes = [1, 8, 8], strides = [1, 1, 1]} : vector<1x8x32xbf16> to vector<1x8x8xbf16>
    "tpu.trace_start"() <{level = 10 : i32, message = "bqd,bkd->bqk"}> : () -> ()
    %cst_22 = arith.constant dense<0.000000e+00> : vector<1x8x8xf32>
    %72 = tpu.matmul %70, %71, %cst_22 {dimension_numbers = #tpu.dot_dimension_numbers<[2], [2], [1], [1], [0, 0, 0, 1, 1, 1], [0], [0]>} : vector<1x8x8xbf16>, vector<1x8x8xbf16>, vector<1x8x8xf32> -> vector<1x8x8xf32>
    "tpu.trace_stop"() : () -> ()
    %cst_23 = arith.constant 0.353553385 : f32
    %73 = vector.broadcast %cst_23 : f32 to vector<1x8x8xf32>
    %74 = arith.mulf %72, %73 : vector<1x8x8xf32>
    %cst_24 = arith.constant -1.000000e+04 : f32
    %75 = vector.shape_cast %47 : vector<1x1x8xi1> to vector<1x1x8xi1>
    %76 = vector.broadcast %75 : vector<1x1x8xi1> to vector<1x8x8xi1>
    %77 = vector.broadcast %cst_24 : f32 to vector<1x8x8xf32>
    %78 = arith.select %76, %77, %74 : vector<1x8x8xi1>, vector<1x8x8xf32>
    %cst_25 = arith.constant dense<0xFF800000> : vector<1x8xf32>
    %79 = vector.multi_reduction <maximumf>, %78, %cst_25 [2] : vector<1x8x8xf32> to vector<1x8xf32>
    %80 = vector.shape_cast %79 : vector<1x8xf32> to vector<1x8x1xf32>
    %81 = vector.broadcast %80 : vector<1x8x1xf32> to vector<1x8x8xf32>
    %82 = arith.subf %78, %81 : vector<1x8x8xf32>
    %83 = math.exp %82 : vector<1x8x8xf32>
    %cst_26 = arith.constant dense<0.000000e+00> : vector<1x8xf32>
    %84 = vector.multi_reduction <add>, %83, %cst_26 [2] : vector<1x8x8xf32> to vector<1x8xf32>
    %85 = vector.shape_cast %84 : vector<1x8xf32> to vector<1x8x1xf32>
    %86 = tpu.reciprocal %85 {approx = true} : vector<1x8x1xf32> -> vector<1x8x1xf32>
    %87 = vector.broadcast %86 : vector<1x8x1xf32> to vector<1x8x8xf32>
    %88 = arith.mulf %83, %87 : vector<1x8x8xf32>
    %89 = arith.truncf %88 : vector<1x8x8xf32> to vector<1x8x8xbf16>
    %90 = vector.extract_strided_slice %45 {offsets = [0, 0, 8], sizes = [1, 8, 8], strides = [1, 1, 1]} : vector<1x8x32xbf16> to vector<1x8x8xbf16>
    "tpu.trace_start"() <{level = 10 : i32, message = "bqk,bkd->bqd"}> : () -> ()
    %cst_27 = arith.constant dense<0.000000e+00> : vector<1x8x8xf32>
    %91 = tpu.matmul %89, %90, %cst_27 {dimension_numbers = #tpu.dot_dimension_numbers<[2], [1], [1], [2], [0, 0, 0, 1, 1, 2], [0], [0]>} : vector<1x8x8xbf16>, vector<1x8x8xbf16>, vector<1x8x8xf32> -> vector<1x8x8xf32>
    "tpu.trace_stop"() : () -> ()
    %92 = vector.extract_strided_slice %43 {offsets = [0, 0, 16], sizes = [1, 8, 8], strides = [1, 1, 1]} : vector<1x8x32xbf16> to vector<1x8x8xbf16>
    %93 = vector.extract_strided_slice %44 {offsets = [0, 0, 16], sizes = [1, 8, 8], strides = [1, 1, 1]} : vector<1x8x32xbf16> to vector<1x8x8xbf16>
    "tpu.trace_start"() <{level = 10 : i32, message = "bqd,bkd->bqk"}> : () -> ()
    %cst_28 = arith.constant dense<0.000000e+00> : vector<1x8x8xf32>
    %94 = tpu.matmul %92, %93, %cst_28 {dimension_numbers = #tpu.dot_dimension_numbers<[2], [2], [1], [1], [0, 0, 0, 1, 1, 1], [0], [0]>} : vector<1x8x8xbf16>, vector<1x8x8xbf16>, vector<1x8x8xf32> -> vector<1x8x8xf32>
    "tpu.trace_stop"() : () -> ()
    %cst_29 = arith.constant 0.353553385 : f32
    %95 = vector.broadcast %cst_29 : f32 to vector<1x8x8xf32>
    %96 = arith.mulf %94, %95 : vector<1x8x8xf32>
    %cst_30 = arith.constant -1.000000e+04 : f32
    %97 = vector.shape_cast %47 : vector<1x1x8xi1> to vector<1x1x8xi1>
    %98 = vector.broadcast %97 : vector<1x1x8xi1> to vector<1x8x8xi1>
    %99 = vector.broadcast %cst_30 : f32 to vector<1x8x8xf32>
    %100 = arith.select %98, %99, %96 : vector<1x8x8xi1>, vector<1x8x8xf32>
    %cst_31 = arith.constant dense<0xFF800000> : vector<1x8xf32>
    %101 = vector.multi_reduction <maximumf>, %100, %cst_31 [2] : vector<1x8x8xf32> to vector<1x8xf32>
    %102 = vector.shape_cast %101 : vector<1x8xf32> to vector<1x8x1xf32>
    %103 = vector.broadcast %102 : vector<1x8x1xf32> to vector<1x8x8xf32>
    %104 = arith.subf %100, %103 : vector<1x8x8xf32>
    %105 = math.exp %104 : vector<1x8x8xf32>
    %cst_32 = arith.constant dense<0.000000e+00> : vector<1x8xf32>
    %106 = vector.multi_reduction <add>, %105, %cst_32 [2] : vector<1x8x8xf32> to vector<1x8xf32>
    %107 = vector.shape_cast %106 : vector<1x8xf32> to vector<1x8x1xf32>
    %108 = tpu.reciprocal %107 {approx = true} : vector<1x8x1xf32> -> vector<1x8x1xf32>
    %109 = vector.broadcast %108 : vector<1x8x1xf32> to vector<1x8x8xf32>
    %110 = arith.mulf %105, %109 : vector<1x8x8xf32>
    %111 = arith.truncf %110 : vector<1x8x8xf32> to vector<1x8x8xbf16>
    %112 = vector.extract_strided_slice %45 {offsets = [0, 0, 16], sizes = [1, 8, 8], strides = [1, 1, 1]} : vector<1x8x32xbf16> to vector<1x8x8xbf16>
    "tpu.trace_start"() <{level = 10 : i32, message = "bqk,bkd->bqd"}> : () -> ()
    %cst_33 = arith.constant dense<0.000000e+00> : vector<1x8x8xf32>
    %113 = tpu.matmul %111, %112, %cst_33 {dimension_numbers = #tpu.dot_dimension_numbers<[2], [1], [1], [2], [0, 0, 0, 1, 1, 2], [0], [0]>} : vector<1x8x8xbf16>, vector<1x8x8xbf16>, vector<1x8x8xf32> -> vector<1x8x8xf32>
    "tpu.trace_stop"() : () -> ()
    %114 = vector.extract_strided_slice %43 {offsets = [0, 0, 24], sizes = [1, 8, 8], strides = [1, 1, 1]} : vector<1x8x32xbf16> to vector<1x8x8xbf16>
    %115 = vector.extract_strided_slice %44 {offsets = [0, 0, 24], sizes = [1, 8, 8], strides = [1, 1, 1]} : vector<1x8x32xbf16> to vector<1x8x8xbf16>
    "tpu.trace_start"() <{level = 10 : i32, message = "bqd,bkd->bqk"}> : () -> ()
    %cst_34 = arith.constant dense<0.000000e+00> : vector<1x8x8xf32>
    %116 = tpu.matmul %114, %115, %cst_34 {dimension_numbers = #tpu.dot_dimension_numbers<[2], [2], [1], [1], [0, 0, 0, 1, 1, 1], [0], [0]>} : vector<1x8x8xbf16>, vector<1x8x8xbf16>, vector<1x8x8xf32> -> vector<1x8x8xf32>
    "tpu.trace_stop"() : () -> ()
    %cst_35 = arith.constant 0.353553385 : f32
    %117 = vector.broadcast %cst_35 : f32 to vector<1x8x8xf32>
    %118 = arith.mulf %116, %117 : vector<1x8x8xf32>
    %cst_36 = arith.constant -1.000000e+04 : f32
    %119 = vector.shape_cast %47 : vector<1x1x8xi1> to vector<1x1x8xi1>
    %120 = vector.broadcast %119 : vector<1x1x8xi1> to vector<1x8x8xi1>
    %121 = vector.broadcast %cst_36 : f32 to vector<1x8x8xf32>
    %122 = arith.select %120, %121, %118 : vector<1x8x8xi1>, vector<1x8x8xf32>
    %cst_37 = arith.constant dense<0xFF800000> : vector<1x8xf32>
    %123 = vector.multi_reduction <maximumf>, %122, %cst_37 [2] : vector<1x8x8xf32> to vector<1x8xf32>
    %124 = vector.shape_cast %123 : vector<1x8xf32> to vector<1x8x1xf32>
    %125 = vector.broadcast %124 : vector<1x8x1xf32> to vector<1x8x8xf32>
    %126 = arith.subf %122, %125 : vector<1x8x8xf32>
    %127 = math.exp %126 : vector<1x8x8xf32>
    %cst_38 = arith.constant dense<0.000000e+00> : vector<1x8xf32>
    %128 = vector.multi_reduction <add>, %127, %cst_38 [2] : vector<1x8x8xf32> to vector<1x8xf32>
    %129 = vector.shape_cast %128 : vector<1x8xf32> to vector<1x8x1xf32>
    %130 = tpu.reciprocal %129 {approx = true} : vector<1x8x1xf32> -> vector<1x8x1xf32>
    %131 = vector.broadcast %130 : vector<1x8x1xf32> to vector<1x8x8xf32>
    %132 = arith.mulf %127, %131 : vector<1x8x8xf32>
    %133 = arith.truncf %132 : vector<1x8x8xf32> to vector<1x8x8xbf16>
    %134 = vector.extract_strided_slice %45 {offsets = [0, 0, 24], sizes = [1, 8, 8], strides = [1, 1, 1]} : vector<1x8x32xbf16> to vector<1x8x8xbf16>
    "tpu.trace_start"() <{level = 10 : i32, message = "bqk,bkd->bqd"}> : () -> ()
    %cst_39 = arith.constant dense<0.000000e+00> : vector<1x8x8xf32>
    %135 = tpu.matmul %133, %134, %cst_39 {dimension_numbers = #tpu.dot_dimension_numbers<[2], [1], [1], [2], [0, 0, 0, 1, 1, 2], [0], [0]>} : vector<1x8x8xbf16>, vector<1x8x8xbf16>, vector<1x8x8xf32> -> vector<1x8x8xf32>
    "tpu.trace_stop"() : () -> ()
    %136 = tpu.concatenate %69, %91, %113, %135 in 2 : vector<1x8x8xf32>, vector<1x8x8xf32>, vector<1x8x8xf32>, vector<1x8x8xf32> -> vector<1x8x32xf32>
    %137 = arith.truncf %136 : vector<1x8x32xf32> to vector<1x8x32xbf16>
    %138 = vector.shape_cast %137 : vector<1x8x32xbf16> to vector<8x32xbf16>
    %c0_40 = arith.constant 0 : index
    %c0_41 = arith.constant 0 : index
    %139 = vector.load %arg6[%c0_40, %c0_41] : memref<32x32xbf16, #tpu.memory_space<vmem>>, vector<32x32xbf16>
    %cst_42 = arith.constant dense<0.000000e+00> : vector<8x32xf32>
    %140 = tpu.matmul %138, %139, %cst_42 {dimension_numbers = #tpu.dot_dimension_numbers<[1], [0], [0], [1], [0, 0, 1, 1], [], []>} : vector<8x32xbf16>, vector<32x32xbf16>, vector<8x32xf32> -> vector<8x32xf32>
    %141 = vector.broadcast %6 : vector<1x32xf32> to vector<8x32xf32>
    %142 = arith.addf %140, %141 : vector<8x32xf32>
    %143 = vector.shape_cast %142 : vector<8x32xf32> to vector<1x8x32xf32>
    %144 = arith.addf %1, %143 : vector<1x8x32xf32>
    %145 = vector.shape_cast %144 : vector<1x8x32xf32> to vector<8x32xf32>
    %cst_43 = arith.constant dense<0.000000e+00> : vector<8xf32>
    %146 = vector.multi_reduction <add>, %145, %cst_43 [1] : vector<8x32xf32> to vector<8xf32>
    %147 = vector.shape_cast %146 : vector<8xf32> to vector<8x1xf32>
    %cst_44 = arith.constant 3.200000e+01 : f32
    %148 = vector.broadcast %cst_44 : f32 to vector<8x1xf32>
    %149 = arith.divf %147, %148 : vector<8x1xf32>
    %150 = vector.broadcast %149 : vector<8x1xf32> to vector<8x32xf32>
    %151 = arith.subf %145, %150 : vector<8x32xf32>
    %152 = arith.mulf %151, %151 : vector<8x32xf32>
    %cst_45 = arith.constant dense<0.000000e+00> : vector<8xf32>
    %153 = vector.multi_reduction <add>, %152, %cst_45 [1] : vector<8x32xf32> to vector<8xf32>
    %154 = vector.shape_cast %153 : vector<8xf32> to vector<8x1xf32>
    %cst_46 = arith.constant 3.200000e+01 : f32
    %155 = vector.broadcast %cst_46 : f32 to vector<8x1xf32>
    %156 = arith.divf %154, %155 : vector<8x1xf32>
    %157 = vector.broadcast %149 : vector<8x1xf32> to vector<8x32xf32>
    %158 = arith.subf %145, %157 : vector<8x32xf32>
    %cst_47 = arith.constant 9.99999974E-6 : f32
    %159 = vector.broadcast %cst_47 : f32 to vector<8x1xf32>
    %160 = arith.addf %156, %159 : vector<8x1xf32>
    %161 = math.rsqrt %160 : vector<8x1xf32>
    %162 = vector.broadcast %161 : vector<8x1xf32> to vector<8x32xf32>
    %163 = arith.mulf %158, %162 : vector<8x32xf32>
    %164 = vector.broadcast %7 : vector<1x32xf32> to vector<8x32xf32>
    %165 = arith.mulf %163, %164 : vector<8x32xf32>
    %166 = vector.broadcast %8 : vector<1x32xf32> to vector<8x32xf32>
    %167 = arith.addf %165, %166 : vector<8x32xf32>
    %c0_48 = arith.constant 0 : index
    %c0_49 = arith.constant 0 : index
    %168 = vector.load %arg7[%c0_48, %c0_49] : memref<32x64xbf16, #tpu.memory_space<vmem>>, vector<32x64xbf16>
    %169 = arith.truncf %167 : vector<8x32xf32> to vector<8x32xbf16>
    %cst_50 = arith.constant dense<0.000000e+00> : vector<8x64xf32>
    %170 = tpu.matmul %169, %168, %cst_50 {dimension_numbers = #tpu.dot_dimension_numbers<[1], [0], [0], [1], [0, 0, 1, 1], [], []>} : vector<8x32xbf16>, vector<32x64xbf16>, vector<8x64xf32> -> vector<8x64xf32>
    %c0_51 = arith.constant 0 : index
    %c0_52 = arith.constant 0 : index
    %171 = vector.load %arg8[%c0_51, %c0_52] : memref<1x64xf32, #tpu.memory_space<vmem>>, vector<1x64xf32>
    %172 = vector.broadcast %171 : vector<1x64xf32> to vector<8x64xf32>
    %173 = arith.addf %170, %172 : vector<8x64xf32>
    %cst_53 = arith.constant 5.000000e-01 : f32
    %174 = vector.broadcast %cst_53 : f32 to vector<8x64xf32>
    %175 = arith.mulf %174, %173 : vector<8x64xf32>
    %cst_54 = arith.constant 0.707106769 : f32
    %176 = vector.broadcast %cst_54 : f32 to vector<8x64xf32>
    %177 = arith.mulf %173, %176 : vector<8x64xf32>
    %cst_55 = arith.constant 0.000000e+00 : f32
    %178 = vector.broadcast %cst_55 : f32 to vector<8x64xf32>
    %179 = arith.cmpf oge, %177, %178 : vector<8x64xf32>
    %cst_56 = arith.constant 1.000000e+00 : f32
    %cst_57 = arith.constant -1.000000e+00 : f32
    %180 = vector.broadcast %cst_56 : f32 to vector<8x64xf32>
    %181 = vector.broadcast %cst_57 : f32 to vector<8x64xf32>
    %182 = arith.select %179, %180, %181 : vector<8x64xi1>, vector<8x64xf32>
    %cst_58 = arith.constant 0.000000e+00 : f32
    %183 = vector.broadcast %cst_58 : f32 to vector<8x64xf32>
    %184 = arith.cmpf oge, %177, %183 : vector<8x64xf32>
    %cst_59 = arith.constant 0.000000e+00 : f32
    %185 = vector.broadcast %cst_59 : f32 to vector<8x64xf32>
    %186 = arith.subf %185, %177 : vector<8x64xf32>
    %187 = arith.select %184, %177, %186 : vector<8x64xi1>, vector<8x64xf32>
    %cst_60 = arith.constant 0.327591091 : f32
    %188 = vector.broadcast %cst_60 : f32 to vector<8x64xf32>
    %189 = arith.mulf %188, %187 : vector<8x64xf32>
    %cst_61 = arith.constant 1.000000e+00 : f32
    %190 = vector.broadcast %cst_61 : f32 to vector<8x64xf32>
    %191 = arith.addf %190, %189 : vector<8x64xf32>
    %cst_62 = arith.constant 1.000000e+00 : f32
    %192 = vector.broadcast %cst_62 : f32 to vector<8x64xf32>
    %193 = arith.divf %192, %191 : vector<8x64xf32>
    %cst_63 = arith.constant 1.06140542 : f32
    %194 = vector.broadcast %cst_63 : f32 to vector<8x64xf32>
    %195 = arith.mulf %194, %193 : vector<8x64xf32>
    %cst_64 = arith.constant -1.45315206 : f32
    %196 = vector.broadcast %cst_64 : f32 to vector<8x64xf32>
    %197 = arith.addf %195, %196 : vector<8x64xf32>
    %198 = arith.mulf %197, %193 : vector<8x64xf32>
    %cst_65 = arith.constant 1.42141378 : f32
    %199 = vector.broadcast %cst_65 : f32 to vector<8x64xf32>
    %200 = arith.addf %198, %199 : vector<8x64xf32>
    %201 = arith.mulf %200, %193 : vector<8x64xf32>
    %cst_66 = arith.constant -0.284496725 : f32
    %202 = vector.broadcast %cst_66 : f32 to vector<8x64xf32>
    %203 = arith.addf %201, %202 : vector<8x64xf32>
    %204 = arith.mulf %203, %193 : vector<8x64xf32>
    %cst_67 = arith.constant 0.254829586 : f32
    %205 = vector.broadcast %cst_67 : f32 to vector<8x64xf32>
    %206 = arith.addf %204, %205 : vector<8x64xf32>
    %207 = arith.mulf %206, %193 : vector<8x64xf32>
    %cst_68 = arith.constant 0.000000e+00 : f32
    %208 = vector.broadcast %cst_68 : f32 to vector<8x64xf32>
    %209 = arith.subf %208, %187 : vector<8x64xf32>
    %210 = arith.mulf %209, %187 : vector<8x64xf32>
    %211 = math.exp %210 : vector<8x64xf32>
    %212 = arith.mulf %207, %211 : vector<8x64xf32>
    %cst_69 = arith.constant 1.000000e+00 : f32
    %213 = vector.broadcast %cst_69 : f32 to vector<8x64xf32>
    %214 = arith.subf %213, %212 : vector<8x64xf32>
    %215 = arith.mulf %182, %214 : vector<8x64xf32>
    %cst_70 = arith.constant 1.000000e+00 : f32
    %216 = vector.broadcast %cst_70 : f32 to vector<8x64xf32>
    %217 = arith.addf %216, %215 : vector<8x64xf32>
    %218 = arith.mulf %175, %217 : vector<8x64xf32>
    %c0_71 = arith.constant 0 : index
    %c0_72 = arith.constant 0 : index
    %219 = vector.load %arg9[%c0_71, %c0_72] : memref<64x32xbf16, #tpu.memory_space<vmem>>, vector<64x32xbf16>
    %220 = arith.truncf %218 : vector<8x64xf32> to vector<8x64xbf16>
    %cst_73 = arith.constant dense<0.000000e+00> : vector<8x32xf32>
    %221 = tpu.matmul %220, %219, %cst_73 {dimension_numbers = #tpu.dot_dimension_numbers<[1], [0], [0], [1], [0, 0, 1, 1], [], []>} : vector<8x64xbf16>, vector<64x32xbf16>, vector<8x32xf32> -> vector<8x32xf32>
    %222 = arith.addf %145, %221 : vector<8x32xf32>
    %223 = vector.broadcast %9 : vector<1x32xf32> to vector<8x32xf32>
    %224 = arith.addf %222, %223 : vector<8x32xf32>
    %225 = vector.shape_cast %224 : vector<8x32xf32> to vector<1x8x32xf32>
    %226 = arith.truncf %225 : vector<1x8x32xf32> to vector<1x8x32xbf16>
    %c0_74 = arith.constant 0 : index
    %c0_75 = arith.constant 0 : index
    %c0_76 = arith.constant 0 : index
    %227 = vector.load %arg10[%c0_74, %c0_75, %c0_76] : memref<1x8x32xbf16, #tpu.memory_space<vmem>>, vector<1x8x32xbf16>
    tpu.vector_store %arg10[%c0_74, %c0_75, %c0_76], %226 {strides = array<i32>} : memref<1x8x32xbf16, #tpu.memory_space<vmem>>, vector<1x8x32xbf16>,
    return
  }
  func.func @transform_0(%arg0: i32) -> (i32, i32, i32) {
    %c0_i32 = arith.constant 0 : i32
    %c0_i32_0 = arith.constant 0 : i32
    %c0_i32_1 = arith.constant 0 : i32
    return %arg0, %c0_i32, %c0_i32_0 : i32, i32, i32
  }
  func.func @transform_1(%arg0: i32) -> (i32, i32, i32) {
    %c0_i32 = arith.constant 0 : i32
    %c0_i32_0 = arith.constant 0 : i32
    %c0_i32_1 = arith.constant 0 : i32
    return %arg0, %c0_i32, %c0_i32_0 : i32, i32, i32
  }
  func.func @transform_2(%arg0: i32) -> (i32, i32) {
    %c0_i32 = arith.constant 0 : i32
    %c0_i32_0 = arith.constant 0 : i32
    %c0_i32_1 = arith.constant 0 : i32
    return %c0_i32, %c0_i32_0 : i32, i32
  }
  func.func @transform_3(%arg0: i32) -> (i32, i32) {
    %c0_i32 = arith.constant 0 : i32
    %c0_i32_0 = arith.constant 0 : i32
    %c0_i32_1 = arith.constant 0 : i32
    return %c0_i32, %c0_i32_0 : i32, i32
  }
  func.func @transform_4(%arg0: i32) -> (i32, i32) {
    %c0_i32 = arith.constant 0 : i32
    %c0_i32_0 = arith.constant 0 : i32
    %c0_i32_1 = arith.constant 0 : i32
    return %c0_i32, %c0_i32_0 : i32, i32
  }
  func.func @transform_5(%arg0: i32) -> (i32, i32) {
    %c0_i32 = arith.constant 0 : i32
    %c0_i32_0 = arith.constant 0 : i32
    %c0_i32_1 = arith.constant 0 : i32
    return %c0_i32, %c0_i32_0 : i32, i32
  }
  func.func @transform_6(%arg0: i32) -> (i32, i32) {
    %c0_i32 = arith.constant 0 : i32
    %c0_i32_0 = arith.constant 0 : i32
    %c0_i32_1 = arith.constant 0 : i32
    return %c0_i32, %c0_i32_0 : i32, i32
  }
  func.func @transform_7(%arg0: i32) -> (i32, i32) {
    %c0_i32 = arith.constant 0 : i32
    %c0_i32_0 = arith.constant 0 : i32
    %c0_i32_1 = arith.constant 0 : i32
    return %c0_i32, %c0_i32_0 : i32, i32
  }
  func.func @transform_8(%arg0: i32) -> (i32, i32) {
    %c0_i32 = arith.constant 0 : i32
    %c0_i32_0 = arith.constant 0 : i32
    %c0_i32_1 = arith.constant 0 : i32
    return %c0_i32, %c0_i32_0 : i32, i32
  }
  func.func @transform_9(%arg0: i32) -> (i32, i32, i32) {
    %c0_i32 = arith.constant 0 : i32
    %c0_i32_0 = arith.constant 0 : i32
    %c0_i32_1 = arith.constant 0 : i32
    return %arg0, %c0_i32, %c0_i32_0 : i32, i32, i32
  }
}

module attributes {stable_mosaic.version = 11 : i64} {
  func.func @_decoder_layer_kernel(%arg0: i32, %arg1: memref<1x8x32xbf16, #tpu.memory_space<vmem>>, %arg2: memref<1x8x32xbf16, #tpu.memory_space<vmem>>, %arg3: memref<1x8x1xi32, #tpu.memory_space<vmem>>, %arg4: memref<1x1x8xi32, #tpu.memory_space<vmem>>, %arg5: memref<10x32xf32, #tpu.memory_space<vmem>>, %arg6: memref<32x96xbf16, #tpu.memory_space<vmem>>, %arg7: memref<1x96xf32, #tpu.memory_space<vmem>>, %arg8: memref<32x32xbf16, #tpu.memory_space<vmem>>, %arg9: memref<32x32xbf16, #tpu.memory_space<vmem>>, %arg10: memref<32x64xbf16, #tpu.memory_space<vmem>>, %arg11: memref<1x64xf32, #tpu.memory_space<vmem>>, %arg12: memref<32x32xbf16, #tpu.memory_space<vmem>>, %arg13: memref<32x64xbf16, #tpu.memory_space<vmem>>, %arg14: memref<1x64xf32, #tpu.memory_space<vmem>>, %arg15: memref<64x32xbf16, #tpu.memory_space<vmem>>, %arg16: memref<1x8x32xbf16, #tpu.memory_space<vmem>>) attributes {dimension_semantics = [#tpu.dimension_semantics<parallel>], iteration_bounds = array<i64: 2>, scalar_prefetch = 0 : i64, scratch_operands = 0 : i64, tpu.core_type = #tpu.core_type<tc>, window_params = [{transform_indices = @transform_0, window_bounds = array<i64: 1, 8, 32>}, {transform_indices = @transform_1, window_bounds = array<i64: 1, 8, 32>}, {transform_indices = @transform_2, window_bounds = array<i64: 1, 8, 1>}, {transform_indices = @transform_3, window_bounds = array<i64: 1, 1, 8>}, {pipeline_mode = #tpu.pipeline_mode<synchronous>, transform_indices = @transform_4, window_bounds = array<i64: 10, 32>}, {pipeline_mode = #tpu.pipeline_mode<synchronous>, transform_indices = @transform_5, window_bounds = array<i64: 32, 96>}, {pipeline_mode = #tpu.pipeline_mode<synchronous>, transform_indices = @transform_6, window_bounds = array<i64: 1, 96>}, {pipeline_mode = #tpu.pipeline_mode<synchronous>, transform_indices = @transform_7, window_bounds = array<i64: 32, 32>}, {pipeline_mode = #tpu.pipeline_mode<synchronous>, transform_indices = @transform_8, window_bounds = array<i64: 32, 32>}, {pipeline_mode = #tpu.pipeline_mode<synchronous>, transform_indices = @transform_9, window_bounds = array<i64: 32, 64>}, {pipeline_mode = #tpu.pipeline_mode<synchronous>, transform_indices = @transform_10, window_bounds = array<i64: 1, 64>}, {pipeline_mode = #tpu.pipeline_mode<synchronous>, transform_indices = @transform_11, window_bounds = array<i64: 32, 32>}, {pipeline_mode = #tpu.pipeline_mode<synchronous>, transform_indices = @transform_12, window_bounds = array<i64: 32, 64>}, {pipeline_mode = #tpu.pipeline_mode<synchronous>, transform_indices = @transform_13, window_bounds = array<i64: 1, 64>}, {pipeline_mode = #tpu.pipeline_mode<synchronous>, transform_indices = @transform_14, window_bounds = array<i64: 64, 32>}, {transform_indices = @transform_15, window_bounds = array<i64: 1, 8, 32>}]} {
    %c0 = arith.constant 0 : index
    %c0_0 = arith.constant 0 : index
    %c0_1 = arith.constant 0 : index
    %0 = vector.load %arg1[%c0, %c0_0, %c0_1] : memref<1x8x32xbf16, #tpu.memory_space<vmem>>, vector<1x8x32xbf16>
    %1 = arith.extf %0 : vector<1x8x32xbf16> to vector<1x8x32xf32>
    %c0_2 = arith.constant 0 : index
    %c0_3 = arith.constant 0 : index
    %c0_4 = arith.constant 0 : index
    %2 = vector.load %arg2[%c0_2, %c0_3, %c0_4] : memref<1x8x32xbf16, #tpu.memory_space<vmem>>, vector<1x8x32xbf16>
    %c0_5 = arith.constant 0 : index
    %c0_6 = arith.constant 0 : index
    %c0_7 = arith.constant 0 : index
    %3 = vector.load %arg3[%c0_5, %c0_6, %c0_7] : memref<1x8x1xi32, #tpu.memory_space<vmem>>, vector<1x8x1xi32>
    %c0_8 = arith.constant 0 : index
    %c0_9 = arith.constant 0 : index
    %c0_10 = arith.constant 0 : index
    %4 = vector.load %arg4[%c0_8, %c0_9, %c0_10] : memref<1x1x8xi32, #tpu.memory_space<vmem>>, vector<1x1x8xi32>
    %c0_11 = arith.constant 0 : index
    %c0_12 = arith.constant 0 : index
    %5 = vector.load %arg5[%c0_11, %c0_12] : memref<10x32xf32, #tpu.memory_space<vmem>>, vector<10x32xf32>
    %6 = vector.extract_strided_slice %5 {offsets = [0, 0], sizes = [1, 32], strides = [1, 1]} : vector<10x32xf32> to vector<1x32xf32>
    %7 = vector.extract_strided_slice %5 {offsets = [1, 0], sizes = [1, 32], strides = [1, 1]} : vector<10x32xf32> to vector<1x32xf32>
    %8 = vector.extract_strided_slice %5 {offsets = [2, 0], sizes = [1, 32], strides = [1, 1]} : vector<10x32xf32> to vector<1x32xf32>
    %9 = vector.extract_strided_slice %5 {offsets = [3, 0], sizes = [1, 32], strides = [1, 1]} : vector<10x32xf32> to vector<1x32xf32>
    %10 = vector.extract_strided_slice %5 {offsets = [4, 0], sizes = [1, 32], strides = [1, 1]} : vector<10x32xf32> to vector<1x32xf32>
    %11 = vector.extract_strided_slice %5 {offsets = [5, 0], sizes = [1, 32], strides = [1, 1]} : vector<10x32xf32> to vector<1x32xf32>
    %12 = vector.extract_strided_slice %5 {offsets = [6, 0], sizes = [1, 32], strides = [1, 1]} : vector<10x32xf32> to vector<1x32xf32>
    %13 = vector.extract_strided_slice %5 {offsets = [7, 0], sizes = [1, 32], strides = [1, 1]} : vector<10x32xf32> to vector<1x32xf32>
    %14 = vector.extract_strided_slice %5 {offsets = [8, 0], sizes = [1, 32], strides = [1, 1]} : vector<10x32xf32> to vector<1x32xf32>
    %15 = vector.extract_strided_slice %5 {offsets = [9, 0], sizes = [1, 32], strides = [1, 1]} : vector<10x32xf32> to vector<1x32xf32>
    %16 = tpu.iota {dimensions = array<i32: 0>} : vector<8x8xi32>
    %17 = tpu.iota {dimensions = array<i32: 1>} : vector<8x8xi32>
    %18 = arith.cmpi sle, %17, %16 : vector<8x8xi32>
    %19 = arith.extui %18 : vector<8x8xi1> to vector<8x8xi32>
    %20 = vector.shape_cast %19 : vector<8x8xi32> to vector<1x8x8xi32>
    %21 = vector.broadcast %3 : vector<1x8x1xi32> to vector<1x8x8xi32>
    %22 = arith.muli %21, %20 : vector<1x8x8xi32>
    %23 = vector.shape_cast %1 : vector<1x8x32xf32> to vector<8x32xf32>
    %cst = arith.constant dense<0.000000e+00> : vector<8xf32>
    %24 = vector.multi_reduction <add>, %23, %cst [1] : vector<8x32xf32> to vector<8xf32>
    %25 = vector.shape_cast %24 : vector<8xf32> to vector<8x1xf32>
    %cst_13 = arith.constant 3.200000e+01 : f32
    %26 = vector.broadcast %cst_13 : f32 to vector<8x1xf32>
    %27 = arith.divf %25, %26 : vector<8x1xf32>
    %28 = vector.broadcast %27 : vector<8x1xf32> to vector<8x32xf32>
    %29 = arith.subf %23, %28 : vector<8x32xf32>
    %30 = arith.mulf %29, %29 : vector<8x32xf32>
    %cst_14 = arith.constant dense<0.000000e+00> : vector<8xf32>
    %31 = vector.multi_reduction <add>, %30, %cst_14 [1] : vector<8x32xf32> to vector<8xf32>
    %32 = vector.shape_cast %31 : vector<8xf32> to vector<8x1xf32>
    %cst_15 = arith.constant 3.200000e+01 : f32
    %33 = vector.broadcast %cst_15 : f32 to vector<8x1xf32>
    %34 = arith.divf %32, %33 : vector<8x1xf32>
    %35 = vector.broadcast %27 : vector<8x1xf32> to vector<8x32xf32>
    %36 = arith.subf %23, %35 : vector<8x32xf32>
    %cst_16 = arith.constant 9.99999974E-6 : f32
    %37 = vector.broadcast %cst_16 : f32 to vector<8x1xf32>
    %38 = arith.addf %34, %37 : vector<8x1xf32>
    %39 = math.rsqrt %38 : vector<8x1xf32>
    %40 = vector.broadcast %39 : vector<8x1xf32> to vector<8x32xf32>
    %41 = arith.mulf %36, %40 : vector<8x32xf32>
    %42 = vector.broadcast %6 : vector<1x32xf32> to vector<8x32xf32>
    %43 = arith.mulf %41, %42 : vector<8x32xf32>
    %44 = vector.broadcast %7 : vector<1x32xf32> to vector<8x32xf32>
    %45 = arith.addf %43, %44 : vector<8x32xf32>
    %c0_17 = arith.constant 0 : index
    %c0_18 = arith.constant 0 : index
    %46 = vector.load %arg6[%c0_17, %c0_18] : memref<32x96xbf16, #tpu.memory_space<vmem>>, vector<32x96xbf16>
    %47 = arith.truncf %45 : vector<8x32xf32> to vector<8x32xbf16>
    %cst_19 = arith.constant dense<0.000000e+00> : vector<8x96xf32>
    %48 = tpu.matmul %47, %46, %cst_19 {dimension_numbers = #tpu.dot_dimension_numbers<[1], [0], [0], [1], [0, 0, 1, 1], [], []>} : vector<8x32xbf16>, vector<32x96xbf16>, vector<8x96xf32> -> vector<8x96xf32>
    %c0_20 = arith.constant 0 : index
    %c0_21 = arith.constant 0 : index
    %49 = vector.load %arg7[%c0_20, %c0_21] : memref<1x96xf32, #tpu.memory_space<vmem>>, vector<1x96xf32>
    %50 = vector.broadcast %49 : vector<1x96xf32> to vector<8x96xf32>
    %51 = arith.addf %48, %50 : vector<8x96xf32>
    %52 = vector.shape_cast %51 : vector<8x96xf32> to vector<1x8x96xf32>
    %53 = vector.extract_strided_slice %52 {offsets = [0, 0, 0], sizes = [1, 8, 32], strides = [1, 1, 1]} : vector<1x8x96xf32> to vector<1x8x32xf32>
    %54 = vector.extract_strided_slice %52 {offsets = [0, 0, 32], sizes = [1, 8, 32], strides = [1, 1, 1]} : vector<1x8x96xf32> to vector<1x8x32xf32>
    %55 = vector.extract_strided_slice %52 {offsets = [0, 0, 64], sizes = [1, 8, 32], strides = [1, 1, 1]} : vector<1x8x96xf32> to vector<1x8x32xf32>
    %56 = arith.truncf %53 : vector<1x8x32xf32> to vector<1x8x32xbf16>
    %57 = arith.truncf %54 : vector<1x8x32xf32> to vector<1x8x32xbf16>
    %58 = arith.truncf %55 : vector<1x8x32xf32> to vector<1x8x32xbf16>
    %c0_i32 = arith.constant 0 : i32
    %59 = vector.broadcast %c0_i32 : i32 to vector<1x8x8xi32>
    %60 = arith.cmpi eq, %22, %59 : vector<1x8x8xi32>
    %61 = vector.extract_strided_slice %56 {offsets = [0, 0, 0], sizes = [1, 8, 8], strides = [1, 1, 1]} : vector<1x8x32xbf16> to vector<1x8x8xbf16>
    %62 = vector.extract_strided_slice %57 {offsets = [0, 0, 0], sizes = [1, 8, 8], strides = [1, 1, 1]} : vector<1x8x32xbf16> to vector<1x8x8xbf16>
    "tpu.trace_start"() <{level = 10 : i32, message = "bqd,bkd->bqk"}> : () -> ()
    %cst_22 = arith.constant dense<0.000000e+00> : vector<1x8x8xf32>
    %63 = tpu.matmul %61, %62, %cst_22 {dimension_numbers = #tpu.dot_dimension_numbers<[2], [2], [1], [1], [0, 0, 0, 1, 1, 1], [0], [0]>} : vector<1x8x8xbf16>, vector<1x8x8xbf16>, vector<1x8x8xf32> -> vector<1x8x8xf32>
    "tpu.trace_stop"() : () -> ()
    %cst_23 = arith.constant 0.353553385 : f32
    %64 = vector.broadcast %cst_23 : f32 to vector<1x8x8xf32>
    %65 = arith.mulf %63, %64 : vector<1x8x8xf32>
    %cst_24 = arith.constant -1.000000e+04 : f32
    %66 = vector.broadcast %cst_24 : f32 to vector<1x8x8xf32>
    %67 = arith.select %60, %66, %65 : vector<1x8x8xi1>, vector<1x8x8xf32>
    %cst_25 = arith.constant dense<0xFF800000> : vector<1x8xf32>
    %68 = vector.multi_reduction <maximumf>, %67, %cst_25 [2] : vector<1x8x8xf32> to vector<1x8xf32>
    %69 = vector.shape_cast %68 : vector<1x8xf32> to vector<1x8x1xf32>
    %70 = vector.broadcast %69 : vector<1x8x1xf32> to vector<1x8x8xf32>
    %71 = arith.subf %67, %70 : vector<1x8x8xf32>
    %72 = math.exp %71 : vector<1x8x8xf32>
    %cst_26 = arith.constant dense<0.000000e+00> : vector<1x8xf32>
    %73 = vector.multi_reduction <add>, %72, %cst_26 [2] : vector<1x8x8xf32> to vector<1x8xf32>
    %74 = vector.shape_cast %73 : vector<1x8xf32> to vector<1x8x1xf32>
    %75 = tpu.reciprocal %74 {approx = true} : vector<1x8x1xf32> -> vector<1x8x1xf32>
    %76 = vector.broadcast %75 : vector<1x8x1xf32> to vector<1x8x8xf32>
    %77 = arith.mulf %72, %76 : vector<1x8x8xf32>
    %78 = arith.truncf %77 : vector<1x8x8xf32> to vector<1x8x8xbf16>
    %79 = vector.extract_strided_slice %58 {offsets = [0, 0, 0], sizes = [1, 8, 8], strides = [1, 1, 1]} : vector<1x8x32xbf16> to vector<1x8x8xbf16>
    "tpu.trace_start"() <{level = 10 : i32, message = "bqk,bkd->bqd"}> : () -> ()
    %cst_27 = arith.constant dense<0.000000e+00> : vector<1x8x8xf32>
    %80 = tpu.matmul %78, %79, %cst_27 {dimension_numbers = #tpu.dot_dimension_numbers<[2], [1], [1], [2], [0, 0, 0, 1, 1, 2], [0], [0]>} : vector<1x8x8xbf16>, vector<1x8x8xbf16>, vector<1x8x8xf32> -> vector<1x8x8xf32>
    "tpu.trace_stop"() : () -> ()
    %81 = vector.extract_strided_slice %56 {offsets = [0, 0, 8], sizes = [1, 8, 8], strides = [1, 1, 1]} : vector<1x8x32xbf16> to vector<1x8x8xbf16>
    %82 = vector.extract_strided_slice %57 {offsets = [0, 0, 8], sizes = [1, 8, 8], strides = [1, 1, 1]} : vector<1x8x32xbf16> to vector<1x8x8xbf16>
    "tpu.trace_start"() <{level = 10 : i32, message = "bqd,bkd->bqk"}> : () -> ()
    %cst_28 = arith.constant dense<0.000000e+00> : vector<1x8x8xf32>
    %83 = tpu.matmul %81, %82, %cst_28 {dimension_numbers = #tpu.dot_dimension_numbers<[2], [2], [1], [1], [0, 0, 0, 1, 1, 1], [0], [0]>} : vector<1x8x8xbf16>, vector<1x8x8xbf16>, vector<1x8x8xf32> -> vector<1x8x8xf32>
    "tpu.trace_stop"() : () -> ()
    %cst_29 = arith.constant 0.353553385 : f32
    %84 = vector.broadcast %cst_29 : f32 to vector<1x8x8xf32>
    %85 = arith.mulf %83, %84 : vector<1x8x8xf32>
    %cst_30 = arith.constant -1.000000e+04 : f32
    %86 = vector.broadcast %cst_30 : f32 to vector<1x8x8xf32>
    %87 = arith.select %60, %86, %85 : vector<1x8x8xi1>, vector<1x8x8xf32>
    %cst_31 = arith.constant dense<0xFF800000> : vector<1x8xf32>
    %88 = vector.multi_reduction <maximumf>, %87, %cst_31 [2] : vector<1x8x8xf32> to vector<1x8xf32>
    %89 = vector.shape_cast %88 : vector<1x8xf32> to vector<1x8x1xf32>
    %90 = vector.broadcast %89 : vector<1x8x1xf32> to vector<1x8x8xf32>
    %91 = arith.subf %87, %90 : vector<1x8x8xf32>
    %92 = math.exp %91 : vector<1x8x8xf32>
    %cst_32 = arith.constant dense<0.000000e+00> : vector<1x8xf32>
    %93 = vector.multi_reduction <add>, %92, %cst_32 [2] : vector<1x8x8xf32> to vector<1x8xf32>
    %94 = vector.shape_cast %93 : vector<1x8xf32> to vector<1x8x1xf32>
    %95 = tpu.reciprocal %94 {approx = true} : vector<1x8x1xf32> -> vector<1x8x1xf32>
    %96 = vector.broadcast %95 : vector<1x8x1xf32> to vector<1x8x8xf32>
    %97 = arith.mulf %92, %96 : vector<1x8x8xf32>
    %98 = arith.truncf %97 : vector<1x8x8xf32> to vector<1x8x8xbf16>
    %99 = vector.extract_strided_slice %58 {offsets = [0, 0, 8], sizes = [1, 8, 8], strides = [1, 1, 1]} : vector<1x8x32xbf16> to vector<1x8x8xbf16>
    "tpu.trace_start"() <{level = 10 : i32, message = "bqk,bkd->bqd"}> : () -> ()
    %cst_33 = arith.constant dense<0.000000e+00> : vector<1x8x8xf32>
    %100 = tpu.matmul %98, %99, %cst_33 {dimension_numbers = #tpu.dot_dimension_numbers<[2], [1], [1], [2], [0, 0, 0, 1, 1, 2], [0], [0]>} : vector<1x8x8xbf16>, vector<1x8x8xbf16>, vector<1x8x8xf32> -> vector<1x8x8xf32>
    "tpu.trace_stop"() : () -> ()
    %101 = vector.extract_strided_slice %56 {offsets = [0, 0, 16], sizes = [1, 8, 8], strides = [1, 1, 1]} : vector<1x8x32xbf16> to vector<1x8x8xbf16>
    %102 = vector.extract_strided_slice %57 {offsets = [0, 0, 16], sizes = [1, 8, 8], strides = [1, 1, 1]} : vector<1x8x32xbf16> to vector<1x8x8xbf16>
    "tpu.trace_start"() <{level = 10 : i32, message = "bqd,bkd->bqk"}> : () -> ()
    %cst_34 = arith.constant dense<0.000000e+00> : vector<1x8x8xf32>
    %103 = tpu.matmul %101, %102, %cst_34 {dimension_numbers = #tpu.dot_dimension_numbers<[2], [2], [1], [1], [0, 0, 0, 1, 1, 1], [0], [0]>} : vector<1x8x8xbf16>, vector<1x8x8xbf16>, vector<1x8x8xf32> -> vector<1x8x8xf32>
    "tpu.trace_stop"() : () -> ()
    %cst_35 = arith.constant 0.353553385 : f32
    %104 = vector.broadcast %cst_35 : f32 to vector<1x8x8xf32>
    %105 = arith.mulf %103, %104 : vector<1x8x8xf32>
    %cst_36 = arith.constant -1.000000e+04 : f32
    %106 = vector.broadcast %cst_36 : f32 to vector<1x8x8xf32>
    %107 = arith.select %60, %106, %105 : vector<1x8x8xi1>, vector<1x8x8xf32>
    %cst_37 = arith.constant dense<0xFF800000> : vector<1x8xf32>
    %108 = vector.multi_reduction <maximumf>, %107, %cst_37 [2] : vector<1x8x8xf32> to vector<1x8xf32>
    %109 = vector.shape_cast %108 : vector<1x8xf32> to vector<1x8x1xf32>
    %110 = vector.broadcast %109 : vector<1x8x1xf32> to vector<1x8x8xf32>
    %111 = arith.subf %107, %110 : vector<1x8x8xf32>
    %112 = math.exp %111 : vector<1x8x8xf32>
    %cst_38 = arith.constant dense<0.000000e+00> : vector<1x8xf32>
    %113 = vector.multi_reduction <add>, %112, %cst_38 [2] : vector<1x8x8xf32> to vector<1x8xf32>
    %114 = vector.shape_cast %113 : vector<1x8xf32> to vector<1x8x1xf32>
    %115 = tpu.reciprocal %114 {approx = true} : vector<1x8x1xf32> -> vector<1x8x1xf32>
    %116 = vector.broadcast %115 : vector<1x8x1xf32> to vector<1x8x8xf32>
    %117 = arith.mulf %112, %116 : vector<1x8x8xf32>
    %118 = arith.truncf %117 : vector<1x8x8xf32> to vector<1x8x8xbf16>
    %119 = vector.extract_strided_slice %58 {offsets = [0, 0, 16], sizes = [1, 8, 8], strides = [1, 1, 1]} : vector<1x8x32xbf16> to vector<1x8x8xbf16>
    "tpu.trace_start"() <{level = 10 : i32, message = "bqk,bkd->bqd"}> : () -> ()
    %cst_39 = arith.constant dense<0.000000e+00> : vector<1x8x8xf32>
    %120 = tpu.matmul %118, %119, %cst_39 {dimension_numbers = #tpu.dot_dimension_numbers<[2], [1], [1], [2], [0, 0, 0, 1, 1, 2], [0], [0]>} : vector<1x8x8xbf16>, vector<1x8x8xbf16>, vector<1x8x8xf32> -> vector<1x8x8xf32>
    "tpu.trace_stop"() : () -> ()
    %121 = vector.extract_strided_slice %56 {offsets = [0, 0, 24], sizes = [1, 8, 8], strides = [1, 1, 1]} : vector<1x8x32xbf16> to vector<1x8x8xbf16>
    %122 = vector.extract_strided_slice %57 {offsets = [0, 0, 24], sizes = [1, 8, 8], strides = [1, 1, 1]} : vector<1x8x32xbf16> to vector<1x8x8xbf16>
    "tpu.trace_start"() <{level = 10 : i32, message = "bqd,bkd->bqk"}> : () -> ()
    %cst_40 = arith.constant dense<0.000000e+00> : vector<1x8x8xf32>
    %123 = tpu.matmul %121, %122, %cst_40 {dimension_numbers = #tpu.dot_dimension_numbers<[2], [2], [1], [1], [0, 0, 0, 1, 1, 1], [0], [0]>} : vector<1x8x8xbf16>, vector<1x8x8xbf16>, vector<1x8x8xf32> -> vector<1x8x8xf32>
    "tpu.trace_stop"() : () -> ()
    %cst_41 = arith.constant 0.353553385 : f32
    %124 = vector.broadcast %cst_41 : f32 to vector<1x8x8xf32>
    %125 = arith.mulf %123, %124 : vector<1x8x8xf32>
    %cst_42 = arith.constant -1.000000e+04 : f32
    %126 = vector.broadcast %cst_42 : f32 to vector<1x8x8xf32>
    %127 = arith.select %60, %126, %125 : vector<1x8x8xi1>, vector<1x8x8xf32>
    %cst_43 = arith.constant dense<0xFF800000> : vector<1x8xf32>
    %128 = vector.multi_reduction <maximumf>, %127, %cst_43 [2] : vector<1x8x8xf32> to vector<1x8xf32>
    %129 = vector.shape_cast %128 : vector<1x8xf32> to vector<1x8x1xf32>
    %130 = vector.broadcast %129 : vector<1x8x1xf32> to vector<1x8x8xf32>
    %131 = arith.subf %127, %130 : vector<1x8x8xf32>
    %132 = math.exp %131 : vector<1x8x8xf32>
    %cst_44 = arith.constant dense<0.000000e+00> : vector<1x8xf32>
    %133 = vector.multi_reduction <add>, %132, %cst_44 [2] : vector<1x8x8xf32> to vector<1x8xf32>
    %134 = vector.shape_cast %133 : vector<1x8xf32> to vector<1x8x1xf32>
    %135 = tpu.reciprocal %134 {approx = true} : vector<1x8x1xf32> -> vector<1x8x1xf32>
    %136 = vector.broadcast %135 : vector<1x8x1xf32> to vector<1x8x8xf32>
    %137 = arith.mulf %132, %136 : vector<1x8x8xf32>
    %138 = arith.truncf %137 : vector<1x8x8xf32> to vector<1x8x8xbf16>
    %139 = vector.extract_strided_slice %58 {offsets = [0, 0, 24], sizes = [1, 8, 8], strides = [1, 1, 1]} : vector<1x8x32xbf16> to vector<1x8x8xbf16>
    "tpu.trace_start"() <{level = 10 : i32, message = "bqk,bkd->bqd"}> : () -> ()
    %cst_45 = arith.constant dense<0.000000e+00> : vector<1x8x8xf32>
    %140 = tpu.matmul %138, %139, %cst_45 {dimension_numbers = #tpu.dot_dimension_numbers<[2], [1], [1], [2], [0, 0, 0, 1, 1, 2], [0], [0]>} : vector<1x8x8xbf16>, vector<1x8x8xbf16>, vector<1x8x8xf32> -> vector<1x8x8xf32>
    "tpu.trace_stop"() : () -> ()
    %141 = tpu.concatenate %80, %100, %120, %140 in 2 : vector<1x8x8xf32>, vector<1x8x8xf32>, vector<1x8x8xf32>, vector<1x8x8xf32> -> vector<1x8x32xf32>
    %142 = arith.truncf %141 : vector<1x8x32xf32> to vector<1x8x32xbf16>
    %143 = vector.shape_cast %142 : vector<1x8x32xbf16> to vector<8x32xbf16>
    %c0_46 = arith.constant 0 : index
    %c0_47 = arith.constant 0 : index
    %144 = vector.load %arg8[%c0_46, %c0_47] : memref<32x32xbf16, #tpu.memory_space<vmem>>, vector<32x32xbf16>
    %cst_48 = arith.constant dense<0.000000e+00> : vector<8x32xf32>
    %145 = tpu.matmul %143, %144, %cst_48 {dimension_numbers = #tpu.dot_dimension_numbers<[1], [0], [0], [1], [0, 0, 1, 1], [], []>} : vector<8x32xbf16>, vector<32x32xbf16>, vector<8x32xf32> -> vector<8x32xf32>
    %146 = vector.broadcast %8 : vector<1x32xf32> to vector<8x32xf32>
    %147 = arith.addf %145, %146 : vector<8x32xf32>
    %148 = vector.shape_cast %147 : vector<8x32xf32> to vector<1x8x32xf32>
    %149 = arith.addf %1, %148 : vector<1x8x32xf32>
    %150 = vector.shape_cast %149 : vector<1x8x32xf32> to vector<8x32xf32>
    %cst_49 = arith.constant dense<0.000000e+00> : vector<8xf32>
    %151 = vector.multi_reduction <add>, %150, %cst_49 [1] : vector<8x32xf32> to vector<8xf32>
    %152 = vector.shape_cast %151 : vector<8xf32> to vector<8x1xf32>
    %cst_50 = arith.constant 3.200000e+01 : f32
    %153 = vector.broadcast %cst_50 : f32 to vector<8x1xf32>
    %154 = arith.divf %152, %153 : vector<8x1xf32>
    %155 = vector.broadcast %154 : vector<8x1xf32> to vector<8x32xf32>
    %156 = arith.subf %150, %155 : vector<8x32xf32>
    %157 = arith.mulf %156, %156 : vector<8x32xf32>
    %cst_51 = arith.constant dense<0.000000e+00> : vector<8xf32>
    %158 = vector.multi_reduction <add>, %157, %cst_51 [1] : vector<8x32xf32> to vector<8xf32>
    %159 = vector.shape_cast %158 : vector<8xf32> to vector<8x1xf32>
    %cst_52 = arith.constant 3.200000e+01 : f32
    %160 = vector.broadcast %cst_52 : f32 to vector<8x1xf32>
    %161 = arith.divf %159, %160 : vector<8x1xf32>
    %162 = vector.broadcast %154 : vector<8x1xf32> to vector<8x32xf32>
    %163 = arith.subf %150, %162 : vector<8x32xf32>
    %cst_53 = arith.constant 9.99999974E-6 : f32
    %164 = vector.broadcast %cst_53 : f32 to vector<8x1xf32>
    %165 = arith.addf %161, %164 : vector<8x1xf32>
    %166 = math.rsqrt %165 : vector<8x1xf32>
    %167 = vector.broadcast %166 : vector<8x1xf32> to vector<8x32xf32>
    %168 = arith.mulf %163, %167 : vector<8x32xf32>
    %169 = vector.broadcast %9 : vector<1x32xf32> to vector<8x32xf32>
    %170 = arith.mulf %168, %169 : vector<8x32xf32>
    %171 = vector.broadcast %10 : vector<1x32xf32> to vector<8x32xf32>
    %172 = arith.addf %170, %171 : vector<8x32xf32>
    %c0_54 = arith.constant 0 : index
    %c0_55 = arith.constant 0 : index
    %173 = vector.load %arg9[%c0_54, %c0_55] : memref<32x32xbf16, #tpu.memory_space<vmem>>, vector<32x32xbf16>
    %174 = arith.truncf %172 : vector<8x32xf32> to vector<8x32xbf16>
    %cst_56 = arith.constant dense<0.000000e+00> : vector<8x32xf32>
    %175 = tpu.matmul %174, %173, %cst_56 {dimension_numbers = #tpu.dot_dimension_numbers<[1], [0], [0], [1], [0, 0, 1, 1], [], []>} : vector<8x32xbf16>, vector<32x32xbf16>, vector<8x32xf32> -> vector<8x32xf32>
    %176 = vector.broadcast %11 : vector<1x32xf32> to vector<8x32xf32>
    %177 = arith.addf %175, %176 : vector<8x32xf32>
    %178 = vector.shape_cast %177 : vector<8x32xf32> to vector<1x8x32xf32>
    %179 = vector.shape_cast %2 : vector<1x8x32xbf16> to vector<8x32xbf16>
    %c0_57 = arith.constant 0 : index
    %c0_58 = arith.constant 0 : index
    %180 = vector.load %arg10[%c0_57, %c0_58] : memref<32x64xbf16, #tpu.memory_space<vmem>>, vector<32x64xbf16>
    %cst_59 = arith.constant dense<0.000000e+00> : vector<8x64xf32>
    %181 = tpu.matmul %179, %180, %cst_59 {dimension_numbers = #tpu.dot_dimension_numbers<[1], [0], [0], [1], [0, 0, 1, 1], [], []>} : vector<8x32xbf16>, vector<32x64xbf16>, vector<8x64xf32> -> vector<8x64xf32>
    %c0_60 = arith.constant 0 : index
    %c0_61 = arith.constant 0 : index
    %182 = vector.load %arg11[%c0_60, %c0_61] : memref<1x64xf32, #tpu.memory_space<vmem>>, vector<1x64xf32>
    %183 = vector.broadcast %182 : vector<1x64xf32> to vector<8x64xf32>
    %184 = arith.addf %181, %183 : vector<8x64xf32>
    %185 = vector.shape_cast %184 : vector<8x64xf32> to vector<1x8x64xf32>
    %186 = vector.extract_strided_slice %185 {offsets = [0, 0, 0], sizes = [1, 8, 32], strides = [1, 1, 1]} : vector<1x8x64xf32> to vector<1x8x32xf32>
    %187 = vector.extract_strided_slice %185 {offsets = [0, 0, 32], sizes = [1, 8, 32], strides = [1, 1, 1]} : vector<1x8x64xf32> to vector<1x8x32xf32>
    %188 = arith.truncf %178 : vector<1x8x32xf32> to vector<1x8x32xbf16>
    %189 = arith.truncf %186 : vector<1x8x32xf32> to vector<1x8x32xbf16>
    %190 = arith.truncf %187 : vector<1x8x32xf32> to vector<1x8x32xbf16>
    %c0_i32_62 = arith.constant 0 : i32
    %191 = vector.broadcast %c0_i32_62 : i32 to vector<1x1x8xi32>
    %192 = arith.cmpi eq, %4, %191 : vector<1x1x8xi32>
    %193 = vector.extract_strided_slice %188 {offsets = [0, 0, 0], sizes = [1, 8, 8], strides = [1, 1, 1]} : vector<1x8x32xbf16> to vector<1x8x8xbf16>
    %194 = vector.extract_strided_slice %189 {offsets = [0, 0, 0], sizes = [1, 8, 8], strides = [1, 1, 1]} : vector<1x8x32xbf16> to vector<1x8x8xbf16>
    "tpu.trace_start"() <{level = 10 : i32, message = "bqd,bkd->bqk"}> : () -> ()
    %cst_63 = arith.constant dense<0.000000e+00> : vector<1x8x8xf32>
    %195 = tpu.matmul %193, %194, %cst_63 {dimension_numbers = #tpu.dot_dimension_numbers<[2], [2], [1], [1], [0, 0, 0, 1, 1, 1], [0], [0]>} : vector<1x8x8xbf16>, vector<1x8x8xbf16>, vector<1x8x8xf32> -> vector<1x8x8xf32>
    "tpu.trace_stop"() : () -> ()
    %cst_64 = arith.constant 0.353553385 : f32
    %196 = vector.broadcast %cst_64 : f32 to vector<1x8x8xf32>
    %197 = arith.mulf %195, %196 : vector<1x8x8xf32>
    %cst_65 = arith.constant -1.000000e+04 : f32
    %198 = vector.shape_cast %192 : vector<1x1x8xi1> to vector<1x1x8xi1>
    %199 = vector.broadcast %198 : vector<1x1x8xi1> to vector<1x8x8xi1>
    %200 = vector.broadcast %cst_65 : f32 to vector<1x8x8xf32>
    %201 = arith.select %199, %200, %197 : vector<1x8x8xi1>, vector<1x8x8xf32>
    %cst_66 = arith.constant dense<0xFF800000> : vector<1x8xf32>
    %202 = vector.multi_reduction <maximumf>, %201, %cst_66 [2] : vector<1x8x8xf32> to vector<1x8xf32>
    %203 = vector.shape_cast %202 : vector<1x8xf32> to vector<1x8x1xf32>
    %204 = vector.broadcast %203 : vector<1x8x1xf32> to vector<1x8x8xf32>
    %205 = arith.subf %201, %204 : vector<1x8x8xf32>
    %206 = math.exp %205 : vector<1x8x8xf32>
    %cst_67 = arith.constant dense<0.000000e+00> : vector<1x8xf32>
    %207 = vector.multi_reduction <add>, %206, %cst_67 [2] : vector<1x8x8xf32> to vector<1x8xf32>
    %208 = vector.shape_cast %207 : vector<1x8xf32> to vector<1x8x1xf32>
    %209 = tpu.reciprocal %208 {approx = true} : vector<1x8x1xf32> -> vector<1x8x1xf32>
    %210 = vector.broadcast %209 : vector<1x8x1xf32> to vector<1x8x8xf32>
    %211 = arith.mulf %206, %210 : vector<1x8x8xf32>
    %212 = arith.truncf %211 : vector<1x8x8xf32> to vector<1x8x8xbf16>
    %213 = vector.extract_strided_slice %190 {offsets = [0, 0, 0], sizes = [1, 8, 8], strides = [1, 1, 1]} : vector<1x8x32xbf16> to vector<1x8x8xbf16>
    "tpu.trace_start"() <{level = 10 : i32, message = "bqk,bkd->bqd"}> : () -> ()
    %cst_68 = arith.constant dense<0.000000e+00> : vector<1x8x8xf32>
    %214 = tpu.matmul %212, %213, %cst_68 {dimension_numbers = #tpu.dot_dimension_numbers<[2], [1], [1], [2], [0, 0, 0, 1, 1, 2], [0], [0]>} : vector<1x8x8xbf16>, vector<1x8x8xbf16>, vector<1x8x8xf32> -> vector<1x8x8xf32>
    "tpu.trace_stop"() : () -> ()
    %215 = vector.extract_strided_slice %188 {offsets = [0, 0, 8], sizes = [1, 8, 8], strides = [1, 1, 1]} : vector<1x8x32xbf16> to vector<1x8x8xbf16>
    %216 = vector.extract_strided_slice %189 {offsets = [0, 0, 8], sizes = [1, 8, 8], strides = [1, 1, 1]} : vector<1x8x32xbf16> to vector<1x8x8xbf16>
    "tpu.trace_start"() <{level = 10 : i32, message = "bqd,bkd->bqk"}> : () -> ()
    %cst_69 = arith.constant dense<0.000000e+00> : vector<1x8x8xf32>
    %217 = tpu.matmul %215, %216, %cst_69 {dimension_numbers = #tpu.dot_dimension_numbers<[2], [2], [1], [1], [0, 0, 0, 1, 1, 1], [0], [0]>} : vector<1x8x8xbf16>, vector<1x8x8xbf16>, vector<1x8x8xf32> -> vector<1x8x8xf32>
    "tpu.trace_stop"() : () -> ()
    %cst_70 = arith.constant 0.353553385 : f32
    %218 = vector.broadcast %cst_70 : f32 to vector<1x8x8xf32>
    %219 = arith.mulf %217, %218 : vector<1x8x8xf32>
    %cst_71 = arith.constant -1.000000e+04 : f32
    %220 = vector.shape_cast %192 : vector<1x1x8xi1> to vector<1x1x8xi1>
    %221 = vector.broadcast %220 : vector<1x1x8xi1> to vector<1x8x8xi1>
    %222 = vector.broadcast %cst_71 : f32 to vector<1x8x8xf32>
    %223 = arith.select %221, %222, %219 : vector<1x8x8xi1>, vector<1x8x8xf32>
    %cst_72 = arith.constant dense<0xFF800000> : vector<1x8xf32>
    %224 = vector.multi_reduction <maximumf>, %223, %cst_72 [2] : vector<1x8x8xf32> to vector<1x8xf32>
    %225 = vector.shape_cast %224 : vector<1x8xf32> to vector<1x8x1xf32>
    %226 = vector.broadcast %225 : vector<1x8x1xf32> to vector<1x8x8xf32>
    %227 = arith.subf %223, %226 : vector<1x8x8xf32>
    %228 = math.exp %227 : vector<1x8x8xf32>
    %cst_73 = arith.constant dense<0.000000e+00> : vector<1x8xf32>
    %229 = vector.multi_reduction <add>, %228, %cst_73 [2] : vector<1x8x8xf32> to vector<1x8xf32>
    %230 = vector.shape_cast %229 : vector<1x8xf32> to vector<1x8x1xf32>
    %231 = tpu.reciprocal %230 {approx = true} : vector<1x8x1xf32> -> vector<1x8x1xf32>
    %232 = vector.broadcast %231 : vector<1x8x1xf32> to vector<1x8x8xf32>
    %233 = arith.mulf %228, %232 : vector<1x8x8xf32>
    %234 = arith.truncf %233 : vector<1x8x8xf32> to vector<1x8x8xbf16>
    %235 = vector.extract_strided_slice %190 {offsets = [0, 0, 8], sizes = [1, 8, 8], strides = [1, 1, 1]} : vector<1x8x32xbf16> to vector<1x8x8xbf16>
    "tpu.trace_start"() <{level = 10 : i32, message = "bqk,bkd->bqd"}> : () -> ()
    %cst_74 = arith.constant dense<0.000000e+00> : vector<1x8x8xf32>
    %236 = tpu.matmul %234, %235, %cst_74 {dimension_numbers = #tpu.dot_dimension_numbers<[2], [1], [1], [2], [0, 0, 0, 1, 1, 2], [0], [0]>} : vector<1x8x8xbf16>, vector<1x8x8xbf16>, vector<1x8x8xf32> -> vector<1x8x8xf32>
    "tpu.trace_stop"() : () -> ()
    %237 = vector.extract_strided_slice %188 {offsets = [0, 0, 16], sizes = [1, 8, 8], strides = [1, 1, 1]} : vector<1x8x32xbf16> to vector<1x8x8xbf16>
    %238 = vector.extract_strided_slice %189 {offsets = [0, 0, 16], sizes = [1, 8, 8], strides = [1, 1, 1]} : vector<1x8x32xbf16> to vector<1x8x8xbf16>
    "tpu.trace_start"() <{level = 10 : i32, message = "bqd,bkd->bqk"}> : () -> ()
    %cst_75 = arith.constant dense<0.000000e+00> : vector<1x8x8xf32>
    %239 = tpu.matmul %237, %238, %cst_75 {dimension_numbers = #tpu.dot_dimension_numbers<[2], [2], [1], [1], [0, 0, 0, 1, 1, 1], [0], [0]>} : vector<1x8x8xbf16>, vector<1x8x8xbf16>, vector<1x8x8xf32> -> vector<1x8x8xf32>
    "tpu.trace_stop"() : () -> ()
    %cst_76 = arith.constant 0.353553385 : f32
    %240 = vector.broadcast %cst_76 : f32 to vector<1x8x8xf32>
    %241 = arith.mulf %239, %240 : vector<1x8x8xf32>
    %cst_77 = arith.constant -1.000000e+04 : f32
    %242 = vector.shape_cast %192 : vector<1x1x8xi1> to vector<1x1x8xi1>
    %243 = vector.broadcast %242 : vector<1x1x8xi1> to vector<1x8x8xi1>
    %244 = vector.broadcast %cst_77 : f32 to vector<1x8x8xf32>
    %245 = arith.select %243, %244, %241 : vector<1x8x8xi1>, vector<1x8x8xf32>
    %cst_78 = arith.constant dense<0xFF800000> : vector<1x8xf32>
    %246 = vector.multi_reduction <maximumf>, %245, %cst_78 [2] : vector<1x8x8xf32> to vector<1x8xf32>
    %247 = vector.shape_cast %246 : vector<1x8xf32> to vector<1x8x1xf32>
    %248 = vector.broadcast %247 : vector<1x8x1xf32> to vector<1x8x8xf32>
    %249 = arith.subf %245, %248 : vector<1x8x8xf32>
    %250 = math.exp %249 : vector<1x8x8xf32>
    %cst_79 = arith.constant dense<0.000000e+00> : vector<1x8xf32>
    %251 = vector.multi_reduction <add>, %250, %cst_79 [2] : vector<1x8x8xf32> to vector<1x8xf32>
    %252 = vector.shape_cast %251 : vector<1x8xf32> to vector<1x8x1xf32>
    %253 = tpu.reciprocal %252 {approx = true} : vector<1x8x1xf32> -> vector<1x8x1xf32>
    %254 = vector.broadcast %253 : vector<1x8x1xf32> to vector<1x8x8xf32>
    %255 = arith.mulf %250, %254 : vector<1x8x8xf32>
    %256 = arith.truncf %255 : vector<1x8x8xf32> to vector<1x8x8xbf16>
    %257 = vector.extract_strided_slice %190 {offsets = [0, 0, 16], sizes = [1, 8, 8], strides = [1, 1, 1]} : vector<1x8x32xbf16> to vector<1x8x8xbf16>
    "tpu.trace_start"() <{level = 10 : i32, message = "bqk,bkd->bqd"}> : () -> ()
    %cst_80 = arith.constant dense<0.000000e+00> : vector<1x8x8xf32>
    %258 = tpu.matmul %256, %257, %cst_80 {dimension_numbers = #tpu.dot_dimension_numbers<[2], [1], [1], [2], [0, 0, 0, 1, 1, 2], [0], [0]>} : vector<1x8x8xbf16>, vector<1x8x8xbf16>, vector<1x8x8xf32> -> vector<1x8x8xf32>
    "tpu.trace_stop"() : () -> ()
    %259 = vector.extract_strided_slice %188 {offsets = [0, 0, 24], sizes = [1, 8, 8], strides = [1, 1, 1]} : vector<1x8x32xbf16> to vector<1x8x8xbf16>
    %260 = vector.extract_strided_slice %189 {offsets = [0, 0, 24], sizes = [1, 8, 8], strides = [1, 1, 1]} : vector<1x8x32xbf16> to vector<1x8x8xbf16>
    "tpu.trace_start"() <{level = 10 : i32, message = "bqd,bkd->bqk"}> : () -> ()
    %cst_81 = arith.constant dense<0.000000e+00> : vector<1x8x8xf32>
    %261 = tpu.matmul %259, %260, %cst_81 {dimension_numbers = #tpu.dot_dimension_numbers<[2], [2], [1], [1], [0, 0, 0, 1, 1, 1], [0], [0]>} : vector<1x8x8xbf16>, vector<1x8x8xbf16>, vector<1x8x8xf32> -> vector<1x8x8xf32>
    "tpu.trace_stop"() : () -> ()
    %cst_82 = arith.constant 0.353553385 : f32
    %262 = vector.broadcast %cst_82 : f32 to vector<1x8x8xf32>
    %263 = arith.mulf %261, %262 : vector<1x8x8xf32>
    %cst_83 = arith.constant -1.000000e+04 : f32
    %264 = vector.shape_cast %192 : vector<1x1x8xi1> to vector<1x1x8xi1>
    %265 = vector.broadcast %264 : vector<1x1x8xi1> to vector<1x8x8xi1>
    %266 = vector.broadcast %cst_83 : f32 to vector<1x8x8xf32>
    %267 = arith.select %265, %266, %263 : vector<1x8x8xi1>, vector<1x8x8xf32>
    %cst_84 = arith.constant dense<0xFF800000> : vector<1x8xf32>
    %268 = vector.multi_reduction <maximumf>, %267, %cst_84 [2] : vector<1x8x8xf32> to vector<1x8xf32>
    %269 = vector.shape_cast %268 : vector<1x8xf32> to vector<1x8x1xf32>
    %270 = vector.broadcast %269 : vector<1x8x1xf32> to vector<1x8x8xf32>
    %271 = arith.subf %267, %270 : vector<1x8x8xf32>
    %272 = math.exp %271 : vector<1x8x8xf32>
    %cst_85 = arith.constant dense<0.000000e+00> : vector<1x8xf32>
    %273 = vector.multi_reduction <add>, %272, %cst_85 [2] : vector<1x8x8xf32> to vector<1x8xf32>
    %274 = vector.shape_cast %273 : vector<1x8xf32> to vector<1x8x1xf32>
    %275 = tpu.reciprocal %274 {approx = true} : vector<1x8x1xf32> -> vector<1x8x1xf32>
    %276 = vector.broadcast %275 : vector<1x8x1xf32> to vector<1x8x8xf32>
    %277 = arith.mulf %272, %276 : vector<1x8x8xf32>
    %278 = arith.truncf %277 : vector<1x8x8xf32> to vector<1x8x8xbf16>
    %279 = vector.extract_strided_slice %190 {offsets = [0, 0, 24], sizes = [1, 8, 8], strides = [1, 1, 1]} : vector<1x8x32xbf16> to vector<1x8x8xbf16>
    "tpu.trace_start"() <{level = 10 : i32, message = "bqk,bkd->bqd"}> : () -> ()
    %cst_86 = arith.constant dense<0.000000e+00> : vector<1x8x8xf32>
    %280 = tpu.matmul %278, %279, %cst_86 {dimension_numbers = #tpu.dot_dimension_numbers<[2], [1], [1], [2], [0, 0, 0, 1, 1, 2], [0], [0]>} : vector<1x8x8xbf16>, vector<1x8x8xbf16>, vector<1x8x8xf32> -> vector<1x8x8xf32>
    "tpu.trace_stop"() : () -> ()
    %281 = tpu.concatenate %214, %236, %258, %280 in 2 : vector<1x8x8xf32>, vector<1x8x8xf32>, vector<1x8x8xf32>, vector<1x8x8xf32> -> vector<1x8x32xf32>
    %282 = arith.truncf %281 : vector<1x8x32xf32> to vector<1x8x32xbf16>
    %283 = vector.shape_cast %282 : vector<1x8x32xbf16> to vector<8x32xbf16>
    %c0_87 = arith.constant 0 : index
    %c0_88 = arith.constant 0 : index
    %284 = vector.load %arg12[%c0_87, %c0_88] : memref<32x32xbf16, #tpu.memory_space<vmem>>, vector<32x32xbf16>
    %cst_89 = arith.constant dense<0.000000e+00> : vector<8x32xf32>
    %285 = tpu.matmul %283, %284, %cst_89 {dimension_numbers = #tpu.dot_dimension_numbers<[1], [0], [0], [1], [0, 0, 1, 1], [], []>} : vector<8x32xbf16>, vector<32x32xbf16>, vector<8x32xf32> -> vector<8x32xf32>
    %286 = vector.broadcast %12 : vector<1x32xf32> to vector<8x32xf32>
    %287 = arith.addf %285, %286 : vector<8x32xf32>
    %288 = vector.shape_cast %287 : vector<8x32xf32> to vector<1x8x32xf32>
    %289 = arith.addf %149, %288 : vector<1x8x32xf32>
    %290 = vector.shape_cast %289 : vector<1x8x32xf32> to vector<8x32xf32>
    %cst_90 = arith.constant dense<0.000000e+00> : vector<8xf32>
    %291 = vector.multi_reduction <add>, %290, %cst_90 [1] : vector<8x32xf32> to vector<8xf32>
    %292 = vector.shape_cast %291 : vector<8xf32> to vector<8x1xf32>
    %cst_91 = arith.constant 3.200000e+01 : f32
    %293 = vector.broadcast %cst_91 : f32 to vector<8x1xf32>
    %294 = arith.divf %292, %293 : vector<8x1xf32>
    %295 = vector.broadcast %294 : vector<8x1xf32> to vector<8x32xf32>
    %296 = arith.subf %290, %295 : vector<8x32xf32>
    %297 = arith.mulf %296, %296 : vector<8x32xf32>
    %cst_92 = arith.constant dense<0.000000e+00> : vector<8xf32>
    %298 = vector.multi_reduction <add>, %297, %cst_92 [1] : vector<8x32xf32> to vector<8xf32>
    %299 = vector.shape_cast %298 : vector<8xf32> to vector<8x1xf32>
    %cst_93 = arith.constant 3.200000e+01 : f32
    %300 = vector.broadcast %cst_93 : f32 to vector<8x1xf32>
    %301 = arith.divf %299, %300 : vector<8x1xf32>
    %302 = vector.broadcast %294 : vector<8x1xf32> to vector<8x32xf32>
    %303 = arith.subf %290, %302 : vector<8x32xf32>
    %cst_94 = arith.constant 9.99999974E-6 : f32
    %304 = vector.broadcast %cst_94 : f32 to vector<8x1xf32>
    %305 = arith.addf %301, %304 : vector<8x1xf32>
    %306 = math.rsqrt %305 : vector<8x1xf32>
    %307 = vector.broadcast %306 : vector<8x1xf32> to vector<8x32xf32>
    %308 = arith.mulf %303, %307 : vector<8x32xf32>
    %309 = vector.broadcast %13 : vector<1x32xf32> to vector<8x32xf32>
    %310 = arith.mulf %308, %309 : vector<8x32xf32>
    %311 = vector.broadcast %14 : vector<1x32xf32> to vector<8x32xf32>
    %312 = arith.addf %310, %311 : vector<8x32xf32>
    %c0_95 = arith.constant 0 : index
    %c0_96 = arith.constant 0 : index
    %313 = vector.load %arg13[%c0_95, %c0_96] : memref<32x64xbf16, #tpu.memory_space<vmem>>, vector<32x64xbf16>
    %314 = arith.truncf %312 : vector<8x32xf32> to vector<8x32xbf16>
    %cst_97 = arith.constant dense<0.000000e+00> : vector<8x64xf32>
    %315 = tpu.matmul %314, %313, %cst_97 {dimension_numbers = #tpu.dot_dimension_numbers<[1], [0], [0], [1], [0, 0, 1, 1], [], []>} : vector<8x32xbf16>, vector<32x64xbf16>, vector<8x64xf32> -> vector<8x64xf32>
    %c0_98 = arith.constant 0 : index
    %c0_99 = arith.constant 0 : index
    %316 = vector.load %arg14[%c0_98, %c0_99] : memref<1x64xf32, #tpu.memory_space<vmem>>, vector<1x64xf32>
    %317 = vector.broadcast %316 : vector<1x64xf32> to vector<8x64xf32>
    %318 = arith.addf %315, %317 : vector<8x64xf32>
    %cst_100 = arith.constant 5.000000e-01 : f32
    %319 = vector.broadcast %cst_100 : f32 to vector<8x64xf32>
    %320 = arith.mulf %319, %318 : vector<8x64xf32>
    %cst_101 = arith.constant 0.707106769 : f32
    %321 = vector.broadcast %cst_101 : f32 to vector<8x64xf32>
    %322 = arith.mulf %318, %321 : vector<8x64xf32>
    %cst_102 = arith.constant 0.000000e+00 : f32
    %323 = vector.broadcast %cst_102 : f32 to vector<8x64xf32>
    %324 = arith.cmpf oge, %322, %323 : vector<8x64xf32>
    %cst_103 = arith.constant 1.000000e+00 : f32
    %cst_104 = arith.constant -1.000000e+00 : f32
    %325 = vector.broadcast %cst_103 : f32 to vector<8x64xf32>
    %326 = vector.broadcast %cst_104 : f32 to vector<8x64xf32>
    %327 = arith.select %324, %325, %326 : vector<8x64xi1>, vector<8x64xf32>
    %cst_105 = arith.constant 0.000000e+00 : f32
    %328 = vector.broadcast %cst_105 : f32 to vector<8x64xf32>
    %329 = arith.cmpf oge, %322, %328 : vector<8x64xf32>
    %cst_106 = arith.constant 0.000000e+00 : f32
    %330 = vector.broadcast %cst_106 : f32 to vector<8x64xf32>
    %331 = arith.subf %330, %322 : vector<8x64xf32>
    %332 = arith.select %329, %322, %331 : vector<8x64xi1>, vector<8x64xf32>
    %cst_107 = arith.constant 0.327591091 : f32
    %333 = vector.broadcast %cst_107 : f32 to vector<8x64xf32>
    %334 = arith.mulf %333, %332 : vector<8x64xf32>
    %cst_108 = arith.constant 1.000000e+00 : f32
    %335 = vector.broadcast %cst_108 : f32 to vector<8x64xf32>
    %336 = arith.addf %335, %334 : vector<8x64xf32>
    %cst_109 = arith.constant 1.000000e+00 : f32
    %337 = vector.broadcast %cst_109 : f32 to vector<8x64xf32>
    %338 = arith.divf %337, %336 : vector<8x64xf32>
    %cst_110 = arith.constant 1.06140542 : f32
    %339 = vector.broadcast %cst_110 : f32 to vector<8x64xf32>
    %340 = arith.mulf %339, %338 : vector<8x64xf32>
    %cst_111 = arith.constant -1.45315206 : f32
    %341 = vector.broadcast %cst_111 : f32 to vector<8x64xf32>
    %342 = arith.addf %340, %341 : vector<8x64xf32>
    %343 = arith.mulf %342, %338 : vector<8x64xf32>
    %cst_112 = arith.constant 1.42141378 : f32
    %344 = vector.broadcast %cst_112 : f32 to vector<8x64xf32>
    %345 = arith.addf %343, %344 : vector<8x64xf32>
    %346 = arith.mulf %345, %338 : vector<8x64xf32>
    %cst_113 = arith.constant -0.284496725 : f32
    %347 = vector.broadcast %cst_113 : f32 to vector<8x64xf32>
    %348 = arith.addf %346, %347 : vector<8x64xf32>
    %349 = arith.mulf %348, %338 : vector<8x64xf32>
    %cst_114 = arith.constant 0.254829586 : f32
    %350 = vector.broadcast %cst_114 : f32 to vector<8x64xf32>
    %351 = arith.addf %349, %350 : vector<8x64xf32>
    %352 = arith.mulf %351, %338 : vector<8x64xf32>
    %cst_115 = arith.constant 0.000000e+00 : f32
    %353 = vector.broadcast %cst_115 : f32 to vector<8x64xf32>
    %354 = arith.subf %353, %332 : vector<8x64xf32>
    %355 = arith.mulf %354, %332 : vector<8x64xf32>
    %356 = math.exp %355 : vector<8x64xf32>
    %357 = arith.mulf %352, %356 : vector<8x64xf32>
    %cst_116 = arith.constant 1.000000e+00 : f32
    %358 = vector.broadcast %cst_116 : f32 to vector<8x64xf32>
    %359 = arith.subf %358, %357 : vector<8x64xf32>
    %360 = arith.mulf %327, %359 : vector<8x64xf32>
    %cst_117 = arith.constant 1.000000e+00 : f32
    %361 = vector.broadcast %cst_117 : f32 to vector<8x64xf32>
    %362 = arith.addf %361, %360 : vector<8x64xf32>
    %363 = arith.mulf %320, %362 : vector<8x64xf32>
    %c0_118 = arith.constant 0 : index
    %c0_119 = arith.constant 0 : index
    %364 = vector.load %arg15[%c0_118, %c0_119] : memref<64x32xbf16, #tpu.memory_space<vmem>>, vector<64x32xbf16>
    %365 = arith.truncf %363 : vector<8x64xf32> to vector<8x64xbf16>
    %cst_120 = arith.constant dense<0.000000e+00> : vector<8x32xf32>
    %366 = tpu.matmul %365, %364, %cst_120 {dimension_numbers = #tpu.dot_dimension_numbers<[1], [0], [0], [1], [0, 0, 1, 1], [], []>} : vector<8x64xbf16>, vector<64x32xbf16>, vector<8x32xf32> -> vector<8x32xf32>
    %367 = arith.addf %290, %366 : vector<8x32xf32>
    %368 = vector.broadcast %15 : vector<1x32xf32> to vector<8x32xf32>
    %369 = arith.addf %367, %368 : vector<8x32xf32>
    %370 = vector.shape_cast %369 : vector<8x32xf32> to vector<1x8x32xf32>
    %371 = arith.truncf %370 : vector<1x8x32xf32> to vector<1x8x32xbf16>
    %c0_121 = arith.constant 0 : index
    %c0_122 = arith.constant 0 : index
    %c0_123 = arith.constant 0 : index
    %372 = vector.load %arg16[%c0_121, %c0_122, %c0_123] : memref<1x8x32xbf16, #tpu.memory_space<vmem>>, vector<1x8x32xbf16>
    tpu.vector_store %arg16[%c0_121, %c0_122, %c0_123], %371 {strides = array<i32>} : memref<1x8x32xbf16, #tpu.memory_space<vmem>>, vector<1x8x32xbf16>,
    return
  }
  func.func @transform_0(%arg0: i32) -> (i32, i32, i32) {
    %c0_i32 = arith.constant 0 : i32
    %c0_i32_0 = arith.constant 0 : i32
    %c0_i32_1 = arith.constant 0 : i32
    return %arg0, %c0_i32, %c0_i32_0 : i32, i32, i32
  }
  func.func @transform_1(%arg0: i32) -> (i32, i32, i32) {
    %c0_i32 = arith.constant 0 : i32
    %c0_i32_0 = arith.constant 0 : i32
    %c0_i32_1 = arith.constant 0 : i32
    return %arg0, %c0_i32, %c0_i32_0 : i32, i32, i32
  }
  func.func @transform_2(%arg0: i32) -> (i32, i32, i32) {
    %c0_i32 = arith.constant 0 : i32
    %c0_i32_0 = arith.constant 0 : i32
    %c0_i32_1 = arith.constant 0 : i32
    return %arg0, %c0_i32, %c0_i32_0 : i32, i32, i32
  }
  func.func @transform_3(%arg0: i32) -> (i32, i32, i32) {
    %c0_i32 = arith.constant 0 : i32
    %c0_i32_0 = arith.constant 0 : i32
    %c0_i32_1 = arith.constant 0 : i32
    return %arg0, %c0_i32, %c0_i32_0 : i32, i32, i32
  }
  func.func @transform_4(%arg0: i32) -> (i32, i32) {
    %c0_i32 = arith.constant 0 : i32
    %c0_i32_0 = arith.constant 0 : i32
    %c0_i32_1 = arith.constant 0 : i32
    return %c0_i32, %c0_i32_0 : i32, i32
  }
  func.func @transform_5(%arg0: i32) -> (i32, i32) {
    %c0_i32 = arith.constant 0 : i32
    %c0_i32_0 = arith.constant 0 : i32
    %c0_i32_1 = arith.constant 0 : i32
    return %c0_i32, %c0_i32_0 : i32, i32
  }
  func.func @transform_6(%arg0: i32) -> (i32, i32) {
    %c0_i32 = arith.constant 0 : i32
    %c0_i32_0 = arith.constant 0 : i32
    %c0_i32_1 = arith.constant 0 : i32
    return %c0_i32, %c0_i32_0 : i32, i32
  }
  func.func @transform_7(%arg0: i32) -> (i32, i32) {
    %c0_i32 = arith.constant 0 : i32
    %c0_i32_0 = arith.constant 0 : i32
    %c0_i32_1 = arith.constant 0 : i32
    return %c0_i32, %c0_i32_0 : i32, i32
  }
  func.func @transform_8(%arg0: i32) -> (i32, i32) {
    %c0_i32 = arith.constant 0 : i32
    %c0_i32_0 = arith.constant 0 : i32
    %c0_i32_1 = arith.constant 0 : i32
    return %c0_i32, %c0_i32_0 : i32, i32
  }
  func.func @transform_9(%arg0: i32) -> (i32, i32) {
    %c0_i32 = arith.constant 0 : i32
    %c0_i32_0 = arith.constant 0 : i32
    %c0_i32_1 = arith.constant 0 : i32
    return %c0_i32, %c0_i32_0 : i32, i32
  }
  func.func @transform_10(%arg0: i32) -> (i32, i32) {
    %c0_i32 = arith.constant 0 : i32
    %c0_i32_0 = arith.constant 0 : i32
    %c0_i32_1 = arith.constant 0 : i32
    return %c0_i32, %c0_i32_0 : i32, i32
  }
  func.func @transform_11(%arg0: i32) -> (i32, i32) {
    %c0_i32 = arith.constant 0 : i32
    %c0_i32_0 = arith.constant 0 : i32
    %c0_i32_1 = arith.constant 0 : i32
    return %c0_i32, %c0_i32_0 : i32, i32
  }
  func.func @transform_12(%arg0: i32) -> (i32, i32) {
    %c0_i32 = arith.constant 0 : i32
    %c0_i32_0 = arith.constant 0 : i32
    %c0_i32_1 = arith.constant 0 : i32
    return %c0_i32, %c0_i32_0 : i32, i32
  }
  func.func @transform_13(%arg0: i32) -> (i32, i32) {
    %c0_i32 = arith.constant 0 : i32
    %c0_i32_0 = arith.constant 0 : i32
    %c0_i32_1 = arith.constant 0 : i32
    return %c0_i32, %c0_i32_0 : i32, i32
  }
  func.func @transform_14(%arg0: i32) -> (i32, i32) {
    %c0_i32 = arith.constant 0 : i32
    %c0_i32_0 = arith.constant 0 : i32
    %c0_i32_1 = arith.constant 0 : i32
    return %c0_i32, %c0_i32_0 : i32, i32
  }
  func.func @transform_15(%arg0: i32) -> (i32, i32, i32) {
    %c0_i32 = arith.constant 0 : i32
    %c0_i32_0 = arith.constant 0 : i32
    %c0_i32_1 = arith.constant 0 : i32
    return %arg0, %c0_i32, %c0_i32_0 : i32, i32, i32
  }
}

</mosaic_0001>

<bundles_post_ra>
// kernel: transformer_forward.9
= control target key start
LH: loop header
LB: loop body
LE: loop exit
PB: predicated region body
PF: predicated region fallthrough
CT: control target
= control target key end

     0   :  { %v179_v1 = vmov 0.0   ;;  %vm48_vm0 = vcmask 261120   ;;  %vm180_vm1 = vmmov 0   ;;  %s222_s0 = inlined_call_operand.vmem [shape: bf16[16,32], index: 0, kind: input, shape index: {}]   ;;  %s223_s1 = inlined_call_operand.vmem [shape: bf16[64,32], index: 1, kind: input, shape index: {}]   ;;  %s224_s2 = inlined_call_operand.hbm [shape: f32[16,64], index: 2, kind: output, shape index: {}]  }
   0x1   :  { %v152_v0 = vld [vmem:[%s223_s1 + $0x18] sm:$0xff]   ;;  %135 = vmatprep.subr.bf16.mxu0 %v179_v1  ;;  %v153_v3 = vld [vmem:[%s223_s1 + $0x10] sm:$0xff]   ;;  %143 = vmatprep.mubr.msk.bf16.mxu0 %vm180_vm1, %v179_v1 }
   0x2   :  { %v62_v2 = vsel %vm48_vm0, %v152_v0, 0 }
   0x3   :  { %136 = vmatpush3.bf16.xpose.msra.mxu0 %v62_v2 }
   0x4   :  { %137 = vmatprep.subr.bf16.mxu0 %v179_v1 }
   0x5   :  { %7 = vsyncpa [#allocation3], 0  ;;  %v59_v4 = vsel %vm48_vm0, %v153_v3, 0  ;;  %v154_v5 = vld [vmem:[%s223_s1 + $0x8] sm:$0xff]   ;;  %v155_v7 = vld [vmem:[%s223_s1] sm:$0xff]   ;;  %vm105_vm2 = vcmask 523264  }
   0x6   :  { %v56_v6 = vsel %vm48_vm0, %v154_v5, 0  ;;  %v53_v8 = vsel %vm48_vm0, %v155_v7, 0  ;;  %v156_v9 = vld [vmem:[%s222_s0] sm:$0xff]   ;;  %s181_s19 = smov [#allocation2]  }
   0x7   :  { %s113_s20 = sshll.u32 %s181_s19, 4  ;;  %s114_s20 = int_to_ptr.vmem [resolvable:$true] %s113_s20 }
   0x8   :  { %s157_s1 = scalar_lea.vmem %s114_s20, 256  ;;  %p162_p1 = scmp.lt.s32.totalorder %s114_s20, %s114_s20 }
   0x9   :  { %p158_p0 = scmp.ne.s32.totalorder %s114_s20, %s157_s1  ;;  %p163_p2 = scmp.lt.s32.totalorder %s157_s1, %s157_s1 }
   0xb   :  { %138 = vmatpush3.bf16.xpose.msra.mxu0 %v59_v4  ;;  %p164_p3 = por %p163_p2, %p162_p1 }
   0xc   :  { %139 = vmatprep.subr.bf16.mxu0 %v179_v1 }
   0xd   :  { %p165_p4 = pnand %p164_p3, %p158_p0 }
  0x13   :  { %140 = vmatpush3.bf16.xpose.msra.mxu0 %v56_v6 }
  0x14   :  { %141 = vmatprep.subr.bf16.mxu0 %v179_v1 }
  0x1b   :  { %142 = vmatpush3.bf16.xpose.msra.mxu0 %v53_v8 }
  0x22   :  { %144 = vmatmul.mubr.msk.bf16.vlgmr.msra.gmra.mxu0 %vm48_vm0, %v156_v9 }
  0xe2   :  { %v98_v10 = vpop.f32.mrf.mxu0 }
  0xe3   :  { %106 = vst.msk [vmem:[#allocation2] sm:$0xff] %vm105_vm2, %v98_v10 }
  0xe4   :  { %v145_v11 = vpop.f32.mrf.mxu0 }
  0xe6   :  { %v101_v12 = vpop.f32.mrf.mxu0 }
  0xe7   :  { %107 = vst.msk [vmem:[#allocation2 + $0x8] sm:$0xff] %vm105_vm2, %v101_v12 }
  0xe8   :  { %v146_v13 = vpop.f32.mrf.mxu0 }
  0xe9   :  { %168 = shalt.err (!%p165_p4)
}
  0xea   :  { %s182_s0 = smov 128   ;;  %s183_s21 = smov 8  }
  0xeb   :  { %119 = dma.vmem_to_hbm [thread:$0]  %s114_s20, 256, %s224_s2, [#allocation3], %s182_s0, %s182_s0, %s183_s21  }
  0xec   :  { %177 = dma.done.wait [#allocation3], 256  }
  0xed   :  { %178 = vsyncadd [#allocation3], 4294967040 }
  0xee   :  { %123 = vsyncpa [#allocation3], 1 }

// kernel: transformer_forward.5
= control target key start
LH: loop header
LB: loop body
LE: loop exit
PB: predicated region body
PF: predicated region fallthrough
CT: control target
= control target key end

     0   :  { %s1527_s30 = smov 0   ;;  %s1718_s0 = inlined_call_operand.vmem [shape: bf16[2,8,32], index: 0, kind: input, shape index: {}]   ;;  %s1719_s1 = inlined_call_operand.vmem [shape: s32[2,1,8], index: 1, kind: input, shape index: {}]   ;;  %s1720_s2 = inlined_call_operand.vmem [shape: f32[6,32], index: 2, kind: input, shape index: {}]   ;;  %s1721_s3 = inlined_call_operand.vmem [shape: bf16[32,96], index: 3, kind: input, shape index: {}]   ;;  %s1722_s4 = inlined_call_operand.vmem [shape: f32[1,96], index: 4, kind: input, shape index: {}]   ;;  %s1723_s5 = inlined_call_operand.vmem [shape: bf16[32,32], index: 5, kind: input, shape index: {}]   ;;  %s1724_s6 = inlined_call_operand.vmem [shape: bf16[32,64], index: 6, kind: input, shape index: {}]   ;;  %s1725_s7 = inlined_call_operand.vmem [shape: f32[1,64], index: 7, kind: input, shape index: {}]   ;;  %s1726_s8 = inlined_call_operand.vmem [shape: bf16[64,32], index: 8, kind: input, shape index: {}]   ;;  %s1727_s9 = inlined_call_operand.vmem [shape: bf16[2,8,32], index: 9, kind: output, shape index: {}]  }
   0x1 LB: > { %s1244_s10 = sadd.s32 4294967295, %s1457_s30   ;;  %p1248_p0 = scmp.ge.s32.totalorder %s1457_s30, 1  ;;  %s1457_s30 = sphi %s1527_s30, %s19_s30  }
   0x2   : > { %p294_p1 = scmp.lt.s32.totalorder %s1457_s30, 3 }
   0x4   : > { %p295_p2 = pnand %p1248_p0, %p294_p1 }
   0x5   : > { %p331_p3 = scmp.lt.s32.totalorder (!%p295_p2), %s1244_s10, 1  ;;  %s1461_s23 = smov (!%p295_p2), 120  }
   0x6   : > { %298 = sbr.rel (%p295_p2) target bundleno = 2484 (0x9b4), region = 56  ;;  %s1462_s24 = smov (!%p295_p2), 96  }
   0x7   : > { %s1463_s25 = smov (!%p295_p2), 88   ;;  %s1464_s26 = smov (!%p295_p2), 80  }
   0x8   : > { %s1465_s27 = smov (!%p295_p2), 112   ;;  %s1466_s28 = smov (!%p295_p2), 72  }
   0x9   : > { %s1467_s29 = smov (!%p295_p2), 104   ;;  %s1469_s15 = smov (!%p295_p2), 64  }
   0xa   : > { %s1470_s16 = smov (!%p295_p2), 56   ;;  %s1471_s17 = smov (!%p295_p2), 48  }
   0xb   : > { %s1729_s10 = smov (!%p331_p3, %s1244_s10), 1  ;;  %vm347_vm0 = vcmask 261120   ;;  %v1417_v8 = vld [vmem:[%s1721_s3 + $0x8] sm:$0xff]   ;;  %v1459_v9 = vmov 0.0   ;;  %vm1460_vm1 = vmmov 0   ;;  %v1418_v10 = vld [vmem:[%s1721_s3] sm:$0xff]   ;;  %v362_v14 = vlaneseq }
   0xc   : > { %s1249_s11 = sshll.u32 %s1729_s10, 2  ;;  %1307 = vmatprep.subr.bf16.mxu0 %v1459_v9  ;;  %1311 = vmatprep.mubr.msk.bf16.mxu0 %vm1460_vm1, %v1459_v9  ;;  %v1569_v17 = vld [vmem:[%s1720_s2] sm:$0x3f]  ;;  %vm444_vm2 = vcmask 64512   ;;  %v1468_v45 = vmov 0   ;;  %s1472_s18 = smov 40  }
   0xd   : > { %s334_s14 = scalar_lea.vmem %s1718_s0, %s1249_s11  ;;  %1308 = vmatpush3.bf16.msra.mxu0 %v1417_v8  ;;  %1315 = vmatprep.subr.bf16.mxu1 %v1459_v9  ;;  %v1563_v15 = vshrl.u32 %v362_v14, 7  ;;  %v1251_v26 = vld [vmem:[%s1722_s4] ss:$0 sm:$0xff]  ;;  %vm516_vm5 = vcmask 1043456   ;;  %s1473_s19 = smov 8   ;;  %vm909_vm6 = vcmask 130048  }
   0xe   : > { %v343_v0 = vld [vmem:[%s334_s14] sm:$0xf]  ;;  %1309 = vmatprep.subr.bf16.mxu0 %v1459_v9  ;;  %1317 = vmatprep.mubr.msk.bf16.mxu1 %vm1460_vm1, %v1459_v9  ;;  %s337_s14 = scalar_lea.vmem %s1719_s1, %s1729_s10  ;;  %vm911_vm7 = vcmask 195584   ;;  %vm1129_vm9 = vcmask 523264   ;;  %vm1180_vm10 = vcmask 257024  }
   0xf   : > { %v1543_v1 = vunpack.c.l.bf16 %v343_v0  ;;  %v364_v16 = vsub.s32 0, %v1563_v15  ;;  %v369_v18 = vsub.s32 1, %v1563_v15  ;;  %v345_v44 = vld [vmem:[%s337_s14] sm:$0x1] }
  0x10   : > { %vm440_vm3 = vcmp.eq.s32.totalorder %v345_v44, 0 }
  0x11   : > { %v348_v2 = vsel %vm347_vm0, %v1543_v1, 0.0  ;;  %1310 = vmatpush3.bf16.msra.mxu0 %v1418_v10  ;;  %v365_v19 = vrot.slane %v1569_v17, %v364_v16  ;;  %v370_v22 = vrot.slane %v1569_v17, %v369_v18  ;;  %v492_v46 = vsel %vm440_vm3, 1, %v1468_v45 }
  0x12   : > { %349 = vadd.xlane.f32.xlu0 %v348_v2  ;;  %1321 = vmatprep.subr.bf16.mxu0 %v1459_v9  ;;  %v496_v47 = vrot.slane %v492_v46, %v364_v16 }
  0x14   : > { %vm497_vm4 = vcmp.eq.s32.totalorder %v496_v47, 1 }
  0x9b   : > { %v350_v3 = vpop.xlane.xlu0 %349 }
  0x9c   : > { %v352_v4 = vmul.f32 0.03125, %v350_v3 }
  0x9e   : > { %v353_v5 = vsub.f32 %v1543_v1, %v352_v4 }
  0xa0   : > { %v354_v6 = vmul.f32 %v353_v5, %v353_v5 }
  0xa2   : > { %v355_v7 = vsel %vm347_vm0, %v354_v6, 0.0 }
  0xa3   : > { %356 = vadd.xlane.f32.xlu0 %v355_v7 }
 0x12c   : > { %v357_v11 = vpop.xlane.xlu0 %356 }
 0x12d   : > { %v358_v12 = vmul.f32 0.03125, %v357_v11 }
 0x12f   : > { %v359_v13 = vadd.f32 1e-05, %v358_v12 }
 0x131   : > { %1427 = vrsqrt.f32 %v359_v13 }
 0x13e   : > { %v1428_v20 = vpop.eup %1427 }
 0x13f   : > { %v361_v21 = vmul.f32 %v1428_v20, %v353_v5 }
 0x141   : > { %v366_v23 = vmul.f32 %v365_v19, %v361_v21 }
 0x143   : > { %v371_v24 = vadd.f32 %v370_v22, %v366_v23 }
 0x145   : > { %v376_v25 = vpack.c.bf16 %v371_v24, %v371_v24 }
 0x147   : > { %1312 = vmatmul.mubr.msk.bf16.vlgmr.msra.gmra.mxu0 %vm347_vm0, %v376_v25 }
 0x148   : > { %1323 = vmatprep.mubr.msk.bf16.mxu0 %vm1460_vm1, %v1459_v9 }
 0x207   : > { %v433_v27 = vpop.f32.mrf.mxu0 }
 0x208   : > { %v434_v28 = vadd.f32 %v1251_v26, %v433_v27 }
 0x209   : > { %v1313_v29 = vpop.f32.mrf.mxu0 }
 0x20a   : > { %v1582_v30 = vpack.c.bf16 %v434_v28, %v434_v28 }
 0x20b   : > { %v436_v31 = vpop.f32.mrf.mxu0 }
 0x20c   : > { %560 = vrot.lane.b32.xlu0 %v1582_v30, %s1461_s23  ;;  %442 = vrot.lane.b32.xlu1 %v1582_v30, %s1462_s24  ;;  %s1474_s24 = smov 16  }
 0x20d   : > { %v1314_v32 = vpop.f32.mrf.mxu0 }
 0x210   : > { %562 = vrot.lane.b32.xlu1 %v1582_v30, %s1463_s25  ;;  %s1475_s25 = smov 24  }
 0x214   : > { %674 = vrot.lane.b32.xlu1 %v1582_v30, %s1464_s26 }
 0x218   : > { %672 = vrot.lane.b32.xlu1 %v1582_v30, %s1465_s27 }
 0x21c   : > { %786 = vrot.lane.b32.xlu1 %v1582_v30, %s1466_s28 }
 0x220   : > { %784 = vrot.lane.b32.xlu1 %v1582_v30, %s1467_s29 }
 0x27e   : > { %v443_v33 = vpop.permute.xlu1 %442  ;;  %v561_v38 = vpop.permute.xlu0 %560 }
 0x27f   : > { %v449_v34 = vsel %vm444_vm2, %v443_v33, 0 }
 0x280   : > { %1316 = vmatpush3.bf16.xpose.msra.mxu1 %v449_v34 }
 0x281   : > { %1327 = vmatprep.subr.bf16.mxu1 %v1459_v9 }
 0x282   : > { %v563_v35 = vpop.permute.xlu1 %562 }
 0x283   : > { %v568_v36 = vsel %vm444_vm2, %v563_v35, 0 }
 0x286   : > { %v675_v37 = vpop.permute.xlu1 %674 }
 0x287   : > { %1318 = vmatmul.mubr.msk.bf16.vlgmr.msra.gmra.mxu1 %vm444_vm2, %v1582_v30  ;;  %v680_v40 = vsel %vm444_vm2, %v675_v37, 0 }
 0x288   : > { %1328 = vmatpush3.bf16.xpose.msra.mxu1 %v568_v36  ;;  %1329 = vmatprep.mubr.msk.bf16.mxu1 %vm1460_vm1, %v1459_v9 }
 0x289   : > { %1339 = vmatprep.subr.bf16.mxu1 %v1459_v9 }
 0x28a   : > { %v673_v39 = vpop.permute.xlu1 %672 }
 0x28e   : > { %v787_v41 = vpop.permute.xlu1 %786 }
 0x28f   : > { %1330 = vmatmul.mubr.msk.bf16.vlgmr.msra.gmra.mxu1 %vm444_vm2, %v561_v38  ;;  %v792_v42 = vsel %vm444_vm2, %v787_v41, 0 }
 0x290   : > { %1340 = vmatpush3.bf16.xpose.msra.mxu1 %v680_v40  ;;  %1341 = vmatprep.mubr.msk.bf16.mxu1 %vm1460_vm1, %v1459_v9 }
 0x291   : > { %1351 = vmatprep.subr.bf16.mxu1 %v1459_v9 }
 0x292   : > { %v785_v43 = vpop.permute.xlu1 %784 }
 0x297   : > { %1342 = vmatmul.mubr.msk.bf16.vlgmr.msra.gmra.mxu1 %vm444_vm2, %v673_v39 }
 0x298   : > { %1352 = vmatpush3.bf16.xpose.msra.mxu1 %v792_v42  ;;  %1353 = vmatprep.mubr.msk.bf16.mxu1 %vm1460_vm1, %v1459_v9 }
 0x299   : > { %1363 = vmatprep.subr.bf16.mxu1 %v1459_v9 }
 0x29f   : > { %1354 = vmatmul.mubr.msk.bf16.vlgmr.msra.gmra.mxu1 %vm444_vm2, %v785_v43 }
 0x2a0   : > { %1367 = vmatprep.mubr.msk.bf16.mxu1 %vm1460_vm1, %v1459_v9 }
 0x347   : > { %v485_v48 = vpop.f32.mrf.mxu1 }
 0x348   : > { %v491_v49 = vmul.f32 0.35355338, %v485_v48 }
 0x349   : > { %v1319_v50 = vpop.f32.mrf.mxu1 }
 0x34a   : > { %v498_v51 = vsel %vm497_vm4, -10000.0, %v491_v49 }
 0x34b   : > { %v488_v52 = vpop.f32.mrf.mxu1  ;;  %v499_v53 = vsel %vm444_vm2, %v498_v51, -inf }
 0x34c   : > { %500 = vmax.xlane.f32.xlu1 %v499_v53 }
 0x34d   : > { %v1320_v54 = vpop.f32.mrf.mxu1 }
 0x34f   : > { %v604_v55 = vpop.f32.mrf.mxu1 }
 0x350   : > { %v610_v56 = vmul.f32 0.35355338, %v604_v55 }
 0x351   : > { %v1331_v57 = vpop.f32.mrf.mxu1 }
 0x352   : > { %v611_v58 = vsel %vm497_vm4, -10000.0, %v610_v56 }
 0x353   : > { %v607_v59 = vpop.f32.mrf.mxu1  ;;  %v612_v60 = vsel %vm444_vm2, %v611_v58, -inf }
 0x354   : > { %613 = vmax.xlane.f32.xlu0 %v612_v60 }
 0x355   : > { %v1332_v61 = vpop.f32.mrf.mxu1 }
 0x357   : > { %v716_v62 = vpop.f32.mrf.mxu1 }
 0x358   : > { %v722_v63 = vmul.f32 0.35355338, %v716_v62 }
 0x359   : > { %v1343_v0 = vpop.f32.mrf.mxu1 }
 0x35a   : > { %v723_v2 = vsel %vm497_vm4, -10000.0, %v722_v63 }
 0x35b   : > { %v719_v3 = vpop.f32.mrf.mxu1  ;;  %v724_v4 = vsel %vm444_vm2, %v723_v2, -inf }
 0x35c   : > { %725 = vmax.xlane.f32.xlu1 %v724_v4 }
 0x35d   : > { %v1344_v5 = vpop.f32.mrf.mxu1 }
 0x35e   : > { %v1419_v5 = vld [vmem:[%s1723_s5 + $0x8] sm:$0xff]  }
 0x35f   : > { %v828_v6 = vpop.f32.mrf.mxu1  ;;  %1364 = vmatpush3.bf16.msra.mxu1 %v1419_v5 }
 0x360   : > { %v834_v7 = vmul.f32 0.35355338, %v828_v6  ;;  %v1420_v6 = vld [vmem:[%s1723_s5] sm:$0xff]   ;;  %1365 = vmatprep.subr.bf16.mxu1 %v1459_v9 }
 0x361   : > { %v1355_v8 = vpop.f32.mrf.mxu1 }
 0x362   : > { %v835_v10 = vsel %vm497_vm4, -10000.0, %v834_v7 }
 0x363   : > { %v831_v11 = vpop.f32.mrf.mxu1  ;;  %v836_v12 = vsel %vm444_vm2, %v835_v10, -inf  ;;  %1366 = vmatpush3.bf16.msra.mxu1 %v1420_v6 }
 0x364   : > { %837 = vmax.xlane.f32.xlu0 %v836_v12  ;;  %1379 = vmatprep.subr.bf16.mxu1 %v1459_v9 }
 0x365   : > { %v1356_v13 = vpop.f32.mrf.mxu1 }
 0x3d5   : > { %v501_v14 = vpop.xlane.xlu1 %500 }
 0x3d6   : > { %v502_v16 = vsub.f32 %v498_v51, %v501_v14 }
 0x3d8   : > { %v503_v18 = vmul.f32 1.442695, %v502_v16 }
 0x3da   : > { %1429 = vpow2.f32 %v503_v18 }
 0x3dd   : > { %v614_v19 = vpop.xlane.xlu0 %613 }
 0x3de   : > { %v615_v20 = vsub.f32 %v611_v58, %v614_v19 }
 0x3e0   : > { %v616_v21 = vmul.f32 1.442695, %v615_v20 }
 0x3e2   : > { %1431 = vpow2.f32 %v616_v21 }
 0x3e5   : > { %v726_v32 = vpop.xlane.xlu1 %725 }
 0x3e6   : > { %v727_v33 = vsub.f32 %v723_v2, %v726_v32 }
 0x3e7   : > { %v1430_v22 = vpop.eup %1429 }
 0x3e8   : > { %v505_v23 = vsel %vm444_vm2, %v1430_v22, 0.0  ;;  %v728_v34 = vmul.f32 1.442695, %v727_v33 }
 0x3e9   : > { %506 = vadd.xlane.f32.xlu1 %v505_v23 }
 0x3ed   : > { %v838_v24 = vpop.xlane.xlu0 %837 }
 0x3ee   : > { %v839_v25 = vsub.f32 %v835_v10, %v838_v24 }
 0x3ef   : > { %v1432_v26 = vpop.eup %1431 }
 0x3f0   : > { %v840_v27 = vmul.f32 1.442695, %v839_v25  ;;  %v618_v28 = vsel %vm444_vm2, %v1432_v26, 0.0  ;;  %v920_v25 = vsub.s32 2, %v1563_v15 }
 0x3f1   : > { %619 = vadd.xlane.f32.xlu0 %v618_v28 }
 0x3f2   : > { %1433 = vpow2.f32 %v840_v27 }
 0x3f3   : > { %1435 = vpow2.f32 %v728_v34 }
 0x3fa   : > { %511 = vrot.lane.b32.xlu1 %v1582_v30, %s1469_s15 }
 0x3ff   : > { %v1434_v29 = vpop.eup %1433 }
 0x400   : > { %v842_v31 = vsel %vm444_vm2, %v1434_v29, 0.0  ;;  %v1436_v35 = vpop.eup %1435 }
 0x401   : > { %843 = vadd.xlane.f32.xlu0 %v842_v31  ;;  %v730_v36 = vsel %vm444_vm2, %v1436_v35, 0.0 }
 0x417   : > { %624 = vrot.lane.b32.xlu0 %v1582_v30, %s1470_s16 }
 0x41e   : > { %731 = vadd.xlane.f32.xlu1 %v730_v36 }
 0x42f   : > { %736 = vrot.lane.b32.xlu1 %v1582_v30, %s1471_s17 }
 0x433   : > { %848 = vrot.lane.b32.xlu1 %v1582_v30, %s1472_s18 }
 0x472   : > { %v507_v37 = vpop.xlane.xlu1 %506 }
 0x473   : > { %1437 = vrcp.f32 %v507_v37 }
 0x476   : > { %v512_v38 = vpop.permute.xlu1 %511 }
 0x477   : > { %v518_v39 = vsel %vm516_vm5, %v512_v38, 0 }
 0x478   : > { %1322 = vmatpush3.bf16.msra.mxu0 %v518_v39 }
 0x479   : > { %1333 = vmatprep.subr.bf16.mxu0 %v1459_v9 }
 0x47a   : > { %v620_v40 = vpop.xlane.xlu0 %619 }
 0x47b   : > { %1439 = vrcp.f32 %v620_v40  ;;  %v1421_v40 = vld [vmem:[%s1724_s6 + $0x8] sm:$0xff]  }
 0x480   : > { %v1438_v41 = vpop.eup %1437 }
 0x481   : > { %v509_v42 = vmul.f32 %v1438_v41, %v1430_v22 }
 0x483   : > { %v510_v43 = vpack.c.bf16 %v509_v42, %v509_v42 }
 0x485   : > { %1324 = vmatmul.mubr.msk.bf16.vlgmr.msra.gmra.mxu0 %vm444_vm2, %v510_v43 }
 0x486   : > { %1335 = vmatprep.mubr.msk.bf16.mxu0 %vm1460_vm1, %v1459_v9 }
 0x488   : > { %v1440_v30 = vpop.eup %1439 }
 0x489   : > { %v622_v45 = vmul.f32 %v1440_v30, %v1432_v26  ;;  %v921_v26 = vrot.slane %v1569_v17, %v920_v25  ;;  %v993_v30 = vsub.s32 3, %v1563_v15 }
 0x48a   : > { %v844_v44 = vpop.xlane.xlu0 %843 }
 0x48b   : > { %v623_v48 = vpack.c.bf16 %v622_v45, %v622_v45  ;;  %v994_v45 = vrot.slane %v1569_v17, %v993_v30 }
 0x48e   : > { %v625_v46 = vpop.permute.xlu0 %624 }
 0x48f   : > { %v630_v47 = vsel %vm516_vm5, %v625_v46, 0 }
 0x490   : > { %1334 = vmatpush3.bf16.msra.mxu0 %v630_v47 }
 0x491   : > { %1345 = vmatprep.subr.bf16.mxu0 %v1459_v9 }
 0x493   : > { %1336 = vmatmul.mubr.msk.bf16.vlgmr.msra.gmra.mxu0 %vm444_vm2, %v623_v48 }
 0x494   : > { %1347 = vmatprep.mubr.msk.bf16.mxu0 %vm1460_vm1, %v1459_v9 }
 0x4a7   : > { %v732_v49 = vpop.xlane.xlu1 %731 }
 0x4a8   : > { %1441 = vrcp.f32 %v732_v49 }
 0x4a9   : > { %1443 = vrcp.f32 %v844_v44  ;;  %v998_v44 = vsub.s32 4, %v1563_v15 }
 0x4ab   : > { %v737_v50 = vpop.permute.xlu1 %736  ;;  %v999_v48 = vrot.slane %v1569_v17, %v998_v44 }
 0x4ac   : > { %v742_v51 = vsel %vm516_vm5, %v737_v50, 0 }
 0x4ad   : > { %1346 = vmatpush3.bf16.msra.mxu0 %v742_v51 }
 0x4ae   : > { %1357 = vmatprep.subr.bf16.mxu0 %v1459_v9 }
 0x4af   : > { %v849_v54 = vpop.permute.xlu1 %848 }
 0x4b0   : > { %v854_v57 = vsel %vm516_vm5, %v849_v54, 0  ;;  %v1425_v54 = vld [vmem:[%s1726_s8 + $0x8] sm:$0xff]  }
 0x4b5   : > { %v1442_v52 = vpop.eup %1441 }
 0x4b6   : > { %v734_v53 = vmul.f32 %v1442_v52, %v1436_v35  ;;  %v1444_v56 = vpop.eup %1443  ;;  %v1423_v52 = vld [vmem:[%s1726_s8 + $0x18] sm:$0xff]  }
 0x4b7   : > { %v846_v58 = vmul.f32 %v1444_v56, %v1434_v29  ;;  %v1266_v56 = vld [vmem:[%s1725_s7] ss:$0 sm:$0xff] }
 0x4b8   : > { %v735_v55 = vpack.c.bf16 %v734_v53, %v734_v53  ;;  %v1424_v53 = vld [vmem:[%s1726_s8 + $0x10] sm:$0xff]  }
 0x4b9   : > { %v847_v59 = vpack.c.bf16 %v846_v58, %v846_v58 }
 0x4ba   : > { %1348 = vmatmul.mubr.msk.bf16.vlgmr.msra.gmra.mxu0 %vm444_vm2, %v735_v55  ;;  %v1426_v55 = vld [vmem:[%s1726_s8] sm:$0xff]  }
 0x4bb   : > { %1358 = vmatpush3.bf16.msra.mxu0 %v854_v57  ;;  %1359 = vmatprep.mubr.msk.bf16.mxu0 %vm1460_vm1, %v1459_v9 }
 0x4bc   : > { %1371 = vmatprep.subr.bf16.mxu0 %v1459_v9 }
 0x4c2   : > { %1360 = vmatmul.mubr.msk.bf16.vlgmr.msra.gmra.mxu0 %vm444_vm2, %v847_v59 }
 0x4c3   : > { %1375 = vmatprep.mubr.msk.bf16.mxu0 %vm1460_vm1, %v1459_v9  ;;  %1372 = vmatpush3.bf16.msra.mxu0 %v1421_v40 }
 0x4c4   : > { %1373 = vmatprep.subr.bf16.mxu0 %v1459_v9 }
 0x545   : > { %v554_v60 = vpop.f32.mrf.mxu0 }
 0x547   : > { %v1325_v61 = vpop.f32.mrf.mxu0 }
 0x549   : > { %v557_v62 = vpop.f32.mrf.mxu0 }
 0x54b   : > { %v1326_v63 = vpop.f32.mrf.mxu0 }
 0x553   : > { %v666_v0 = vpop.f32.mrf.mxu0 }
 0x554   : > { %897 = vrot.lane.b32.xlu0 %v666_v0, %s1473_s19 }
 0x555   : > { %v1337_v2 = vpop.f32.mrf.mxu0 }
 0x557   : > { %v669_v3 = vpop.f32.mrf.mxu0 }
 0x559   : > { %v1338_v4 = vpop.f32.mrf.mxu0 }
 0x57a   : > { %v778_v7 = vpop.f32.mrf.mxu0 }
 0x57b   : > { %901 = vrot.lane.b32.xlu1 %v778_v7, %s1474_s24  ;;  %s341_s24 = scalar_lea.vmem %s1727_s9, %s1249_s11 }
 0x57c   : > { %v1349_v8 = vpop.f32.mrf.mxu0 }
 0x57e   : > { %v781_v10 = vpop.f32.mrf.mxu0 }
 0x580   : > { %v1350_v11 = vpop.f32.mrf.mxu0 }
 0x582   : > { %v890_v12 = vpop.f32.mrf.mxu0 }
 0x583   : > { %905 = vrot.lane.b32.xlu0 %v890_v12, %s1475_s25 }
 0x584   : > { %v1361_v13 = vpop.f32.mrf.mxu0 }
 0x586   : > { %v893_v14 = vpop.f32.mrf.mxu0 }
 0x588   : > { %v1362_v16 = vpop.f32.mrf.mxu0 }
 0x5c6   : > { %v898_v18 = vpop.permute.xlu0 %897 }
 0x5c7   : > { %v908_v20 = vsel %vm444_vm2, %v554_v60, %v898_v18 }
 0x5ed   : > { %v902_v19 = vpop.permute.xlu1 %901 }
 0x5ee   : > { %v910_v21 = vsel %vm909_vm6, %v908_v20, %v902_v19 }
 0x5f5   : > { %v906_v22 = vpop.permute.xlu0 %905 }
 0x5f6   : > { %v912_v23 = vsel %vm911_vm7, %v910_v21, %v906_v22  ;;  %v1476_v22 = vmov -1.0  }
 0x5f7   : > { %v913_v24 = vpack.c.bf16 %v912_v23, %v912_v23 }
 0x5f9   : > { %1368 = vmatmul.mubr.msk.bf16.vlgmr.msra.gmra.mxu1 %vm347_vm0, %v913_v24 }
 0x5fa   : > { %1387 = vmatprep.mubr.msk.bf16.mxu1 %vm1460_vm1, %v1459_v9  ;;  %1380 = vmatpush3.bf16.msra.mxu1 %v1423_v52 }
 0x5fb   : > { %1381 = vmatprep.subr.bf16.mxu1 %v1459_v9 }
 0x5fe   : > { %1382 = vmatpush3.bf16.msra.mxu1 %v1424_v53 }
 0x5ff   : > { %1383 = vmatprep.subr.bf16.mxu1 %v1459_v9 }
 0x602   : > { %1384 = vmatpush3.bf16.msra.mxu1 %v1425_v54 }
 0x603   : > { %1385 = vmatprep.subr.bf16.mxu1 %v1459_v9 }
 0x606   : > { %1386 = vmatpush3.bf16.msra.mxu1 %v1426_v55 }
 0x6b9   : > { %v971_v27 = vpop.f32.mrf.mxu1 }
 0x6ba   : > { %v972_v28 = vadd.f32 %v971_v27, %v921_v26 }
 0x6bb   : > { %v1369_v29 = vpop.f32.mrf.mxu1 }
 0x6bc   : > { %v1669_v31 = vadd.f32 %v972_v28, %v1543_v1  ;;  %v1422_v1 = vld [vmem:[%s1724_s6] sm:$0xff]   ;;  %v1176_v29 = vsub.s32 5, %v1563_v15 }
 0x6bd   : > { %v974_v32 = vpop.f32.mrf.mxu1  ;;  %1374 = vmatpush3.bf16.msra.mxu0 %v1422_v1 }
 0x6be   : > { %v978_v33 = vsel %vm347_vm0, %v1669_v31, 0.0  ;;  %v1177_v32 = vrot.slane %v1569_v17, %v1176_v29 }
 0x6bf   : > { %979 = vadd.xlane.f32.xlu1 %v978_v33  ;;  %v1370_v34 = vpop.f32.mrf.mxu1 }
 0x748   : > { %v980_v35 = vpop.xlane.xlu1 %979 }
 0x749   : > { %v981_v36 = vmul.f32 0.03125, %v980_v35 }
 0x74b   : > { %v982_v37 = vsub.f32 %v1669_v31, %v981_v36 }
 0x74d   : > { %v983_v38 = vmul.f32 %v982_v37, %v982_v37 }
 0x74f   : > { %v984_v39 = vsel %vm347_vm0, %v983_v38, 0.0 }
 0x750   : > { %985 = vadd.xlane.f32.xlu0 %v984_v39 }
 0x7d9   : > { %v986_v41 = vpop.xlane.xlu0 %985 }
 0x7da   : > { %v987_v42 = vmul.f32 0.03125, %v986_v41 }
 0x7dc   : > { %v988_v43 = vadd.f32 1e-05, %v987_v42 }
 0x7de   : > { %1445 = vrsqrt.f32 %v988_v43 }
 0x7eb   : > { %v1446_v46 = vpop.eup %1445 }
 0x7ec   : > { %v990_v47 = vmul.f32 %v1446_v46, %v982_v37 }
 0x7ee   : > { %v995_v49 = vmul.f32 %v994_v45, %v990_v47 }
 0x7f0   : > { %v1000_v50 = vadd.f32 %v999_v48, %v995_v49 }
 0x7f2   : > { %v1005_v51 = vpack.c.bf16 %v1000_v50, %v1000_v50 }
 0x7f4   : > { %1376 = vmatmul.mubr.msk.bf16.vlgmr.msra.gmra.mxu0 %vm347_vm0, %v1005_v51 }
 0x8b4   : > { %v1062_v57 = vpop.f32.mrf.mxu0 }
 0x8b5   : > { %v1063_v58 = vadd.f32 %v1266_v56, %v1062_v57 }
 0x8b6   : > { %v1377_v59 = vpop.f32.mrf.mxu0 }
 0x8b7   : > { %v1069_v60 = vmul.f32 0.70710677, %v1063_v58  ;;  %v1068_v25 = vmul.f32 0.5, %v1063_v58 }
 0x8b8   : > { %v1065_v61 = vpop.f32.mrf.mxu0 }
 0x8b9   : > { %vm1070_vm8 = vcmp.ge.f32.partialorder %v1069_v60, 0.0  ;;  %v1072_v62 = vsub.f32 0.0, %v1069_v60 }
 0x8ba   : > { %v1378_v63 = vpop.f32.mrf.mxu0  ;;  %v1071_v23 = vsel %vm1070_vm8, 1.0, %v1476_v22 }
 0x8bb   : > { %v1073_v0 = vsel %vm1070_vm8, %v1069_v60, %v1072_v62 }
 0x8bc   : > { %v1074_v9 = vmul.f32 0.3275911, %v1073_v0  ;;  %v1087_v3 = vsub.f32 0.0, %v1073_v0 }
 0x8be   : > { %v1075_v2 = vadd.f32 1.0, %v1074_v9  ;;  %v1088_v4 = vmul.f32 %v1087_v3, %v1073_v0 }
 0x8c0   : > { %1447 = vrcp.f32 %v1075_v2  ;;  %v1089_v7 = vmul.f32 1.442695, %v1088_v4 }
 0x8c2   : > { %1449 = vpow2.f32 %v1089_v7 }
 0x8cd   : > { %v1448_v5 = vpop.eup %1447 }
 0x8ce   : > { %v1078_v6 = vmul.f32 1.0614054, %v1448_v5 }
 0x8cf   : > { %v1450_v19 = vpop.eup %1449 }
 0x8d0   : > { %v1079_v8 = vadd.f32 -1.4531521, %v1078_v6 }
 0x8d2   : > { %v1080_v10 = vmul.f32 %v1448_v5, %v1079_v8 }
 0x8d4   : > { %v1081_v11 = vadd.f32 1.4214138, %v1080_v10 }
 0x8d6   : > { %v1082_v12 = vmul.f32 %v1448_v5, %v1081_v11 }
 0x8d8   : > { %v1083_v13 = vadd.f32 -0.28449672, %v1082_v12 }
 0x8da   : > { %v1084_v14 = vmul.f32 %v1448_v5, %v1083_v13 }
 0x8dc   : > { %v1085_v16 = vadd.f32 0.2548296, %v1084_v14 }
 0x8de   : > { %v1086_v18 = vmul.f32 %v1448_v5, %v1085_v16 }
 0x8e0   : > { %v1091_v20 = vmul.f32 %v1450_v19, %v1086_v18 }
 0x8e2   : > { %v1092_v21 = vsub.f32 1.0, %v1091_v20 }
 0x8e4   : > { %v1093_v24 = vmul.f32 %v1092_v21, %v1071_v23 }
 0x8e6   : > { %v1094_v26 = vadd.f32 1.0, %v1093_v24 }
 0x8e8   : > { %v1095_v27 = vmul.f32 %v1094_v26, %v1068_v25 }
 0x8ea   : > { %v1104_v28 = vpack.c.bf16 %v1095_v27, %v1095_v27 }
 0x8ec   : > { %1388 = vmatmul.mubr.msk.bf16.vlgmr.msra.gmra.mxu1 %vm1129_vm9, %v1104_v28 }
 0x9ac   : > { %v1167_v33 = vpop.f32.mrf.mxu1 }
 0x9ad   : > { %v1173_v34 = vadd.f32 %v1167_v33, %v1669_v31 }
 0x9ae   : > { %v1389_v35 = vpop.f32.mrf.mxu1 }
 0x9af   : > { %v1178_v36 = vadd.f32 %v1177_v32, %v1173_v34 }
 0x9b0   : > { %v1170_v37 = vpop.f32.mrf.mxu1 }
 0x9b1   : > { %v1179_v38 = vpack.c.bf16 %v1178_v36, %v1178_v36 }
 0x9b2   : > { %v1390_v39 = vpop.f32.mrf.mxu1 }
 0x9b3   : > { %1181 = vst.msk [vmem:[%s341_s24] sm:$0xf] %vm1180_vm10, %v1179_v38 }
 0x9b4 PF: > { %s19_s30 = sadd.s32 1, %s1457_s30  }
 0x9b5   : > { %p16_p4 = scmp.ge.s32.totalorder %s19_s30, 4  }
 0x9b7   :  { %18 = sbr.rel (!%p16_p4) target bundleno = 1 (0x1), region = 89 }

// kernel: transformer_forward.7
= control target key start
LH: loop header
LB: loop body
LE: loop exit
PB: predicated region body
PF: predicated region fallthrough
CT: control target
= control target key end

     0   :  { %s2615_s18 = smov 0   ;;  %s2982_s0 = inlined_call_operand.vmem [shape: bf16[2,8,32], index: 0, kind: input, shape index: {}]   ;;  %s2983_s1 = inlined_call_operand.vmem [shape: bf16[2,8,32], index: 1, kind: input, shape index: {}]   ;;  %s2984_s2 = inlined_call_operand.vmem [shape: s32[2,8,1], index: 2, kind: input, shape index: {}]   ;;  %s2985_s3 = inlined_call_operand.vmem [shape: s32[2,1,8], index: 3, kind: input, shape index: {}]   ;;  %s2986_s4 = inlined_call_operand.vmem [shape: f32[10,32], index: 4, kind: input, shape index: {}]   ;;  %s2987_s5 = inlined_call_operand.vmem [shape: bf16[32,96], index: 5, kind: input, shape index: {}]   ;;  %s2988_s6 = inlined_call_operand.vmem [shape: f32[1,96], index: 6, kind: input, shape index: {}]   ;;  %s2989_s7 = inlined_call_operand.vmem [shape: bf16[32,32], index: 7, kind: input, shape index: {}]   ;;  %s2990_s8 = inlined_call_operand.vmem [shape: bf16[32,32], index: 8, kind: input, shape index: {}]   ;;  %s2991_s9 = inlined_call_operand.vmem [shape: bf16[32,64], index: 9, kind: input, shape index: {}]   ;;  %s2992_s10 = inlined_call_operand.vmem [shape: f32[1,64], index: 10, kind: input, shape index: {}]   ;;  %s2993_s11 = inlined_call_operand.vmem [shape: bf16[32,32], index: 11, kind: input, shape index: {}]   ;;  %s2994_s12 = inlined_call_operand.vmem [shape: bf16[32,64], index: 12, kind: input, shape index: {}]   ;;  %s2995_s13 = inlined_call_operand.vmem [shape: f32[1,64], index: 13, kind: input, shape index: {}]   ;;  %s2996_s14 = inlined_call_operand.vmem [shape: bf16[64,32], index: 14, kind: input, shape index: {}]   ;;  %s2997_s15 = inlined_call_operand.vmem [shape: bf16[2,8,32], index: 15, kind: output, shape index: {}]  }
   0x1 LB: > { %s2159_s19 = sadd.s32 4294967295, %s2515_s18   ;;  %p2163_p0 = scmp.ge.s32.totalorder %s2515_s18, 1  ;;  %s2515_s18 = sphi %s2615_s18, %s25_s18  }
   0x2   : > { %p462_p1 = scmp.lt.s32.totalorder %s2515_s18, 3 }
   0x4   : > { %p463_p2 = pnand %p2163_p0, %p462_p1 }
   0x5   : > { %p519_p3 = scmp.lt.s32.totalorder (!%p463_p2), %s2159_s19, 1  ;;  %s2519_s17 = smov (!%p463_p2), 120  }
   0x6   : > { %466 = sbr.rel (%p463_p2) target bundleno = 4146 (0x1032), region = 80  ;;  %s2520_s21 = smov (!%p463_p2), 96  }
   0x7   : > { %s2998_s22 = smov (!%p463_p2), 88   ;;  %s2523_s24 = smov (!%p463_p2), 112  }
   0x8   : > { %s3002_s25 = smov (!%p463_p2), 72   ;;  %s2525_s27 = smov (!%p463_p2), 104  }
   0x9   : > { %s2527_s16 = smov (!%p463_p2), 56   ;;  %s2529_s28 = smov (!%p463_p2), 40  }
   0xa   : > { %s2530_s29 = smov (!%p463_p2), 48  }
   0xb   : > { %s3013_s19 = smov (!%p519_p3, %s2159_s19), 1  ;;  %vm556_vm0 = vcmask 261120   ;;  %v2451_v8 = vld [vmem:[%s2987_s5 + $0x8] sm:$0xff]   ;;  %v2517_v9 = vmov 0.0   ;;  %vm2518_vm1 = vmmov 0   ;;  %v2452_v10 = vld [vmem:[%s2987_s5] sm:$0xff]   ;;  %v546_v14 = vlaneseq }
   0xc   : > { %s2626_s20 = sshll.u32 %s3013_s19, 2  ;;  %2267 = vmatprep.subr.bf16.mxu1 %v2517_v9  ;;  %2271 = vmatprep.mubr.msk.bf16.mxu1 %vm2518_vm1, %v2517_v9  ;;  %v2661_v17 = vld [vmem:[%s2986_s4] sm:$0xff]  ;;  %s2166_s26 = sshll.u32 %s3013_s19, 3  ;;  %v2526_v33 = vmov 0   ;;  %vm653_vm2 = vcmask 64512   ;;  %vm719_vm5 = vcmask 1043456  }
   0xd   : > { %s522_s23 = scalar_lea.vmem %s2982_s0, %s2626_s20  ;;  %2268 = vmatpush3.bf16.msra.mxu1 %v2451_v8  ;;  %2281 = vmatprep.subr.bf16.mxu0 %v2517_v9  ;;  %v2653_v15 = vshrl.u32 %v546_v14, 7  ;;  %v2168_v26 = vld [vmem:[%s2988_s6] ss:$0 sm:$0xff]  ;;  %s530_s30 = scalar_lea.vmem %s2984_s2, %s2166_s26  ;;  %v549_v46 = vand.u32 127, %v546_v14  ;;  %vm1112_vm6 = vcmask 130048   ;;  %vm1114_vm7 = vcmask 195584  }
   0xe   : > { %v539_v0 = vld [vmem:[%s522_s23] sm:$0xf]  ;;  %2269 = vmatprep.subr.bf16.mxu1 %v2517_v9  ;;  %2283 = vmatprep.mubr.msk.bf16.mxu0 %vm2518_vm1, %v2517_v9  ;;  %s2522_s23 = smov 80   ;;  %s2528_s26 = smov 64   ;;  %vm2020_vm11 = vcmask 523264   ;;  %vm2071_vm12 = vcmask 257024  }
   0xf   : > { %v2632_v1 = vunpack.c.l.bf16 %v539_v0  ;;  %v2656_v16 = vsub.s32 0, %v2653_v15  ;;  %v578_v18 = vsub.s32 1, %v2653_v15  ;;  %2450 = vset.pattern.permute.xlu0 %v2526_v33  ;;  %2449 = vset.pattern.permute.xlu1 %v2526_v33  ;;  %v542_v34 = vld [vmem:[%s530_s30] sm:$0xff]  ;;  %vm550_vm3 = vcmp.le.s32.totalorder %v549_v46, %v2653_v15  ;;  %s3001_s30 = smov 8  }
  0x10   : > { %v551_v47 = vsel %vm550_vm3, 1, %v2526_v33 }
  0x11   : > { %v557_v2 = vsel %vm556_vm0, %v2632_v1, 0.0  ;;  %2270 = vmatpush3.bf16.msra.mxu1 %v2452_v10  ;;  %v574_v19 = vrot.slane %v2661_v17, %v2656_v16  ;;  %v579_v22 = vrot.slane %v2661_v17, %v578_v18 }
  0x12   : > { %558 = vadd.xlane.f32.xlu0 %v557_v2  ;;  %2275 = vmatprep.subr.bf16.mxu1 %v2517_v9 }
  0x9b   : > { %v559_v3 = vpop.xlane.xlu0 %558 }
  0x9c   : > { %v561_v4 = vmul.f32 0.03125, %v559_v3 }
  0x9e   : > { %v562_v5 = vsub.f32 %v2632_v1, %v561_v4 }
  0xa0   : > { %v563_v6 = vmul.f32 %v562_v5, %v562_v5 }
  0xa2   : > { %v564_v7 = vsel %vm556_vm0, %v563_v6, 0.0 }
  0xa3   : > { %565 = vadd.xlane.f32.xlu0 %v564_v7 }
 0x12c   : > { %v566_v11 = vpop.xlane.xlu0 %565 }
 0x12d   : > { %v567_v12 = vmul.f32 0.03125, %v566_v11 }
 0x12f   : > { %v568_v13 = vadd.f32 1e-05, %v567_v12 }
 0x131   : > { %2467 = vrsqrt.f32 %v568_v13 }
 0x13e   : > { %v2468_v20 = vpop.eup %2467 }
 0x13f   : > { %v570_v21 = vmul.f32 %v2468_v20, %v562_v5 }
 0x141   : > { %v575_v23 = vmul.f32 %v574_v19, %v570_v21 }
 0x143   : > { %v580_v24 = vadd.f32 %v579_v22, %v575_v23 }
 0x145   : > { %v585_v25 = vpack.c.bf16 %v580_v24, %v580_v24 }
 0x147   : > { %2272 = vmatmul.mubr.msk.bf16.vlgmr.msra.gmra.mxu1 %vm556_vm0, %v585_v25 }
 0x148   : > { %2277 = vmatprep.mubr.msk.bf16.mxu1 %vm2518_vm1, %v2517_v9 }
 0x207   : > { %v642_v27 = vpop.f32.mrf.mxu1 }
 0x208   : > { %v643_v28 = vadd.f32 %v2168_v26, %v642_v27 }
 0x209   : > { %v2273_v29 = vpop.f32.mrf.mxu1 }
 0x20a   : > { %v2675_v30 = vpack.c.bf16 %v643_v28, %v643_v28 }
 0x20b   : > { %v645_v31 = vpop.f32.mrf.mxu1 }
 0x20c   : > { %763 = vrot.lane.b32.xlu0 %v2675_v30, %s2519_s17  ;;  %651 = vrot.lane.b32.xlu1 %v2675_v30, %s2520_s21 }
 0x20d   : > { %v2274_v32 = vpop.f32.mrf.mxu1 }
 0x210   : > { %765 = vrot.lane.b32.xlu1 %v2675_v30, %s2998_s22  ;;  %s3000_s22 = smov 16  }
 0x214   : > { %877 = vrot.lane.b32.xlu1 %v2675_v30, %s2522_s23 }
 0x218   : > { %875 = vrot.lane.b32.xlu1 %v2675_v30, %s2523_s24 }
 0x21c   : > { %989 = vrot.lane.b32.xlu1 %v2675_v30, %s3002_s25  ;;  %s526_s25 = scalar_lea.vmem %s2983_s1, %s2626_s20 }
 0x220   : > { %987 = vrot.lane.b32.xlu1 %v2675_v30, %s2525_s27 }
 0x224   : > { %553 = vperm.xlu1 %2449, %v542_v34  }
 0x27e   : > { %v652_v35 = vpop.permute.xlu1 %651  ;;  %v764_v40 = vpop.permute.xlu0 %763 }
 0x27f   : > { %v658_v36 = vsel %vm653_vm2, %v652_v35, 0 }
 0x280   : > { %2276 = vmatpush3.bf16.xpose.msra.mxu1 %v658_v36 }
 0x281   : > { %2287 = vmatprep.subr.bf16.mxu1 %v2517_v9 }
 0x282   : > { %v766_v37 = vpop.permute.xlu1 %765 }
 0x283   : > { %v771_v38 = vsel %vm653_vm2, %v766_v37, 0 }
 0x286   : > { %v878_v39 = vpop.permute.xlu1 %877 }
 0x287   : > { %2278 = vmatmul.mubr.msk.bf16.vlgmr.msra.gmra.mxu1 %vm653_vm2, %v2675_v30  ;;  %v883_v42 = vsel %vm653_vm2, %v878_v39, 0 }
 0x288   : > { %2288 = vmatpush3.bf16.xpose.msra.mxu1 %v771_v38  ;;  %2289 = vmatprep.mubr.msk.bf16.mxu1 %vm2518_vm1, %v2517_v9 }
 0x289   : > { %2299 = vmatprep.subr.bf16.mxu1 %v2517_v9 }
 0x28a   : > { %v876_v41 = vpop.permute.xlu1 %875 }
 0x28e   : > { %v990_v43 = vpop.permute.xlu1 %989 }
 0x28f   : > { %2290 = vmatmul.mubr.msk.bf16.vlgmr.msra.gmra.mxu1 %vm653_vm2, %v764_v40  ;;  %v995_v44 = vsel %vm653_vm2, %v990_v43, 0 }
 0x290   : > { %2300 = vmatpush3.bf16.xpose.msra.mxu1 %v883_v42  ;;  %2301 = vmatprep.mubr.msk.bf16.mxu1 %vm2518_vm1, %v2517_v9 }
 0x291   : > { %2311 = vmatprep.subr.bf16.mxu1 %v2517_v9 }
 0x292   : > { %v988_v45 = vpop.permute.xlu1 %987 }
 0x297   : > { %2302 = vmatmul.mubr.msk.bf16.vlgmr.msra.gmra.mxu1 %vm653_vm2, %v876_v41 }
 0x298   : > { %2312 = vmatpush3.bf16.xpose.msra.mxu1 %v995_v44  ;;  %2313 = vmatprep.mubr.msk.bf16.mxu1 %vm2518_vm1, %v2517_v9 }
 0x299   : > { %2323 = vmatprep.subr.bf16.mxu1 %v2517_v9 }
 0x29f   : > { %2314 = vmatmul.mubr.msk.bf16.vlgmr.msra.gmra.mxu1 %vm653_vm2, %v988_v45  ;;  %v554_v48 = vpop.permute.xlu1 %553 }
 0x2a0   : > { %2327 = vmatprep.mubr.msk.bf16.mxu1 %vm2518_vm1, %v2517_v9  ;;  %v555_v49 = vmul.u32 %v554_v48, %v551_v47 }
 0x2a2   : > { %vm2721_vm4 = vcmp.eq.s32.totalorder %v555_v49, 0 }
 0x347   : > { %v694_v51 = vpop.f32.mrf.mxu1 }
 0x348   : > { %v700_v52 = vmul.f32 0.35355338, %v694_v51 }
 0x349   : > { %v2279_v53 = vpop.f32.mrf.mxu1 }
 0x34a   : > { %v701_v54 = vsel %vm2721_vm4, -10000.0, %v700_v52 }
 0x34b   : > { %v697_v55 = vpop.f32.mrf.mxu1  ;;  %v702_v56 = vsel %vm653_vm2, %v701_v54, -inf }
 0x34c   : > { %703 = vmax.xlane.f32.xlu1 %v702_v56 }
 0x34d   : > { %v2280_v57 = vpop.f32.mrf.mxu1 }
 0x34f   : > { %v807_v58 = vpop.f32.mrf.mxu1 }
 0x350   : > { %v813_v59 = vmul.f32 0.35355338, %v807_v58 }
 0x351   : > { %v2291_v60 = vpop.f32.mrf.mxu1 }
 0x352   : > { %v814_v61 = vsel %vm2721_vm4, -10000.0, %v813_v59 }
 0x353   : > { %v810_v62 = vpop.f32.mrf.mxu1  ;;  %v815_v63 = vsel %vm653_vm2, %v814_v61, -inf }
 0x354   : > { %816 = vmax.xlane.f32.xlu0 %v815_v63 }
 0x355   : > { %v2292_v0 = vpop.f32.mrf.mxu1 }
 0x357   : > { %v919_v2 = vpop.f32.mrf.mxu1 }
 0x358   : > { %v925_v3 = vmul.f32 0.35355338, %v919_v2 }
 0x359   : > { %v2303_v4 = vpop.f32.mrf.mxu1 }
 0x35a   : > { %v926_v5 = vsel %vm2721_vm4, -10000.0, %v925_v3 }
 0x35b   : > { %v922_v6 = vpop.f32.mrf.mxu1  ;;  %v927_v7 = vsel %vm653_vm2, %v926_v5, -inf }
 0x35c   : > { %928 = vmax.xlane.f32.xlu0 %v927_v7 }
 0x35d   : > { %v2304_v8 = vpop.f32.mrf.mxu1 }
 0x35f   : > { %v1031_v10 = vpop.f32.mrf.mxu1 }
 0x360   : > { %v1037_v11 = vmul.f32 0.35355338, %v1031_v10 }
 0x361   : > { %v2315_v12 = vpop.f32.mrf.mxu1 }
 0x362   : > { %v1038_v13 = vsel %vm2721_vm4, -10000.0, %v1037_v11  ;;  %v2453_v12 = vld [vmem:[%s2989_s7 + $0x8] sm:$0xff]  }
 0x363   : > { %v1034_v14 = vpop.f32.mrf.mxu1  ;;  %v1039_v19 = vsel %vm653_vm2, %v1038_v13, -inf  ;;  %2324 = vmatpush3.bf16.msra.mxu1 %v2453_v12 }
 0x364   : > { %1040 = vmax.xlane.f32.xlu1 %v1039_v19  ;;  %2325 = vmatprep.subr.bf16.mxu1 %v2517_v9 }
 0x365   : > { %v2316_v20 = vpop.f32.mrf.mxu1 }
 0x3d5   : > { %v704_v21 = vpop.xlane.xlu1 %703 }
 0x3d6   : > { %v705_v22 = vsub.f32 %v701_v54, %v704_v21 }
 0x3d8   : > { %v706_v23 = vmul.f32 1.442695, %v705_v22 }
 0x3da   : > { %2469 = vpow2.f32 %v706_v23 }
 0x3dd   : > { %v817_v24 = vpop.xlane.xlu0 %816 }
 0x3de   : > { %v818_v25 = vsub.f32 %v814_v61, %v817_v24 }
 0x3e0   : > { %v819_v26 = vmul.f32 1.442695, %v818_v25 }
 0x3e2   : > { %2471 = vpow2.f32 %v819_v26 }
 0x3e5   : > { %v929_v27 = vpop.xlane.xlu0 %928 }
 0x3e6   : > { %v930_v28 = vsub.f32 %v926_v5, %v929_v27 }
 0x3e7   : > { %v2470_v29 = vpop.eup %2469 }
 0x3e8   : > { %v931_v31 = vmul.f32 1.442695, %v930_v28  ;;  %v708_v32 = vsel %vm653_vm2, %v2470_v29, 0.0 }
 0x3e9   : > { %709 = vadd.xlane.f32.xlu0 %v708_v32 }
 0x3ea   : > { %2473 = vpow2.f32 %v931_v31 }
 0x3ed   : > { %v1041_v38 = vpop.xlane.xlu1 %1040 }
 0x3ee   : > { %v1042_v39 = vsub.f32 %v1038_v13, %v1041_v38  ;;  %v2454_v13 = vld [vmem:[%s2989_s7] sm:$0xff]  }
 0x3ef   : > { %v2472_v34 = vpop.eup %2471  ;;  %2326 = vmatpush3.bf16.msra.mxu1 %v2454_v13 }
 0x3f0   : > { %v821_v35 = vsel %vm653_vm2, %v2472_v34, 0.0  ;;  %v1043_v40 = vmul.f32 1.442695, %v1042_v39  ;;  %2339 = vmatprep.subr.bf16.mxu1 %v2517_v9 }
 0x3f1   : > { %822 = vadd.xlane.f32.xlu1 %v821_v35  ;;  %v1123_v35 = vsub.s32 2, %v2653_v15 }
 0x3f2   : > { %2475 = vpow2.f32 %v1043_v40 }
 0x3f7   : > { %v2474_v36 = vpop.eup %2473 }
 0x3f8   : > { %v933_v37 = vsel %vm653_vm2, %v2474_v36, 0.0 }
 0x3f9   : > { %934 = vadd.xlane.f32.xlu0 %v933_v37 }
 0x3ff   : > { %v2476_v41 = vpop.eup %2475 }
 0x400   : > { %v1045_v42 = vsel %vm653_vm2, %v2476_v41, 0.0 }
 0x402   : > { %827 = vrot.lane.b32.xlu1 %v2675_v30, %s2527_s16  ;;  %s2999_s16 = smov 24  }
 0x40f   : > { %714 = vrot.lane.b32.xlu0 %v2675_v30, %s2528_s26  ;;  %s3009_s26 = smov 8  }
 0x413   : > { %1051 = vrot.lane.b32.xlu0 %v2675_v30, %s2529_s28 }
 0x426   : > { %1046 = vadd.xlane.f32.xlu1 %v1045_v42 }
 0x437   : > { %939 = vrot.lane.b32.xlu1 %v2675_v30, %s2530_s29  ;;  %s3010_s29 = smov 16  }
 0x472   : > { %v710_v43 = vpop.xlane.xlu0 %709 }
 0x473   : > { %2477 = vrcp.f32 %v710_v43 }
 0x47a   : > { %v823_v44 = vpop.xlane.xlu1 %822 }
 0x47b   : > { %2479 = vrcp.f32 %v823_v44 }
 0x47e   : > { %v828_v50 = vpop.permute.xlu1 %827 }
 0x47f   : > { %v833_v53 = vsel %vm719_vm5, %v828_v50, 0  ;;  %v541_v50 = vld [vmem:[%s526_s25] sm:$0xf] }
 0x480   : > { %v2478_v45 = vpop.eup %2477 }
 0x481   : > { %v712_v47 = vmul.f32 %v2478_v45, %v2470_v29 }
 0x482   : > { %v935_v46 = vpop.xlane.xlu0 %934 }
 0x483   : > { %v713_v51 = vpack.c.bf16 %v712_v47, %v712_v47  ;;  %2481 = vrcp.f32 %v935_v46 }
 0x486   : > { %v715_v48 = vpop.permute.xlu0 %714 }
 0x487   : > { %v721_v49 = vsel %vm719_vm5, %v715_v48, 0 }
 0x488   : > { %2282 = vmatpush3.bf16.msra.mxu0 %v721_v49  ;;  %v2480_v52 = vpop.eup %2479  ;;  %v2456_v49 = vld [vmem:[%s2991_s9] sm:$0xff]  }
 0x489   : > { %2293 = vmatprep.subr.bf16.mxu0 %v2517_v9  ;;  %v825_v30 = vmul.f32 %v2480_v52, %v2472_v34  ;;  %v2458_v52 = vld [vmem:[%s2990_s8] sm:$0xff]  }
 0x48a   : > { %v1052_v60 = vpop.permute.xlu0 %1051 }
 0x48b   : > { %2284 = vmatmul.mubr.msk.bf16.vlgmr.msra.gmra.mxu0 %vm653_vm2, %v713_v51  ;;  %v826_v54 = vpack.c.bf16 %v825_v30, %v825_v30  ;;  %v1057_v62 = vsel %vm719_vm5, %v1052_v60, 0  ;;  %v2457_v51 = vld [vmem:[%s2990_s8 + $0x8] sm:$0xff]  }
 0x48c   : > { %2294 = vmatpush3.bf16.msra.mxu0 %v833_v53  ;;  %2295 = vmatprep.mubr.msk.bf16.mxu0 %vm2518_vm1, %v2517_v9 }
 0x48d   : > { %2305 = vmatprep.subr.bf16.mxu0 %v2517_v9 }
 0x490   : > { %v2482_v55 = vpop.eup %2481 }
 0x491   : > { %v937_v57 = vmul.f32 %v2482_v55, %v2474_v36  ;;  %v1124_v36 = vrot.slane %v2661_v17, %v1123_v35  ;;  %v1196_v55 = vsub.s32 3, %v2653_v15 }
 0x493   : > { %2296 = vmatmul.mubr.msk.bf16.vlgmr.msra.gmra.mxu0 %vm653_vm2, %v826_v54  ;;  %v938_v61 = vpack.c.bf16 %v937_v57, %v937_v57  ;;  %v1197_v57 = vrot.slane %v2661_v17, %v1196_v55 }
 0x494   : > { %2307 = vmatprep.mubr.msk.bf16.mxu0 %vm2518_vm1, %v2517_v9 }
 0x4af   : > { %v1047_v56 = vpop.xlane.xlu1 %1046 }
 0x4b0   : > { %2483 = vrcp.f32 %v1047_v56  ;;  %v1201_v56 = vsub.s32 4, %v2653_v15 }
 0x4b2   : > { %v1202_v60 = vrot.slane %v2661_v17, %v1201_v56 }
 0x4b3   : > { %v940_v58 = vpop.permute.xlu1 %939 }
 0x4b4   : > { %v945_v59 = vsel %vm719_vm5, %v940_v58, 0 }
 0x4b5   : > { %2306 = vmatpush3.bf16.msra.mxu0 %v945_v59 }
 0x4b6   : > { %2317 = vmatprep.subr.bf16.mxu0 %v2517_v9 }
 0x4b8   : > { %2308 = vmatmul.mubr.msk.bf16.vlgmr.msra.gmra.mxu0 %vm653_vm2, %v938_v61 }
 0x4b9   : > { %2318 = vmatpush3.bf16.msra.mxu0 %v1057_v62  ;;  %2319 = vmatprep.mubr.msk.bf16.mxu0 %vm2518_vm1, %v2517_v9 }
 0x4ba   : > { %2331 = vmatprep.subr.bf16.mxu0 %v2517_v9 }
 0x4bd   : > { %v2484_v63 = vpop.eup %2483 }
 0x4be   : > { %v1049_v0 = vmul.f32 %v2484_v63, %v2476_v41 }
 0x4c0   : > { %v1050_v2 = vpack.c.bf16 %v1049_v0, %v1049_v0  ;;  %v2186_v0 = vld [vmem:[%s2992_s10] ss:$0 sm:$0xff] }
 0x4c2   : > { %2320 = vmatmul.mubr.msk.bf16.vlgmr.msra.gmra.mxu0 %vm653_vm2, %v1050_v2 }
 0x4c3   : > { %2335 = vmatprep.mubr.msk.bf16.mxu0 %vm2518_vm1, %v2517_v9  ;;  %2332 = vmatpush3.bf16.msra.mxu0 %v2457_v51 }
 0x4c4   : > { %2333 = vmatprep.subr.bf16.mxu0 %v2517_v9 }
 0x4c7   : > { %2334 = vmatpush3.bf16.msra.mxu0 %v2458_v52 }
 0x4c8   : > { %2347 = vmatprep.subr.bf16.mxu0 %v2517_v9 }
 0x54b   : > { %v757_v3 = vpop.f32.mrf.mxu0 }
 0x54d   : > { %v2285_v4 = vpop.f32.mrf.mxu0 }
 0x54f   : > { %v760_v5 = vpop.f32.mrf.mxu0 }
 0x551   : > { %v2286_v6 = vpop.f32.mrf.mxu0 }
 0x553   : > { %v869_v7 = vpop.f32.mrf.mxu0 }
 0x554   : > { %1100 = vrot.lane.b32.xlu1 %v869_v7, %s3001_s30 }
 0x555   : > { %v2297_v8 = vpop.f32.mrf.mxu0 }
 0x557   : > { %v872_v10 = vpop.f32.mrf.mxu0 }
 0x558   : > { %v1211_v10 = vsub.s32 5, %v2653_v15 }
 0x559   : > { %v2298_v11 = vpop.f32.mrf.mxu0 }
 0x55a   : > { %v1212_v11 = vrot.slane %v2661_v17, %v1211_v10 }
 0x578   : > { %v981_v14 = vpop.f32.mrf.mxu0 }
 0x579   : > { %1104 = vrot.lane.b32.xlu0 %v981_v14, %s3000_s22  ;;  %s3011_s22 = smov 24  }
 0x57a   : > { %v2309_v19 = vpop.f32.mrf.mxu0 }
 0x57c   : > { %v984_v20 = vpop.f32.mrf.mxu0 }
 0x57e   : > { %v2310_v21 = vpop.f32.mrf.mxu0 }
 0x582   : > { %v1093_v22 = vpop.f32.mrf.mxu0 }
 0x583   : > { %1108 = vrot.lane.b32.xlu1 %v1093_v22, %s2999_s16 }
 0x584   : > { %v2321_v23 = vpop.f32.mrf.mxu0 }
 0x586   : > { %v1096_v24 = vpop.f32.mrf.mxu0 }
 0x588   : > { %v2322_v25 = vpop.f32.mrf.mxu0 }
 0x5c6   : > { %v1101_v26 = vpop.permute.xlu1 %1100 }
 0x5c7   : > { %v1111_v28 = vsel %vm653_vm2, %v757_v3, %v1101_v26 }
 0x5eb   : > { %v1105_v27 = vpop.permute.xlu0 %1104 }
 0x5ec   : > { %v1113_v29 = vsel %vm1112_vm6, %v1111_v28, %v1105_v27 }
 0x5f5   : > { %v1109_v31 = vpop.permute.xlu1 %1108 }
 0x5f6   : > { %v1115_v32 = vsel %vm1114_vm7, %v1113_v29, %v1109_v31 }
 0x5f7   : > { %v1116_v34 = vpack.c.bf16 %v1115_v32, %v1115_v32 }
 0x5f9   : > { %2328 = vmatmul.mubr.msk.bf16.vlgmr.msra.gmra.mxu1 %vm556_vm0, %v1116_v34 }
 0x5fa   : > { %2343 = vmatprep.mubr.msk.bf16.mxu1 %vm2518_vm1, %v2517_v9 }
 0x6b9   : > { %v1174_v37 = vpop.f32.mrf.mxu1 }
 0x6ba   : > { %v1175_v38 = vadd.f32 %v1174_v37, %v1124_v36 }
 0x6bb   : > { %v2329_v39 = vpop.f32.mrf.mxu1 }
 0x6bc   : > { %v2785_v40 = vadd.f32 %v1175_v38, %v2632_v1  ;;  %v2455_v1 = vld [vmem:[%s2991_s9 + $0x8] sm:$0xff]  }
 0x6bd   : > { %v1177_v41 = vpop.f32.mrf.mxu1  ;;  %2340 = vmatpush3.bf16.msra.mxu1 %v2455_v1 }
 0x6be   : > { %v1181_v42 = vsel %vm556_vm0, %v2785_v40, 0.0  ;;  %2341 = vmatprep.subr.bf16.mxu1 %v2517_v9 }
 0x6bf   : > { %1182 = vadd.xlane.f32.xlu0 %v1181_v42  ;;  %v2330_v43 = vpop.f32.mrf.mxu1 }
 0x6c1   : > { %2342 = vmatpush3.bf16.msra.mxu1 %v2456_v49 }
 0x6c2   : > { %2353 = vmatprep.subr.bf16.mxu1 %v2517_v9 }
 0x6c4   : > { %2344 = vmatmul.mubr.msk.bf16.vlgmr.msra.gmra.mxu1 %vm556_vm0, %v541_v50 }
 0x6c5   : > { %2355 = vmatprep.mubr.msk.bf16.mxu1 %vm2518_vm1, %v2517_v9 }
 0x748   : > { %v1183_v44 = vpop.xlane.xlu0 %1182 }
 0x749   : > { %v1184_v45 = vmul.f32 0.03125, %v1183_v44 }
 0x74b   : > { %v1185_v46 = vsub.f32 %v2785_v40, %v1184_v45 }
 0x74d   : > { %v1186_v47 = vmul.f32 %v1185_v46, %v1185_v46 }
 0x74f   : > { %v1187_v48 = vsel %vm556_vm0, %v1186_v47, 0.0 }
 0x750   : > { %1188 = vadd.xlane.f32.xlu1 %v1187_v48 }
 0x784   : > { %v1328_v2 = vpop.f32.mrf.mxu1 }
 0x785   : > { %v1329_v3 = vadd.f32 %v2186_v0, %v1328_v2 }
 0x786   : > { %v2345_v4 = vpop.f32.mrf.mxu1 }
 0x787   : > { %v2824_v5 = vpack.c.bf16 %v1329_v3, %v1329_v3 }
 0x788   : > { %v1331_v6 = vpop.f32.mrf.mxu1 }
 0x789   : > { %1455 = vrot.lane.b32.xlu0 %v2824_v5, %s2519_s17  ;;  %v1341_v7 = vsel %vm653_vm2, %v2824_v5, 0 }
 0x78a   : > { %v2346_v8 = vpop.f32.mrf.mxu1 }
 0x78d   : > { %1567 = vrot.lane.b32.xlu0 %v2824_v5, %s2523_s24 }
 0x791   : > { %1679 = vrot.lane.b32.xlu0 %v2824_v5, %s2525_s27 }
 0x7d9   : > { %v1189_v53 = vpop.xlane.xlu1 %1188 }
 0x7da   : > { %v1190_v30 = vmul.f32 0.03125, %v1189_v53 }
 0x7dc   : > { %v1191_v54 = vadd.f32 1e-05, %v1190_v30 }
 0x7de   : > { %2485 = vrsqrt.f32 %v1191_v54 }
 0x7eb   : > { %v2486_v58 = vpop.eup %2485 }
 0x7ec   : > { %v1193_v59 = vmul.f32 %v2486_v58, %v1185_v46 }
 0x7ee   : > { %v1198_v61 = vmul.f32 %v1197_v57, %v1193_v59 }
 0x7f0   : > { %v1203_v62 = vadd.f32 %v1202_v60, %v1198_v61 }
 0x7f2   : > { %v1208_v63 = vpack.c.bf16 %v1203_v62, %v1203_v62 }
 0x7f4   : > { %2336 = vmatmul.mubr.msk.bf16.vlgmr.msra.gmra.mxu0 %vm556_vm0, %v1208_v63 }
 0x7f5   : > { %2349 = vmatprep.mubr.msk.bf16.mxu0 %vm2518_vm1, %v2517_v9  ;;  %2348 = vmatpush3.bf16.xpose.msra.mxu0 %v1341_v7 }
 0x7f6   : > { %2359 = vmatprep.subr.bf16.mxu0 %v2517_v9 }
 0x7fb   : > { %v1456_v19 = vpop.permute.xlu0 %1455 }
 0x7fc   : > { %v1461_v21 = vsel %vm653_vm2, %v1456_v19, 0 }
 0x7ff   : > { %v1568_v24 = vpop.permute.xlu0 %1567 }
 0x800   : > { %v1573_v26 = vsel %vm653_vm2, %v1568_v24, 0 }
 0x803   : > { %v1680_v27 = vpop.permute.xlu0 %1679 }
 0x804   : > { %v1685_v29 = vsel %vm653_vm2, %v1680_v27, 0 }
 0x8b4   : > { %v1262_v12 = vpop.f32.mrf.mxu0 }
 0x8b5   : > { %v1263_v13 = vadd.f32 %v1262_v12, %v1212_v11 }
 0x8b6   : > { %v2337_v14 = vpop.f32.mrf.mxu0 }
 0x8b7   : > { %v1334_v20 = vpack.c.bf16 %v1263_v13, %v1263_v13 }
 0x8b8   : > { %v1265_v22 = vpop.f32.mrf.mxu0 }
 0x8b9   : > { %1453 = vrot.lane.b32.xlu1 %v1334_v20, %s2519_s17  ;;  %2350 = vmatmul.mubr.msk.bf16.vlgmr.msra.gmra.mxu0 %vm653_vm2, %v1334_v20 }
 0x8ba   : > { %v2338_v23 = vpop.f32.mrf.mxu0  ;;  %2360 = vmatpush3.bf16.xpose.msra.mxu0 %v1461_v21  ;;  %2361 = vmatprep.mubr.msk.bf16.mxu0 %vm2518_vm1, %v2517_v9 }
 0x8bb   : > { %2371 = vmatprep.subr.bf16.mxu0 %v2517_v9 }
 0x8bd   : > { %1565 = vrot.lane.b32.xlu1 %v1334_v20, %s2523_s24 }
 0x8c1   : > { %1677 = vrot.lane.b32.xlu1 %v1334_v20, %s2525_s27  ;;  %s533_s27 = scalar_lea.vmem %s2985_s3, %s3013_s19  ;;  %s3007_s19 = smov 72  }
 0x8c2   : > { %v543_v32 = vld [vmem:[%s533_s27] sm:$0x1] }
 0x8c3   : > { %vm1336_vm8 = vcmp.eq.s32.totalorder %v543_v32, 0 }
 0x8c4   : > { %v1384_v34 = vsel %vm1336_vm8, 1, %v2526_v33 }
 0x8c5   : > { %v1388_v35 = vrot.slane %v1384_v34, %v2656_v16 }
 0x8c7   : > { %vm2864_vm9 = vcmp.eq.s32.totalorder %v1388_v35, 1 }
 0x92b   : > { %v1454_v25 = vpop.permute.xlu1 %1453 }
 0x92c   : > { %2362 = vmatmul.mubr.msk.bf16.vlgmr.msra.gmra.mxu0 %vm653_vm2, %v1454_v25 }
 0x92d   : > { %2372 = vmatpush3.bf16.xpose.msra.mxu0 %v1573_v26  ;;  %2373 = vmatprep.mubr.msk.bf16.mxu0 %vm2518_vm1, %v2517_v9 }
 0x92e   : > { %2383 = vmatprep.subr.bf16.mxu0 %v2517_v9 }
 0x92f   : > { %v1566_v28 = vpop.permute.xlu1 %1565 }
 0x933   : > { %v1678_v31 = vpop.permute.xlu1 %1677 }
 0x934   : > { %2374 = vmatmul.mubr.msk.bf16.vlgmr.msra.gmra.mxu0 %vm653_vm2, %v1566_v28 }
 0x935   : > { %2384 = vmatpush3.bf16.xpose.msra.mxu0 %v1685_v29  ;;  %2385 = vmatprep.mubr.msk.bf16.mxu0 %vm2518_vm1, %v2517_v9 }
 0x936   : > { %2395 = vmatprep.subr.bf16.mxu0 %v2517_v9 }
 0x93c   : > { %2386 = vmatmul.mubr.msk.bf16.vlgmr.msra.gmra.mxu0 %vm653_vm2, %v1678_v31 }
 0x93d   : > { %2399 = vmatprep.mubr.msk.bf16.mxu0 %vm2518_vm1, %v2517_v9 }
 0x979   : > { %v1377_v36 = vpop.f32.mrf.mxu0 }
 0x97a   : > { %v1383_v38 = vmul.f32 0.35355338, %v1377_v36 }
 0x97b   : > { %v2351_v39 = vpop.f32.mrf.mxu0 }
 0x97c   : > { %v1390_v41 = vsel %vm2864_vm9, -10000.0, %v1383_v38 }
 0x97d   : > { %v1380_v42 = vpop.f32.mrf.mxu0  ;;  %v1391_v43 = vsel %vm653_vm2, %v1390_v41, -inf }
 0x97e   : > { %1392 = vmax.xlane.f32.xlu0 %v1391_v43 }
 0x97f   : > { %v2352_v44 = vpop.f32.mrf.mxu0 }
 0x9ec   : > { %v1497_v45 = vpop.f32.mrf.mxu0 }
 0x9ed   : > { %v1503_v46 = vmul.f32 0.35355338, %v1497_v45 }
 0x9ee   : > { %v2363_v33 = vpop.f32.mrf.mxu0 }
 0x9ef   : > { %v1504_v47 = vsel %vm2864_vm9, -10000.0, %v1503_v46 }
 0x9f0   : > { %v1500_v48 = vpop.f32.mrf.mxu0  ;;  %v1505_v1 = vsel %vm653_vm2, %v1504_v47, -inf }
 0x9f1   : > { %1506 = vmax.xlane.f32.xlu1 %v1505_v1 }
 0x9f2   : > { %v2364_v49 = vpop.f32.mrf.mxu0 }
 0x9f4   : > { %v1609_v50 = vpop.f32.mrf.mxu0 }
 0x9f5   : > { %v1615_v51 = vmul.f32 0.35355338, %v1609_v50 }
 0x9f6   : > { %v2375_v52 = vpop.f32.mrf.mxu0 }
 0x9f7   : > { %v1616_v53 = vsel %vm2864_vm9, -10000.0, %v1615_v51 }
 0x9f8   : > { %v1612_v30 = vpop.f32.mrf.mxu0  ;;  %v1617_v54 = vsel %vm653_vm2, %v1616_v53, -inf }
 0x9f9   : > { %1618 = vmax.xlane.f32.xlu0 %v1617_v54  ;;  %v2459_v30 = vld [vmem:[%s2993_s11 + $0x8] sm:$0xff]  }
 0x9fa   : > { %v2376_v55 = vpop.f32.mrf.mxu0  ;;  %2396 = vmatpush3.bf16.msra.mxu0 %v2459_v30 }
 0x9fb   : > { %2397 = vmatprep.subr.bf16.mxu0 %v2517_v9 }
 0x9fc   : > { %v1721_v56 = vpop.f32.mrf.mxu0 }
 0x9fd   : > { %v1727_v57 = vmul.f32 0.35355338, %v1721_v56  ;;  %v2460_v56 = vld [vmem:[%s2993_s11] sm:$0xff]  }
 0x9fe   : > { %v2387_v58 = vpop.f32.mrf.mxu0  ;;  %2398 = vmatpush3.bf16.msra.mxu0 %v2460_v56 }
 0x9ff   : > { %v1728_v59 = vsel %vm2864_vm9, -10000.0, %v1727_v57  ;;  %2411 = vmatprep.subr.bf16.mxu0 %v2517_v9 }
 0xa00   : > { %v1724_v60 = vpop.f32.mrf.mxu0  ;;  %v1729_v61 = vsel %vm653_vm2, %v1728_v59, -inf }
 0xa01   : > { %1730 = vmax.xlane.f32.xlu0 %v1729_v61 }
 0xa02   : > { %v2388_v62 = vpop.f32.mrf.mxu0 }
 0xa07   : > { %v1393_v63 = vpop.xlane.xlu0 %1392 }
 0xa08   : > { %v1394_v0 = vsub.f32 %v1390_v41, %v1393_v63 }
 0xa0a   : > { %v1395_v2 = vmul.f32 1.442695, %v1394_v0 }
 0xa0c   : > { %2487 = vpow2.f32 %v1395_v2 }
 0xa19   : > { %v2488_v3 = vpop.eup %2487 }
 0xa1a   : > { %v1397_v4 = vsel %vm653_vm2, %v2488_v3, 0.0 }
 0xa1b   : > { %1398 = vadd.xlane.f32.xlu1 %v1397_v4 }
 0xa2c   : > { %1404 = vrot.lane.b32.xlu1 %v2824_v5, %s2520_s21  ;;  %s3008_s21 = smov 88  }
 0xa7a   : > { %v1507_v6 = vpop.xlane.xlu1 %1506 }
 0xa7b   : > { %v1508_v7 = vsub.f32 %v1504_v47, %v1507_v6 }
 0xa7d   : > { %v1509_v8 = vmul.f32 1.442695, %v1508_v7 }
 0xa7f   : > { %2489 = vpow2.f32 %v1509_v8 }
 0xa82   : > { %v1619_v10 = vpop.xlane.xlu0 %1618 }
 0xa83   : > { %v1620_v11 = vsub.f32 %v1616_v53, %v1619_v10 }
 0xa85   : > { %v1621_v12 = vmul.f32 1.442695, %v1620_v11 }
 0xa87   : > { %2491 = vpow2.f32 %v1621_v12 }
 0xa8a   : > { %v1731_v13 = vpop.xlane.xlu0 %1730 }
 0xa8b   : > { %v1732_v14 = vsub.f32 %v1728_v59, %v1731_v13  ;;  %v1811_v13 = vsub.s32 6, %v2653_v15 }
 0xa8c   : > { %v2490_v19 = vpop.eup %2489 }
 0xa8d   : > { %v1733_v20 = vmul.f32 1.442695, %v1732_v14  ;;  %v1511_v21 = vsel %vm653_vm2, %v2490_v19, 0.0  ;;  %v1812_v14 = vrot.slane %v2661_v17, %v1811_v13 }
 0xa8e   : > { %1512 = vadd.xlane.f32.xlu0 %v1511_v21 }
 0xa8f   : > { %2493 = vpow2.f32 %v1733_v20 }
 0xa94   : > { %v2492_v22 = vpop.eup %2491 }
 0xa95   : > { %v1623_v23 = vsel %vm653_vm2, %v2492_v22, 0.0 }
 0xa96   : > { %1624 = vadd.xlane.f32.xlu1 %v1623_v23 }
 0xa9c   : > { %v2494_v24 = vpop.eup %2493 }
 0xa9d   : > { %v1735_v25 = vsel %vm653_vm2, %v2494_v24, 0.0 }
 0xa9e   : > { %1736 = vadd.xlane.f32.xlu0 %v1735_v25 }
 0xaa4   : > { %v1399_v26 = vpop.xlane.xlu1 %1398 }
 0xaa5   : > { %2495 = vrcp.f32 %v1399_v26 }
 0xaa7   : > { %1629 = vrot.lane.b32.xlu1 %v2824_v5, %s2522_s23 }
 0xaa8   : > { %v1405_v27 = vpop.permute.xlu1 %1404 }
 0xaa9   : > { %v1410_v28 = vsel %vm719_vm5, %v1405_v27, 0 }
 0xaaa   : > { %2354 = vmatpush3.bf16.msra.mxu1 %v1410_v28 }
 0xaab   : > { %1741 = vrot.lane.b32.xlu1 %v2824_v5, %s3007_s19  ;;  %2365 = vmatprep.subr.bf16.mxu1 %v2517_v9 }
 0xab2   : > { %v2496_v29 = vpop.eup %2495 }
 0xab3   : > { %v1401_v31 = vmul.f32 %v2496_v29, %v2488_v3 }
 0xab4   : > { %1517 = vrot.lane.b32.xlu0 %v2824_v5, %s3008_s21  ;;  %s537_s21 = scalar_lea.vmem %s2997_s15, %s2626_s20 }
 0xab5   : > { %v1402_v32 = vpack.c.bf16 %v1401_v31, %v1401_v31 }
 0xab7   : > { %2356 = vmatmul.mubr.msk.bf16.vlgmr.msra.gmra.mxu1 %vm653_vm2, %v1402_v32  ;;  %v2461_v32 = vld [vmem:[%s2994_s12 + $0x8] sm:$0xff]  }
 0xab8   : > { %2367 = vmatprep.mubr.msk.bf16.mxu1 %vm2518_vm1, %v2517_v9 }
 0xb17   : > { %v1513_v34 = vpop.xlane.xlu0 %1512 }
 0xb18   : > { %2497 = vrcp.f32 %v1513_v34 }
 0xb1f   : > { %v1625_v35 = vpop.xlane.xlu1 %1624 }
 0xb20   : > { %2499 = vrcp.f32 %v1625_v35 }
 0xb23   : > { %v1630_v42 = vpop.permute.xlu1 %1629 }
 0xb24   : > { %v1635_v44 = vsel %vm719_vm5, %v1630_v42, 0 }
 0xb25   : > { %v2498_v36 = vpop.eup %2497 }
 0xb26   : > { %v1515_v38 = vmul.f32 %v2498_v36, %v2490_v19 }
 0xb27   : > { %v1737_v37 = vpop.xlane.xlu0 %1736  ;;  %v1742_v46 = vpop.permute.xlu1 %1741 }
 0xb28   : > { %2501 = vrcp.f32 %v1737_v37  ;;  %v1516_v5 = vpack.c.bf16 %v1515_v38, %v1515_v38  ;;  %v1747_v48 = vsel %vm719_vm5, %v1742_v46, 0  ;;  %v1884_v37 = vsub.s32 7, %v2653_v15  ;;  %v545_v38 = vld [vmem:[%s2986_s4 + $0x8] sm:$0x3]  ;;  %v2463_v46 = vld [vmem:[%s2996_s14 + $0x18] sm:$0xff]  }
 0xb2b   : > { %v1518_v39 = vpop.permute.xlu0 %1517 }
 0xb2c   : > { %v1523_v41 = vsel %vm719_vm5, %v1518_v39, 0  ;;  %v1885_v39 = vrot.slane %v2661_v17, %v1884_v37  ;;  %v2464_v17 = vld [vmem:[%s2996_s14 + $0x10] sm:$0xff]  }
 0xb2d   : > { %2366 = vmatpush3.bf16.msra.mxu1 %v1523_v41  ;;  %v2500_v43 = vpop.eup %2499 }
 0xb2e   : > { %2377 = vmatprep.subr.bf16.mxu1 %v2517_v9  ;;  %v1627_v45 = vmul.f32 %v2500_v43, %v2492_v22 }
 0xb30   : > { %2368 = vmatmul.mubr.msk.bf16.vlgmr.msra.gmra.mxu1 %vm653_vm2, %v1516_v5  ;;  %v1628_v33 = vpack.c.bf16 %v1627_v45, %v1627_v45  ;;  %v1890_v5 = vrot.slane %v545_v38, %v2656_v16  ;;  %v2465_v16 = vld [vmem:[%s2996_s14 + $0x8] sm:$0xff]  }
 0xb31   : > { %2378 = vmatpush3.bf16.msra.mxu1 %v1635_v44  ;;  %2379 = vmatprep.mubr.msk.bf16.mxu1 %vm2518_vm1, %v2517_v9 }
 0xb32   : > { %2389 = vmatprep.subr.bf16.mxu1 %v2517_v9 }
 0xb35   : > { %v2502_v47 = vpop.eup %2501 }
 0xb36   : > { %v1739_v1 = vmul.f32 %v2502_v47, %v2494_v24  ;;  %v2201_v47 = vld [vmem:[%s2995_s13] ss:$0 sm:$0xff] }
 0xb38   : > { %2380 = vmatmul.mubr.msk.bf16.vlgmr.msra.gmra.mxu1 %vm653_vm2, %v1628_v33  ;;  %v1740_v49 = vpack.c.bf16 %v1739_v1, %v1739_v1  ;;  %v2466_v33 = vld [vmem:[%s2996_s14] sm:$0xff]  }
 0xb39   : > { %2390 = vmatpush3.bf16.msra.mxu1 %v1747_v48  ;;  %2391 = vmatprep.mubr.msk.bf16.mxu1 %vm2518_vm1, %v2517_v9 }
 0xb3a   : > { %2403 = vmatprep.subr.bf16.mxu1 %v2517_v9 }
 0xb40   : > { %2392 = vmatmul.mubr.msk.bf16.vlgmr.msra.gmra.mxu1 %vm653_vm2, %v1740_v49 }
 0xb41   : > { %2407 = vmatprep.mubr.msk.bf16.mxu1 %vm2518_vm1, %v2517_v9  ;;  %2404 = vmatpush3.bf16.msra.mxu1 %v2461_v32 }
 0xb42   : > { %2405 = vmatprep.subr.bf16.mxu1 %v2517_v9 }
 0xb77   : > { %v1446_v50 = vpop.f32.mrf.mxu1 }
 0xb79   : > { %v2357_v51 = vpop.f32.mrf.mxu1 }
 0xb7b   : > { %v1449_v52 = vpop.f32.mrf.mxu1 }
 0xb7d   : > { %v2358_v53 = vpop.f32.mrf.mxu1 }
 0xbf0   : > { %v1559_v54 = vpop.f32.mrf.mxu1 }
 0xbf1   : > { %1790 = vrot.lane.b32.xlu0 %v1559_v54, %s3009_s26 }
 0xbf2   : > { %v2369_v55 = vpop.f32.mrf.mxu1 }
 0xbf4   : > { %v1562_v57 = vpop.f32.mrf.mxu1 }
 0xbf6   : > { %v2370_v58 = vpop.f32.mrf.mxu1 }
 0xbf8   : > { %v1671_v59 = vpop.f32.mrf.mxu1 }
 0xbf9   : > { %1794 = vrot.lane.b32.xlu1 %v1671_v59, %s3010_s29 }
 0xbfa   : > { %v2381_v60 = vpop.f32.mrf.mxu1 }
 0xbfc   : > { %v1674_v61 = vpop.f32.mrf.mxu1 }
 0xbfe   : > { %v2382_v62 = vpop.f32.mrf.mxu1 }
 0xc00   : > { %v1783_v63 = vpop.f32.mrf.mxu1 }
 0xc01   : > { %1798 = vrot.lane.b32.xlu0 %v1783_v63, %s3011_s22 }
 0xc02   : > { %v2393_v0 = vpop.f32.mrf.mxu1 }
 0xc04   : > { %v1786_v2 = vpop.f32.mrf.mxu1 }
 0xc06   : > { %v2394_v3 = vpop.f32.mrf.mxu1 }
 0xc63   : > { %v1791_v4 = vpop.permute.xlu0 %1790 }
 0xc64   : > { %v1801_v7 = vsel %vm653_vm2, %v1446_v50, %v1791_v4 }
 0xc6b   : > { %v1795_v6 = vpop.permute.xlu1 %1794 }
 0xc6c   : > { %v1802_v8 = vsel %vm1112_vm6, %v1801_v7, %v1795_v6 }
 0xc73   : > { %v1799_v10 = vpop.permute.xlu0 %1798 }
 0xc74   : > { %v1803_v11 = vsel %vm1114_vm7, %v1802_v8, %v1799_v10  ;;  %v2534_v10 = vmov -1.0  }
 0xc75   : > { %v1804_v12 = vpack.c.bf16 %v1803_v11, %v1803_v11 }
 0xc77   : > { %2400 = vmatmul.mubr.msk.bf16.vlgmr.msra.gmra.mxu0 %vm556_vm0, %v1804_v12 }
 0xc78   : > { %2419 = vmatprep.mubr.msk.bf16.mxu0 %vm2518_vm1, %v2517_v9  ;;  %2412 = vmatpush3.bf16.msra.mxu0 %v2463_v46 }
 0xc79   : > { %2413 = vmatprep.subr.bf16.mxu0 %v2517_v9 }
 0xc7c   : > { %2414 = vmatpush3.bf16.msra.mxu0 %v2464_v17 }
 0xc7d   : > { %2415 = vmatprep.subr.bf16.mxu0 %v2517_v9 }
 0xc80   : > { %2416 = vmatpush3.bf16.msra.mxu0 %v2465_v16 }
 0xc81   : > { %2417 = vmatprep.subr.bf16.mxu0 %v2517_v9 }
 0xc84   : > { %2418 = vmatpush3.bf16.msra.mxu0 %v2466_v33 }
 0xd37   : > { %v1862_v19 = vpop.f32.mrf.mxu0 }
 0xd38   : > { %v1863_v20 = vadd.f32 %v1862_v19, %v1812_v14 }
 0xd39   : > { %v2401_v21 = vpop.f32.mrf.mxu0 }
 0xd3a   : > { %v2932_v22 = vadd.f32 %v1863_v20, %v2785_v40  ;;  %v2462_v40 = vld [vmem:[%s2994_s12] sm:$0xff]   ;;  %v2068_v21 = vrot.slane %v545_v38, %v578_v18 }
 0xd3b   : > { %v1865_v23 = vpop.f32.mrf.mxu0  ;;  %2406 = vmatpush3.bf16.msra.mxu1 %v2462_v40 }
 0xd3c   : > { %v1869_v24 = vsel %vm556_vm0, %v2932_v22, 0.0 }
 0xd3d   : > { %1870 = vadd.xlane.f32.xlu1 %v1869_v24  ;;  %v2402_v25 = vpop.f32.mrf.mxu0 }
 0xdc6   : > { %v1871_v26 = vpop.xlane.xlu1 %1870 }
 0xdc7   : > { %v1872_v27 = vmul.f32 0.03125, %v1871_v26 }
 0xdc9   : > { %v1873_v28 = vsub.f32 %v2932_v22, %v1872_v27 }
 0xdcb   : > { %v1874_v29 = vmul.f32 %v1873_v28, %v1873_v28 }
 0xdcd   : > { %v1875_v31 = vsel %vm556_vm0, %v1874_v29, 0.0 }
 0xdce   : > { %1876 = vadd.xlane.f32.xlu0 %v1875_v31 }
 0xe57   : > { %v1877_v34 = vpop.xlane.xlu0 %1876 }
 0xe58   : > { %v1878_v35 = vmul.f32 0.03125, %v1877_v34 }
 0xe5a   : > { %v1879_v36 = vadd.f32 1e-05, %v1878_v35 }
 0xe5c   : > { %2503 = vrsqrt.f32 %v1879_v36 }
 0xe69   : > { %v2504_v41 = vpop.eup %2503 }
 0xe6a   : > { %v1881_v42 = vmul.f32 %v2504_v41, %v1873_v28 }
 0xe6c   : > { %v1886_v43 = vmul.f32 %v1885_v39, %v1881_v42 }
 0xe6e   : > { %v1891_v44 = vadd.f32 %v1890_v5, %v1886_v43 }
 0xe70   : > { %v1896_v45 = vpack.c.bf16 %v1891_v44, %v1891_v44 }
 0xe72   : > { %2408 = vmatmul.mubr.msk.bf16.vlgmr.msra.gmra.mxu1 %vm556_vm0, %v1896_v45 }
 0xf32   : > { %v1953_v48 = vpop.f32.mrf.mxu1 }
 0xf33   : > { %v1954_v1 = vadd.f32 %v2201_v47, %v1953_v48 }
 0xf34   : > { %v2409_v49 = vpop.f32.mrf.mxu1 }
 0xf35   : > { %v1960_v50 = vmul.f32 0.70710677, %v1954_v1  ;;  %v1959_v13 = vmul.f32 0.5, %v1954_v1 }
 0xf36   : > { %v1956_v51 = vpop.f32.mrf.mxu1 }
 0xf37   : > { %vm1961_vm10 = vcmp.ge.f32.partialorder %v1960_v50, 0.0  ;;  %v1963_v52 = vsub.f32 0.0, %v1960_v50 }
 0xf38   : > { %v2410_v53 = vpop.f32.mrf.mxu1  ;;  %v1962_v11 = vsel %vm1961_vm10, 1.0, %v2534_v10 }
 0xf39   : > { %v1964_v30 = vsel %vm1961_vm10, %v1960_v50, %v1963_v52 }
 0xf3a   : > { %v1965_v9 = vmul.f32 0.3275911, %v1964_v30  ;;  %v1978_v55 = vsub.f32 0.0, %v1964_v30 }
 0xf3c   : > { %v1966_v54 = vadd.f32 1.0, %v1965_v9  ;;  %v1979_v56 = vmul.f32 %v1978_v55, %v1964_v30 }
 0xf3e   : > { %2505 = vrcp.f32 %v1966_v54  ;;  %v1980_v59 = vmul.f32 1.442695, %v1979_v56 }
 0xf40   : > { %2507 = vpow2.f32 %v1980_v59 }
 0xf4b   : > { %v2506_v57 = vpop.eup %2505 }
 0xf4c   : > { %v1969_v58 = vmul.f32 1.0614054, %v2506_v57 }
 0xf4d   : > { %v2508_v6 = vpop.eup %2507 }
 0xf4e   : > { %v1970_v60 = vadd.f32 -1.4531521, %v1969_v58 }
 0xf50   : > { %v1971_v61 = vmul.f32 %v2506_v57, %v1970_v60 }
 0xf52   : > { %v1972_v62 = vadd.f32 1.4214138, %v1971_v61 }
 0xf54   : > { %v1973_v63 = vmul.f32 %v2506_v57, %v1972_v62 }
 0xf56   : > { %v1974_v0 = vadd.f32 -0.28449672, %v1973_v63 }
 0xf58   : > { %v1975_v2 = vmul.f32 %v2506_v57, %v1974_v0 }
 0xf5a   : > { %v1976_v3 = vadd.f32 0.2548296, %v1975_v2 }
 0xf5c   : > { %v1977_v4 = vmul.f32 %v2506_v57, %v1976_v3 }
 0xf5e   : > { %v1982_v7 = vmul.f32 %v2508_v6, %v1977_v4 }
 0xf60   : > { %v1983_v8 = vsub.f32 1.0, %v1982_v7 }
 0xf62   : > { %v1984_v12 = vmul.f32 %v1983_v8, %v1962_v11 }
 0xf64   : > { %v1985_v14 = vadd.f32 1.0, %v1984_v12 }
 0xf66   : > { %v1986_v19 = vmul.f32 %v1985_v14, %v1959_v13 }
 0xf68   : > { %v1995_v20 = vpack.c.bf16 %v1986_v19, %v1986_v19 }
 0xf6a   : > { %2420 = vmatmul.mubr.msk.bf16.vlgmr.msra.gmra.mxu0 %vm2020_vm11, %v1995_v20 }
0x102a   : > { %v2058_v23 = vpop.f32.mrf.mxu0 }
0x102b   : > { %v2064_v24 = vadd.f32 %v2058_v23, %v2932_v22 }
0x102c   : > { %v2421_v25 = vpop.f32.mrf.mxu0 }
0x102d   : > { %v2069_v26 = vadd.f32 %v2068_v21, %v2064_v24 }
0x102e   : > { %v2061_v27 = vpop.f32.mrf.mxu0 }
0x102f   : > { %v2070_v28 = vpack.c.bf16 %v2069_v26, %v2069_v26 }
0x1030   : > { %v2422_v29 = vpop.f32.mrf.mxu0 }
0x1031   : > { %2072 = vst.msk [vmem:[%s537_s21] sm:$0xf] %vm2071_vm12, %v2070_v28 }
0x1032 PF: > { %s25_s18 = sadd.s32 1, %s2515_s18  }
0x1033   : > { %p22_p4 = scmp.ge.s32.totalorder %s25_s18, 4  }
0x1035   :  { %24 = sbr.rel (!%p22_p4) target bundleno = 1 (0x1), region = 119 }

// kernel: transformer_forward.9
= control target key start
LH: loop header
LB: loop body
LE: loop exit
PB: predicated region body
PF: predicated region fallthrough
CT: control target
= control target key end

     0   :  { %v179_v1 = vmov 0.0   ;;  %vm48_vm0 = vcmask 261120   ;;  %vm180_vm1 = vmmov 0   ;;  %s222_s0 = inlined_call_operand.vmem [shape: bf16[16,32], index: 0, kind: input, shape index: {}]   ;;  %s223_s1 = inlined_call_operand.vmem [shape: bf16[64,32], index: 1, kind: input, shape index: {}]   ;;  %s224_s2 = inlined_call_operand.hbm [shape: f32[16,64], index: 2, kind: output, shape index: {}]  }
   0x1   :  { %v152_v0 = vld [vmem:[%s223_s1 + $0x18] sm:$0xff]   ;;  %135 = vmatprep.subr.bf16.mxu0 %v179_v1  ;;  %v153_v3 = vld [vmem:[%s223_s1 + $0x10] sm:$0xff]   ;;  %143 = vmatprep.mubr.msk.bf16.mxu0 %vm180_vm1, %v179_v1 }
   0x2   :  { %v62_v2 = vsel %vm48_vm0, %v152_v0, 0 }
   0x3   :  { %136 = vmatpush3.bf16.xpose.msra.mxu0 %v62_v2 }
   0x4   :  { %137 = vmatprep.subr.bf16.mxu0 %v179_v1 }
   0x5   :  { %7 = vsyncpa [#allocation3], 0  ;;  %v59_v4 = vsel %vm48_vm0, %v153_v3, 0  ;;  %v154_v5 = vld [vmem:[%s223_s1 + $0x8] sm:$0xff]   ;;  %v155_v7 = vld [vmem:[%s223_s1] sm:$0xff]   ;;  %vm105_vm2 = vcmask 523264  }
   0x6   :  { %v56_v6 = vsel %vm48_vm0, %v154_v5, 0  ;;  %v53_v8 = vsel %vm48_vm0, %v155_v7, 0  ;;  %v156_v9 = vld [vmem:[%s222_s0] sm:$0xff]   ;;  %s181_s19 = smov [#allocation2]  }
   0x7   :  { %s113_s20 = sshll.u32 %s181_s19, 4  ;;  %s114_s20 = int_to_ptr.vmem [resolvable:$true] %s113_s20 }
   0x8   :  { %s157_s1 = scalar_lea.vmem %s114_s20, 256  ;;  %p162_p1 = scmp.lt.s32.totalorder %s114_s20, %s114_s20 }
   0x9   :  { %p158_p0 = scmp.ne.s32.totalorder %s114_s20, %s157_s1  ;;  %p163_p2 = scmp.lt.s32.totalorder %s157_s1, %s157_s1 }
   0xb   :  { %138 = vmatpush3.bf16.xpose.msra.mxu0 %v59_v4  ;;  %p164_p3 = por %p163_p2, %p162_p1 }
   0xc   :  { %139 = vmatprep.subr.bf16.mxu0 %v179_v1 }
   0xd   :  { %p165_p4 = pnand %p164_p3, %p158_p0 }
  0x13   :  { %140 = vmatpush3.bf16.xpose.msra.mxu0 %v56_v6 }
  0x14   :  { %141 = vmatprep.subr.bf16.mxu0 %v179_v1 }
  0x1b   :  { %142 = vmatpush3.bf16.xpose.msra.mxu0 %v53_v8 }
  0x22   :  { %144 = vmatmul.mubr.msk.bf16.vlgmr.msra.gmra.mxu0 %vm48_vm0, %v156_v9 }
  0xe2   :  { %v98_v10 = vpop.f32.mrf.mxu0 }
  0xe3   :  { %106 = vst.msk [vmem:[#allocation2] sm:$0xff] %vm105_vm2, %v98_v10 }
  0xe4   :  { %v145_v11 = vpop.f32.mrf.mxu0 }
  0xe6   :  { %v101_v12 = vpop.f32.mrf.mxu0 }
  0xe7   :  { %107 = vst.msk [vmem:[#allocation2 + $0x8] sm:$0xff] %vm105_vm2, %v101_v12 }
  0xe8   :  { %v146_v13 = vpop.f32.mrf.mxu0 }
  0xe9   :  { %168 = shalt.err (!%p165_p4)
}
  0xea   :  { %s182_s0 = smov 128   ;;  %s183_s21 = smov 8  }
  0xeb   :  { %119 = dma.vmem_to_hbm [thread:$0]  %s114_s20, 256, %s224_s2, [#allocation3], %s182_s0, %s182_s0, %s183_s21  }
  0xec   :  { %177 = dma.done.wait [#allocation3], 256  }
  0xed   :  { %178 = vsyncadd [#allocation3], 4294967040 }
  0xee   :  { %123 = vsyncpa [#allocation3], 1 }

// kernel: transformer_forward.5
= control target key start
LH: loop header
LB: loop body
LE: loop exit
PB: predicated region body
PF: predicated region fallthrough
CT: control target
= control target key end

     0   :  { %s1527_s30 = smov 0   ;;  %s1718_s0 = inlined_call_operand.vmem [shape: bf16[2,8,32], index: 0, kind: input, shape index: {}]   ;;  %s1719_s1 = inlined_call_operand.vmem [shape: s32[2,1,8], index: 1, kind: input, shape index: {}]   ;;  %s1720_s2 = inlined_call_operand.vmem [shape: f32[6,32], index: 2, kind: input, shape index: {}]   ;;  %s1721_s3 = inlined_call_operand.vmem [shape: bf16[32,96], index: 3, kind: input, shape index: {}]   ;;  %s1722_s4 = inlined_call_operand.vmem [shape: f32[1,96], index: 4, kind: input, shape index: {}]   ;;  %s1723_s5 = inlined_call_operand.vmem [shape: bf16[32,32], index: 5, kind: input, shape index: {}]   ;;  %s1724_s6 = inlined_call_operand.vmem [shape: bf16[32,64], index: 6, kind: input, shape index: {}]   ;;  %s1725_s7 = inlined_call_operand.vmem [shape: f32[1,64], index: 7, kind: input, shape index: {}]   ;;  %s1726_s8 = inlined_call_operand.vmem [shape: bf16[64,32], index: 8, kind: input, shape index: {}]   ;;  %s1727_s9 = inlined_call_operand.vmem [shape: bf16[2,8,32], index: 9, kind: output, shape index: {}]  }
   0x1 LB: > { %s1244_s10 = sadd.s32 4294967295, %s1457_s30   ;;  %p1248_p0 = scmp.ge.s32.totalorder %s1457_s30, 1  ;;  %s1457_s30 = sphi %s1527_s30, %s19_s30  }
   0x2   : > { %p294_p1 = scmp.lt.s32.totalorder %s1457_s30, 3 }
   0x4   : > { %p295_p2 = pnand %p1248_p0, %p294_p1 }
   0x5   : > { %p331_p3 = scmp.lt.s32.totalorder (!%p295_p2), %s1244_s10, 1  ;;  %s1461_s23 = smov (!%p295_p2), 120  }
   0x6   : > { %298 = sbr.rel (%p295_p2) target bundleno = 2484 (0x9b4), region = 56  ;;  %s1462_s24 = smov (!%p295_p2), 96  }
   0x7   : > { %s1463_s25 = smov (!%p295_p2), 88   ;;  %s1464_s26 = smov (!%p295_p2), 80  }
   0x8   : > { %s1465_s27 = smov (!%p295_p2), 112   ;;  %s1466_s28 = smov (!%p295_p2), 72  }
   0x9   : > { %s1467_s29 = smov (!%p295_p2), 104   ;;  %s1469_s15 = smov (!%p295_p2), 64  }
   0xa   : > { %s1470_s16 = smov (!%p295_p2), 56   ;;  %s1471_s17 = smov (!%p295_p2), 48  }
   0xb   : > { %s1729_s10 = smov (!%p331_p3, %s1244_s10), 1  ;;  %vm347_vm0 = vcmask 261120   ;;  %v1417_v8 = vld [vmem:[%s1721_s3 + $0x8] sm:$0xff]   ;;  %v1459_v9 = vmov 0.0   ;;  %vm1460_vm1 = vmmov 0   ;;  %v1418_v10 = vld [vmem:[%s1721_s3] sm:$0xff]   ;;  %v362_v14 = vlaneseq }
   0xc   : > { %s1249_s11 = sshll.u32 %s1729_s10, 2  ;;  %1307 = vmatprep.subr.bf16.mxu0 %v1459_v9  ;;  %1311 = vmatprep.mubr.msk.bf16.mxu0 %vm1460_vm1, %v1459_v9  ;;  %v1569_v17 = vld [vmem:[%s1720_s2] sm:$0x3f]  ;;  %vm444_vm2 = vcmask 64512   ;;  %v1468_v45 = vmov 0   ;;  %s1472_s18 = smov 40  }
   0xd   : > { %s334_s14 = scalar_lea.vmem %s1718_s0, %s1249_s11  ;;  %1308 = vmatpush3.bf16.msra.mxu0 %v1417_v8  ;;  %1315 = vmatprep.subr.bf16.mxu1 %v1459_v9  ;;  %v1563_v15 = vshrl.u32 %v362_v14, 7  ;;  %v1251_v26 = vld [vmem:[%s1722_s4] ss:$0 sm:$0xff]  ;;  %vm516_vm5 = vcmask 1043456   ;;  %s1473_s19 = smov 8   ;;  %vm909_vm6 = vcmask 130048  }
   0xe   : > { %v343_v0 = vld [vmem:[%s334_s14] sm:$0xf]  ;;  %1309 = vmatprep.subr.bf16.mxu0 %v1459_v9  ;;  %1317 = vmatprep.mubr.msk.bf16.mxu1 %vm1460_vm1, %v1459_v9  ;;  %s337_s14 = scalar_lea.vmem %s1719_s1, %s1729_s10  ;;  %vm911_vm7 = vcmask 195584   ;;  %vm1129_vm9 = vcmask 523264   ;;  %vm1180_vm10 = vcmask 257024  }
   0xf   : > { %v1543_v1 = vunpack.c.l.bf16 %v343_v0  ;;  %v364_v16 = vsub.s32 0, %v1563_v15  ;;  %v369_v18 = vsub.s32 1, %v1563_v15  ;;  %v345_v44 = vld [vmem:[%s337_s14] sm:$0x1] }
  0x10   : > { %vm440_vm3 = vcmp.eq.s32.totalorder %v345_v44, 0 }
  0x11   : > { %v348_v2 = vsel %vm347_vm0, %v1543_v1, 0.0  ;;  %1310 = vmatpush3.bf16.msra.mxu0 %v1418_v10  ;;  %v365_v19 = vrot.slane %v1569_v17, %v364_v16  ;;  %v370_v22 = vrot.slane %v1569_v17, %v369_v18  ;;  %v492_v46 = vsel %vm440_vm3, 1, %v1468_v45 }
  0x12   : > { %349 = vadd.xlane.f32.xlu0 %v348_v2  ;;  %1321 = vmatprep.subr.bf16.mxu0 %v1459_v9  ;;  %v496_v47 = vrot.slane %v492_v46, %v364_v16 }
  0x14   : > { %vm497_vm4 = vcmp.eq.s32.totalorder %v496_v47, 1 }
  0x9b   : > { %v350_v3 = vpop.xlane.xlu0 %349 }
  0x9c   : > { %v352_v4 = vmul.f32 0.03125, %v350_v3 }
  0x9e   : > { %v353_v5 = vsub.f32 %v1543_v1, %v352_v4 }
  0xa0   : > { %v354_v6 = vmul.f32 %v353_v5, %v353_v5 }
  0xa2   : > { %v355_v7 = vsel %vm347_vm0, %v354_v6, 0.0 }
  0xa3   : > { %356 = vadd.xlane.f32.xlu0 %v355_v7 }
 0x12c   : > { %v357_v11 = vpop.xlane.xlu0 %356 }
 0x12d   : > { %v358_v12 = vmul.f32 0.03125, %v357_v11 }
 0x12f   : > { %v359_v13 = vadd.f32 1e-05, %v358_v12 }
 0x131   : > { %1427 = vrsqrt.f32 %v359_v13 }
 0x13e   : > { %v1428_v20 = vpop.eup %1427 }
 0x13f   : > { %v361_v21 = vmul.f32 %v1428_v20, %v353_v5 }
 0x141   : > { %v366_v23 = vmul.f32 %v365_v19, %v361_v21 }
 0x143   : > { %v371_v24 = vadd.f32 %v370_v22, %v366_v23 }
 0x145   : > { %v376_v25 = vpack.c.bf16 %v371_v24, %v371_v24 }
 0x147   : > { %1312 = vmatmul.mubr.msk.bf16.vlgmr.msra.gmra.mxu0 %vm347_vm0, %v376_v25 }
 0x148   : > { %1323 = vmatprep.mubr.msk.bf16.mxu0 %vm1460_vm1, %v1459_v9 }
 0x207   : > { %v433_v27 = vpop.f32.mrf.mxu0 }
 0x208   : > { %v434_v28 = vadd.f32 %v1251_v26, %v433_v27 }
 0x209   : > { %v1313_v29 = vpop.f32.mrf.mxu0 }
 0x20a   : > { %v1582_v30 = vpack.c.bf16 %v434_v28, %v434_v28 }
 0x20b   : > { %v436_v31 = vpop.f32.mrf.mxu0 }
 0x20c   : > { %560 = vrot.lane.b32.xlu0 %v1582_v30, %s1461_s23  ;;  %442 = vrot.lane.b32.xlu1 %v1582_v30, %s1462_s24  ;;  %s1474_s24 = smov 16  }
 0x20d   : > { %v1314_v32 = vpop.f32.mrf.mxu0 }
 0x210   : > { %562 = vrot.lane.b32.xlu1 %v1582_v30, %s1463_s25  ;;  %s1475_s25 = smov 24  }
 0x214   : > { %674 = vrot.lane.b32.xlu1 %v1582_v30, %s1464_s26 }
 0x218   : > { %672 = vrot.lane.b32.xlu1 %v1582_v30, %s1465_s27 }
 0x21c   : > { %786 = vrot.lane.b32.xlu1 %v1582_v30, %s1466_s28 }
 0x220   : > { %784 = vrot.lane.b32.xlu1 %v1582_v30, %s1467_s29 }
 0x27e   : > { %v443_v33 = vpop.permute.xlu1 %442  ;;  %v561_v38 = vpop.permute.xlu0 %560 }
 0x27f   : > { %v449_v34 = vsel %vm444_vm2, %v443_v33, 0 }
 0x280   : > { %1316 = vmatpush3.bf16.xpose.msra.mxu1 %v449_v34 }
 0x281   : > { %1327 = vmatprep.subr.bf16.mxu1 %v1459_v9 }
 0x282   : > { %v563_v35 = vpop.permute.xlu1 %562 }
 0x283   : > { %v568_v36 = vsel %vm444_vm2, %v563_v35, 0 }
 0x286   : > { %v675_v37 = vpop.permute.xlu1 %674 }
 0x287   : > { %1318 = vmatmul.mubr.msk.bf16.vlgmr.msra.gmra.mxu1 %vm444_vm2, %v1582_v30  ;;  %v680_v40 = vsel %vm444_vm2, %v675_v37, 0 }
 0x288   : > { %1328 = vmatpush3.bf16.xpose.msra.mxu1 %v568_v36  ;;  %1329 = vmatprep.mubr.msk.bf16.mxu1 %vm1460_vm1, %v1459_v9 }
 0x289   : > { %1339 = vmatprep.subr.bf16.mxu1 %v1459_v9 }
 0x28a   : > { %v673_v39 = vpop.permute.xlu1 %672 }
 0x28e   : > { %v787_v41 = vpop.permute.xlu1 %786 }
 0x28f   : > { %1330 = vmatmul.mubr.msk.bf16.vlgmr.msra.gmra.mxu1 %vm444_vm2, %v561_v38  ;;  %v792_v42 = vsel %vm444_vm2, %v787_v41, 0 }
 0x290   : > { %1340 = vmatpush3.bf16.xpose.msra.mxu1 %v680_v40  ;;  %1341 = vmatprep.mubr.msk.bf16.mxu1 %vm1460_vm1, %v1459_v9 }
 0x291   : > { %1351 = vmatprep.subr.bf16.mxu1 %v1459_v9 }
 0x292   : > { %v785_v43 = vpop.permute.xlu1 %784 }
 0x297   : > { %1342 = vmatmul.mubr.msk.bf16.vlgmr.msra.gmra.mxu1 %vm444_vm2, %v673_v39 }
 0x298   : > { %1352 = vmatpush3.bf16.xpose.msra.mxu1 %v792_v42  ;;  %1353 = vmatprep.mubr.msk.bf16.mxu1 %vm1460_vm1, %v1459_v9 }
 0x299   : > { %1363 = vmatprep.subr.bf16.mxu1 %v1459_v9 }
 0x29f   : > { %1354 = vmatmul.mubr.msk.bf16.vlgmr.msra.gmra.mxu1 %vm444_vm2, %v785_v43 }
 0x2a0   : > { %1367 = vmatprep.mubr.msk.bf16.mxu1 %vm1460_vm1, %v1459_v9 }
 0x347   : > { %v485_v48 = vpop.f32.mrf.mxu1 }
 0x348   : > { %v491_v49 = vmul.f32 0.35355338, %v485_v48 }
 0x349   : > { %v1319_v50 = vpop.f32.mrf.mxu1 }
 0x34a   : > { %v498_v51 = vsel %vm497_vm4, -10000.0, %v491_v49 }
 0x34b   : > { %v488_v52 = vpop.f32.mrf.mxu1  ;;  %v499_v53 = vsel %vm444_vm2, %v498_v51, -inf }
 0x34c   : > { %500 = vmax.xlane.f32.xlu1 %v499_v53 }
 0x34d   : > { %v1320_v54 = vpop.f32.mrf.mxu1 }
 0x34f   : > { %v604_v55 = vpop.f32.mrf.mxu1 }
 0x350   : > { %v610_v56 = vmul.f32 0.35355338, %v604_v55 }
 0x351   : > { %v1331_v57 = vpop.f32.mrf.mxu1 }
 0x352   : > { %v611_v58 = vsel %vm497_vm4, -10000.0, %v610_v56 }
 0x353   : > { %v607_v59 = vpop.f32.mrf.mxu1  ;;  %v612_v60 = vsel %vm444_vm2, %v611_v58, -inf }
 0x354   : > { %613 = vmax.xlane.f32.xlu0 %v612_v60 }
 0x355   : > { %v1332_v61 = vpop.f32.mrf.mxu1 }
 0x357   : > { %v716_v62 = vpop.f32.mrf.mxu1 }
 0x358   : > { %v722_v63 = vmul.f32 0.35355338, %v716_v62 }
 0x359   : > { %v1343_v0 = vpop.f32.mrf.mxu1 }
 0x35a   : > { %v723_v2 = vsel %vm497_vm4, -10000.0, %v722_v63 }
 0x35b   : > { %v719_v3 = vpop.f32.mrf.mxu1  ;;  %v724_v4 = vsel %vm444_vm2, %v723_v2, -inf }
 0x35c   : > { %725 = vmax.xlane.f32.xlu1 %v724_v4 }
 0x35d   : > { %v1344_v5 = vpop.f32.mrf.mxu1 }
 0x35e   : > { %v1419_v5 = vld [vmem:[%s1723_s5 + $0x8] sm:$0xff]  }
 0x35f   : > { %v828_v6 = vpop.f32.mrf.mxu1  ;;  %1364 = vmatpush3.bf16.msra.mxu1 %v1419_v5 }
 0x360   : > { %v834_v7 = vmul.f32 0.35355338, %v828_v6  ;;  %v1420_v6 = vld [vmem:[%s1723_s5] sm:$0xff]   ;;  %1365 = vmatprep.subr.bf16.mxu1 %v1459_v9 }
 0x361   : > { %v1355_v8 = vpop.f32.mrf.mxu1 }
 0x362   : > { %v835_v10 = vsel %vm497_vm4, -10000.0, %v834_v7 }
 0x363   : > { %v831_v11 = vpop.f32.mrf.mxu1  ;;  %v836_v12 = vsel %vm444_vm2, %v835_v10, -inf  ;;  %1366 = vmatpush3.bf16.msra.mxu1 %v1420_v6 }
 0x364   : > { %837 = vmax.xlane.f32.xlu0 %v836_v12  ;;  %1379 = vmatprep.subr.bf16.mxu1 %v1459_v9 }
 0x365   : > { %v1356_v13 = vpop.f32.mrf.mxu1 }
 0x3d5   : > { %v501_v14 = vpop.xlane.xlu1 %500 }
 0x3d6   : > { %v502_v16 = vsub.f32 %v498_v51, %v501_v14 }
 0x3d8   : > { %v503_v18 = vmul.f32 1.442695, %v502_v16 }
 0x3da   : > { %1429 = vpow2.f32 %v503_v18 }
 0x3dd   : > { %v614_v19 = vpop.xlane.xlu0 %613 }
 0x3de   : > { %v615_v20 = vsub.f32 %v611_v58, %v614_v19 }
 0x3e0   : > { %v616_v21 = vmul.f32 1.442695, %v615_v20 }
 0x3e2   : > { %1431 = vpow2.f32 %v616_v21 }
 0x3e5   : > { %v726_v32 = vpop.xlane.xlu1 %725 }
 0x3e6   : > { %v727_v33 = vsub.f32 %v723_v2, %v726_v32 }
 0x3e7   : > { %v1430_v22 = vpop.eup %1429 }
 0x3e8   : > { %v505_v23 = vsel %vm444_vm2, %v1430_v22, 0.0  ;;  %v728_v34 = vmul.f32 1.442695, %v727_v33 }
 0x3e9   : > { %506 = vadd.xlane.f32.xlu1 %v505_v23 }
 0x3ed   : > { %v838_v24 = vpop.xlane.xlu0 %837 }
 0x3ee   : > { %v839_v25 = vsub.f32 %v835_v10, %v838_v24 }
 0x3ef   : > { %v1432_v26 = vpop.eup %1431 }
 0x3f0   : > { %v840_v27 = vmul.f32 1.442695, %v839_v25  ;;  %v618_v28 = vsel %vm444_vm2, %v1432_v26, 0.0  ;;  %v920_v25 = vsub.s32 2, %v1563_v15 }
 0x3f1   : > { %619 = vadd.xlane.f32.xlu0 %v618_v28 }
 0x3f2   : > { %1433 = vpow2.f32 %v840_v27 }
 0x3f3   : > { %1435 = vpow2.f32 %v728_v34 }
 0x3fa   : > { %511 = vrot.lane.b32.xlu1 %v1582_v30, %s1469_s15 }
 0x3ff   : > { %v1434_v29 = vpop.eup %1433 }
 0x400   : > { %v842_v31 = vsel %vm444_vm2, %v1434_v29, 0.0  ;;  %v1436_v35 = vpop.eup %1435 }
 0x401   : > { %843 = vadd.xlane.f32.xlu0 %v842_v31  ;;  %v730_v36 = vsel %vm444_vm2, %v1436_v35, 0.0 }
 0x417   : > { %624 = vrot.lane.b32.xlu0 %v1582_v30, %s1470_s16 }
 0x41e   : > { %731 = vadd.xlane.f32.xlu1 %v730_v36 }
 0x42f   : > { %736 = vrot.lane.b32.xlu1 %v1582_v30, %s1471_s17 }
 0x433   : > { %848 = vrot.lane.b32.xlu1 %v1582_v30, %s1472_s18 }
 0x472   : > { %v507_v37 = vpop.xlane.xlu1 %506 }
 0x473   : > { %1437 = vrcp.f32 %v507_v37 }
 0x476   : > { %v512_v38 = vpop.permute.xlu1 %511 }
 0x477   : > { %v518_v39 = vsel %vm516_vm5, %v512_v38, 0 }
 0x478   : > { %1322 = vmatpush3.bf16.msra.mxu0 %v518_v39 }
 0x479   : > { %1333 = vmatprep.subr.bf16.mxu0 %v1459_v9 }
 0x47a   : > { %v620_v40 = vpop.xlane.xlu0 %619 }
 0x47b   : > { %1439 = vrcp.f32 %v620_v40  ;;  %v1421_v40 = vld [vmem:[%s1724_s6 + $0x8] sm:$0xff]  }
 0x480   : > { %v1438_v41 = vpop.eup %1437 }
 0x481   : > { %v509_v42 = vmul.f32 %v1438_v41, %v1430_v22 }
 0x483   : > { %v510_v43 = vpack.c.bf16 %v509_v42, %v509_v42 }
 0x485   : > { %1324 = vmatmul.mubr.msk.bf16.vlgmr.msra.gmra.mxu0 %vm444_vm2, %v510_v43 }
 0x486   : > { %1335 = vmatprep.mubr.msk.bf16.mxu0 %vm1460_vm1, %v1459_v9 }
 0x488   : > { %v1440_v30 = vpop.eup %1439 }
 0x489   : > { %v622_v45 = vmul.f32 %v1440_v30, %v1432_v26  ;;  %v921_v26 = vrot.slane %v1569_v17, %v920_v25  ;;  %v993_v30 = vsub.s32 3, %v1563_v15 }
 0x48a   : > { %v844_v44 = vpop.xlane.xlu0 %843 }
 0x48b   : > { %v623_v48 = vpack.c.bf16 %v622_v45, %v622_v45  ;;  %v994_v45 = vrot.slane %v1569_v17, %v993_v30 }
 0x48e   : > { %v625_v46 = vpop.permute.xlu0 %624 }
 0x48f   : > { %v630_v47 = vsel %vm516_vm5, %v625_v46, 0 }
 0x490   : > { %1334 = vmatpush3.bf16.msra.mxu0 %v630_v47 }
 0x491   : > { %1345 = vmatprep.subr.bf16.mxu0 %v1459_v9 }
 0x493   : > { %1336 = vmatmul.mubr.msk.bf16.vlgmr.msra.gmra.mxu0 %vm444_vm2, %v623_v48 }
 0x494   : > { %1347 = vmatprep.mubr.msk.bf16.mxu0 %vm1460_vm1, %v1459_v9 }
 0x4a7   : > { %v732_v49 = vpop.xlane.xlu1 %731 }
 0x4a8   : > { %1441 = vrcp.f32 %v732_v49 }
 0x4a9   : > { %1443 = vrcp.f32 %v844_v44  ;;  %v998_v44 = vsub.s32 4, %v1563_v15 }
 0x4ab   : > { %v737_v50 = vpop.permute.xlu1 %736  ;;  %v999_v48 = vrot.slane %v1569_v17, %v998_v44 }
 0x4ac   : > { %v742_v51 = vsel %vm516_vm5, %v737_v50, 0 }
 0x4ad   : > { %1346 = vmatpush3.bf16.msra.mxu0 %v742_v51 }
 0x4ae   : > { %1357 = vmatprep.subr.bf16.mxu0 %v1459_v9 }
 0x4af   : > { %v849_v54 = vpop.permute.xlu1 %848 }
 0x4b0   : > { %v854_v57 = vsel %vm516_vm5, %v849_v54, 0  ;;  %v1425_v54 = vld [vmem:[%s1726_s8 + $0x8] sm:$0xff]  }
 0x4b5   : > { %v1442_v52 = vpop.eup %1441 }
 0x4b6   : > { %v734_v53 = vmul.f32 %v1442_v52, %v1436_v35  ;;  %v1444_v56 = vpop.eup %1443  ;;  %v1423_v52 = vld [vmem:[%s1726_s8 + $0x18] sm:$0xff]  }
 0x4b7   : > { %v846_v58 = vmul.f32 %v1444_v56, %v1434_v29  ;;  %v1266_v56 = vld [vmem:[%s1725_s7] ss:$0 sm:$0xff] }
 0x4b8   : > { %v735_v55 = vpack.c.bf16 %v734_v53, %v734_v53  ;;  %v1424_v53 = vld [vmem:[%s1726_s8 + $0x10] sm:$0xff]  }
 0x4b9   : > { %v847_v59 = vpack.c.bf16 %v846_v58, %v846_v58 }
 0x4ba   : > { %1348 = vmatmul.mubr.msk.bf16.vlgmr.msra.gmra.mxu0 %vm444_vm2, %v735_v55  ;;  %v1426_v55 = vld [vmem:[%s1726_s8] sm:$0xff]  }
 0x4bb   : > { %1358 = vmatpush3.bf16.msra.mxu0 %v854_v57  ;;  %1359 = vmatprep.mubr.msk.bf16.mxu0 %vm1460_vm1, %v1459_v9 }
 0x4bc   : > { %1371 = vmatprep.subr.bf16.mxu0 %v1459_v9 }
 0x4c2   : > { %1360 = vmatmul.mubr.msk.bf16.vlgmr.msra.gmra.mxu0 %vm444_vm2, %v847_v59 }
 0x4c3   : > { %1375 = vmatprep.mubr.msk.bf16.mxu0 %vm1460_vm1, %v1459_v9  ;;  %1372 = vmatpush3.bf16.msra.mxu0 %v1421_v40 }
 0x4c4   : > { %1373 = vmatprep.subr.bf16.mxu0 %v1459_v9 }
 0x545   : > { %v554_v60 = vpop.f32.mrf.mxu0 }
 0x547   : > { %v1325_v61 = vpop.f32.mrf.mxu0 }
 0x549   : > { %v557_v62 = vpop.f32.mrf.mxu0 }
 0x54b   : > { %v1326_v63 = vpop.f32.mrf.mxu0 }
 0x553   : > { %v666_v0 = vpop.f32.mrf.mxu0 }
 0x554   : > { %897 = vrot.lane.b32.xlu0 %v666_v0, %s1473_s19 }
 0x555   : > { %v1337_v2 = vpop.f32.mrf.mxu0 }
 0x557   : > { %v669_v3 = vpop.f32.mrf.mxu0 }
 0x559   : > { %v1338_v4 = vpop.f32.mrf.mxu0 }
 0x57a   : > { %v778_v7 = vpop.f32.mrf.mxu0 }
 0x57b   : > { %901 = vrot.lane.b32.xlu1 %v778_v7, %s1474_s24  ;;  %s341_s24 = scalar_lea.vmem %s1727_s9, %s1249_s11 }
 0x57c   : > { %v1349_v8 = vpop.f32.mrf.mxu0 }
 0x57e   : > { %v781_v10 = vpop.f32.mrf.mxu0 }
 0x580   : > { %v1350_v11 = vpop.f32.mrf.mxu0 }
 0x582   : > { %v890_v12 = vpop.f32.mrf.mxu0 }
 0x583   : > { %905 = vrot.lane.b32.xlu0 %v890_v12, %s1475_s25 }
 0x584   : > { %v1361_v13 = vpop.f32.mrf.mxu0 }
 0x586   : > { %v893_v14 = vpop.f32.mrf.mxu0 }
 0x588   : > { %v1362_v16 = vpop.f32.mrf.mxu0 }
 0x5c6   : > { %v898_v18 = vpop.permute.xlu0 %897 }
 0x5c7   : > { %v908_v20 = vsel %vm444_vm2, %v554_v60, %v898_v18 }
 0x5ed   : > { %v902_v19 = vpop.permute.xlu1 %901 }
 0x5ee   : > { %v910_v21 = vsel %vm909_vm6, %v908_v20, %v902_v19 }
 0x5f5   : > { %v906_v22 = vpop.permute.xlu0 %905 }
 0x5f6   : > { %v912_v23 = vsel %vm911_vm7, %v910_v21, %v906_v22  ;;  %v1476_v22 = vmov -1.0  }
 0x5f7   : > { %v913_v24 = vpack.c.bf16 %v912_v23, %v912_v23 }
 0x5f9   : > { %1368 = vmatmul.mubr.msk.bf16.vlgmr.msra.gmra.mxu1 %vm347_vm0, %v913_v24 }
 0x5fa   : > { %1387 = vmatprep.mubr.msk.bf16.mxu1 %vm1460_vm1, %v1459_v9  ;;  %1380 = vmatpush3.bf16.msra.mxu1 %v1423_v52 }
 0x5fb   : > { %1381 = vmatprep.subr.bf16.mxu1 %v1459_v9 }
 0x5fe   : > { %1382 = vmatpush3.bf16.msra.mxu1 %v1424_v53 }
 0x5ff   : > { %1383 = vmatprep.subr.bf16.mxu1 %v1459_v9 }
 0x602   : > { %1384 = vmatpush3.bf16.msra.mxu1 %v1425_v54 }
 0x603   : > { %1385 = vmatprep.subr.bf16.mxu1 %v1459_v9 }
 0x606   : > { %1386 = vmatpush3.bf16.msra.mxu1 %v1426_v55 }
 0x6b9   : > { %v971_v27 = vpop.f32.mrf.mxu1 }
 0x6ba   : > { %v972_v28 = vadd.f32 %v971_v27, %v921_v26 }
 0x6bb   : > { %v1369_v29 = vpop.f32.mrf.mxu1 }
 0x6bc   : > { %v1669_v31 = vadd.f32 %v972_v28, %v1543_v1  ;;  %v1422_v1 = vld [vmem:[%s1724_s6] sm:$0xff]   ;;  %v1176_v29 = vsub.s32 5, %v1563_v15 }
 0x6bd   : > { %v974_v32 = vpop.f32.mrf.mxu1  ;;  %1374 = vmatpush3.bf16.msra.mxu0 %v1422_v1 }
 0x6be   : > { %v978_v33 = vsel %vm347_vm0, %v1669_v31, 0.0  ;;  %v1177_v32 = vrot.slane %v1569_v17, %v1176_v29 }
 0x6bf   : > { %979 = vadd.xlane.f32.xlu1 %v978_v33  ;;  %v1370_v34 = vpop.f32.mrf.mxu1 }
 0x748   : > { %v980_v35 = vpop.xlane.xlu1 %979 }
 0x749   : > { %v981_v36 = vmul.f32 0.03125, %v980_v35 }
 0x74b   : > { %v982_v37 = vsub.f32 %v1669_v31, %v981_v36 }
 0x74d   : > { %v983_v38 = vmul.f32 %v982_v37, %v982_v37 }
 0x74f   : > { %v984_v39 = vsel %vm347_vm0, %v983_v38, 0.0 }
 0x750   : > { %985 = vadd.xlane.f32.xlu0 %v984_v39 }
 0x7d9   : > { %v986_v41 = vpop.xlane.xlu0 %985 }
 0x7da   : > { %v987_v42 = vmul.f32 0.03125, %v986_v41 }
 0x7dc   : > { %v988_v43 = vadd.f32 1e-05, %v987_v42 }
 0x7de   : > { %1445 = vrsqrt.f32 %v988_v43 }
 0x7eb   : > { %v1446_v46 = vpop.eup %1445 }
 0x7ec   : > { %v990_v47 = vmul.f32 %v1446_v46, %v982_v37 }
 0x7ee   : > { %v995_v49 = vmul.f32 %v994_v45, %v990_v47 }
 0x7f0   : > { %v1000_v50 = vadd.f32 %v999_v48, %v995_v49 }
 0x7f2   : > { %v1005_v51 = vpack.c.bf16 %v1000_v50, %v1000_v50 }
 0x7f4   : > { %1376 = vmatmul.mubr.msk.bf16.vlgmr.msra.gmra.mxu0 %vm347_vm0, %v1005_v51 }
 0x8b4   : > { %v1062_v57 = vpop.f32.mrf.mxu0 }
 0x8b5   : > { %v1063_v58 = vadd.f32 %v1266_v56, %v1062_v57 }
 0x8b6   : > { %v1377_v59 = vpop.f32.mrf.mxu0 }
 0x8b7   : > { %v1069_v60 = vmul.f32 0.70710677, %v1063_v58  ;;  %v1068_v25 = vmul.f32 0.5, %v1063_v58 }
 0x8b8   : > { %v1065_v61 = vpop.f32.mrf.mxu0 }
 0x8b9   : > { %vm1070_vm8 = vcmp.ge.f32.partialorder %v1069_v60, 0.0  ;;  %v1072_v62 = vsub.f32 0.0, %v1069_v60 }
 0x8ba   : > { %v1378_v63 = vpop.f32.mrf.mxu0  ;;  %v1071_v23 = vsel %vm1070_vm8, 1.0, %v1476_v22 }
 0x8bb   : > { %v1073_v0 = vsel %vm1070_vm8, %v1069_v60, %v1072_v62 }
 0x8bc   : > { %v1074_v9 = vmul.f32 0.3275911, %v1073_v0  ;;  %v1087_v3 = vsub.f32 0.0, %v1073_v0 }
 0x8be   : > { %v1075_v2 = vadd.f32 1.0, %v1074_v9  ;;  %v1088_v4 = vmul.f32 %v1087_v3, %v1073_v0 }
 0x8c0   : > { %1447 = vrcp.f32 %v1075_v2  ;;  %v1089_v7 = vmul.f32 1.442695, %v1088_v4 }
 0x8c2   : > { %1449 = vpow2.f32 %v1089_v7 }
 0x8cd   : > { %v1448_v5 = vpop.eup %1447 }
 0x8ce   : > { %v1078_v6 = vmul.f32 1.0614054, %v1448_v5 }
 0x8cf   : > { %v1450_v19 = vpop.eup %1449 }
 0x8d0   : > { %v1079_v8 = vadd.f32 -1.4531521, %v1078_v6 }
 0x8d2   : > { %v1080_v10 = vmul.f32 %v1448_v5, %v1079_v8 }
 0x8d4   : > { %v1081_v11 = vadd.f32 1.4214138, %v1080_v10 }
 0x8d6   : > { %v1082_v12 = vmul.f32 %v1448_v5, %v1081_v11 }
 0x8d8   : > { %v1083_v13 = vadd.f32 -0.28449672, %v1082_v12 }
 0x8da   : > { %v1084_v14 = vmul.f32 %v1448_v5, %v1083_v13 }
 0x8dc   : > { %v1085_v16 = vadd.f32 0.2548296, %v1084_v14 }
 0x8de   : > { %v1086_v18 = vmul.f32 %v1448_v5, %v1085_v16 }
 0x8e0   : > { %v1091_v20 = vmul.f32 %v1450_v19, %v1086_v18 }
 0x8e2   : > { %v1092_v21 = vsub.f32 1.0, %v1091_v20 }
 0x8e4   : > { %v1093_v24 = vmul.f32 %v1092_v21, %v1071_v23 }
 0x8e6   : > { %v1094_v26 = vadd.f32 1.0, %v1093_v24 }
 0x8e8   : > { %v1095_v27 = vmul.f32 %v1094_v26, %v1068_v25 }
 0x8ea   : > { %v1104_v28 = vpack.c.bf16 %v1095_v27, %v1095_v27 }
 0x8ec   : > { %1388 = vmatmul.mubr.msk.bf16.vlgmr.msra.gmra.mxu1 %vm1129_vm9, %v1104_v28 }
 0x9ac   : > { %v1167_v33 = vpop.f32.mrf.mxu1 }
 0x9ad   : > { %v1173_v34 = vadd.f32 %v1167_v33, %v1669_v31 }
 0x9ae   : > { %v1389_v35 = vpop.f32.mrf.mxu1 }
 0x9af   : > { %v1178_v36 = vadd.f32 %v1177_v32, %v1173_v34 }
 0x9b0   : > { %v1170_v37 = vpop.f32.mrf.mxu1 }
 0x9b1   : > { %v1179_v38 = vpack.c.bf16 %v1178_v36, %v1178_v36 }
 0x9b2   : > { %v1390_v39 = vpop.f32.mrf.mxu1 }
 0x9b3   : > { %1181 = vst.msk [vmem:[%s341_s24] sm:$0xf] %vm1180_vm10, %v1179_v38 }
 0x9b4 PF: > { %s19_s30 = sadd.s32 1, %s1457_s30  }
 0x9b5   : > { %p16_p4 = scmp.ge.s32.totalorder %s19_s30, 4  }
 0x9b7   :  { %18 = sbr.rel (!%p16_p4) target bundleno = 1 (0x1), region = 89 }

// kernel: transformer_forward.7
= control target key start
LH: loop header
LB: loop body
LE: loop exit
PB: predicated region body
PF: predicated region fallthrough
CT: control target
= control target key end

     0   :  { %s2615_s18 = smov 0   ;;  %s2982_s0 = inlined_call_operand.vmem [shape: bf16[2,8,32], index: 0, kind: input, shape index: {}]   ;;  %s2983_s1 = inlined_call_operand.vmem [shape: bf16[2,8,32], index: 1, kind: input, shape index: {}]   ;;  %s2984_s2 = inlined_call_operand.vmem [shape: s32[2,8,1], index: 2, kind: input, shape index: {}]   ;;  %s2985_s3 = inlined_call_operand.vmem [shape: s32[2,1,8], index: 3, kind: input, shape index: {}]   ;;  %s2986_s4 = inlined_call_operand.vmem [shape: f32[10,32], index: 4, kind: input, shape index: {}]   ;;  %s2987_s5 = inlined_call_operand.vmem [shape: bf16[32,96], index: 5, kind: input, shape index: {}]   ;;  %s2988_s6 = inlined_call_operand.vmem [shape: f32[1,96], index: 6, kind: input, shape index: {}]   ;;  %s2989_s7 = inlined_call_operand.vmem [shape: bf16[32,32], index: 7, kind: input, shape index: {}]   ;;  %s2990_s8 = inlined_call_operand.vmem [shape: bf16[32,32], index: 8, kind: input, shape index: {}]   ;;  %s2991_s9 = inlined_call_operand.vmem [shape: bf16[32,64], index: 9, kind: input, shape index: {}]   ;;  %s2992_s10 = inlined_call_operand.vmem [shape: f32[1,64], index: 10, kind: input, shape index: {}]   ;;  %s2993_s11 = inlined_call_operand.vmem [shape: bf16[32,32], index: 11, kind: input, shape index: {}]   ;;  %s2994_s12 = inlined_call_operand.vmem [shape: bf16[32,64], index: 12, kind: input, shape index: {}]   ;;  %s2995_s13 = inlined_call_operand.vmem [shape: f32[1,64], index: 13, kind: input, shape index: {}]   ;;  %s2996_s14 = inlined_call_operand.vmem [shape: bf16[64,32], index: 14, kind: input, shape index: {}]   ;;  %s2997_s15 = inlined_call_operand.vmem [shape: bf16[2,8,32], index: 15, kind: output, shape index: {}]  }
   0x1 LB: > { %s2159_s19 = sadd.s32 4294967295, %s2515_s18   ;;  %p2163_p0 = scmp.ge.s32.totalorder %s2515_s18, 1  ;;  %s2515_s18 = sphi %s2615_s18, %s25_s18  }
   0x2   : > { %p462_p1 = scmp.lt.s32.totalorder %s2515_s18, 3 }
   0x4   : > { %p463_p2 = pnand %p2163_p0, %p462_p1 }
   0x5   : > { %p519_p3 = scmp.lt.s32.totalorder (!%p463_p2), %s2159_s19, 1  ;;  %s2519_s17 = smov (!%p463_p2), 120  }
   0x6   : > { %466 = sbr.rel (%p463_p2) target bundleno = 4146 (0x1032), region = 80  ;;  %s2520_s21 = smov (!%p463_p2), 96  }
   0x7   : > { %s2998_s22 = smov (!%p463_p2), 88   ;;  %s2523_s24 = smov (!%p463_p2), 112  }
   0x8   : > { %s3002_s25 = smov (!%p463_p2), 72   ;;  %s2525_s27 = smov (!%p463_p2), 104  }
   0x9   : > { %s2527_s16 = smov (!%p463_p2), 56   ;;  %s2529_s28 = smov (!%p463_p2), 40  }
   0xa   : > { %s2530_s29 = smov (!%p463_p2), 48  }
   0xb   : > { %s3013_s19 = smov (!%p519_p3, %s2159_s19), 1  ;;  %vm556_vm0 = vcmask 261120   ;;  %v2451_v8 = vld [vmem:[%s2987_s5 + $0x8] sm:$0xff]   ;;  %v2517_v9 = vmov 0.0   ;;  %vm2518_vm1 = vmmov 0   ;;  %v2452_v10 = vld [vmem:[%s2987_s5] sm:$0xff]   ;;  %v546_v14 = vlaneseq }
   0xc   : > { %s2626_s20 = sshll.u32 %s3013_s19, 2  ;;  %2267 = vmatprep.subr.bf16.mxu1 %v2517_v9  ;;  %2271 = vmatprep.mubr.msk.bf16.mxu1 %vm2518_vm1, %v2517_v9  ;;  %v2661_v17 = vld [vmem:[%s2986_s4] sm:$0xff]  ;;  %s2166_s26 = sshll.u32 %s3013_s19, 3  ;;  %v2526_v33 = vmov 0   ;;  %vm653_vm2 = vcmask 64512   ;;  %vm719_vm5 = vcmask 1043456  }
   0xd   : > { %s522_s23 = scalar_lea.vmem %s2982_s0, %s2626_s20  ;;  %2268 = vmatpush3.bf16.msra.mxu1 %v2451_v8  ;;  %2281 = vmatprep.subr.bf16.mxu0 %v2517_v9  ;;  %v2653_v15 = vshrl.u32 %v546_v14, 7  ;;  %v2168_v26 = vld [vmem:[%s2988_s6] ss:$0 sm:$0xff]  ;;  %s530_s30 = scalar_lea.vmem %s2984_s2, %s2166_s26  ;;  %v549_v46 = vand.u32 127, %v546_v14  ;;  %vm1112_vm6 = vcmask 130048   ;;  %vm1114_vm7 = vcmask 195584  }
   0xe   : > { %v539_v0 = vld [vmem:[%s522_s23] sm:$0xf]  ;;  %2269 = vmatprep.subr.bf16.mxu1 %v2517_v9  ;;  %2283 = vmatprep.mubr.msk.bf16.mxu0 %vm2518_vm1, %v2517_v9  ;;  %s2522_s23 = smov 80   ;;  %s2528_s26 = smov 64   ;;  %vm2020_vm11 = vcmask 523264   ;;  %vm2071_vm12 = vcmask 257024  }
   0xf   : > { %v2632_v1 = vunpack.c.l.bf16 %v539_v0  ;;  %v2656_v16 = vsub.s32 0, %v2653_v15  ;;  %v578_v18 = vsub.s32 1, %v2653_v15  ;;  %2450 = vset.pattern.permute.xlu0 %v2526_v33  ;;  %2449 = vset.pattern.permute.xlu1 %v2526_v33  ;;  %v542_v34 = vld [vmem:[%s530_s30] sm:$0xff]  ;;  %vm550_vm3 = vcmp.le.s32.totalorder %v549_v46, %v2653_v15  ;;  %s3001_s30 = smov 8  }
  0x10   : > { %v551_v47 = vsel %vm550_vm3, 1, %v2526_v33 }
  0x11   : > { %v557_v2 = vsel %vm556_vm0, %v2632_v1, 0.0  ;;  %2270 = vmatpush3.bf16.msra.mxu1 %v2452_v10  ;;  %v574_v19 = vrot.slane %v2661_v17, %v2656_v16  ;;  %v579_v22 = vrot.slane %v2661_v17, %v578_v18 }
  0x12   : > { %558 = vadd.xlane.f32.xlu0 %v557_v2  ;;  %2275 = vmatprep.subr.bf16.mxu1 %v2517_v9 }
  0x9b   : > { %v559_v3 = vpop.xlane.xlu0 %558 }
  0x9c   : > { %v561_v4 = vmul.f32 0.03125, %v559_v3 }
  0x9e   : > { %v562_v5 = vsub.f32 %v2632_v1, %v561_v4 }
  0xa0   : > { %v563_v6 = vmul.f32 %v562_v5, %v562_v5 }
  0xa2   : > { %v564_v7 = vsel %vm556_vm0, %v563_v6, 0.0 }
  0xa3   : > { %565 = vadd.xlane.f32.xlu0 %v564_v7 }
 0x12c   : > { %v566_v11 = vpop.xlane.xlu0 %565 }
 0x12d   : > { %v567_v12 = vmul.f32 0.03125, %v566_v11 }
 0x12f   : > { %v568_v13 = vadd.f32 1e-05, %v567_v12 }
 0x131   : > { %2467 = vrsqrt.f32 %v568_v13 }
 0x13e   : > { %v2468_v20 = vpop.eup %2467 }
 0x13f   : > { %v570_v21 = vmul.f32 %v2468_v20, %v562_v5 }
 0x141   : > { %v575_v23 = vmul.f32 %v574_v19, %v570_v21 }
 0x143   : > { %v580_v24 = vadd.f32 %v579_v22, %v575_v23 }
 0x145   : > { %v585_v25 = vpack.c.bf16 %v580_v24, %v580_v24 }
 0x147   : > { %2272 = vmatmul.mubr.msk.bf16.vlgmr.msra.gmra.mxu1 %vm556_vm0, %v585_v25 }
 0x148   : > { %2277 = vmatprep.mubr.msk.bf16.mxu1 %vm2518_vm1, %v2517_v9 }
 0x207   : > { %v642_v27 = vpop.f32.mrf.mxu1 }
 0x208   : > { %v643_v28 = vadd.f32 %v2168_v26, %v642_v27 }
 0x209   : > { %v2273_v29 = vpop.f32.mrf.mxu1 }
 0x20a   : > { %v2675_v30 = vpack.c.bf16 %v643_v28, %v643_v28 }
 0x20b   : > { %v645_v31 = vpop.f32.mrf.mxu1 }
 0x20c   : > { %763 = vrot.lane.b32.xlu0 %v2675_v30, %s2519_s17  ;;  %651 = vrot.lane.b32.xlu1 %v2675_v30, %s2520_s21 }
 0x20d   : > { %v2274_v32 = vpop.f32.mrf.mxu1 }
 0x210   : > { %765 = vrot.lane.b32.xlu1 %v2675_v30, %s2998_s22  ;;  %s3000_s22 = smov 16  }
 0x214   : > { %877 = vrot.lane.b32.xlu1 %v2675_v30, %s2522_s23 }
 0x218   : > { %875 = vrot.lane.b32.xlu1 %v2675_v30, %s2523_s24 }
 0x21c   : > { %989 = vrot.lane.b32.xlu1 %v2675_v30, %s3002_s25  ;;  %s526_s25 = scalar_lea.vmem %s2983_s1, %s2626_s20 }
 0x220   : > { %987 = vrot.lane.b32.xlu1 %v2675_v30, %s2525_s27 }
 0x224   : > { %553 = vperm.xlu1 %2449, %v542_v34  }
 0x27e   : > { %v652_v35 = vpop.permute.xlu1 %651  ;;  %v764_v40 = vpop.permute.xlu0 %763 }
 0x27f   : > { %v658_v36 = vsel %vm653_vm2, %v652_v35, 0 }
 0x280   : > { %2276 = vmatpush3.bf16.xpose.msra.mxu1 %v658_v36 }
 0x281   : > { %2287 = vmatprep.subr.bf16.mxu1 %v2517_v9 }
 0x282   : > { %v766_v37 = vpop.permute.xlu1 %765 }
 0x283   : > { %v771_v38 = vsel %vm653_vm2, %v766_v37, 0 }
 0x286   : > { %v878_v39 = vpop.permute.xlu1 %877 }
 0x287   : > { %2278 = vmatmul.mubr.msk.bf16.vlgmr.msra.gmra.mxu1 %vm653_vm2, %v2675_v30  ;;  %v883_v42 = vsel %vm653_vm2, %v878_v39, 0 }
 0x288   : > { %2288 = vmatpush3.bf16.xpose.msra.mxu1 %v771_v38  ;;  %2289 = vmatprep.mubr.msk.bf16.mxu1 %vm2518_vm1, %v2517_v9 }
 0x289   : > { %2299 = vmatprep.subr.bf16.mxu1 %v2517_v9 }
 0x28a   : > { %v876_v41 = vpop.permute.xlu1 %875 }
 0x28e   : > { %v990_v43 = vpop.permute.xlu1 %989 }
 0x28f   : > { %2290 = vmatmul.mubr.msk.bf16.vlgmr.msra.gmra.mxu1 %vm653_vm2, %v764_v40  ;;  %v995_v44 = vsel %vm653_vm2, %v990_v43, 0 }
 0x290   : > { %2300 = vmatpush3.bf16.xpose.msra.mxu1 %v883_v42  ;;  %2301 = vmatprep.mubr.msk.bf16.mxu1 %vm2518_vm1, %v2517_v9 }
 0x291   : > { %2311 = vmatprep.subr.bf16.mxu1 %v2517_v9 }
 0x292   : > { %v988_v45 = vpop.permute.xlu1 %987 }
 0x297   : > { %2302 = vmatmul.mubr.msk.bf16.vlgmr.msra.gmra.mxu1 %vm653_vm2, %v876_v41 }
 0x298   : > { %2312 = vmatpush3.bf16.xpose.msra.mxu1 %v995_v44  ;;  %2313 = vmatprep.mubr.msk.bf16.mxu1 %vm2518_vm1, %v2517_v9 }
 0x299   : > { %2323 = vmatprep.subr.bf16.mxu1 %v2517_v9 }
 0x29f   : > { %2314 = vmatmul.mubr.msk.bf16.vlgmr.msra.gmra.mxu1 %vm653_vm2, %v988_v45  ;;  %v554_v48 = vpop.permute.xlu1 %553 }
 0x2a0   : > { %2327 = vmatprep.mubr.msk.bf16.mxu1 %vm2518_vm1, %v2517_v9  ;;  %v555_v49 = vmul.u32 %v554_v48, %v551_v47 }
 0x2a2   : > { %vm2721_vm4 = vcmp.eq.s32.totalorder %v555_v49, 0 }
 0x347   : > { %v694_v51 = vpop.f32.mrf.mxu1 }
 0x348   : > { %v700_v52 = vmul.f32 0.35355338, %v694_v51 }
 0x349   : > { %v2279_v53 = vpop.f32.mrf.mxu1 }
 0x34a   : > { %v701_v54 = vsel %vm2721_vm4, -10000.0, %v700_v52 }
 0x34b   : > { %v697_v55 = vpop.f32.mrf.mxu1  ;;  %v702_v56 = vsel %vm653_vm2, %v701_v54, -inf }
 0x34c   : > { %703 = vmax.xlane.f32.xlu1 %v702_v56 }
 0x34d   : > { %v2280_v57 = vpop.f32.mrf.mxu1 }
 0x34f   : > { %v807_v58 = vpop.f32.mrf.mxu1 }
 0x350   : > { %v813_v59 = vmul.f32 0.35355338, %v807_v58 }
 0x351   : > { %v2291_v60 = vpop.f32.mrf.mxu1 }
 0x352   : > { %v814_v61 = vsel %vm2721_vm4, -10000.0, %v813_v59 }
 0x353   : > { %v810_v62 = vpop.f32.mrf.mxu1  ;;  %v815_v63 = vsel %vm653_vm2, %v814_v61, -inf }
 0x354   : > { %816 = vmax.xlane.f32.xlu0 %v815_v63 }
 0x355   : > { %v2292_v0 = vpop.f32.mrf.mxu1 }
 0x357   : > { %v919_v2 = vpop.f32.mrf.mxu1 }
 0x358   : > { %v925_v3 = vmul.f32 0.35355338, %v919_v2 }
 0x359   : > { %v2303_v4 = vpop.f32.mrf.mxu1 }
 0x35a   : > { %v926_v5 = vsel %vm2721_vm4, -10000.0, %v925_v3 }
 0x35b   : > { %v922_v6 = vpop.f32.mrf.mxu1  ;;  %v927_v7 = vsel %vm653_vm2, %v926_v5, -inf }
 0x35c   : > { %928 = vmax.xlane.f32.xlu0 %v927_v7 }
 0x35d   : > { %v2304_v8 = vpop.f32.mrf.mxu1 }
 0x35f   : > { %v1031_v10 = vpop.f32.mrf.mxu1 }
 0x360   : > { %v1037_v11 = vmul.f32 0.35355338, %v1031_v10 }
 0x361   : > { %v2315_v12 = vpop.f32.mrf.mxu1 }
 0x362   : > { %v1038_v13 = vsel %vm2721_vm4, -10000.0, %v1037_v11  ;;  %v2453_v12 = vld [vmem:[%s2989_s7 + $0x8] sm:$0xff]  }
 0x363   : > { %v1034_v14 = vpop.f32.mrf.mxu1  ;;  %v1039_v19 = vsel %vm653_vm2, %v1038_v13, -inf  ;;  %2324 = vmatpush3.bf16.msra.mxu1 %v2453_v12 }
 0x364   : > { %1040 = vmax.xlane.f32.xlu1 %v1039_v19  ;;  %2325 = vmatprep.subr.bf16.mxu1 %v2517_v9 }
 0x365   : > { %v2316_v20 = vpop.f32.mrf.mxu1 }
 0x3d5   : > { %v704_v21 = vpop.xlane.xlu1 %703 }
 0x3d6   : > { %v705_v22 = vsub.f32 %v701_v54, %v704_v21 }
 0x3d8   : > { %v706_v23 = vmul.f32 1.442695, %v705_v22 }
 0x3da   : > { %2469 = vpow2.f32 %v706_v23 }
 0x3dd   : > { %v817_v24 = vpop.xlane.xlu0 %816 }
 0x3de   : > { %v818_v25 = vsub.f32 %v814_v61, %v817_v24 }
 0x3e0   : > { %v819_v26 = vmul.f32 1.442695, %v818_v25 }
 0x3e2   : > { %2471 = vpow2.f32 %v819_v26 }
 0x3e5   : > { %v929_v27 = vpop.xlane.xlu0 %928 }
 0x3e6   : > { %v930_v28 = vsub.f32 %v926_v5, %v929_v27 }
 0x3e7   : > { %v2470_v29 = vpop.eup %2469 }
 0x3e8   : > { %v931_v31 = vmul.f32 1.442695, %v930_v28  ;;  %v708_v32 = vsel %vm653_vm2, %v2470_v29, 0.0 }
 0x3e9   : > { %709 = vadd.xlane.f32.xlu0 %v708_v32 }
 0x3ea   : > { %2473 = vpow2.f32 %v931_v31 }
 0x3ed   : > { %v1041_v38 = vpop.xlane.xlu1 %1040 }
 0x3ee   : > { %v1042_v39 = vsub.f32 %v1038_v13, %v1041_v38  ;;  %v2454_v13 = vld [vmem:[%s2989_s7] sm:$0xff]  }
 0x3ef   : > { %v2472_v34 = vpop.eup %2471  ;;  %2326 = vmatpush3.bf16.msra.mxu1 %v2454_v13 }
 0x3f0   : > { %v821_v35 = vsel %vm653_vm2, %v2472_v34, 0.0  ;;  %v1043_v40 = vmul.f32 1.442695, %v1042_v39  ;;  %2339 = vmatprep.subr.bf16.mxu1 %v2517_v9 }
 0x3f1   : > { %822 = vadd.xlane.f32.xlu1 %v821_v35  ;;  %v1123_v35 = vsub.s32 2, %v2653_v15 }
 0x3f2   : > { %2475 = vpow2.f32 %v1043_v40 }
 0x3f7   : > { %v2474_v36 = vpop.eup %2473 }
 0x3f8   : > { %v933_v37 = vsel %vm653_vm2, %v2474_v36, 0.0 }
 0x3f9   : > { %934 = vadd.xlane.f32.xlu0 %v933_v37 }
 0x3ff   : > { %v2476_v41 = vpop.eup %2475 }
 0x400   : > { %v1045_v42 = vsel %vm653_vm2, %v2476_v41, 0.0 }
 0x402   : > { %827 = vrot.lane.b32.xlu1 %v2675_v30, %s2527_s16  ;;  %s2999_s16 = smov 24  }
 0x40f   : > { %714 = vrot.lane.b32.xlu0 %v2675_v30, %s2528_s26  ;;  %s3009_s26 = smov 8  }
 0x413   : > { %1051 = vrot.lane.b32.xlu0 %v2675_v30, %s2529_s28 }
 0x426   : > { %1046 = vadd.xlane.f32.xlu1 %v1045_v42 }
 0x437   : > { %939 = vrot.lane.b32.xlu1 %v2675_v30, %s2530_s29  ;;  %s3010_s29 = smov 16  }
 0x472   : > { %v710_v43 = vpop.xlane.xlu0 %709 }
 0x473   : > { %2477 = vrcp.f32 %v710_v43 }
 0x47a   : > { %v823_v44 = vpop.xlane.xlu1 %822 }
 0x47b   : > { %2479 = vrcp.f32 %v823_v44 }
 0x47e   : > { %v828_v50 = vpop.permute.xlu1 %827 }
 0x47f   : > { %v833_v53 = vsel %vm719_vm5, %v828_v50, 0  ;;  %v541_v50 = vld [vmem:[%s526_s25] sm:$0xf] }
 0x480   : > { %v2478_v45 = vpop.eup %2477 }
 0x481   : > { %v712_v47 = vmul.f32 %v2478_v45, %v2470_v29 }
 0x482   : > { %v935_v46 = vpop.xlane.xlu0 %934 }
 0x483   : > { %v713_v51 = vpack.c.bf16 %v712_v47, %v712_v47  ;;  %2481 = vrcp.f32 %v935_v46 }
 0x486   : > { %v715_v48 = vpop.permute.xlu0 %714 }
 0x487   : > { %v721_v49 = vsel %vm719_vm5, %v715_v48, 0 }
 0x488   : > { %2282 = vmatpush3.bf16.msra.mxu0 %v721_v49  ;;  %v2480_v52 = vpop.eup %2479  ;;  %v2456_v49 = vld [vmem:[%s2991_s9] sm:$0xff]  }
 0x489   : > { %2293 = vmatprep.subr.bf16.mxu0 %v2517_v9  ;;  %v825_v30 = vmul.f32 %v2480_v52, %v2472_v34  ;;  %v2458_v52 = vld [vmem:[%s2990_s8] sm:$0xff]  }
 0x48a   : > { %v1052_v60 = vpop.permute.xlu0 %1051 }
 0x48b   : > { %2284 = vmatmul.mubr.msk.bf16.vlgmr.msra.gmra.mxu0 %vm653_vm2, %v713_v51  ;;  %v826_v54 = vpack.c.bf16 %v825_v30, %v825_v30  ;;  %v1057_v62 = vsel %vm719_vm5, %v1052_v60, 0  ;;  %v2457_v51 = vld [vmem:[%s2990_s8 + $0x8] sm:$0xff]  }
 0x48c   : > { %2294 = vmatpush3.bf16.msra.mxu0 %v833_v53  ;;  %2295 = vmatprep.mubr.msk.bf16.mxu0 %vm2518_vm1, %v2517_v9 }
 0x48d   : > { %2305 = vmatprep.subr.bf16.mxu0 %v2517_v9 }
 0x490   : > { %v2482_v55 = vpop.eup %2481 }
 0x491   : > { %v937_v57 = vmul.f32 %v2482_v55, %v2474_v36  ;;  %v1124_v36 = vrot.slane %v2661_v17, %v1123_v35  ;;  %v1196_v55 = vsub.s32 3, %v2653_v15 }
 0x493   : > { %2296 = vmatmul.mubr.msk.bf16.vlgmr.msra.gmra.mxu0 %vm653_vm2, %v826_v54  ;;  %v938_v61 = vpack.c.bf16 %v937_v57, %v937_v57  ;;  %v1197_v57 = vrot.slane %v2661_v17, %v1196_v55 }
 0x494   : > { %2307 = vmatprep.mubr.msk.bf16.mxu0 %vm2518_vm1, %v2517_v9 }
 0x4af   : > { %v1047_v56 = vpop.xlane.xlu1 %1046 }
 0x4b0   : > { %2483 = vrcp.f32 %v1047_v56  ;;  %v1201_v56 = vsub.s32 4, %v2653_v15 }
 0x4b2   : > { %v1202_v60 = vrot.slane %v2661_v17, %v1201_v56 }
 0x4b3   : > { %v940_v58 = vpop.permute.xlu1 %939 }
 0x4b4   : > { %v945_v59 = vsel %vm719_vm5, %v940_v58, 0 }
 0x4b5   : > { %2306 = vmatpush3.bf16.msra.mxu0 %v945_v59 }
 0x4b6   : > { %2317 = vmatprep.subr.bf16.mxu0 %v2517_v9 }
 0x4b8   : > { %2308 = vmatmul.mubr.msk.bf16.vlgmr.msra.gmra.mxu0 %vm653_vm2, %v938_v61 }
 0x4b9   : > { %2318 = vmatpush3.bf16.msra.mxu0 %v1057_v62  ;;  %2319 = vmatprep.mubr.msk.bf16.mxu0 %vm2518_vm1, %v2517_v9 }
 0x4ba   : > { %2331 = vmatprep.subr.bf16.mxu0 %v2517_v9 }
 0x4bd   : > { %v2484_v63 = vpop.eup %2483 }
 0x4be   : > { %v1049_v0 = vmul.f32 %v2484_v63, %v2476_v41 }
 0x4c0   : > { %v1050_v2 = vpack.c.bf16 %v1049_v0, %v1049_v0  ;;  %v2186_v0 = vld [vmem:[%s2992_s10] ss:$0 sm:$0xff] }
 0x4c2   : > { %2320 = vmatmul.mubr.msk.bf16.vlgmr.msra.gmra.mxu0 %vm653_vm2, %v1050_v2 }
 0x4c3   : > { %2335 = vmatprep.mubr.msk.bf16.mxu0 %vm2518_vm1, %v2517_v9  ;;  %2332 = vmatpush3.bf16.msra.mxu0 %v2457_v51 }
 0x4c4   : > { %2333 = vmatprep.subr.bf16.mxu0 %v2517_v9 }
 0x4c7   : > { %2334 = vmatpush3.bf16.msra.mxu0 %v2458_v52 }
 0x4c8   : > { %2347 = vmatprep.subr.bf16.mxu0 %v2517_v9 }
 0x54b   : > { %v757_v3 = vpop.f32.mrf.mxu0 }
 0x54d   : > { %v2285_v4 = vpop.f32.mrf.mxu0 }
 0x54f   : > { %v760_v5 = vpop.f32.mrf.mxu0 }
 0x551   : > { %v2286_v6 = vpop.f32.mrf.mxu0 }
 0x553   : > { %v869_v7 = vpop.f32.mrf.mxu0 }
 0x554   : > { %1100 = vrot.lane.b32.xlu1 %v869_v7, %s3001_s30 }
 0x555   : > { %v2297_v8 = vpop.f32.mrf.mxu0 }
 0x557   : > { %v872_v10 = vpop.f32.mrf.mxu0 }
 0x558   : > { %v1211_v10 = vsub.s32 5, %v2653_v15 }
 0x559   : > { %v2298_v11 = vpop.f32.mrf.mxu0 }
 0x55a   : > { %v1212_v11 = vrot.slane %v2661_v17, %v1211_v10 }
 0x578   : > { %v981_v14 = vpop.f32.mrf.mxu0 }
 0x579   : > { %1104 = vrot.lane.b32.xlu0 %v981_v14, %s3000_s22  ;;  %s3011_s22 = smov 24  }
 0x57a   : > { %v2309_v19 = vpop.f32.mrf.mxu0 }
 0x57c   : > { %v984_v20 = vpop.f32.mrf.mxu0 }
 0x57e   : > { %v2310_v21 = vpop.f32.mrf.mxu0 }
 0x582   : > { %v1093_v22 = vpop.f32.mrf.mxu0 }
 0x583   : > { %1108 = vrot.lane.b32.xlu1 %v1093_v22, %s2999_s16 }
 0x584   : > { %v2321_v23 = vpop.f32.mrf.mxu0 }
 0x586   : > { %v1096_v24 = vpop.f32.mrf.mxu0 }
 0x588   : > { %v2322_v25 = vpop.f32.mrf.mxu0 }
 0x5c6   : > { %v1101_v26 = vpop.permute.xlu1 %1100 }
 0x5c7   : > { %v1111_v28 = vsel %vm653_vm2, %v757_v3, %v1101_v26 }
 0x5eb   : > { %v1105_v27 = vpop.permute.xlu0 %1104 }
 0x5ec   : > { %v1113_v29 = vsel %vm1112_vm6, %v1111_v28, %v1105_v27 }
 0x5f5   : > { %v1109_v31 = vpop.permute.xlu1 %1108 }
 0x5f6   : > { %v1115_v32 = vsel %vm1114_vm7, %v1113_v29, %v1109_v31 }
 0x5f7   : > { %v1116_v34 = vpack.c.bf16 %v1115_v32, %v1115_v32 }
 0x5f9   : > { %2328 = vmatmul.mubr.msk.bf16.vlgmr.msra.gmra.mxu1 %vm556_vm0, %v1116_v34 }
 0x5fa   : > { %2343 = vmatprep.mubr.msk.bf16.mxu1 %vm2518_vm1, %v2517_v9 }
 0x6b9   : > { %v1174_v37 = vpop.f32.mrf.mxu1 }
 0x6ba   : > { %v1175_v38 = vadd.f32 %v1174_v37, %v1124_v36 }
 0x6bb   : > { %v2329_v39 = vpop.f32.mrf.mxu1 }
 0x6bc   : > { %v2785_v40 = vadd.f32 %v1175_v38, %v2632_v1  ;;  %v2455_v1 = vld [vmem:[%s2991_s9 + $0x8] sm:$0xff]  }
 0x6bd   : > { %v1177_v41 = vpop.f32.mrf.mxu1  ;;  %2340 = vmatpush3.bf16.msra.mxu1 %v2455_v1 }
 0x6be   : > { %v1181_v42 = vsel %vm556_vm0, %v2785_v40, 0.0  ;;  %2341 = vmatprep.subr.bf16.mxu1 %v2517_v9 }
 0x6bf   : > { %1182 = vadd.xlane.f32.xlu0 %v1181_v42  ;;  %v2330_v43 = vpop.f32.mrf.mxu1 }
 0x6c1   : > { %2342 = vmatpush3.bf16.msra.mxu1 %v2456_v49 }
 0x6c2   : > { %2353 = vmatprep.subr.bf16.mxu1 %v2517_v9 }
 0x6c4   : > { %2344 = vmatmul.mubr.msk.bf16.vlgmr.msra.gmra.mxu1 %vm556_vm0, %v541_v50 }
 0x6c5   : > { %2355 = vmatprep.mubr.msk.bf16.mxu1 %vm2518_vm1, %v2517_v9 }
 0x748   : > { %v1183_v44 = vpop.xlane.xlu0 %1182 }
 0x749   : > { %v1184_v45 = vmul.f32 0.03125, %v1183_v44 }
 0x74b   : > { %v1185_v46 = vsub.f32 %v2785_v40, %v1184_v45 }
 0x74d   : > { %v1186_v47 = vmul.f32 %v1185_v46, %v1185_v46 }
 0x74f   : > { %v1187_v48 = vsel %vm556_vm0, %v1186_v47, 0.0 }
 0x750   : > { %1188 = vadd.xlane.f32.xlu1 %v1187_v48 }
 0x784   : > { %v1328_v2 = vpop.f32.mrf.mxu1 }
 0x785   : > { %v1329_v3 = vadd.f32 %v2186_v0, %v1328_v2 }
 0x786   : > { %v2345_v4 = vpop.f32.mrf.mxu1 }
 0x787   : > { %v2824_v5 = vpack.c.bf16 %v1329_v3, %v1329_v3 }
 0x788   : > { %v1331_v6 = vpop.f32.mrf.mxu1 }
 0x789   : > { %1455 = vrot.lane.b32.xlu0 %v2824_v5, %s2519_s17  ;;  %v1341_v7 = vsel %vm653_vm2, %v2824_v5, 0 }
 0x78a   : > { %v2346_v8 = vpop.f32.mrf.mxu1 }
 0x78d   : > { %1567 = vrot.lane.b32.xlu0 %v2824_v5, %s2523_s24 }
 0x791   : > { %1679 = vrot.lane.b32.xlu0 %v2824_v5, %s2525_s27 }
 0x7d9   : > { %v1189_v53 = vpop.xlane.xlu1 %1188 }
 0x7da   : > { %v1190_v30 = vmul.f32 0.03125, %v1189_v53 }
 0x7dc   : > { %v1191_v54 = vadd.f32 1e-05, %v1190_v30 }
 0x7de   : > { %2485 = vrsqrt.f32 %v1191_v54 }
 0x7eb   : > { %v2486_v58 = vpop.eup %2485 }
 0x7ec   : > { %v1193_v59 = vmul.f32 %v2486_v58, %v1185_v46 }
 0x7ee   : > { %v1198_v61 = vmul.f32 %v1197_v57, %v1193_v59 }
 0x7f0   : > { %v1203_v62 = vadd.f32 %v1202_v60, %v1198_v61 }
 0x7f2   : > { %v1208_v63 = vpack.c.bf16 %v1203_v62, %v1203_v62 }
 0x7f4   : > { %2336 = vmatmul.mubr.msk.bf16.vlgmr.msra.gmra.mxu0 %vm556_vm0, %v1208_v63 }
 0x7f5   : > { %2349 = vmatprep.mubr.msk.bf16.mxu0 %vm2518_vm1, %v2517_v9  ;;  %2348 = vmatpush3.bf16.xpose.msra.mxu0 %v1341_v7 }
 0x7f6   : > { %2359 = vmatprep.subr.bf16.mxu0 %v2517_v9 }
 0x7fb   : > { %v1456_v19 = vpop.permute.xlu0 %1455 }
 0x7fc   : > { %v1461_v21 = vsel %vm653_vm2, %v1456_v19, 0 }
 0x7ff   : > { %v1568_v24 = vpop.permute.xlu0 %1567 }
 0x800   : > { %v1573_v26 = vsel %vm653_vm2, %v1568_v24, 0 }
 0x803   : > { %v1680_v27 = vpop.permute.xlu0 %1679 }
 0x804   : > { %v1685_v29 = vsel %vm653_vm2, %v1680_v27, 0 }
 0x8b4   : > { %v1262_v12 = vpop.f32.mrf.mxu0 }
 0x8b5   : > { %v1263_v13 = vadd.f32 %v1262_v12, %v1212_v11 }
 0x8b6   : > { %v2337_v14 = vpop.f32.mrf.mxu0 }
 0x8b7   : > { %v1334_v20 = vpack.c.bf16 %v1263_v13, %v1263_v13 }
 0x8b8   : > { %v1265_v22 = vpop.f32.mrf.mxu0 }
 0x8b9   : > { %1453 = vrot.lane.b32.xlu1 %v1334_v20, %s2519_s17  ;;  %2350 = vmatmul.mubr.msk.bf16.vlgmr.msra.gmra.mxu0 %vm653_vm2, %v1334_v20 }
 0x8ba   : > { %v2338_v23 = vpop.f32.mrf.mxu0  ;;  %2360 = vmatpush3.bf16.xpose.msra.mxu0 %v1461_v21  ;;  %2361 = vmatprep.mubr.msk.bf16.mxu0 %vm2518_vm1, %v2517_v9 }
 0x8bb   : > { %2371 = vmatprep.subr.bf16.mxu0 %v2517_v9 }
 0x8bd   : > { %1565 = vrot.lane.b32.xlu1 %v1334_v20, %s2523_s24 }
 0x8c1   : > { %1677 = vrot.lane.b32.xlu1 %v1334_v20, %s2525_s27  ;;  %s533_s27 = scalar_lea.vmem %s2985_s3, %s3013_s19  ;;  %s3007_s19 = smov 72  }
 0x8c2   : > { %v543_v32 = vld [vmem:[%s533_s27] sm:$0x1] }
 0x8c3   : > { %vm1336_vm8 = vcmp.eq.s32.totalorder %v543_v32, 0 }
 0x8c4   : > { %v1384_v34 = vsel %vm1336_vm8, 1, %v2526_v33 }
 0x8c5   : > { %v1388_v35 = vrot.slane %v1384_v34, %v2656_v16 }
 0x8c7   : > { %vm2864_vm9 = vcmp.eq.s32.totalorder %v1388_v35, 1 }
 0x92b   : > { %v1454_v25 = vpop.permute.xlu1 %1453 }
 0x92c   : > { %2362 = vmatmul.mubr.msk.bf16.vlgmr.msra.gmra.mxu0 %vm653_vm2, %v1454_v25 }
 0x92d   : > { %2372 = vmatpush3.bf16.xpose.msra.mxu0 %v1573_v26  ;;  %2373 = vmatprep.mubr.msk.bf16.mxu0 %vm2518_vm1, %v2517_v9 }
 0x92e   : > { %2383 = vmatprep.subr.bf16.mxu0 %v2517_v9 }
 0x92f   : > { %v1566_v28 = vpop.permute.xlu1 %1565 }
 0x933   : > { %v1678_v31 = vpop.permute.xlu1 %1677 }
 0x934   : > { %2374 = vmatmul.mubr.msk.bf16.vlgmr.msra.gmra.mxu0 %vm653_vm2, %v1566_v28 }
 0x935   : > { %2384 = vmatpush3.bf16.xpose.msra.mxu0 %v1685_v29  ;;  %2385 = vmatprep.mubr.msk.bf16.mxu0 %vm2518_vm1, %v2517_v9 }
 0x936   : > { %2395 = vmatprep.subr.bf16.mxu0 %v2517_v9 }
 0x93c   : > { %2386 = vmatmul.mubr.msk.bf16.vlgmr.msra.gmra.mxu0 %vm653_vm2, %v1678_v31 }
 0x93d   : > { %2399 = vmatprep.mubr.msk.bf16.mxu0 %vm2518_vm1, %v2517_v9 }
 0x979   : > { %v1377_v36 = vpop.f32.mrf.mxu0 }
 0x97a   : > { %v1383_v38 = vmul.f32 0.35355338, %v1377_v36 }
 0x97b   : > { %v2351_v39 = vpop.f32.mrf.mxu0 }
 0x97c   : > { %v1390_v41 = vsel %vm2864_vm9, -10000.0, %v1383_v38 }
 0x97d   : > { %v1380_v42 = vpop.f32.mrf.mxu0  ;;  %v1391_v43 = vsel %vm653_vm2, %v1390_v41, -inf }
 0x97e   : > { %1392 = vmax.xlane.f32.xlu0 %v1391_v43 }
 0x97f   : > { %v2352_v44 = vpop.f32.mrf.mxu0 }
 0x9ec   : > { %v1497_v45 = vpop.f32.mrf.mxu0 }
 0x9ed   : > { %v1503_v46 = vmul.f32 0.35355338, %v1497_v45 }
 0x9ee   : > { %v2363_v33 = vpop.f32.mrf.mxu0 }
 0x9ef   : > { %v1504_v47 = vsel %vm2864_vm9, -10000.0, %v1503_v46 }
 0x9f0   : > { %v1500_v48 = vpop.f32.mrf.mxu0  ;;  %v1505_v1 = vsel %vm653_vm2, %v1504_v47, -inf }
 0x9f1   : > { %1506 = vmax.xlane.f32.xlu1 %v1505_v1 }
 0x9f2   : > { %v2364_v49 = vpop.f32.mrf.mxu0 }
 0x9f4   : > { %v1609_v50 = vpop.f32.mrf.mxu0 }
 0x9f5   : > { %v1615_v51 = vmul.f32 0.35355338, %v1609_v50 }
 0x9f6   : > { %v2375_v52 = vpop.f32.mrf.mxu0 }
 0x9f7   : > { %v1616_v53 = vsel %vm2864_vm9, -10000.0, %v1615_v51 }
 0x9f8   : > { %v1612_v30 = vpop.f32.mrf.mxu0  ;;  %v1617_v54 = vsel %vm653_vm2, %v1616_v53, -inf }
 0x9f9   : > { %1618 = vmax.xlane.f32.xlu0 %v1617_v54  ;;  %v2459_v30 = vld [vmem:[%s2993_s11 + $0x8] sm:$0xff]  }
 0x9fa   : > { %v2376_v55 = vpop.f32.mrf.mxu0  ;;  %2396 = vmatpush3.bf16.msra.mxu0 %v2459_v30 }
 0x9fb   : > { %2397 = vmatprep.subr.bf16.mxu0 %v2517_v9 }
 0x9fc   : > { %v1721_v56 = vpop.f32.mrf.mxu0 }
 0x9fd   : > { %v1727_v57 = vmul.f32 0.35355338, %v1721_v56  ;;  %v2460_v56 = vld [vmem:[%s2993_s11] sm:$0xff]  }
 0x9fe   : > { %v2387_v58 = vpop.f32.mrf.mxu0  ;;  %2398 = vmatpush3.bf16.msra.mxu0 %v2460_v56 }
 0x9ff   : > { %v1728_v59 = vsel %vm2864_vm9, -10000.0, %v1727_v57  ;;  %2411 = vmatprep.subr.bf16.mxu0 %v2517_v9 }
 0xa00   : > { %v1724_v60 = vpop.f32.mrf.mxu0  ;;  %v1729_v61 = vsel %vm653_vm2, %v1728_v59, -inf }
 0xa01   : > { %1730 = vmax.xlane.f32.xlu0 %v1729_v61 }
 0xa02   : > { %v2388_v62 = vpop.f32.mrf.mxu0 }
 0xa07   : > { %v1393_v63 = vpop.xlane.xlu0 %1392 }
 0xa08   : > { %v1394_v0 = vsub.f32 %v1390_v41, %v1393_v63 }
 0xa0a   : > { %v1395_v2 = vmul.f32 1.442695, %v1394_v0 }
 0xa0c   : > { %2487 = vpow2.f32 %v1395_v2 }
 0xa19   : > { %v2488_v3 = vpop.eup %2487 }
 0xa1a   : > { %v1397_v4 = vsel %vm653_vm2, %v2488_v3, 0.0 }
 0xa1b   : > { %1398 = vadd.xlane.f32.xlu1 %v1397_v4 }
 0xa2c   : > { %1404 = vrot.lane.b32.xlu1 %v2824_v5, %s2520_s21  ;;  %s3008_s21 = smov 88  }
 0xa7a   : > { %v1507_v6 = vpop.xlane.xlu1 %1506 }
 0xa7b   : > { %v1508_v7 = vsub.f32 %v1504_v47, %v1507_v6 }
 0xa7d   : > { %v1509_v8 = vmul.f32 1.442695, %v1508_v7 }
 0xa7f   : > { %2489 = vpow2.f32 %v1509_v8 }
 0xa82   : > { %v1619_v10 = vpop.xlane.xlu0 %1618 }
 0xa83   : > { %v1620_v11 = vsub.f32 %v1616_v53, %v1619_v10 }
 0xa85   : > { %v1621_v12 = vmul.f32 1.442695, %v1620_v11 }
 0xa87   : > { %2491 = vpow2.f32 %v1621_v12 }
 0xa8a   : > { %v1731_v13 = vpop.xlane.xlu0 %1730 }
 0xa8b   : > { %v1732_v14 = vsub.f32 %v1728_v59, %v1731_v13  ;;  %v1811_v13 = vsub.s32 6, %v2653_v15 }
 0xa8c   : > { %v2490_v19 = vpop.eup %2489 }
 0xa8d   : > { %v1733_v20 = vmul.f32 1.442695, %v1732_v14  ;;  %v1511_v21 = vsel %vm653_vm2, %v2490_v19, 0.0  ;;  %v1812_v14 = vrot.slane %v2661_v17, %v1811_v13 }
 0xa8e   : > { %1512 = vadd.xlane.f32.xlu0 %v1511_v21 }
 0xa8f   : > { %2493 = vpow2.f32 %v1733_v20 }
 0xa94   : > { %v2492_v22 = vpop.eup %2491 }
 0xa95   : > { %v1623_v23 = vsel %vm653_vm2, %v2492_v22, 0.0 }
 0xa96   : > { %1624 = vadd.xlane.f32.xlu1 %v1623_v23 }
 0xa9c   : > { %v2494_v24 = vpop.eup %2493 }
 0xa9d   : > { %v1735_v25 = vsel %vm653_vm2, %v2494_v24, 0.0 }
 0xa9e   : > { %1736 = vadd.xlane.f32.xlu0 %v1735_v25 }
 0xaa4   : > { %v1399_v26 = vpop.xlane.xlu1 %1398 }
 0xaa5   : > { %2495 = vrcp.f32 %v1399_v26 }
 0xaa7   : > { %1629 = vrot.lane.b32.xlu1 %v2824_v5, %s2522_s23 }
 0xaa8   : > { %v1405_v27 = vpop.permute.xlu1 %1404 }
 0xaa9   : > { %v1410_v28 = vsel %vm719_vm5, %v1405_v27, 0 }
 0xaaa   : > { %2354 = vmatpush3.bf16.msra.mxu1 %v1410_v28 }
 0xaab   : > { %1741 = vrot.lane.b32.xlu1 %v2824_v5, %s3007_s19  ;;  %2365 = vmatprep.subr.bf16.mxu1 %v2517_v9 }
 0xab2   : > { %v2496_v29 = vpop.eup %2495 }
 0xab3   : > { %v1401_v31 = vmul.f32 %v2496_v29, %v2488_v3 }
 0xab4   : > { %1517 = vrot.lane.b32.xlu0 %v2824_v5, %s3008_s21  ;;  %s537_s21 = scalar_lea.vmem %s2997_s15, %s2626_s20 }
 0xab5   : > { %v1402_v32 = vpack.c.bf16 %v1401_v31, %v1401_v31 }
 0xab7   : > { %2356 = vmatmul.mubr.msk.bf16.vlgmr.msra.gmra.mxu1 %vm653_vm2, %v1402_v32  ;;  %v2461_v32 = vld [vmem:[%s2994_s12 + $0x8] sm:$0xff]  }
 0xab8   : > { %2367 = vmatprep.mubr.msk.bf16.mxu1 %vm2518_vm1, %v2517_v9 }
 0xb17   : > { %v1513_v34 = vpop.xlane.xlu0 %1512 }
 0xb18   : > { %2497 = vrcp.f32 %v1513_v34 }
 0xb1f   : > { %v1625_v35 = vpop.xlane.xlu1 %1624 }
 0xb20   : > { %2499 = vrcp.f32 %v1625_v35 }
 0xb23   : > { %v1630_v42 = vpop.permute.xlu1 %1629 }
 0xb24   : > { %v1635_v44 = vsel %vm719_vm5, %v1630_v42, 0 }
 0xb25   : > { %v2498_v36 = vpop.eup %2497 }
 0xb26   : > { %v1515_v38 = vmul.f32 %v2498_v36, %v2490_v19 }
 0xb27   : > { %v1737_v37 = vpop.xlane.xlu0 %1736  ;;  %v1742_v46 = vpop.permute.xlu1 %1741 }
 0xb28   : > { %2501 = vrcp.f32 %v1737_v37  ;;  %v1516_v5 = vpack.c.bf16 %v1515_v38, %v1515_v38  ;;  %v1747_v48 = vsel %vm719_vm5, %v1742_v46, 0  ;;  %v1884_v37 = vsub.s32 7, %v2653_v15  ;;  %v545_v38 = vld [vmem:[%s2986_s4 + $0x8] sm:$0x3]  ;;  %v2463_v46 = vld [vmem:[%s2996_s14 + $0x18] sm:$0xff]  }
 0xb2b   : > { %v1518_v39 = vpop.permute.xlu0 %1517 }
 0xb2c   : > { %v1523_v41 = vsel %vm719_vm5, %v1518_v39, 0  ;;  %v1885_v39 = vrot.slane %v2661_v17, %v1884_v37  ;;  %v2464_v17 = vld [vmem:[%s2996_s14 + $0x10] sm:$0xff]  }
 0xb2d   : > { %2366 = vmatpush3.bf16.msra.mxu1 %v1523_v41  ;;  %v2500_v43 = vpop.eup %2499 }
 0xb2e   : > { %2377 = vmatprep.subr.bf16.mxu1 %v2517_v9  ;;  %v1627_v45 = vmul.f32 %v2500_v43, %v2492_v22 }
 0xb30   : > { %2368 = vmatmul.mubr.msk.bf16.vlgmr.msra.gmra.mxu1 %vm653_vm2, %v1516_v5  ;;  %v1628_v33 = vpack.c.bf16 %v1627_v45, %v1627_v45  ;;  %v1890_v5 = vrot.slane %v545_v38, %v2656_v16  ;;  %v2465_v16 = vld [vmem:[%s2996_s14 + $0x8] sm:$0xff]  }
 0xb31   : > { %2378 = vmatpush3.bf16.msra.mxu1 %v1635_v44  ;;  %2379 = vmatprep.mubr.msk.bf16.mxu1 %vm2518_vm1, %v2517_v9 }
 0xb32   : > { %2389 = vmatprep.subr.bf16.mxu1 %v2517_v9 }
 0xb35   : > { %v2502_v47 = vpop.eup %2501 }
 0xb36   : > { %v1739_v1 = vmul.f32 %v2502_v47, %v2494_v24  ;;  %v2201_v47 = vld [vmem:[%s2995_s13] ss:$0 sm:$0xff] }
 0xb38   : > { %2380 = vmatmul.mubr.msk.bf16.vlgmr.msra.gmra.mxu1 %vm653_vm2, %v1628_v33  ;;  %v1740_v49 = vpack.c.bf16 %v1739_v1, %v1739_v1  ;;  %v2466_v33 = vld [vmem:[%s2996_s14] sm:$0xff]  }
 0xb39   : > { %2390 = vmatpush3.bf16.msra.mxu1 %v1747_v48  ;;  %2391 = vmatprep.mubr.msk.bf16.mxu1 %vm2518_vm1, %v2517_v9 }
 0xb3a   : > { %2403 = vmatprep.subr.bf16.mxu1 %v2517_v9 }
 0xb40   : > { %2392 = vmatmul.mubr.msk.bf16.vlgmr.msra.gmra.mxu1 %vm653_vm2, %v1740_v49 }
 0xb41   : > { %2407 = vmatprep.mubr.msk.bf16.mxu1 %vm2518_vm1, %v2517_v9  ;;  %2404 = vmatpush3.bf16.msra.mxu1 %v2461_v32 }
 0xb42   : > { %2405 = vmatprep.subr.bf16.mxu1 %v2517_v9 }
 0xb77   : > { %v1446_v50 = vpop.f32.mrf.mxu1 }
 0xb79   : > { %v2357_v51 = vpop.f32.mrf.mxu1 }
 0xb7b   : > { %v1449_v52 = vpop.f32.mrf.mxu1 }
 0xb7d   : > { %v2358_v53 = vpop.f32.mrf.mxu1 }
 0xbf0   : > { %v1559_v54 = vpop.f32.mrf.mxu1 }
 0xbf1   : > { %1790 = vrot.lane.b32.xlu0 %v1559_v54, %s3009_s26 }
 0xbf2   : > { %v2369_v55 = vpop.f32.mrf.mxu1 }
 0xbf4   : > { %v1562_v57 = vpop.f32.mrf.mxu1 }
 0xbf6   : > { %v2370_v58 = vpop.f32.mrf.mxu1 }
 0xbf8   : > { %v1671_v59 = vpop.f32.mrf.mxu1 }
 0xbf9   : > { %1794 = vrot.lane.b32.xlu1 %v1671_v59, %s3010_s29 }
 0xbfa   : > { %v2381_v60 = vpop.f32.mrf.mxu1 }
 0xbfc   : > { %v1674_v61 = vpop.f32.mrf.mxu1 }
 0xbfe   : > { %v2382_v62 = vpop.f32.mrf.mxu1 }
 0xc00   : > { %v1783_v63 = vpop.f32.mrf.mxu1 }
 0xc01   : > { %1798 = vrot.lane.b32.xlu0 %v1783_v63, %s3011_s22 }
 0xc02   : > { %v2393_v0 = vpop.f32.mrf.mxu1 }
 0xc04   : > { %v1786_v2 = vpop.f32.mrf.mxu1 }
 0xc06   : > { %v2394_v3 = vpop.f32.mrf.mxu1 }
 0xc63   : > { %v1791_v4 = vpop.permute.xlu0 %1790 }
 0xc64   : > { %v1801_v7 = vsel %vm653_vm2, %v1446_v50, %v1791_v4 }
 0xc6b   : > { %v1795_v6 = vpop.permute.xlu1 %1794 }
 0xc6c   : > { %v1802_v8 = vsel %vm1112_vm6, %v1801_v7, %v1795_v6 }
 0xc73   : > { %v1799_v10 = vpop.permute.xlu0 %1798 }
 0xc74   : > { %v1803_v11 = vsel %vm1114_vm7, %v1802_v8, %v1799_v10  ;;  %v2534_v10 = vmov -1.0  }
 0xc75   : > { %v1804_v12 = vpack.c.bf16 %v1803_v11, %v1803_v11 }
 0xc77   : > { %2400 = vmatmul.mubr.msk.bf16.vlgmr.msra.gmra.mxu0 %vm556_vm0, %v1804_v12 }
 0xc78   : > { %2419 = vmatprep.mubr.msk.bf16.mxu0 %vm2518_vm1, %v2517_v9  ;;  %2412 = vmatpush3.bf16.msra.mxu0 %v2463_v46 }
 0xc79   : > { %2413 = vmatprep.subr.bf16.mxu0 %v2517_v9 }
 0xc7c   : > { %2414 = vmatpush3.bf16.msra.mxu0 %v2464_v17 }
 0xc7d   : > { %2415 = vmatprep.subr.bf16.mxu0 %v2517_v9 }
 0xc80   : > { %2416 = vmatpush3.bf16.msra.mxu0 %v2465_v16 }
 0xc81   : > { %2417 = vmatprep.subr.bf16.mxu0 %v2517_v9 }
 0xc84   : > { %2418 = vmatpush3.bf16.msra.mxu0 %v2466_v33 }
 0xd37   : > { %v1862_v19 = vpop.f32.mrf.mxu0 }
 0xd38   : > { %v1863_v20 = vadd.f32 %v1862_v19, %v1812_v14 }
 0xd39   : > { %v2401_v21 = vpop.f32.mrf.mxu0 }
 0xd3a   : > { %v2932_v22 = vadd.f32 %v1863_v20, %v2785_v40  ;;  %v2462_v40 = vld [vmem:[%s2994_s12] sm:$0xff]   ;;  %v2068_v21 = vrot.slane %v545_v38, %v578_v18 }
 0xd3b   : > { %v1865_v23 = vpop.f32.mrf.mxu0  ;;  %2406 = vmatpush3.bf16.msra.mxu1 %v2462_v40 }
 0xd3c   : > { %v1869_v24 = vsel %vm556_vm0, %v2932_v22, 0.0 }
 0xd3d   : > { %1870 = vadd.xlane.f32.xlu1 %v1869_v24  ;;  %v2402_v25 = vpop.f32.mrf.mxu0 }
 0xdc6   : > { %v1871_v26 = vpop.xlane.xlu1 %1870 }
 0xdc7   : > { %v1872_v27 = vmul.f32 0.03125, %v1871_v26 }
 0xdc9   : > { %v1873_v28 = vsub.f32 %v2932_v22, %v1872_v27 }
 0xdcb   : > { %v1874_v29 = vmul.f32 %v1873_v28, %v1873_v28 }
 0xdcd   : > { %v1875_v31 = vsel %vm556_vm0, %v1874_v29, 0.0 }
 0xdce   : > { %1876 = vadd.xlane.f32.xlu0 %v1875_v31 }
 0xe57   : > { %v1877_v34 = vpop.xlane.xlu0 %1876 }
 0xe58   : > { %v1878_v35 = vmul.f32 0.03125, %v1877_v34 }
 0xe5a   : > { %v1879_v36 = vadd.f32 1e-05, %v1878_v35 }
 0xe5c   : > { %2503 = vrsqrt.f32 %v1879_v36 }
 0xe69   : > { %v2504_v41 = vpop.eup %2503 }
 0xe6a   : > { %v1881_v42 = vmul.f32 %v2504_v41, %v1873_v28 }
 0xe6c   : > { %v1886_v43 = vmul.f32 %v1885_v39, %v1881_v42 }
 0xe6e   : > { %v1891_v44 = vadd.f32 %v1890_v5, %v1886_v43 }
 0xe70   : > { %v1896_v45 = vpack.c.bf16 %v1891_v44, %v1891_v44 }
 0xe72   : > { %2408 = vmatmul.mubr.msk.bf16.vlgmr.msra.gmra.mxu1 %vm556_vm0, %v1896_v45 }
 0xf32   : > { %v1953_v48 = vpop.f32.mrf.mxu1 }
 0xf33   : > { %v1954_v1 = vadd.f32 %v2201_v47, %v1953_v48 }
 0xf34   : > { %v2409_v49 = vpop.f32.mrf.mxu1 }
 0xf35   : > { %v1960_v50 = vmul.f32 0.70710677, %v1954_v1  ;;  %v1959_v13 = vmul.f32 0.5, %v1954_v1 }
 0xf36   : > { %v1956_v51 = vpop.f32.mrf.mxu1 }
 0xf37   : > { %vm1961_vm10 = vcmp.ge.f32.partialorder %v1960_v50, 0.0  ;;  %v1963_v52 = vsub.f32 0.0, %v1960_v50 }
 0xf38   : > { %v2410_v53 = vpop.f32.mrf.mxu1  ;;  %v1962_v11 = vsel %vm1961_vm10, 1.0, %v2534_v10 }
 0xf39   : > { %v1964_v30 = vsel %vm1961_vm10, %v1960_v50, %v1963_v52 }
 0xf3a   : > { %v1965_v9 = vmul.f32 0.3275911, %v1964_v30  ;;  %v1978_v55 = vsub.f32 0.0, %v1964_v30 }
 0xf3c   : > { %v1966_v54 = vadd.f32 1.0, %v1965_v9  ;;  %v1979_v56 = vmul.f32 %v1978_v55, %v1964_v30 }
 0xf3e   : > { %2505 = vrcp.f32 %v1966_v54  ;;  %v1980_v59 = vmul.f32 1.442695, %v1979_v56 }
 0xf40   : > { %2507 = vpow2.f32 %v1980_v59 }
 0xf4b   : > { %v2506_v57 = vpop.eup %2505 }
 0xf4c   : > { %v1969_v58 = vmul.f32 1.0614054, %v2506_v57 }
 0xf4d   : > { %v2508_v6 = vpop.eup %2507 }
 0xf4e   : > { %v1970_v60 = vadd.f32 -1.4531521, %v1969_v58 }
 0xf50   : > { %v1971_v61 = vmul.f32 %v2506_v57, %v1970_v60 }
 0xf52   : > { %v1972_v62 = vadd.f32 1.4214138, %v1971_v61 }
 0xf54   : > { %v1973_v63 = vmul.f32 %v2506_v57, %v1972_v62 }
 0xf56   : > { %v1974_v0 = vadd.f32 -0.28449672, %v1973_v63 }
 0xf58   : > { %v1975_v2 = vmul.f32 %v2506_v57, %v1974_v0 }
 0xf5a   : > { %v1976_v3 = vadd.f32 0.2548296, %v1975_v2 }
 0xf5c   : > { %v1977_v4 = vmul.f32 %v2506_v57, %v1976_v3 }
 0xf5e   : > { %v1982_v7 = vmul.f32 %v2508_v6, %v1977_v4 }
 0xf60   : > { %v1983_v8 = vsub.f32 1.0, %v1982_v7 }
 0xf62   : > { %v1984_v12 = vmul.f32 %v1983_v8, %v1962_v11 }
 0xf64   : > { %v1985_v14 = vadd.f32 1.0, %v1984_v12 }
 0xf66   : > { %v1986_v19 = vmul.f32 %v1985_v14, %v1959_v13 }
 0xf68   : > { %v1995_v20 = vpack.c.bf16 %v1986_v19, %v1986_v19 }
 0xf6a   : > { %2420 = vmatmul.mubr.msk.bf16.vlgmr.msra.gmra.mxu0 %vm2020_vm11, %v1995_v20 }
0x102a   : > { %v2058_v23 = vpop.f32.mrf.mxu0 }
0x102b   : > { %v2064_v24 = vadd.f32 %v2058_v23, %v2932_v22 }
0x102c   : > { %v2421_v25 = vpop.f32.mrf.mxu0 }
0x102d   : > { %v2069_v26 = vadd.f32 %v2068_v21, %v2064_v24 }
0x102e   : > { %v2061_v27 = vpop.f32.mrf.mxu0 }
0x102f   : > { %v2070_v28 = vpack.c.bf16 %v2069_v26, %v2069_v26 }
0x1030   : > { %v2422_v29 = vpop.f32.mrf.mxu0 }
0x1031   : > { %2072 = vst.msk [vmem:[%s537_s21] sm:$0xf] %vm2071_vm12, %v2070_v28 }
0x1032 PF: > { %s25_s18 = sadd.s32 1, %s2515_s18  }
0x1033   : > { %p22_p4 = scmp.ge.s32.totalorder %s25_s18, 4  }
0x1035   :  { %24 = sbr.rel (!%p22_p4) target bundleno = 1 (0x1), region = 119 }

</bundles_post_ra>
